<compile_context>
chip_gen: v7x
topology: tpu7x:2x2x1
jax: 0.10.0
libtpu: 0.0.40
codegen_flags: <defaults>
</compile_context>

<pallas_src>
import functools
import math

import jax
import jax.numpy as jnp
from jax.experimental import pallas as pl
from jax.experimental.pallas import tpu as pltpu

EMBED_DIM = 32
NUM_LAYERS = 2
NUM_HEADS = 4
NUM_TIMESTEPS = 1000
LN_EPS = 1e-5

_VMEM = functools.partial(pl.BlockSpec, memory_space=pltpu.MemorySpace.VMEM)


# ----------------------------- in-kernel math helpers -----------------------------

def _erf(x):
    # TODO(synk): no guaranteed native erf primitive in Mosaic; A&S 7.1.26 rational
    # approximation (|err| < 1.5e-7) matches torch's exact (erf) GELU to f32 noise.
    p = 0.3275911
    a1, a2, a3, a4, a5 = 0.254829592, -0.284496736, 1.421413741, -1.453152027, 1.061405429
    sgn = jnp.where(x >= 0.0, 1.0, -1.0)
    ax = jnp.abs(x)
    t = 1.0 / (1.0 + p * ax)
    poly = ((((a5 * t + a4) * t + a3) * t + a2) * t + a1) * t
    return sgn * (1.0 - poly * jnp.exp(-ax * ax))


def _gelu_exact(x):
    # torch.nn.GELU() default (erf formulation)
    return 0.5 * x * (1.0 + _erf(x * 0.7071067811865476))


def _block_mask(mq, mk, sq, sk):
    # Additive mask forbidding attention across batch elements in the flattened
    # (B*S, E) view.  Built with iota + float floor (no vector integer division).
    r = jax.lax.broadcasted_iota(jnp.int32, (mq, mk), 0).astype(jnp.float32)
    c = jax.lax.broadcasted_iota(jnp.int32, (mq, mk), 1).astype(jnp.float32)
    rb = jnp.floor((r + 0.5) * (1.0 / sq))
    cb = jnp.floor((c + 0.5) * (1.0 / sk))
    return jnp.where(rb == cb, 0.0, -1e9).astype(jnp.float32)


# ----------------------------------- fused kernel ----------------------------------

def _fused_forward_kernel(*refs, layout, widths, num_heads, num_layers, s_seq, s_env):
    seq_ref, env_ref, tseq_ref, tenv_ref = refs[:4]
    nslab = len(widths)
    slab_refs = dict(zip(widths, refs[4:4 + nslab]))
    out_seq_ref, out_env_ref = refs[4 + nslab], refs[5 + nslab]

    def rd(name):
        w, off, n = layout[name]
        return slab_refs[w][off:off + n, :]

    seq = seq_ref[...]            # (B*S_seq, E)
    env = env_ref[...]            # (B*S_env, E)
    m_seq, m_env = seq.shape[0], env.shape[0]

    # Built once, reused by every head / layer.
    mask_ss = _block_mask(m_seq, m_seq, s_seq, s_seq)
    mask_ee = _block_mask(m_env, m_env, s_env, s_env)
    mask_se = _block_mask(m_seq, m_env, s_seq, s_env)
    mask_es = _block_mask(m_env, m_seq, s_env, s_seq)

    def time_embed(t_rows):
        # Linear(1,E) on a column of t values is an outer product with the (1,E)
        # weight row; then SiLU; then Linear(E,E).
        h = t_rows * rd("time_w1") + rd("time_b1")
        h = h * jax.nn.sigmoid(h)                                   # SiLU
        return jnp.dot(h, rd("time2_w"), preferred_element_type=jnp.float32) + rd("time2_b")

    temb_seq = time_embed(tseq_ref[...])                            # (B*S_seq, E)
    temb_env = time_embed(tenv_ref[...])                            # (B*S_env, E)

    def add_ln(x, res, name):
        # LayerNorm(x + res) over the last dim (eps = 1e-5, biased variance)
        y = x + res
        mu = jnp.mean(y, axis=-1, keepdims=True)
        yc = y - mu
        var = jnp.mean(yc * yc, axis=-1, keepdims=True)
        return yc * jax.lax.rsqrt(var + LN_EPS) * rd(name + "_g") + rd(name + "_b")

    def ffn(x, name):
        h = jnp.dot(x, rd(name + "_1_w"), preferred_element_type=jnp.float32) + rd(name + "_1_b")
        h = _gelu_exact(h)
        return jnp.dot(h, rd(name + "_2_w"), preferred_element_type=jnp.float32) + rd(name + "_2_b")

    def attend(q, k, v, wo, bo, mask_add):
        # q already carries the 1/sqrt(dh) scale (folded into the projection).
        e = q.shape[-1]
        dh = e // num_heads
        ctx = []
        for h in range(num_heads):
            lo = h * dh
            s = jax.lax.dot_general(q[:, lo:lo + dh], k[:, lo:lo + dh],
                                    (((1,), (1,)), ((), ())),        # contract head dim, no k.T
                                    preferred_element_type=jnp.float32)
            s = s + mask_add
            s = s - jnp.max(s, axis=-1, keepdims=True)
            p = jnp.exp(s)
            p = p * pl.reciprocal(jnp.sum(p, axis=-1, keepdims=True), approx=True)
            ctx.append(jnp.dot(p, v[:, lo:lo + dh], preferred_element_type=jnp.float32))
        ctx = jnp.concatenate(ctx, axis=-1)                           # (M, E)
        return jnp.dot(ctx, wo, preferred_element_type=jnp.float32) + bo

    def self_attn(x, name, mask_add):
        e = x.shape[-1]
        qkv = jnp.dot(x, rd(name + "_wqkv"), preferred_element_type=jnp.float32) + rd(name + "_bqkv")
        return attend(qkv[:, :e], qkv[:, e:2 * e], qkv[:, 2 * e:],
                      rd(name + "_o_w"), rd(name + "_o_b"), mask_add)

    def cross_attn(xq, xkv, name, mask_add):
        e = xq.shape[-1]
        q = jnp.dot(xq, rd(name + "_wq"), preferred_element_type=jnp.float32) + rd(name + "_bq")
        kv = jnp.dot(xkv, rd(name + "_wkv"), preferred_element_type=jnp.float32) + rd(name + "_bkv")
        return attend(q, kv[:, :e], kv[:, e:],
                      rd(name + "_o_w"), rd(name + "_o_b"), mask_add)

    for li in range(num_layers):
        # time embedding re-added at the top of EVERY layer (matches the reference)
        seq = seq + temb_seq
        env = env + temb_env
        seq = add_ln(seq, self_attn(seq, f"l{li}_sa_seq", mask_ss), f"l{li}_ln1_seq")
        env = add_ln(env, self_attn(env, f"l{li}_sa_env", mask_ee), f"l{li}_ln1_env")
        seq = add_ln(seq, cross_attn(seq, env, f"l{li}_ca_s2e", mask_se), f"l{li}_ln2_seq")
        env = add_ln(env, cross_attn(env, seq, f"l{li}_ca_e2s", mask_es), f"l{li}_ln2_env")
        seq = add_ln(seq, ffn(seq, f"l{li}_ff_seq"), f"l{li}_ln3_seq")
        env = add_ln(env, ffn(env, f"l{li}_ff_env"), f"l{li}_ln3_env")

    out_seq_ref[...] = jnp.dot(seq, rd("out_seq_w"), preferred_element_type=jnp.float32) + rd("out_seq_b")
    out_env_ref[...] = jnp.dot(env, rd("out_env_w"), preferred_element_type=jnp.float32) + rd("out_env_b")


# ------------------------------- pallas_call wrapper -------------------------------

def bidirectional_diffusion_forward(slab_list, seq, env, t_seq, t_env, *, layout, widths):
    bsz, s_seq, e = seq.shape
    _, s_env, _ = env.shape

    # t / num_timesteps, replicated to one row per (batch, position)
    t_seq_rows = jnp.repeat((t_seq.astype(jnp.float32) / NUM_TIMESTEPS).reshape(bsz, 1),
                            s_seq, axis=0)                            # (B*S_seq, 1)
    t_env_rows = jnp.repeat((t_env.astype(jnp.float32) / NUM_TIMESTEPS).reshape(bsz, 1),
                            s_env, axis=0)                            # (B*S_env, 1)

    kernel = functools.partial(_fused_forward_kernel, layout=layout, widths=widths,
                               num_heads=NUM_HEADS, num_layers=NUM_LAYERS,
                               s_seq=s_seq, s_env=s_env)

    out_seq2d, out_env2d = pl.pallas_call(
        kernel,
        out_shape=(jax.ShapeDtypeStruct((bsz * s_seq, e), jnp.float32),
                   jax.ShapeDtypeStruct((bsz * s_env, e), jnp.float32)),
        in_specs=[_VMEM()] * (4 + len(slab_list)),
        out_specs=(_VMEM(), _VMEM()),
    )(seq.reshape(bsz * s_seq, e), env.reshape(bsz * s_env, e),
      t_seq_rows, t_env_rows, *slab_list)

    return out_seq2d.reshape(bsz, s_seq, e), out_env2d.reshape(bsz, s_env, e)


# ----------------------------- parameter packing (slabs) ---------------------------

class _SlabPacker:
    """Packs tensors into one contiguous (rows, W) slab per lane width W.

    Matrices (>1 row, row counts multiples of 8) are placed first so their row
    offsets stay 8-aligned; 1-row biases / LN params go at the end of each slab.
    """

    def __init__(self):
        self._mats = {}
        self._vecs = {}

    def add(self, name, arr):
        arr = jnp.asarray(arr, jnp.float32)
        if arr.ndim == 1:
            arr = arr.reshape(1, -1)
        w = int(arr.shape[1])
        bucket = self._mats if arr.shape[0] > 1 else self._vecs
        bucket.setdefault(w, []).append((name, arr))

    def finish(self):
        slabs, layout = {}, {}
        for w in sorted(set(self._mats) | set(self._vecs)):
            rows, off = [], 0
            for name, arr in self._mats.get(w, []) + self._vecs.get(w, []):
                layout[name] = (w, off, int(arr.shape[0]))
                rows.append(arr)
                off += int(arr.shape[0])
            slabs[w] = jnp.concatenate(rows, axis=0)
        return slabs, layout


def pack_params(params, e, num_heads):
    """PyTorch-layout params -> (slabs dict by width, static layout dict)."""
    scale = 1.0 / math.sqrt(e // num_heads)
    pk = _SlabPacker()

    def add_dense(name, d):                      # torch Linear: w (out,in), b (out,)
        pk.add(name + "_w", d["w"].T)            # kernel layout (in, out)
        pk.add(name + "_b", d["b"].reshape(1, -1))

    def add_self_mha(name, m):                   # fused [Q|K|V], Q pre-scaled by 1/sqrt(dh)
        wqkv = m["in_w"].T                       # (E, 3E)
        bqkv = m["in_b"].reshape(1, -1)          # (1, 3E)
        col_scale = jnp.concatenate(
            [jnp.full((e,), scale, jnp.float32), jnp.ones((2 * e,), jnp.float32)])
        pk.add(name + "_wqkv", wqkv * col_scale[None, :])
        pk.add(name + "_bqkv", bqkv * col_scale[None, :])
        add_dense(name + "_o", m["out"])

    def add_cross_mha(name, m):                  # separate Q (scaled) and packed [K|V]
        w = m["in_w"].T                          # (E, 3E)
        b = m["in_b"]
        pk.add(name + "_wq", w[:, :e] * scale)
        pk.add(name + "_bq", (b[:e] * scale).reshape(1, -1))
        pk.add(name + "_wkv", w[:, e:])
        pk.add(name + "_bkv", b[e:].reshape(1, -1))
        add_dense(name + "_o", m["out"])

    pk.add("time_w1", params["time1"]["w"].T)    # (1, E)
    pk.add("time_b1", params["time1"]["b"].reshape(1, -1))
    add_dense("time2", params["time2"])
    add_dense("out_seq", params["out_seq"])
    add_dense("out_env", params["out_env"])

    for li, lp in enumerate(params["layers"]):
        add_self_mha(f"l{li}_sa_seq", lp["sa_seq"])
        add_self_mha(f"l{li}_sa_env", lp["sa_env"])
        add_cross_mha(f"l{li}_ca_s2e", lp["ca_s2e"])
        add_cross_mha(f"l{li}_ca_e2s", lp["ca_e2s"])
        add_dense(f"l{li}_ff_seq_1", lp["ff_seq"]["lin1"])
        add_dense(f"l{li}_ff_seq_2", lp["ff_seq"]["lin2"])
        add_dense(f"l{li}_ff_env_1", lp["ff_env"]["lin1"])
        add_dense(f"l{li}_ff_env_2", lp["ff_env"]["lin2"])
        for nm in ("ln1_seq", "ln2_seq", "ln3_seq", "ln1_env", "ln2_env", "ln3_env"):
            pk.add(f"l{li}_{nm}_g", lp[nm]["g"].reshape(1, -1))
            pk.add(f"l{li}_{nm}_b", lp[nm]["b"].reshape(1, -1))

    return pk.finish()


# ------------------------------ parameters (deterministic) -------------------------

def init_params(key, e, num_layers):
    """Parameters in native PyTorch layouts (Linear: (out,in); MHA: in_proj (3E,E))."""
    def dense(k, fin, fout, s=0.05):
        kw, kb = jax.random.split(k)
        return dict(w=s * jax.random.normal(kw, (fout, fin), jnp.float32),
                    b=s * jax.random.normal(kb, (fout,), jnp.float32))

    def mha(k, s=0.05):
        k1, k2, k3 = jax.random.split(k, 3)
        return dict(in_w=s * jax.random.normal(k1, (3 * e, e), jnp.float32),
                    in_b=s * jax.random.normal(k2, (3 * e,), jnp.float32),
                    out=dense(k3, e, e))

    def ff(k):
        k1, k2 = jax.random.split(k)
        return dict(lin1=dense(k1, e, 4 * e), lin2=dense(k2, 4 * e, e))

    def ln():
        return dict(g=jnp.ones((e,), jnp.float32), b=jnp.zeros((e,), jnp.float32))

    keys = jax.random.split(key, 4 + num_layers)
    layers = []
    for lk in keys[4:]:
        ks = jax.random.split(lk, 6)
        layers.append(dict(sa_seq=mha(ks[0]), sa_env=mha(ks[1]),
                           ca_s2e=mha(ks[2]), ca_e2s=mha(ks[3]),
                           ff_seq=ff(ks[4]), ff_env=ff(ks[5]),
                           ln1_seq=ln(), ln2_seq=ln(), ln3_seq=ln(),
                           ln1_env=ln(), ln2_env=ln(), ln3_env=ln()))
    return dict(time1=dense(keys[0], 1, e), time2=dense(keys[1], e, e),
                out_seq=dense(keys[2], e, e), out_env=dense(keys[3], e, e),
                layers=layers)


# ------------------------------------- main ----------------------------------------

if __name__ == "__main__":
    B, S_SEQ, S_ENV = 2, 8, 16

    key = jax.random.PRNGKey(0)
    kp, ks, ke, kt1, kt2 = jax.random.split(key, 5)
    params = init_params(kp, EMBED_DIM, NUM_LAYERS)
    slabs, layout = pack_params(params, EMBED_DIM, NUM_HEADS)
    widths = tuple(sorted(slabs))
    slab_list = [slabs[w] for w in widths]

    seq = jax.random.normal(ks, (B, S_SEQ, EMBED_DIM), jnp.float32)
    env = jax.random.normal(ke, (B, S_ENV, EMBED_DIM), jnp.float32)
    t_seq = jax.random.randint(kt1, (B,), 0, NUM_TIMESTEPS)
    t_env = jax.random.randint(kt2, (B,), 0, NUM_TIMESTEPS)

    fwd = jax.jit(functools.partial(bidirectional_diffusion_forward,
                                    layout=layout, widths=widths))
    pred_seq, pred_env = fwd(slab_list, seq, env, t_seq, t_env)
    jax.block_until_ready((pred_seq, pred_env))

    assert pred_seq.shape == (B, S_SEQ, EMBED_DIM)
    assert pred_env.shape == (B, S_ENV, EMBED_DIM)
    assert pred_seq.dtype == jnp.float32 and pred_env.dtype == jnp.float32
    assert bool(jnp.all(jnp.isfinite(pred_seq))) and bool(jnp.all(jnp.isfinite(pred_env)))
    print("KERNEL_OK")
</pallas_src>

<mosaic_0001>
module attributes {stable_mosaic.version = 11 : i64} {
  func.func @_fused_forward_kernel(%arg0: memref<16x32xf32, #tpu.memory_space<vmem>>, %arg1: memref<32x32xf32, #tpu.memory_space<vmem>>, %arg2: memref<16x1xf32, #tpu.memory_space<vmem>>, %arg3: memref<32x1xf32, #tpu.memory_space<vmem>>, %arg4: memref<1037x32xf32, #tpu.memory_space<vmem>>, %arg5: memref<132x64xf32, #tpu.memory_space<vmem>>, %arg6: memref<132x96xf32, #tpu.memory_space<vmem>>, %arg7: memref<132x128xf32, #tpu.memory_space<vmem>>, %arg8: memref<16x32xf32, #tpu.memory_space<vmem>>, %arg9: memref<32x32xf32, #tpu.memory_space<vmem>>) attributes {dimension_semantics = [], scalar_prefetch = 0 : i64, scratch_operands = 0 : i64, tpu.core_type = #tpu.core_type<tc>} {
    %c0 = arith.constant 0 : index
    %c0_0 = arith.constant 0 : index
    %0 = vector.load %arg0[%c0, %c0_0] : memref<16x32xf32, #tpu.memory_space<vmem>>, vector<16x32xf32>
    %c0_1 = arith.constant 0 : index
    %c0_2 = arith.constant 0 : index
    %1 = vector.load %arg1[%c0_1, %c0_2] : memref<32x32xf32, #tpu.memory_space<vmem>>, vector<32x32xf32>
    %2 = tpu.iota {dimensions = array<i32: 0>} : vector<16x16xi32>
    %3 = arith.sitofp %2 : vector<16x16xi32> to vector<16x16xf32>
    %4 = tpu.iota {dimensions = array<i32: 1>} : vector<16x16xi32>
    %5 = arith.sitofp %4 : vector<16x16xi32> to vector<16x16xf32>
    %cst = arith.constant 5.000000e-01 : f32
    %6 = vector.broadcast %cst : f32 to vector<16x16xf32>
    %7 = arith.addf %3, %6 : vector<16x16xf32>
    %cst_3 = arith.constant 1.250000e-01 : f32
    %8 = vector.broadcast %cst_3 : f32 to vector<16x16xf32>
    %9 = arith.mulf %7, %8 : vector<16x16xf32>
    %10 = math.floor %9 : vector<16x16xf32>
    %cst_4 = arith.constant 5.000000e-01 : f32
    %11 = vector.broadcast %cst_4 : f32 to vector<16x16xf32>
    %12 = arith.addf %5, %11 : vector<16x16xf32>
    %cst_5 = arith.constant 1.250000e-01 : f32
    %13 = vector.broadcast %cst_5 : f32 to vector<16x16xf32>
    %14 = arith.mulf %12, %13 : vector<16x16xf32>
    %15 = math.floor %14 : vector<16x16xf32>
    %16 = arith.cmpf oeq, %10, %15 : vector<16x16xf32>
    %cst_6 = arith.constant 0.000000e+00 : f32
    %cst_7 = arith.constant -1.000000e+09 : f32
    %17 = vector.broadcast %cst_6 : f32 to vector<16x16xf32>
    %18 = vector.broadcast %cst_7 : f32 to vector<16x16xf32>
    %19 = arith.select %16, %17, %18 : vector<16x16xi1>, vector<16x16xf32>
    %20 = tpu.iota {dimensions = array<i32: 0>} : vector<32x32xi32>
    %21 = arith.sitofp %20 : vector<32x32xi32> to vector<32x32xf32>
    %22 = tpu.iota {dimensions = array<i32: 1>} : vector<32x32xi32>
    %23 = arith.sitofp %22 : vector<32x32xi32> to vector<32x32xf32>
    %cst_8 = arith.constant 5.000000e-01 : f32
    %24 = vector.broadcast %cst_8 : f32 to vector<32x32xf32>
    %25 = arith.addf %21, %24 : vector<32x32xf32>
    %cst_9 = arith.constant 6.250000e-02 : f32
    %26 = vector.broadcast %cst_9 : f32 to vector<32x32xf32>
    %27 = arith.mulf %25, %26 : vector<32x32xf32>
    %28 = math.floor %27 : vector<32x32xf32>
    %cst_10 = arith.constant 5.000000e-01 : f32
    %29 = vector.broadcast %cst_10 : f32 to vector<32x32xf32>
    %30 = arith.addf %23, %29 : vector<32x32xf32>
    %cst_11 = arith.constant 6.250000e-02 : f32
    %31 = vector.broadcast %cst_11 : f32 to vector<32x32xf32>
    %32 = arith.mulf %30, %31 : vector<32x32xf32>
    %33 = math.floor %32 : vector<32x32xf32>
    %34 = arith.cmpf oeq, %28, %33 : vector<32x32xf32>
    %cst_12 = arith.constant 0.000000e+00 : f32
    %cst_13 = arith.constant -1.000000e+09 : f32
    %35 = vector.broadcast %cst_12 : f32 to vector<32x32xf32>
    %36 = vector.broadcast %cst_13 : f32 to vector<32x32xf32>
    %37 = arith.select %34, %35, %36 : vector<32x32xi1>, vector<32x32xf32>
    %38 = tpu.iota {dimensions = array<i32: 0>} : vector<16x32xi32>
    %39 = arith.sitofp %38 : vector<16x32xi32> to vector<16x32xf32>
    %40 = tpu.iota {dimensions = array<i32: 1>} : vector<16x32xi32>
    %41 = arith.sitofp %40 : vector<16x32xi32> to vector<16x32xf32>
    %cst_14 = arith.constant 5.000000e-01 : f32
    %42 = vector.broadcast %cst_14 : f32 to vector<16x32xf32>
    %43 = arith.addf %39, %42 : vector<16x32xf32>
    %cst_15 = arith.constant 1.250000e-01 : f32
    %44 = vector.broadcast %cst_15 : f32 to vector<16x32xf32>
    %45 = arith.mulf %43, %44 : vector<16x32xf32>
    %46 = math.floor %45 : vector<16x32xf32>
    %cst_16 = arith.constant 5.000000e-01 : f32
    %47 = vector.broadcast %cst_16 : f32 to vector<16x32xf32>
    %48 = arith.addf %41, %47 : vector<16x32xf32>
    %cst_17 = arith.constant 6.250000e-02 : f32
    %49 = vector.broadcast %cst_17 : f32 to vector<16x32xf32>
    %50 = arith.mulf %48, %49 : vector<16x32xf32>
    %51 = math.floor %50 : vector<16x32xf32>
    %52 = arith.cmpf oeq, %46, %51 : vector<16x32xf32>
    %cst_18 = arith.constant 0.000000e+00 : f32
    %cst_19 = arith.constant -1.000000e+09 : f32
    %53 = vector.broadcast %cst_18 : f32 to vector<16x32xf32>
    %54 = vector.broadcast %cst_19 : f32 to vector<16x32xf32>
    %55 = arith.select %52, %53, %54 : vector<16x32xi1>, vector<16x32xf32>
    %56 = tpu.iota {dimensions = array<i32: 0>} : vector<32x16xi32>
    %57 = arith.sitofp %56 : vector<32x16xi32> to vector<32x16xf32>
    %58 = tpu.iota {dimensions = array<i32: 1>} : vector<32x16xi32>
    %59 = arith.sitofp %58 : vector<32x16xi32> to vector<32x16xf32>
    %cst_20 = arith.constant 5.000000e-01 : f32
    %60 = vector.broadcast %cst_20 : f32 to vector<32x16xf32>
    %61 = arith.addf %57, %60 : vector<32x16xf32>
    %cst_21 = arith.constant 6.250000e-02 : f32
    %62 = vector.broadcast %cst_21 : f32 to vector<32x16xf32>
    %63 = arith.mulf %61, %62 : vector<32x16xf32>
    %64 = math.floor %63 : vector<32x16xf32>
    %cst_22 = arith.constant 5.000000e-01 : f32
    %65 = vector.broadcast %cst_22 : f32 to vector<32x16xf32>
    %66 = arith.addf %59, %65 : vector<32x16xf32>
    %cst_23 = arith.constant 1.250000e-01 : f32
    %67 = vector.broadcast %cst_23 : f32 to vector<32x16xf32>
    %68 = arith.mulf %66, %67 : vector<32x16xf32>
    %69 = math.floor %68 : vector<32x16xf32>
    %70 = arith.cmpf oeq, %64, %69 : vector<32x16xf32>
    %cst_24 = arith.constant 0.000000e+00 : f32
    %cst_25 = arith.constant -1.000000e+09 : f32
    %71 = vector.broadcast %cst_24 : f32 to vector<32x16xf32>
    %72 = vector.broadcast %cst_25 : f32 to vector<32x16xf32>
    %73 = arith.select %70, %71, %72 : vector<32x16xi1>, vector<32x16xf32>
    %c0_26 = arith.constant 0 : index
    %c0_27 = arith.constant 0 : index
    %74 = vector.load %arg2[%c0_26, %c0_27] : memref<16x1xf32, #tpu.memory_space<vmem>>, vector<16x1xf32>
    %c992 = arith.constant 992 : index
    %c0_28 = arith.constant 0 : index
    %75 = vector.load %arg4[%c992, %c0_28] : memref<1037x32xf32, #tpu.memory_space<vmem>>, vector<1x32xf32>
    %76 = vector.broadcast %74 : vector<16x1xf32> to vector<16x32xf32>
    %77 = vector.broadcast %75 : vector<1x32xf32> to vector<16x32xf32>
    %78 = arith.mulf %76, %77 : vector<16x32xf32>
    %c993 = arith.constant 993 : index
    %c0_29 = arith.constant 0 : index
    %79 = vector.load %arg4[%c993, %c0_29] : memref<1037x32xf32, #tpu.memory_space<vmem>>, vector<1x32xf32>
    %80 = vector.broadcast %79 : vector<1x32xf32> to vector<16x32xf32>
    %81 = arith.addf %78, %80 : vector<16x32xf32>
    %82 = arith.negf %81 : vector<16x32xf32>
    %83 = math.exp %82 : vector<16x32xf32>
    %cst_30 = arith.constant 1.000000e+00 : f32
    %84 = vector.broadcast %cst_30 : f32 to vector<16x32xf32>
    %85 = arith.addf %84, %83 : vector<16x32xf32>
    %86 = arith.divf %84, %85 : vector<16x32xf32>
    %87 = arith.mulf %81, %86 : vector<16x32xf32>
    %c0_31 = arith.constant 0 : index
    %c0_32 = arith.constant 0 : index
    %88 = vector.load %arg4[%c0_31, %c0_32] : memref<1037x32xf32, #tpu.memory_space<vmem>>, vector<32x32xf32>
    %cst_33 = arith.constant dense<0.000000e+00> : vector<16x32xf32>
    %89 = tpu.matmul %87, %88, %cst_33 {dimension_numbers = #tpu.dot_dimension_numbers<[1], [0], [0], [1], [0, 0, 1, 1], [], []>} : vector<16x32xf32>, vector<32x32xf32>, vector<16x32xf32> -> vector<16x32xf32>
    %c994 = arith.constant 994 : index
    %c0_34 = arith.constant 0 : index
    %90 = vector.load %arg4[%c994, %c0_34] : memref<1037x32xf32, #tpu.memory_space<vmem>>, vector<1x32xf32>
    %91 = vector.broadcast %90 : vector<1x32xf32> to vector<16x32xf32>
    %92 = arith.addf %89, %91 : vector<16x32xf32>
    %c0_35 = arith.constant 0 : index
    %c0_36 = arith.constant 0 : index
    %93 = vector.load %arg3[%c0_35, %c0_36] : memref<32x1xf32, #tpu.memory_space<vmem>>, vector<32x1xf32>
    %c992_37 = arith.constant 992 : index
    %c0_38 = arith.constant 0 : index
    %94 = vector.load %arg4[%c992_37, %c0_38] : memref<1037x32xf32, #tpu.memory_space<vmem>>, vector<1x32xf32>
    %95 = vector.broadcast %93 : vector<32x1xf32> to vector<32x32xf32>
    %96 = vector.broadcast %94 : vector<1x32xf32> to vector<32x32xf32>
    %97 = arith.mulf %95, %96 : vector<32x32xf32>
    %c993_39 = arith.constant 993 : index
    %c0_40 = arith.constant 0 : index
    %98 = vector.load %arg4[%c993_39, %c0_40] : memref<1037x32xf32, #tpu.memory_space<vmem>>, vector<1x32xf32>
    %99 = vector.broadcast %98 : vector<1x32xf32> to vector<32x32xf32>
    %100 = arith.addf %97, %99 : vector<32x32xf32>
    %101 = arith.negf %100 : vector<32x32xf32>
    %102 = math.exp %101 : vector<32x32xf32>
    %cst_41 = arith.constant 1.000000e+00 : f32
    %103 = vector.broadcast %cst_41 : f32 to vector<32x32xf32>
    %104 = arith.addf %103, %102 : vector<32x32xf32>
    %105 = arith.divf %103, %104 : vector<32x32xf32>
    %106 = arith.mulf %100, %105 : vector<32x32xf32>
    %c0_42 = arith.constant 0 : index
    %c0_43 = arith.constant 0 : index
    %107 = vector.load %arg4[%c0_42, %c0_43] : memref<1037x32xf32, #tpu.memory_space<vmem>>, vector<32x32xf32>
    %cst_44 = arith.constant dense<0.000000e+00> : vector<32x32xf32>
    %108 = tpu.matmul %106, %107, %cst_44 {dimension_numbers = #tpu.dot_dimension_numbers<[1], [0], [0], [1], [0, 0, 1, 1], [], []>} : vector<32x32xf32>, vector<32x32xf32>, vector<32x32xf32> -> vector<32x32xf32>
    %c994_45 = arith.constant 994 : index
    %c0_46 = arith.constant 0 : index
    %109 = vector.load %arg4[%c994_45, %c0_46] : memref<1037x32xf32, #tpu.memory_space<vmem>>, vector<1x32xf32>
    %110 = vector.broadcast %109 : vector<1x32xf32> to vector<32x32xf32>
    %111 = arith.addf %108, %110 : vector<32x32xf32>
    %112 = arith.addf %0, %92 : vector<16x32xf32>
    %113 = arith.addf %1, %111 : vector<32x32xf32>
    %c0_47 = arith.constant 0 : index
    %c0_48 = arith.constant 0 : index
    %114 = vector.load %arg6[%c0_47, %c0_48] : memref<132x96xf32, #tpu.memory_space<vmem>>, vector<32x96xf32>
    %cst_49 = arith.constant dense<0.000000e+00> : vector<16x96xf32>
    %115 = tpu.matmul %112, %114, %cst_49 {dimension_numbers = #tpu.dot_dimension_numbers<[1], [0], [0], [1], [0, 0, 1, 1], [], []>} : vector<16x32xf32>, vector<32x96xf32>, vector<16x96xf32> -> vector<16x96xf32>
    %c128 = arith.constant 128 : index
    %c0_50 = arith.constant 0 : index
    %116 = vector.load %arg6[%c128, %c0_50] : memref<132x96xf32, #tpu.memory_space<vmem>>, vector<1x96xf32>
    %117 = vector.broadcast %116 : vector<1x96xf32> to vector<16x96xf32>
    %118 = arith.addf %115, %117 : vector<16x96xf32>
    %119 = vector.extract_strided_slice %118 {offsets = [0, 0], sizes = [16, 32], strides = [1, 1]} : vector<16x96xf32> to vector<16x32xf32>
    %120 = vector.extract_strided_slice %118 {offsets = [0, 32], sizes = [16, 32], strides = [1, 1]} : vector<16x96xf32> to vector<16x32xf32>
    %121 = vector.extract_strided_slice %118 {offsets = [0, 64], sizes = [16, 32], strides = [1, 1]} : vector<16x96xf32> to vector<16x32xf32>
    %c96 = arith.constant 96 : index
    %c0_51 = arith.constant 0 : index
    %122 = vector.load %arg4[%c96, %c0_51] : memref<1037x32xf32, #tpu.memory_space<vmem>>, vector<32x32xf32>
    %c997 = arith.constant 997 : index
    %c0_52 = arith.constant 0 : index
    %123 = vector.load %arg4[%c997, %c0_52] : memref<1037x32xf32, #tpu.memory_space<vmem>>, vector<1x32xf32>
    %124 = vector.extract_strided_slice %119 {offsets = [0, 0], sizes = [16, 8], strides = [1, 1]} : vector<16x32xf32> to vector<16x8xf32>
    %125 = vector.extract_strided_slice %120 {offsets = [0, 0], sizes = [16, 8], strides = [1, 1]} : vector<16x32xf32> to vector<16x8xf32>
    %cst_53 = arith.constant dense<0.000000e+00> : vector<16x16xf32>
    %126 = tpu.matmul %124, %125, %cst_53 {dimension_numbers = #tpu.dot_dimension_numbers<[1], [1], [0], [0], [0, 0, 1, 0], [], []>} : vector<16x8xf32>, vector<16x8xf32>, vector<16x16xf32> -> vector<16x16xf32>
    %127 = arith.addf %126, %19 : vector<16x16xf32>
    %cst_54 = arith.constant dense<0xFF800000> : vector<16xf32>
    %128 = vector.multi_reduction <maximumf>, %127, %cst_54 [1] : vector<16x16xf32> to vector<16xf32>
    %129 = vector.shape_cast %128 : vector<16xf32> to vector<16x1xf32>
    %130 = vector.broadcast %129 : vector<16x1xf32> to vector<16x16xf32>
    %131 = arith.subf %127, %130 : vector<16x16xf32>
    %132 = math.exp %131 : vector<16x16xf32>
    %cst_55 = arith.constant dense<0.000000e+00> : vector<16xf32>
    %133 = vector.multi_reduction <add>, %132, %cst_55 [1] : vector<16x16xf32> to vector<16xf32>
    %134 = vector.shape_cast %133 : vector<16xf32> to vector<16x1xf32>
    %135 = tpu.reciprocal %134 {approx = true} : vector<16x1xf32> -> vector<16x1xf32>
    %136 = vector.broadcast %135 : vector<16x1xf32> to vector<16x16xf32>
    %137 = arith.mulf %132, %136 : vector<16x16xf32>
    %138 = vector.extract_strided_slice %121 {offsets = [0, 0], sizes = [16, 8], strides = [1, 1]} : vector<16x32xf32> to vector<16x8xf32>
    %cst_56 = arith.constant dense<0.000000e+00> : vector<16x8xf32>
    %139 = tpu.matmul %137, %138, %cst_56 {dimension_numbers = #tpu.dot_dimension_numbers<[1], [0], [0], [1], [0, 0, 1, 1], [], []>} : vector<16x16xf32>, vector<16x8xf32>, vector<16x8xf32> -> vector<16x8xf32>
    %140 = vector.extract_strided_slice %119 {offsets = [0, 8], sizes = [16, 8], strides = [1, 1]} : vector<16x32xf32> to vector<16x8xf32>
    %141 = vector.extract_strided_slice %120 {offsets = [0, 8], sizes = [16, 8], strides = [1, 1]} : vector<16x32xf32> to vector<16x8xf32>
    %cst_57 = arith.constant dense<0.000000e+00> : vector<16x16xf32>
    %142 = tpu.matmul %140, %141, %cst_57 {dimension_numbers = #tpu.dot_dimension_numbers<[1], [1], [0], [0], [0, 0, 1, 0], [], []>} : vector<16x8xf32>, vector<16x8xf32>, vector<16x16xf32> -> vector<16x16xf32>
    %143 = arith.addf %142, %19 : vector<16x16xf32>
    %cst_58 = arith.constant dense<0xFF800000> : vector<16xf32>
    %144 = vector.multi_reduction <maximumf>, %143, %cst_58 [1] : vector<16x16xf32> to vector<16xf32>
    %145 = vector.shape_cast %144 : vector<16xf32> to vector<16x1xf32>
    %146 = vector.broadcast %145 : vector<16x1xf32> to vector<16x16xf32>
    %147 = arith.subf %143, %146 : vector<16x16xf32>
    %148 = math.exp %147 : vector<16x16xf32>
    %cst_59 = arith.constant dense<0.000000e+00> : vector<16xf32>
    %149 = vector.multi_reduction <add>, %148, %cst_59 [1] : vector<16x16xf32> to vector<16xf32>
    %150 = vector.shape_cast %149 : vector<16xf32> to vector<16x1xf32>
    %151 = tpu.reciprocal %150 {approx = true} : vector<16x1xf32> -> vector<16x1xf32>
    %152 = vector.broadcast %151 : vector<16x1xf32> to vector<16x16xf32>
    %153 = arith.mulf %148, %152 : vector<16x16xf32>
    %154 = vector.extract_strided_slice %121 {offsets = [0, 8], sizes = [16, 8], strides = [1, 1]} : vector<16x32xf32> to vector<16x8xf32>
    %cst_60 = arith.constant dense<0.000000e+00> : vector<16x8xf32>
    %155 = tpu.matmul %153, %154, %cst_60 {dimension_numbers = #tpu.dot_dimension_numbers<[1], [0], [0], [1], [0, 0, 1, 1], [], []>} : vector<16x16xf32>, vector<16x8xf32>, vector<16x8xf32> -> vector<16x8xf32>
    %156 = vector.extract_strided_slice %119 {offsets = [0, 16], sizes = [16, 8], strides = [1, 1]} : vector<16x32xf32> to vector<16x8xf32>
    %157 = vector.extract_strided_slice %120 {offsets = [0, 16], sizes = [16, 8], strides = [1, 1]} : vector<16x32xf32> to vector<16x8xf32>
    %cst_61 = arith.constant dense<0.000000e+00> : vector<16x16xf32>
    %158 = tpu.matmul %156, %157, %cst_61 {dimension_numbers = #tpu.dot_dimension_numbers<[1], [1], [0], [0], [0, 0, 1, 0], [], []>} : vector<16x8xf32>, vector<16x8xf32>, vector<16x16xf32> -> vector<16x16xf32>
    %159 = arith.addf %158, %19 : vector<16x16xf32>
    %cst_62 = arith.constant dense<0xFF800000> : vector<16xf32>
    %160 = vector.multi_reduction <maximumf>, %159, %cst_62 [1] : vector<16x16xf32> to vector<16xf32>
    %161 = vector.shape_cast %160 : vector<16xf32> to vector<16x1xf32>
    %162 = vector.broadcast %161 : vector<16x1xf32> to vector<16x16xf32>
    %163 = arith.subf %159, %162 : vector<16x16xf32>
    %164 = math.exp %163 : vector<16x16xf32>
    %cst_63 = arith.constant dense<0.000000e+00> : vector<16xf32>
    %165 = vector.multi_reduction <add>, %164, %cst_63 [1] : vector<16x16xf32> to vector<16xf32>
    %166 = vector.shape_cast %165 : vector<16xf32> to vector<16x1xf32>
    %167 = tpu.reciprocal %166 {approx = true} : vector<16x1xf32> -> vector<16x1xf32>
    %168 = vector.broadcast %167 : vector<16x1xf32> to vector<16x16xf32>
    %169 = arith.mulf %164, %168 : vector<16x16xf32>
    %170 = vector.extract_strided_slice %121 {offsets = [0, 16], sizes = [16, 8], strides = [1, 1]} : vector<16x32xf32> to vector<16x8xf32>
    %cst_64 = arith.constant dense<0.000000e+00> : vector<16x8xf32>
    %171 = tpu.matmul %169, %170, %cst_64 {dimension_numbers = #tpu.dot_dimension_numbers<[1], [0], [0], [1], [0, 0, 1, 1], [], []>} : vector<16x16xf32>, vector<16x8xf32>, vector<16x8xf32> -> vector<16x8xf32>
    %172 = vector.extract_strided_slice %119 {offsets = [0, 24], sizes = [16, 8], strides = [1, 1]} : vector<16x32xf32> to vector<16x8xf32>
    %173 = vector.extract_strided_slice %120 {offsets = [0, 24], sizes = [16, 8], strides = [1, 1]} : vector<16x32xf32> to vector<16x8xf32>
    %cst_65 = arith.constant dense<0.000000e+00> : vector<16x16xf32>
    %174 = tpu.matmul %172, %173, %cst_65 {dimension_numbers = #tpu.dot_dimension_numbers<[1], [1], [0], [0], [0, 0, 1, 0], [], []>} : vector<16x8xf32>, vector<16x8xf32>, vector<16x16xf32> -> vector<16x16xf32>
    %175 = arith.addf %174, %19 : vector<16x16xf32>
    %cst_66 = arith.constant dense<0xFF800000> : vector<16xf32>
    %176 = vector.multi_reduction <maximumf>, %175, %cst_66 [1] : vector<16x16xf32> to vector<16xf32>
    %177 = vector.shape_cast %176 : vector<16xf32> to vector<16x1xf32>
    %178 = vector.broadcast %177 : vector<16x1xf32> to vector<16x16xf32>
    %179 = arith.subf %175, %178 : vector<16x16xf32>
    %180 = math.exp %179 : vector<16x16xf32>
    %cst_67 = arith.constant dense<0.000000e+00> : vector<16xf32>
    %181 = vector.multi_reduction <add>, %180, %cst_67 [1] : vector<16x16xf32> to vector<16xf32>
    %182 = vector.shape_cast %181 : vector<16xf32> to vector<16x1xf32>
    %183 = tpu.reciprocal %182 {approx = true} : vector<16x1xf32> -> vector<16x1xf32>
    %184 = vector.broadcast %183 : vector<16x1xf32> to vector<16x16xf32>
    %185 = arith.mulf %180, %184 : vector<16x16xf32>
    %186 = vector.extract_strided_slice %121 {offsets = [0, 24], sizes = [16, 8], strides = [1, 1]} : vector<16x32xf32> to vector<16x8xf32>
    %cst_68 = arith.constant dense<0.000000e+00> : vector<16x8xf32>
    %187 = tpu.matmul %185, %186, %cst_68 {dimension_numbers = #tpu.dot_dimension_numbers<[1], [0], [0], [1], [0, 0, 1, 1], [], []>} : vector<16x16xf32>, vector<16x8xf32>, vector<16x8xf32> -> vector<16x8xf32>
    %188 = tpu.concatenate %139, %155, %171, %187 in 1 : vector<16x8xf32>, vector<16x8xf32>, vector<16x8xf32>, vector<16x8xf32> -> vector<16x32xf32>
    %cst_69 = arith.constant dense<0.000000e+00> : vector<16x32xf32>
    %189 = tpu.matmul %188, %122, %cst_69 {dimension_numbers = #tpu.dot_dimension_numbers<[1], [0], [0], [1], [0, 0, 1, 1], [], []>} : vector<16x32xf32>, vector<32x32xf32>, vector<16x32xf32> -> vector<16x32xf32>
    %190 = vector.broadcast %123 : vector<1x32xf32> to vector<16x32xf32>
    %191 = arith.addf %189, %190 : vector<16x32xf32>
    %192 = arith.addf %112, %191 : vector<16x32xf32>
    %cst_70 = arith.constant dense<0.000000e+00> : vector<16xf32>
    %193 = vector.multi_reduction <add>, %192, %cst_70 [1] : vector<16x32xf32> to vector<16xf32>
    %194 = vector.shape_cast %193 : vector<16xf32> to vector<16x1xf32>
    %cst_71 = arith.constant 3.200000e+01 : f32
    %195 = vector.broadcast %cst_71 : f32 to vector<16x1xf32>
    %196 = arith.divf %194, %195 : vector<16x1xf32>
    %197 = vector.broadcast %196 : vector<16x1xf32> to vector<16x32xf32>
    %198 = arith.subf %192, %197 : vector<16x32xf32>
    %199 = arith.mulf %198, %198 : vector<16x32xf32>
    %cst_72 = arith.constant dense<0.000000e+00> : vector<16xf32>
    %200 = vector.multi_reduction <add>, %199, %cst_72 [1] : vector<16x32xf32> to vector<16xf32>
    %201 = vector.shape_cast %200 : vector<16xf32> to vector<16x1xf32>
    %cst_73 = arith.constant 3.200000e+01 : f32
    %202 = vector.broadcast %cst_73 : f32 to vector<16x1xf32>
    %203 = arith.divf %201, %202 : vector<16x1xf32>
    %cst_74 = arith.constant 9.99999974E-6 : f32
    %204 = vector.broadcast %cst_74 : f32 to vector<16x1xf32>
    %205 = arith.addf %203, %204 : vector<16x1xf32>
    %206 = math.rsqrt %205 : vector<16x1xf32>
    %207 = vector.broadcast %206 : vector<16x1xf32> to vector<16x32xf32>
    %208 = arith.mulf %198, %207 : vector<16x32xf32>
    %c1005 = arith.constant 1005 : index
    %c0_75 = arith.constant 0 : index
    %209 = vector.load %arg4[%c1005, %c0_75] : memref<1037x32xf32, #tpu.memory_space<vmem>>, vector<1x32xf32>
    %210 = vector.broadcast %209 : vector<1x32xf32> to vector<16x32xf32>
    %211 = arith.mulf %208, %210 : vector<16x32xf32>
    %c1006 = arith.constant 1006 : index
    %c0_76 = arith.constant 0 : index
    %212 = vector.load %arg4[%c1006, %c0_76] : memref<1037x32xf32, #tpu.memory_space<vmem>>, vector<1x32xf32>
    %213 = vector.broadcast %212 : vector<1x32xf32> to vector<16x32xf32>
    %214 = arith.addf %211, %213 : vector<16x32xf32>
    %c32 = arith.constant 32 : index
    %c0_77 = arith.constant 0 : index
    %215 = vector.load %arg6[%c32, %c0_77] : memref<132x96xf32, #tpu.memory_space<vmem>>, vector<32x96xf32>
    %cst_78 = arith.constant dense<0.000000e+00> : vector<32x96xf32>
    %216 = tpu.matmul %113, %215, %cst_78 {dimension_numbers = #tpu.dot_dimension_numbers<[1], [0], [0], [1], [0, 0, 1, 1], [], []>} : vector<32x32xf32>, vector<32x96xf32>, vector<32x96xf32> -> vector<32x96xf32>
    %c129 = arith.constant 129 : index
    %c0_79 = arith.constant 0 : index
    %217 = vector.load %arg6[%c129, %c0_79] : memref<132x96xf32, #tpu.memory_space<vmem>>, vector<1x96xf32>
    %218 = vector.broadcast %217 : vector<1x96xf32> to vector<32x96xf32>
    %219 = arith.addf %216, %218 : vector<32x96xf32>
    %220 = vector.extract_strided_slice %219 {offsets = [0, 0], sizes = [32, 32], strides = [1, 1]} : vector<32x96xf32> to vector<32x32xf32>
    %221 = vector.extract_strided_slice %219 {offsets = [0, 32], sizes = [32, 32], strides = [1, 1]} : vector<32x96xf32> to vector<32x32xf32>
    %222 = vector.extract_strided_slice %219 {offsets = [0, 64], sizes = [32, 32], strides = [1, 1]} : vector<32x96xf32> to vector<32x32xf32>
    %c128_80 = arith.constant 128 : index
    %c0_81 = arith.constant 0 : index
    %223 = vector.load %arg4[%c128_80, %c0_81] : memref<1037x32xf32, #tpu.memory_space<vmem>>, vector<32x32xf32>
    %c998 = arith.constant 998 : index
    %c0_82 = arith.constant 0 : index
    %224 = vector.load %arg4[%c998, %c0_82] : memref<1037x32xf32, #tpu.memory_space<vmem>>, vector<1x32xf32>
    %225 = vector.extract_strided_slice %220 {offsets = [0, 0], sizes = [32, 8], strides = [1, 1]} : vector<32x32xf32> to vector<32x8xf32>
    %226 = vector.extract_strided_slice %221 {offsets = [0, 0], sizes = [32, 8], strides = [1, 1]} : vector<32x32xf32> to vector<32x8xf32>
    %cst_83 = arith.constant dense<0.000000e+00> : vector<32x32xf32>
    %227 = tpu.matmul %225, %226, %cst_83 {dimension_numbers = #tpu.dot_dimension_numbers<[1], [1], [0], [0], [0, 0, 1, 0], [], []>} : vector<32x8xf32>, vector<32x8xf32>, vector<32x32xf32> -> vector<32x32xf32>
    %228 = arith.addf %227, %37 : vector<32x32xf32>
    %cst_84 = arith.constant dense<0xFF800000> : vector<32xf32>
    %229 = vector.multi_reduction <maximumf>, %228, %cst_84 [1] : vector<32x32xf32> to vector<32xf32>
    %230 = vector.shape_cast %229 : vector<32xf32> to vector<32x1xf32>
    %231 = vector.broadcast %230 : vector<32x1xf32> to vector<32x32xf32>
    %232 = arith.subf %228, %231 : vector<32x32xf32>
    %233 = math.exp %232 : vector<32x32xf32>
    %cst_85 = arith.constant dense<0.000000e+00> : vector<32xf32>
    %234 = vector.multi_reduction <add>, %233, %cst_85 [1] : vector<32x32xf32> to vector<32xf32>
    %235 = vector.shape_cast %234 : vector<32xf32> to vector<32x1xf32>
    %236 = tpu.reciprocal %235 {approx = true} : vector<32x1xf32> -> vector<32x1xf32>
    %237 = vector.broadcast %236 : vector<32x1xf32> to vector<32x32xf32>
    %238 = arith.mulf %233, %237 : vector<32x32xf32>
    %239 = vector.extract_strided_slice %222 {offsets = [0, 0], sizes = [32, 8], strides = [1, 1]} : vector<32x32xf32> to vector<32x8xf32>
    %cst_86 = arith.constant dense<0.000000e+00> : vector<32x8xf32>
    %240 = tpu.matmul %238, %239, %cst_86 {dimension_numbers = #tpu.dot_dimension_numbers<[1], [0], [0], [1], [0, 0, 1, 1], [], []>} : vector<32x32xf32>, vector<32x8xf32>, vector<32x8xf32> -> vector<32x8xf32>
    %241 = vector.extract_strided_slice %220 {offsets = [0, 8], sizes = [32, 8], strides = [1, 1]} : vector<32x32xf32> to vector<32x8xf32>
    %242 = vector.extract_strided_slice %221 {offsets = [0, 8], sizes = [32, 8], strides = [1, 1]} : vector<32x32xf32> to vector<32x8xf32>
    %cst_87 = arith.constant dense<0.000000e+00> : vector<32x32xf32>
    %243 = tpu.matmul %241, %242, %cst_87 {dimension_numbers = #tpu.dot_dimension_numbers<[1], [1], [0], [0], [0, 0, 1, 0], [], []>} : vector<32x8xf32>, vector<32x8xf32>, vector<32x32xf32> -> vector<32x32xf32>
    %244 = arith.addf %243, %37 : vector<32x32xf32>
    %cst_88 = arith.constant dense<0xFF800000> : vector<32xf32>
    %245 = vector.multi_reduction <maximumf>, %244, %cst_88 [1] : vector<32x32xf32> to vector<32xf32>
    %246 = vector.shape_cast %245 : vector<32xf32> to vector<32x1xf32>
    %247 = vector.broadcast %246 : vector<32x1xf32> to vector<32x32xf32>
    %248 = arith.subf %244, %247 : vector<32x32xf32>
    %249 = math.exp %248 : vector<32x32xf32>
    %cst_89 = arith.constant dense<0.000000e+00> : vector<32xf32>
    %250 = vector.multi_reduction <add>, %249, %cst_89 [1] : vector<32x32xf32> to vector<32xf32>
    %251 = vector.shape_cast %250 : vector<32xf32> to vector<32x1xf32>
    %252 = tpu.reciprocal %251 {approx = true} : vector<32x1xf32> -> vector<32x1xf32>
    %253 = vector.broadcast %252 : vector<32x1xf32> to vector<32x32xf32>
    %254 = arith.mulf %249, %253 : vector<32x32xf32>
    %255 = vector.extract_strided_slice %222 {offsets = [0, 8], sizes = [32, 8], strides = [1, 1]} : vector<32x32xf32> to vector<32x8xf32>
    %cst_90 = arith.constant dense<0.000000e+00> : vector<32x8xf32>
    %256 = tpu.matmul %254, %255, %cst_90 {dimension_numbers = #tpu.dot_dimension_numbers<[1], [0], [0], [1], [0, 0, 1, 1], [], []>} : vector<32x32xf32>, vector<32x8xf32>, vector<32x8xf32> -> vector<32x8xf32>
    %257 = vector.extract_strided_slice %220 {offsets = [0, 16], sizes = [32, 8], strides = [1, 1]} : vector<32x32xf32> to vector<32x8xf32>
    %258 = vector.extract_strided_slice %221 {offsets = [0, 16], sizes = [32, 8], strides = [1, 1]} : vector<32x32xf32> to vector<32x8xf32>
    %cst_91 = arith.constant dense<0.000000e+00> : vector<32x32xf32>
    %259 = tpu.matmul %257, %258, %cst_91 {dimension_numbers = #tpu.dot_dimension_numbers<[1], [1], [0], [0], [0, 0, 1, 0], [], []>} : vector<32x8xf32>, vector<32x8xf32>, vector<32x32xf32> -> vector<32x32xf32>
    %260 = arith.addf %259, %37 : vector<32x32xf32>
    %cst_92 = arith.constant dense<0xFF800000> : vector<32xf32>
    %261 = vector.multi_reduction <maximumf>, %260, %cst_92 [1] : vector<32x32xf32> to vector<32xf32>
    %262 = vector.shape_cast %261 : vector<32xf32> to vector<32x1xf32>
    %263 = vector.broadcast %262 : vector<32x1xf32> to vector<32x32xf32>
    %264 = arith.subf %260, %263 : vector<32x32xf32>
    %265 = math.exp %264 : vector<32x32xf32>
    %cst_93 = arith.constant dense<0.000000e+00> : vector<32xf32>
    %266 = vector.multi_reduction <add>, %265, %cst_93 [1] : vector<32x32xf32> to vector<32xf32>
    %267 = vector.shape_cast %266 : vector<32xf32> to vector<32x1xf32>
    %268 = tpu.reciprocal %267 {approx = true} : vector<32x1xf32> -> vector<32x1xf32>
    %269 = vector.broadcast %268 : vector<32x1xf32> to vector<32x32xf32>
    %270 = arith.mulf %265, %269 : vector<32x32xf32>
    %271 = vector.extract_strided_slice %222 {offsets = [0, 16], sizes = [32, 8], strides = [1, 1]} : vector<32x32xf32> to vector<32x8xf32>
    %cst_94 = arith.constant dense<0.000000e+00> : vector<32x8xf32>
    %272 = tpu.matmul %270, %271, %cst_94 {dimension_numbers = #tpu.dot_dimension_numbers<[1], [0], [0], [1], [0, 0, 1, 1], [], []>} : vector<32x32xf32>, vector<32x8xf32>, vector<32x8xf32> -> vector<32x8xf32>
    %273 = vector.extract_strided_slice %220 {offsets = [0, 24], sizes = [32, 8], strides = [1, 1]} : vector<32x32xf32> to vector<32x8xf32>
    %274 = vector.extract_strided_slice %221 {offsets = [0, 24], sizes = [32, 8], strides = [1, 1]} : vector<32x32xf32> to vector<32x8xf32>
    %cst_95 = arith.constant dense<0.000000e+00> : vector<32x32xf32>
    %275 = tpu.matmul %273, %274, %cst_95 {dimension_numbers = #tpu.dot_dimension_numbers<[1], [1], [0], [0], [0, 0, 1, 0], [], []>} : vector<32x8xf32>, vector<32x8xf32>, vector<32x32xf32> -> vector<32x32xf32>
    %276 = arith.addf %275, %37 : vector<32x32xf32>
    %cst_96 = arith.constant dense<0xFF800000> : vector<32xf32>
    %277 = vector.multi_reduction <maximumf>, %276, %cst_96 [1] : vector<32x32xf32> to vector<32xf32>
    %278 = vector.shape_cast %277 : vector<32xf32> to vector<32x1xf32>
    %279 = vector.broadcast %278 : vector<32x1xf32> to vector<32x32xf32>
    %280 = arith.subf %276, %279 : vector<32x32xf32>
    %281 = math.exp %280 : vector<32x32xf32>
    %cst_97 = arith.constant dense<0.000000e+00> : vector<32xf32>
    %282 = vector.multi_reduction <add>, %281, %cst_97 [1] : vector<32x32xf32> to vector<32xf32>
    %283 = vector.shape_cast %282 : vector<32xf32> to vector<32x1xf32>
    %284 = tpu.reciprocal %283 {approx = true} : vector<32x1xf32> -> vector<32x1xf32>
    %285 = vector.broadcast %284 : vector<32x1xf32> to vector<32x32xf32>
    %286 = arith.mulf %281, %285 : vector<32x32xf32>
    %287 = vector.extract_strided_slice %222 {offsets = [0, 24], sizes = [32, 8], strides = [1, 1]} : vector<32x32xf32> to vector<32x8xf32>
    %cst_98 = arith.constant dense<0.000000e+00> : vector<32x8xf32>
    %288 = tpu.matmul %286, %287, %cst_98 {dimension_numbers = #tpu.dot_dimension_numbers<[1], [0], [0], [1], [0, 0, 1, 1], [], []>} : vector<32x32xf32>, vector<32x8xf32>, vector<32x8xf32> -> vector<32x8xf32>
    %289 = tpu.concatenate %240, %256, %272, %288 in 1 : vector<32x8xf32>, vector<32x8xf32>, vector<32x8xf32>, vector<32x8xf32> -> vector<32x32xf32>
    %cst_99 = arith.constant dense<0.000000e+00> : vector<32x32xf32>
    %290 = tpu.matmul %289, %223, %cst_99 {dimension_numbers = #tpu.dot_dimension_numbers<[1], [0], [0], [1], [0, 0, 1, 1], [], []>} : vector<32x32xf32>, vector<32x32xf32>, vector<32x32xf32> -> vector<32x32xf32>
    %291 = vector.broadcast %224 : vector<1x32xf32> to vector<32x32xf32>
    %292 = arith.addf %290, %291 : vector<32x32xf32>
    %293 = arith.addf %113, %292 : vector<32x32xf32>
    %cst_100 = arith.constant dense<0.000000e+00> : vector<32xf32>
    %294 = vector.multi_reduction <add>, %293, %cst_100 [1] : vector<32x32xf32> to vector<32xf32>
    %295 = vector.shape_cast %294 : vector<32xf32> to vector<32x1xf32>
    %cst_101 = arith.constant 3.200000e+01 : f32
    %296 = vector.broadcast %cst_101 : f32 to vector<32x1xf32>
    %297 = arith.divf %295, %296 : vector<32x1xf32>
    %298 = vector.broadcast %297 : vector<32x1xf32> to vector<32x32xf32>
    %299 = arith.subf %293, %298 : vector<32x32xf32>
    %300 = arith.mulf %299, %299 : vector<32x32xf32>
    %cst_102 = arith.constant dense<0.000000e+00> : vector<32xf32>
    %301 = vector.multi_reduction <add>, %300, %cst_102 [1] : vector<32x32xf32> to vector<32xf32>
    %302 = vector.shape_cast %301 : vector<32xf32> to vector<32x1xf32>
    %cst_103 = arith.constant 3.200000e+01 : f32
    %303 = vector.broadcast %cst_103 : f32 to vector<32x1xf32>
    %304 = arith.divf %302, %303 : vector<32x1xf32>
    %cst_104 = arith.constant 9.99999974E-6 : f32
    %305 = vector.broadcast %cst_104 : f32 to vector<32x1xf32>
    %306 = arith.addf %304, %305 : vector<32x1xf32>
    %307 = math.rsqrt %306 : vector<32x1xf32>
    %308 = vector.broadcast %307 : vector<32x1xf32> to vector<32x32xf32>
    %309 = arith.mulf %299, %308 : vector<32x32xf32>
    %c1011 = arith.constant 1011 : index
    %c0_105 = arith.constant 0 : index
    %310 = vector.load %arg4[%c1011, %c0_105] : memref<1037x32xf32, #tpu.memory_space<vmem>>, vector<1x32xf32>
    %311 = vector.broadcast %310 : vector<1x32xf32> to vector<32x32xf32>
    %312 = arith.mulf %309, %311 : vector<32x32xf32>
    %c1012 = arith.constant 1012 : index
    %c0_106 = arith.constant 0 : index
    %313 = vector.load %arg4[%c1012, %c0_106] : memref<1037x32xf32, #tpu.memory_space<vmem>>, vector<1x32xf32>
    %314 = vector.broadcast %313 : vector<1x32xf32> to vector<32x32xf32>
    %315 = arith.addf %312, %314 : vector<32x32xf32>
    %c160 = arith.constant 160 : index
    %c0_107 = arith.constant 0 : index
    %316 = vector.load %arg4[%c160, %c0_107] : memref<1037x32xf32, #tpu.memory_space<vmem>>, vector<32x32xf32>
    %cst_108 = arith.constant dense<0.000000e+00> : vector<16x32xf32>
    %317 = tpu.matmul %214, %316, %cst_108 {dimension_numbers = #tpu.dot_dimension_numbers<[1], [0], [0], [1], [0, 0, 1, 1], [], []>} : vector<16x32xf32>, vector<32x32xf32>, vector<16x32xf32> -> vector<16x32xf32>
    %c999 = arith.constant 999 : index
    %c0_109 = arith.constant 0 : index
    %318 = vector.load %arg4[%c999, %c0_109] : memref<1037x32xf32, #tpu.memory_space<vmem>>, vector<1x32xf32>
    %319 = vector.broadcast %318 : vector<1x32xf32> to vector<16x32xf32>
    %320 = arith.addf %317, %319 : vector<16x32xf32>
    %c0_110 = arith.constant 0 : index
    %c0_111 = arith.constant 0 : index
    %321 = vector.load %arg5[%c0_110, %c0_111] : memref<132x64xf32, #tpu.memory_space<vmem>>, vector<32x64xf32>
    %cst_112 = arith.constant dense<0.000000e+00> : vector<32x64xf32>
    %322 = tpu.matmul %315, %321, %cst_112 {dimension_numbers = #tpu.dot_dimension_numbers<[1], [0], [0], [1], [0, 0, 1, 1], [], []>} : vector<32x32xf32>, vector<32x64xf32>, vector<32x64xf32> -> vector<32x64xf32>
    %c128_113 = arith.constant 128 : index
    %c0_114 = arith.constant 0 : index
    %323 = vector.load %arg5[%c128_113, %c0_114] : memref<132x64xf32, #tpu.memory_space<vmem>>, vector<1x64xf32>
    %324 = vector.broadcast %323 : vector<1x64xf32> to vector<32x64xf32>
    %325 = arith.addf %322, %324 : vector<32x64xf32>
    %326 = vector.extract_strided_slice %325 {offsets = [0, 0], sizes = [32, 32], strides = [1, 1]} : vector<32x64xf32> to vector<32x32xf32>
    %327 = vector.extract_strided_slice %325 {offsets = [0, 32], sizes = [32, 32], strides = [1, 1]} : vector<32x64xf32> to vector<32x32xf32>
    %c192 = arith.constant 192 : index
    %c0_115 = arith.constant 0 : index
    %328 = vector.load %arg4[%c192, %c0_115] : memref<1037x32xf32, #tpu.memory_space<vmem>>, vector<32x32xf32>
    %c1000 = arith.constant 1000 : index
    %c0_116 = arith.constant 0 : index
    %329 = vector.load %arg4[%c1000, %c0_116] : memref<1037x32xf32, #tpu.memory_space<vmem>>, vector<1x32xf32>
    %330 = vector.extract_strided_slice %320 {offsets = [0, 0], sizes = [16, 8], strides = [1, 1]} : vector<16x32xf32> to vector<16x8xf32>
    %331 = vector.extract_strided_slice %326 {offsets = [0, 0], sizes = [32, 8], strides = [1, 1]} : vector<32x32xf32> to vector<32x8xf32>
    %cst_117 = arith.constant dense<0.000000e+00> : vector<16x32xf32>
    %332 = tpu.matmul %330, %331, %cst_117 {dimension_numbers = #tpu.dot_dimension_numbers<[1], [1], [0], [0], [0, 0, 1, 0], [], []>} : vector<16x8xf32>, vector<32x8xf32>, vector<16x32xf32> -> vector<16x32xf32>
    %333 = arith.addf %332, %55 : vector<16x32xf32>
    %cst_118 = arith.constant dense<0xFF800000> : vector<16xf32>
    %334 = vector.multi_reduction <maximumf>, %333, %cst_118 [1] : vector<16x32xf32> to vector<16xf32>
    %335 = vector.shape_cast %334 : vector<16xf32> to vector<16x1xf32>
    %336 = vector.broadcast %335 : vector<16x1xf32> to vector<16x32xf32>
    %337 = arith.subf %333, %336 : vector<16x32xf32>
    %338 = math.exp %337 : vector<16x32xf32>
    %cst_119 = arith.constant dense<0.000000e+00> : vector<16xf32>
    %339 = vector.multi_reduction <add>, %338, %cst_119 [1] : vector<16x32xf32> to vector<16xf32>
    %340 = vector.shape_cast %339 : vector<16xf32> to vector<16x1xf32>
    %341 = tpu.reciprocal %340 {approx = true} : vector<16x1xf32> -> vector<16x1xf32>
    %342 = vector.broadcast %341 : vector<16x1xf32> to vector<16x32xf32>
    %343 = arith.mulf %338, %342 : vector<16x32xf32>
    %344 = vector.extract_strided_slice %327 {offsets = [0, 0], sizes = [32, 8], strides = [1, 1]} : vector<32x32xf32> to vector<32x8xf32>
    %cst_120 = arith.constant dense<0.000000e+00> : vector<16x8xf32>
    %345 = tpu.matmul %343, %344, %cst_120 {dimension_numbers = #tpu.dot_dimension_numbers<[1], [0], [0], [1], [0, 0, 1, 1], [], []>} : vector<16x32xf32>, vector<32x8xf32>, vector<16x8xf32> -> vector<16x8xf32>
    %346 = vector.extract_strided_slice %320 {offsets = [0, 8], sizes = [16, 8], strides = [1, 1]} : vector<16x32xf32> to vector<16x8xf32>
    %347 = vector.extract_strided_slice %326 {offsets = [0, 8], sizes = [32, 8], strides = [1, 1]} : vector<32x32xf32> to vector<32x8xf32>
    %cst_121 = arith.constant dense<0.000000e+00> : vector<16x32xf32>
    %348 = tpu.matmul %346, %347, %cst_121 {dimension_numbers = #tpu.dot_dimension_numbers<[1], [1], [0], [0], [0, 0, 1, 0], [], []>} : vector<16x8xf32>, vector<32x8xf32>, vector<16x32xf32> -> vector<16x32xf32>
    %349 = arith.addf %348, %55 : vector<16x32xf32>
    %cst_122 = arith.constant dense<0xFF800000> : vector<16xf32>
    %350 = vector.multi_reduction <maximumf>, %349, %cst_122 [1] : vector<16x32xf32> to vector<16xf32>
    %351 = vector.shape_cast %350 : vector<16xf32> to vector<16x1xf32>
    %352 = vector.broadcast %351 : vector<16x1xf32> to vector<16x32xf32>
    %353 = arith.subf %349, %352 : vector<16x32xf32>
    %354 = math.exp %353 : vector<16x32xf32>
    %cst_123 = arith.constant dense<0.000000e+00> : vector<16xf32>
    %355 = vector.multi_reduction <add>, %354, %cst_123 [1] : vector<16x32xf32> to vector<16xf32>
    %356 = vector.shape_cast %355 : vector<16xf32> to vector<16x1xf32>
    %357 = tpu.reciprocal %356 {approx = true} : vector<16x1xf32> -> vector<16x1xf32>
    %358 = vector.broadcast %357 : vector<16x1xf32> to vector<16x32xf32>
    %359 = arith.mulf %354, %358 : vector<16x32xf32>
    %360 = vector.extract_strided_slice %327 {offsets = [0, 8], sizes = [32, 8], strides = [1, 1]} : vector<32x32xf32> to vector<32x8xf32>
    %cst_124 = arith.constant dense<0.000000e+00> : vector<16x8xf32>
    %361 = tpu.matmul %359, %360, %cst_124 {dimension_numbers = #tpu.dot_dimension_numbers<[1], [0], [0], [1], [0, 0, 1, 1], [], []>} : vector<16x32xf32>, vector<32x8xf32>, vector<16x8xf32> -> vector<16x8xf32>
    %362 = vector.extract_strided_slice %320 {offsets = [0, 16], sizes = [16, 8], strides = [1, 1]} : vector<16x32xf32> to vector<16x8xf32>
    %363 = vector.extract_strided_slice %326 {offsets = [0, 16], sizes = [32, 8], strides = [1, 1]} : vector<32x32xf32> to vector<32x8xf32>
    %cst_125 = arith.constant dense<0.000000e+00> : vector<16x32xf32>
    %364 = tpu.matmul %362, %363, %cst_125 {dimension_numbers = #tpu.dot_dimension_numbers<[1], [1], [0], [0], [0, 0, 1, 0], [], []>} : vector<16x8xf32>, vector<32x8xf32>, vector<16x32xf32> -> vector<16x32xf32>
    %365 = arith.addf %364, %55 : vector<16x32xf32>
    %cst_126 = arith.constant dense<0xFF800000> : vector<16xf32>
    %366 = vector.multi_reduction <maximumf>, %365, %cst_126 [1] : vector<16x32xf32> to vector<16xf32>
    %367 = vector.shape_cast %366 : vector<16xf32> to vector<16x1xf32>
    %368 = vector.broadcast %367 : vector<16x1xf32> to vector<16x32xf32>
    %369 = arith.subf %365, %368 : vector<16x32xf32>
    %370 = math.exp %369 : vector<16x32xf32>
    %cst_127 = arith.constant dense<0.000000e+00> : vector<16xf32>
    %371 = vector.multi_reduction <add>, %370, %cst_127 [1] : vector<16x32xf32> to vector<16xf32>
    %372 = vector.shape_cast %371 : vector<16xf32> to vector<16x1xf32>
    %373 = tpu.reciprocal %372 {approx = true} : vector<16x1xf32> -> vector<16x1xf32>
    %374 = vector.broadcast %373 : vector<16x1xf32> to vector<16x32xf32>
    %375 = arith.mulf %370, %374 : vector<16x32xf32>
    %376 = vector.extract_strided_slice %327 {offsets = [0, 16], sizes = [32, 8], strides = [1, 1]} : vector<32x32xf32> to vector<32x8xf32>
    %cst_128 = arith.constant dense<0.000000e+00> : vector<16x8xf32>
    %377 = tpu.matmul %375, %376, %cst_128 {dimension_numbers = #tpu.dot_dimension_numbers<[1], [0], [0], [1], [0, 0, 1, 1], [], []>} : vector<16x32xf32>, vector<32x8xf32>, vector<16x8xf32> -> vector<16x8xf32>
    %378 = vector.extract_strided_slice %320 {offsets = [0, 24], sizes = [16, 8], strides = [1, 1]} : vector<16x32xf32> to vector<16x8xf32>
    %379 = vector.extract_strided_slice %326 {offsets = [0, 24], sizes = [32, 8], strides = [1, 1]} : vector<32x32xf32> to vector<32x8xf32>
    %cst_129 = arith.constant dense<0.000000e+00> : vector<16x32xf32>
    %380 = tpu.matmul %378, %379, %cst_129 {dimension_numbers = #tpu.dot_dimension_numbers<[1], [1], [0], [0], [0, 0, 1, 0], [], []>} : vector<16x8xf32>, vector<32x8xf32>, vector<16x32xf32> -> vector<16x32xf32>
    %381 = arith.addf %380, %55 : vector<16x32xf32>
    %cst_130 = arith.constant dense<0xFF800000> : vector<16xf32>
    %382 = vector.multi_reduction <maximumf>, %381, %cst_130 [1] : vector<16x32xf32> to vector<16xf32>
    %383 = vector.shape_cast %382 : vector<16xf32> to vector<16x1xf32>
    %384 = vector.broadcast %383 : vector<16x1xf32> to vector<16x32xf32>
    %385 = arith.subf %381, %384 : vector<16x32xf32>
    %386 = math.exp %385 : vector<16x32xf32>
    %cst_131 = arith.constant dense<0.000000e+00> : vector<16xf32>
    %387 = vector.multi_reduction <add>, %386, %cst_131 [1] : vector<16x32xf32> to vector<16xf32>
    %388 = vector.shape_cast %387 : vector<16xf32> to vector<16x1xf32>
    %389 = tpu.reciprocal %388 {approx = true} : vector<16x1xf32> -> vector<16x1xf32>
    %390 = vector.broadcast %389 : vector<16x1xf32> to vector<16x32xf32>
    %391 = arith.mulf %386, %390 : vector<16x32xf32>
    %392 = vector.extract_strided_slice %327 {offsets = [0, 24], sizes = [32, 8], strides = [1, 1]} : vector<32x32xf32> to vector<32x8xf32>
    %cst_132 = arith.constant dense<0.000000e+00> : vector<16x8xf32>
    %393 = tpu.matmul %391, %392, %cst_132 {dimension_numbers = #tpu.dot_dimension_numbers<[1], [0], [0], [1], [0, 0, 1, 1], [], []>} : vector<16x32xf32>, vector<32x8xf32>, vector<16x8xf32> -> vector<16x8xf32>
    %394 = tpu.concatenate %345, %361, %377, %393 in 1 : vector<16x8xf32>, vector<16x8xf32>, vector<16x8xf32>, vector<16x8xf32> -> vector<16x32xf32>
    %cst_133 = arith.constant dense<0.000000e+00> : vector<16x32xf32>
    %395 = tpu.matmul %394, %328, %cst_133 {dimension_numbers = #tpu.dot_dimension_numbers<[1], [0], [0], [1], [0, 0, 1, 1], [], []>} : vector<16x32xf32>, vector<32x32xf32>, vector<16x32xf32> -> vector<16x32xf32>
    %396 = vector.broadcast %329 : vector<1x32xf32> to vector<16x32xf32>
    %397 = arith.addf %395, %396 : vector<16x32xf32>
    %398 = arith.addf %214, %397 : vector<16x32xf32>
    %cst_134 = arith.constant dense<0.000000e+00> : vector<16xf32>
    %399 = vector.multi_reduction <add>, %398, %cst_134 [1] : vector<16x32xf32> to vector<16xf32>
    %400 = vector.shape_cast %399 : vector<16xf32> to vector<16x1xf32>
    %cst_135 = arith.constant 3.200000e+01 : f32
    %401 = vector.broadcast %cst_135 : f32 to vector<16x1xf32>
    %402 = arith.divf %400, %401 : vector<16x1xf32>
    %403 = vector.broadcast %402 : vector<16x1xf32> to vector<16x32xf32>
    %404 = arith.subf %398, %403 : vector<16x32xf32>
    %405 = arith.mulf %404, %404 : vector<16x32xf32>
    %cst_136 = arith.constant dense<0.000000e+00> : vector<16xf32>
    %406 = vector.multi_reduction <add>, %405, %cst_136 [1] : vector<16x32xf32> to vector<16xf32>
    %407 = vector.shape_cast %406 : vector<16xf32> to vector<16x1xf32>
    %cst_137 = arith.constant 3.200000e+01 : f32
    %408 = vector.broadcast %cst_137 : f32 to vector<16x1xf32>
    %409 = arith.divf %407, %408 : vector<16x1xf32>
    %cst_138 = arith.constant 9.99999974E-6 : f32
    %410 = vector.broadcast %cst_138 : f32 to vector<16x1xf32>
    %411 = arith.addf %409, %410 : vector<16x1xf32>
    %412 = math.rsqrt %411 : vector<16x1xf32>
    %413 = vector.broadcast %412 : vector<16x1xf32> to vector<16x32xf32>
    %414 = arith.mulf %404, %413 : vector<16x32xf32>
    %c1007 = arith.constant 1007 : index
    %c0_139 = arith.constant 0 : index
    %415 = vector.load %arg4[%c1007, %c0_139] : memref<1037x32xf32, #tpu.memory_space<vmem>>, vector<1x32xf32>
    %416 = vector.broadcast %415 : vector<1x32xf32> to vector<16x32xf32>
    %417 = arith.mulf %414, %416 : vector<16x32xf32>
    %c1008 = arith.constant 1008 : index
    %c0_140 = arith.constant 0 : index
    %418 = vector.load %arg4[%c1008, %c0_140] : memref<1037x32xf32, #tpu.memory_space<vmem>>, vector<1x32xf32>
    %419 = vector.broadcast %418 : vector<1x32xf32> to vector<16x32xf32>
    %420 = arith.addf %417, %419 : vector<16x32xf32>
    %c224 = arith.constant 224 : index
    %c0_141 = arith.constant 0 : index
    %421 = vector.load %arg4[%c224, %c0_141] : memref<1037x32xf32, #tpu.memory_space<vmem>>, vector<32x32xf32>
    %cst_142 = arith.constant dense<0.000000e+00> : vector<32x32xf32>
    %422 = tpu.matmul %315, %421, %cst_142 {dimension_numbers = #tpu.dot_dimension_numbers<[1], [0], [0], [1], [0, 0, 1, 1], [], []>} : vector<32x32xf32>, vector<32x32xf32>, vector<32x32xf32> -> vector<32x32xf32>
    %c1001 = arith.constant 1001 : index
    %c0_143 = arith.constant 0 : index
    %423 = vector.load %arg4[%c1001, %c0_143] : memref<1037x32xf32, #tpu.memory_space<vmem>>, vector<1x32xf32>
    %424 = vector.broadcast %423 : vector<1x32xf32> to vector<32x32xf32>
    %425 = arith.addf %422, %424 : vector<32x32xf32>
    %c32_144 = arith.constant 32 : index
    %c0_145 = arith.constant 0 : index
    %426 = vector.load %arg5[%c32_144, %c0_145] : memref<132x64xf32, #tpu.memory_space<vmem>>, vector<32x64xf32>
    %cst_146 = arith.constant dense<0.000000e+00> : vector<16x64xf32>
    %427 = tpu.matmul %420, %426, %cst_146 {dimension_numbers = #tpu.dot_dimension_numbers<[1], [0], [0], [1], [0, 0, 1, 1], [], []>} : vector<16x32xf32>, vector<32x64xf32>, vector<16x64xf32> -> vector<16x64xf32>
    %c129_147 = arith.constant 129 : index
    %c0_148 = arith.constant 0 : index
    %428 = vector.load %arg5[%c129_147, %c0_148] : memref<132x64xf32, #tpu.memory_space<vmem>>, vector<1x64xf32>
    %429 = vector.broadcast %428 : vector<1x64xf32> to vector<16x64xf32>
    %430 = arith.addf %427, %429 : vector<16x64xf32>
    %431 = vector.extract_strided_slice %430 {offsets = [0, 0], sizes = [16, 32], strides = [1, 1]} : vector<16x64xf32> to vector<16x32xf32>
    %432 = vector.extract_strided_slice %430 {offsets = [0, 32], sizes = [16, 32], strides = [1, 1]} : vector<16x64xf32> to vector<16x32xf32>
    %c256 = arith.constant 256 : index
    %c0_149 = arith.constant 0 : index
    %433 = vector.load %arg4[%c256, %c0_149] : memref<1037x32xf32, #tpu.memory_space<vmem>>, vector<32x32xf32>
    %c1002 = arith.constant 1002 : index
    %c0_150 = arith.constant 0 : index
    %434 = vector.load %arg4[%c1002, %c0_150] : memref<1037x32xf32, #tpu.memory_space<vmem>>, vector<1x32xf32>
    %435 = vector.extract_strided_slice %425 {offsets = [0, 0], sizes = [32, 8], strides = [1, 1]} : vector<32x32xf32> to vector<32x8xf32>
    %436 = vector.extract_strided_slice %431 {offsets = [0, 0], sizes = [16, 8], strides = [1, 1]} : vector<16x32xf32> to vector<16x8xf32>
    %cst_151 = arith.constant dense<0.000000e+00> : vector<32x16xf32>
    %437 = tpu.matmul %435, %436, %cst_151 {dimension_numbers = #tpu.dot_dimension_numbers<[1], [1], [0], [0], [0, 0, 1, 0], [], []>} : vector<32x8xf32>, vector<16x8xf32>, vector<32x16xf32> -> vector<32x16xf32>
    %438 = arith.addf %437, %73 : vector<32x16xf32>
    %cst_152 = arith.constant dense<0xFF800000> : vector<32xf32>
    %439 = vector.multi_reduction <maximumf>, %438, %cst_152 [1] : vector<32x16xf32> to vector<32xf32>
    %440 = vector.shape_cast %439 : vector<32xf32> to vector<32x1xf32>
    %441 = vector.broadcast %440 : vector<32x1xf32> to vector<32x16xf32>
    %442 = arith.subf %438, %441 : vector<32x16xf32>
    %443 = math.exp %442 : vector<32x16xf32>
    %cst_153 = arith.constant dense<0.000000e+00> : vector<32xf32>
    %444 = vector.multi_reduction <add>, %443, %cst_153 [1] : vector<32x16xf32> to vector<32xf32>
    %445 = vector.shape_cast %444 : vector<32xf32> to vector<32x1xf32>
    %446 = tpu.reciprocal %445 {approx = true} : vector<32x1xf32> -> vector<32x1xf32>
    %447 = vector.broadcast %446 : vector<32x1xf32> to vector<32x16xf32>
    %448 = arith.mulf %443, %447 : vector<32x16xf32>
    %449 = vector.extract_strided_slice %432 {offsets = [0, 0], sizes = [16, 8], strides = [1, 1]} : vector<16x32xf32> to vector<16x8xf32>
    %cst_154 = arith.constant dense<0.000000e+00> : vector<32x8xf32>
    %450 = tpu.matmul %448, %449, %cst_154 {dimension_numbers = #tpu.dot_dimension_numbers<[1], [0], [0], [1], [0, 0, 1, 1], [], []>} : vector<32x16xf32>, vector<16x8xf32>, vector<32x8xf32> -> vector<32x8xf32>
    %451 = vector.extract_strided_slice %425 {offsets = [0, 8], sizes = [32, 8], strides = [1, 1]} : vector<32x32xf32> to vector<32x8xf32>
    %452 = vector.extract_strided_slice %431 {offsets = [0, 8], sizes = [16, 8], strides = [1, 1]} : vector<16x32xf32> to vector<16x8xf32>
    %cst_155 = arith.constant dense<0.000000e+00> : vector<32x16xf32>
    %453 = tpu.matmul %451, %452, %cst_155 {dimension_numbers = #tpu.dot_dimension_numbers<[1], [1], [0], [0], [0, 0, 1, 0], [], []>} : vector<32x8xf32>, vector<16x8xf32>, vector<32x16xf32> -> vector<32x16xf32>
    %454 = arith.addf %453, %73 : vector<32x16xf32>
    %cst_156 = arith.constant dense<0xFF800000> : vector<32xf32>
    %455 = vector.multi_reduction <maximumf>, %454, %cst_156 [1] : vector<32x16xf32> to vector<32xf32>
    %456 = vector.shape_cast %455 : vector<32xf32> to vector<32x1xf32>
    %457 = vector.broadcast %456 : vector<32x1xf32> to vector<32x16xf32>
    %458 = arith.subf %454, %457 : vector<32x16xf32>
    %459 = math.exp %458 : vector<32x16xf32>
    %cst_157 = arith.constant dense<0.000000e+00> : vector<32xf32>
    %460 = vector.multi_reduction <add>, %459, %cst_157 [1] : vector<32x16xf32> to vector<32xf32>
    %461 = vector.shape_cast %460 : vector<32xf32> to vector<32x1xf32>
    %462 = tpu.reciprocal %461 {approx = true} : vector<32x1xf32> -> vector<32x1xf32>
    %463 = vector.broadcast %462 : vector<32x1xf32> to vector<32x16xf32>
    %464 = arith.mulf %459, %463 : vector<32x16xf32>
    %465 = vector.extract_strided_slice %432 {offsets = [0, 8], sizes = [16, 8], strides = [1, 1]} : vector<16x32xf32> to vector<16x8xf32>
    %cst_158 = arith.constant dense<0.000000e+00> : vector<32x8xf32>
    %466 = tpu.matmul %464, %465, %cst_158 {dimension_numbers = #tpu.dot_dimension_numbers<[1], [0], [0], [1], [0, 0, 1, 1], [], []>} : vector<32x16xf32>, vector<16x8xf32>, vector<32x8xf32> -> vector<32x8xf32>
    %467 = vector.extract_strided_slice %425 {offsets = [0, 16], sizes = [32, 8], strides = [1, 1]} : vector<32x32xf32> to vector<32x8xf32>
    %468 = vector.extract_strided_slice %431 {offsets = [0, 16], sizes = [16, 8], strides = [1, 1]} : vector<16x32xf32> to vector<16x8xf32>
    %cst_159 = arith.constant dense<0.000000e+00> : vector<32x16xf32>
    %469 = tpu.matmul %467, %468, %cst_159 {dimension_numbers = #tpu.dot_dimension_numbers<[1], [1], [0], [0], [0, 0, 1, 0], [], []>} : vector<32x8xf32>, vector<16x8xf32>, vector<32x16xf32> -> vector<32x16xf32>
    %470 = arith.addf %469, %73 : vector<32x16xf32>
    %cst_160 = arith.constant dense<0xFF800000> : vector<32xf32>
    %471 = vector.multi_reduction <maximumf>, %470, %cst_160 [1] : vector<32x16xf32> to vector<32xf32>
    %472 = vector.shape_cast %471 : vector<32xf32> to vector<32x1xf32>
    %473 = vector.broadcast %472 : vector<32x1xf32> to vector<32x16xf32>
    %474 = arith.subf %470, %473 : vector<32x16xf32>
    %475 = math.exp %474 : vector<32x16xf32>
    %cst_161 = arith.constant dense<0.000000e+00> : vector<32xf32>
    %476 = vector.multi_reduction <add>, %475, %cst_161 [1] : vector<32x16xf32> to vector<32xf32>
    %477 = vector.shape_cast %476 : vector<32xf32> to vector<32x1xf32>
    %478 = tpu.reciprocal %477 {approx = true} : vector<32x1xf32> -> vector<32x1xf32>
    %479 = vector.broadcast %478 : vector<32x1xf32> to vector<32x16xf32>
    %480 = arith.mulf %475, %479 : vector<32x16xf32>
    %481 = vector.extract_strided_slice %432 {offsets = [0, 16], sizes = [16, 8], strides = [1, 1]} : vector<16x32xf32> to vector<16x8xf32>
    %cst_162 = arith.constant dense<0.000000e+00> : vector<32x8xf32>
    %482 = tpu.matmul %480, %481, %cst_162 {dimension_numbers = #tpu.dot_dimension_numbers<[1], [0], [0], [1], [0, 0, 1, 1], [], []>} : vector<32x16xf32>, vector<16x8xf32>, vector<32x8xf32> -> vector<32x8xf32>
    %483 = vector.extract_strided_slice %425 {offsets = [0, 24], sizes = [32, 8], strides = [1, 1]} : vector<32x32xf32> to vector<32x8xf32>
    %484 = vector.extract_strided_slice %431 {offsets = [0, 24], sizes = [16, 8], strides = [1, 1]} : vector<16x32xf32> to vector<16x8xf32>
    %cst_163 = arith.constant dense<0.000000e+00> : vector<32x16xf32>
    %485 = tpu.matmul %483, %484, %cst_163 {dimension_numbers = #tpu.dot_dimension_numbers<[1], [1], [0], [0], [0, 0, 1, 0], [], []>} : vector<32x8xf32>, vector<16x8xf32>, vector<32x16xf32> -> vector<32x16xf32>
    %486 = arith.addf %485, %73 : vector<32x16xf32>
    %cst_164 = arith.constant dense<0xFF800000> : vector<32xf32>
    %487 = vector.multi_reduction <maximumf>, %486, %cst_164 [1] : vector<32x16xf32> to vector<32xf32>
    %488 = vector.shape_cast %487 : vector<32xf32> to vector<32x1xf32>
    %489 = vector.broadcast %488 : vector<32x1xf32> to vector<32x16xf32>
    %490 = arith.subf %486, %489 : vector<32x16xf32>
    %491 = math.exp %490 : vector<32x16xf32>
    %cst_165 = arith.constant dense<0.000000e+00> : vector<32xf32>
    %492 = vector.multi_reduction <add>, %491, %cst_165 [1] : vector<32x16xf32> to vector<32xf32>
    %493 = vector.shape_cast %492 : vector<32xf32> to vector<32x1xf32>
    %494 = tpu.reciprocal %493 {approx = true} : vector<32x1xf32> -> vector<32x1xf32>
    %495 = vector.broadcast %494 : vector<32x1xf32> to vector<32x16xf32>
    %496 = arith.mulf %491, %495 : vector<32x16xf32>
    %497 = vector.extract_strided_slice %432 {offsets = [0, 24], sizes = [16, 8], strides = [1, 1]} : vector<16x32xf32> to vector<16x8xf32>
    %cst_166 = arith.constant dense<0.000000e+00> : vector<32x8xf32>
    %498 = tpu.matmul %496, %497, %cst_166 {dimension_numbers = #tpu.dot_dimension_numbers<[1], [0], [0], [1], [0, 0, 1, 1], [], []>} : vector<32x16xf32>, vector<16x8xf32>, vector<32x8xf32> -> vector<32x8xf32>
    %499 = tpu.concatenate %450, %466, %482, %498 in 1 : vector<32x8xf32>, vector<32x8xf32>, vector<32x8xf32>, vector<32x8xf32> -> vector<32x32xf32>
    %cst_167 = arith.constant dense<0.000000e+00> : vector<32x32xf32>
    %500 = tpu.matmul %499, %433, %cst_167 {dimension_numbers = #tpu.dot_dimension_numbers<[1], [0], [0], [1], [0, 0, 1, 1], [], []>} : vector<32x32xf32>, vector<32x32xf32>, vector<32x32xf32> -> vector<32x32xf32>
    %501 = vector.broadcast %434 : vector<1x32xf32> to vector<32x32xf32>
    %502 = arith.addf %500, %501 : vector<32x32xf32>
    %503 = arith.addf %315, %502 : vector<32x32xf32>
    %cst_168 = arith.constant dense<0.000000e+00> : vector<32xf32>
    %504 = vector.multi_reduction <add>, %503, %cst_168 [1] : vector<32x32xf32> to vector<32xf32>
    %505 = vector.shape_cast %504 : vector<32xf32> to vector<32x1xf32>
    %cst_169 = arith.constant 3.200000e+01 : f32
    %506 = vector.broadcast %cst_169 : f32 to vector<32x1xf32>
    %507 = arith.divf %505, %506 : vector<32x1xf32>
    %508 = vector.broadcast %507 : vector<32x1xf32> to vector<32x32xf32>
    %509 = arith.subf %503, %508 : vector<32x32xf32>
    %510 = arith.mulf %509, %509 : vector<32x32xf32>
    %cst_170 = arith.constant dense<0.000000e+00> : vector<32xf32>
    %511 = vector.multi_reduction <add>, %510, %cst_170 [1] : vector<32x32xf32> to vector<32xf32>
    %512 = vector.shape_cast %511 : vector<32xf32> to vector<32x1xf32>
    %cst_171 = arith.constant 3.200000e+01 : f32
    %513 = vector.broadcast %cst_171 : f32 to vector<32x1xf32>
    %514 = arith.divf %512, %513 : vector<32x1xf32>
    %cst_172 = arith.constant 9.99999974E-6 : f32
    %515 = vector.broadcast %cst_172 : f32 to vector<32x1xf32>
    %516 = arith.addf %514, %515 : vector<32x1xf32>
    %517 = math.rsqrt %516 : vector<32x1xf32>
    %518 = vector.broadcast %517 : vector<32x1xf32> to vector<32x32xf32>
    %519 = arith.mulf %509, %518 : vector<32x32xf32>
    %c1013 = arith.constant 1013 : index
    %c0_173 = arith.constant 0 : index
    %520 = vector.load %arg4[%c1013, %c0_173] : memref<1037x32xf32, #tpu.memory_space<vmem>>, vector<1x32xf32>
    %521 = vector.broadcast %520 : vector<1x32xf32> to vector<32x32xf32>
    %522 = arith.mulf %519, %521 : vector<32x32xf32>
    %c1014 = arith.constant 1014 : index
    %c0_174 = arith.constant 0 : index
    %523 = vector.load %arg4[%c1014, %c0_174] : memref<1037x32xf32, #tpu.memory_space<vmem>>, vector<1x32xf32>
    %524 = vector.broadcast %523 : vector<1x32xf32> to vector<32x32xf32>
    %525 = arith.addf %522, %524 : vector<32x32xf32>
    %c0_175 = arith.constant 0 : index
    %c0_176 = arith.constant 0 : index
    %526 = vector.load %arg7[%c0_175, %c0_176] : memref<132x128xf32, #tpu.memory_space<vmem>>, vector<32x128xf32>
    %cst_177 = arith.constant dense<0.000000e+00> : vector<16x128xf32>
    %527 = tpu.matmul %420, %526, %cst_177 {dimension_numbers = #tpu.dot_dimension_numbers<[1], [0], [0], [1], [0, 0, 1, 1], [], []>} : vector<16x32xf32>, vector<32x128xf32>, vector<16x128xf32> -> vector<16x128xf32>
    %c128_178 = arith.constant 128 : index
    %c0_179 = arith.constant 0 : index
    %528 = vector.load %arg7[%c128_178, %c0_179] : memref<132x128xf32, #tpu.memory_space<vmem>>, vector<1x128xf32>
    %529 = vector.broadcast %528 : vector<1x128xf32> to vector<16x128xf32>
    %530 = arith.addf %527, %529 : vector<16x128xf32>
    %cst_180 = arith.constant 5.000000e-01 : f32
    %531 = vector.broadcast %cst_180 : f32 to vector<16x128xf32>
    %532 = arith.mulf %531, %530 : vector<16x128xf32>
    %cst_181 = arith.constant 0.707106769 : f32
    %533 = vector.broadcast %cst_181 : f32 to vector<16x128xf32>
    %534 = arith.mulf %530, %533 : vector<16x128xf32>
    %cst_182 = arith.constant 0.000000e+00 : f32
    %535 = vector.broadcast %cst_182 : f32 to vector<16x128xf32>
    %536 = arith.cmpf oge, %534, %535 : vector<16x128xf32>
    %cst_183 = arith.constant 1.000000e+00 : f32
    %cst_184 = arith.constant -1.000000e+00 : f32
    %537 = vector.broadcast %cst_183 : f32 to vector<16x128xf32>
    %538 = vector.broadcast %cst_184 : f32 to vector<16x128xf32>
    %539 = arith.select %536, %537, %538 : vector<16x128xi1>, vector<16x128xf32>
    %540 = math.absf %534 : vector<16x128xf32>
    %cst_185 = arith.constant 0.327591091 : f32
    %541 = vector.broadcast %cst_185 : f32 to vector<16x128xf32>
    %542 = arith.mulf %541, %540 : vector<16x128xf32>
    %cst_186 = arith.constant 1.000000e+00 : f32
    %543 = vector.broadcast %cst_186 : f32 to vector<16x128xf32>
    %544 = arith.addf %543, %542 : vector<16x128xf32>
    %cst_187 = arith.constant 1.000000e+00 : f32
    %545 = vector.broadcast %cst_187 : f32 to vector<16x128xf32>
    %546 = arith.divf %545, %544 : vector<16x128xf32>
    %cst_188 = arith.constant 1.06140542 : f32
    %547 = vector.broadcast %cst_188 : f32 to vector<16x128xf32>
    %548 = arith.mulf %547, %546 : vector<16x128xf32>
    %cst_189 = arith.constant -1.45315206 : f32
    %549 = vector.broadcast %cst_189 : f32 to vector<16x128xf32>
    %550 = arith.addf %548, %549 : vector<16x128xf32>
    %551 = arith.mulf %550, %546 : vector<16x128xf32>
    %cst_190 = arith.constant 1.42141378 : f32
    %552 = vector.broadcast %cst_190 : f32 to vector<16x128xf32>
    %553 = arith.addf %551, %552 : vector<16x128xf32>
    %554 = arith.mulf %553, %546 : vector<16x128xf32>
    %cst_191 = arith.constant -0.284496725 : f32
    %555 = vector.broadcast %cst_191 : f32 to vector<16x128xf32>
    %556 = arith.addf %554, %555 : vector<16x128xf32>
    %557 = arith.mulf %556, %546 : vector<16x128xf32>
    %cst_192 = arith.constant 0.254829586 : f32
    %558 = vector.broadcast %cst_192 : f32 to vector<16x128xf32>
    %559 = arith.addf %557, %558 : vector<16x128xf32>
    %560 = arith.mulf %559, %546 : vector<16x128xf32>
    %cst_193 = arith.constant 0.000000e+00 : f32
    %561 = vector.broadcast %cst_193 : f32 to vector<16x128xf32>
    %562 = arith.subf %561, %540 : vector<16x128xf32>
    %563 = arith.mulf %562, %540 : vector<16x128xf32>
    %564 = math.exp %563 : vector<16x128xf32>
    %565 = arith.mulf %560, %564 : vector<16x128xf32>
    %cst_194 = arith.constant 1.000000e+00 : f32
    %566 = vector.broadcast %cst_194 : f32 to vector<16x128xf32>
    %567 = arith.subf %566, %565 : vector<16x128xf32>
    %568 = arith.mulf %539, %567 : vector<16x128xf32>
    %cst_195 = arith.constant 1.000000e+00 : f32
    %569 = vector.broadcast %cst_195 : f32 to vector<16x128xf32>
    %570 = arith.addf %569, %568 : vector<16x128xf32>
    %571 = arith.mulf %532, %570 : vector<16x128xf32>
    %c288 = arith.constant 288 : index
    %c0_196 = arith.constant 0 : index
    %572 = vector.load %arg4[%c288, %c0_196] : memref<1037x32xf32, #tpu.memory_space<vmem>>, vector<128x32xf32>
    %cst_197 = arith.constant dense<0.000000e+00> : vector<16x32xf32>
    %573 = tpu.matmul %571, %572, %cst_197 {dimension_numbers = #tpu.dot_dimension_numbers<[1], [0], [0], [1], [0, 0, 1, 1], [], []>} : vector<16x128xf32>, vector<128x32xf32>, vector<16x32xf32> -> vector<16x32xf32>
    %c1003 = arith.constant 1003 : index
    %c0_198 = arith.constant 0 : index
    %574 = vector.load %arg4[%c1003, %c0_198] : memref<1037x32xf32, #tpu.memory_space<vmem>>, vector<1x32xf32>
    %575 = vector.broadcast %574 : vector<1x32xf32> to vector<16x32xf32>
    %576 = arith.addf %573, %575 : vector<16x32xf32>
    %577 = arith.addf %420, %576 : vector<16x32xf32>
    %cst_199 = arith.constant dense<0.000000e+00> : vector<16xf32>
    %578 = vector.multi_reduction <add>, %577, %cst_199 [1] : vector<16x32xf32> to vector<16xf32>
    %579 = vector.shape_cast %578 : vector<16xf32> to vector<16x1xf32>
    %cst_200 = arith.constant 3.200000e+01 : f32
    %580 = vector.broadcast %cst_200 : f32 to vector<16x1xf32>
    %581 = arith.divf %579, %580 : vector<16x1xf32>
    %582 = vector.broadcast %581 : vector<16x1xf32> to vector<16x32xf32>
    %583 = arith.subf %577, %582 : vector<16x32xf32>
    %584 = arith.mulf %583, %583 : vector<16x32xf32>
    %cst_201 = arith.constant dense<0.000000e+00> : vector<16xf32>
    %585 = vector.multi_reduction <add>, %584, %cst_201 [1] : vector<16x32xf32> to vector<16xf32>
    %586 = vector.shape_cast %585 : vector<16xf32> to vector<16x1xf32>
    %cst_202 = arith.constant 3.200000e+01 : f32
    %587 = vector.broadcast %cst_202 : f32 to vector<16x1xf32>
    %588 = arith.divf %586, %587 : vector<16x1xf32>
    %cst_203 = arith.constant 9.99999974E-6 : f32
    %589 = vector.broadcast %cst_203 : f32 to vector<16x1xf32>
    %590 = arith.addf %588, %589 : vector<16x1xf32>
    %591 = math.rsqrt %590 : vector<16x1xf32>
    %592 = vector.broadcast %591 : vector<16x1xf32> to vector<16x32xf32>
    %593 = arith.mulf %583, %592 : vector<16x32xf32>
    %c1009 = arith.constant 1009 : index
    %c0_204 = arith.constant 0 : index
    %594 = vector.load %arg4[%c1009, %c0_204] : memref<1037x32xf32, #tpu.memory_space<vmem>>, vector<1x32xf32>
    %595 = vector.broadcast %594 : vector<1x32xf32> to vector<16x32xf32>
    %596 = arith.mulf %593, %595 : vector<16x32xf32>
    %c1010 = arith.constant 1010 : index
    %c0_205 = arith.constant 0 : index
    %597 = vector.load %arg4[%c1010, %c0_205] : memref<1037x32xf32, #tpu.memory_space<vmem>>, vector<1x32xf32>
    %598 = vector.broadcast %597 : vector<1x32xf32> to vector<16x32xf32>
    %599 = arith.addf %596, %598 : vector<16x32xf32>
    %c32_206 = arith.constant 32 : index
    %c0_207 = arith.constant 0 : index
    %600 = vector.load %arg7[%c32_206, %c0_207] : memref<132x128xf32, #tpu.memory_space<vmem>>, vector<32x128xf32>
    %cst_208 = arith.constant dense<0.000000e+00> : vector<32x128xf32>
    %601 = tpu.matmul %525, %600, %cst_208 {dimension_numbers = #tpu.dot_dimension_numbers<[1], [0], [0], [1], [0, 0, 1, 1], [], []>} : vector<32x32xf32>, vector<32x128xf32>, vector<32x128xf32> -> vector<32x128xf32>
    %c129_209 = arith.constant 129 : index
    %c0_210 = arith.constant 0 : index
    %602 = vector.load %arg7[%c129_209, %c0_210] : memref<132x128xf32, #tpu.memory_space<vmem>>, vector<1x128xf32>
    %603 = vector.broadcast %602 : vector<1x128xf32> to vector<32x128xf32>
    %604 = arith.addf %601, %603 : vector<32x128xf32>
    %cst_211 = arith.constant 5.000000e-01 : f32
    %605 = vector.broadcast %cst_211 : f32 to vector<32x128xf32>
    %606 = arith.mulf %605, %604 : vector<32x128xf32>
    %cst_212 = arith.constant 0.707106769 : f32
    %607 = vector.broadcast %cst_212 : f32 to vector<32x128xf32>
    %608 = arith.mulf %604, %607 : vector<32x128xf32>
    %cst_213 = arith.constant 0.000000e+00 : f32
    %609 = vector.broadcast %cst_213 : f32 to vector<32x128xf32>
    %610 = arith.cmpf oge, %608, %609 : vector<32x128xf32>
    %cst_214 = arith.constant 1.000000e+00 : f32
    %cst_215 = arith.constant -1.000000e+00 : f32
    %611 = vector.broadcast %cst_214 : f32 to vector<32x128xf32>
    %612 = vector.broadcast %cst_215 : f32 to vector<32x128xf32>
    %613 = arith.select %610, %611, %612 : vector<32x128xi1>, vector<32x128xf32>
    %614 = math.absf %608 : vector<32x128xf32>
    %cst_216 = arith.constant 0.327591091 : f32
    %615 = vector.broadcast %cst_216 : f32 to vector<32x128xf32>
    %616 = arith.mulf %615, %614 : vector<32x128xf32>
    %cst_217 = arith.constant 1.000000e+00 : f32
    %617 = vector.broadcast %cst_217 : f32 to vector<32x128xf32>
    %618 = arith.addf %617, %616 : vector<32x128xf32>
    %cst_218 = arith.constant 1.000000e+00 : f32
    %619 = vector.broadcast %cst_218 : f32 to vector<32x128xf32>
    %620 = arith.divf %619, %618 : vector<32x128xf32>
    %cst_219 = arith.constant 1.06140542 : f32
    %621 = vector.broadcast %cst_219 : f32 to vector<32x128xf32>
    %622 = arith.mulf %621, %620 : vector<32x128xf32>
    %cst_220 = arith.constant -1.45315206 : f32
    %623 = vector.broadcast %cst_220 : f32 to vector<32x128xf32>
    %624 = arith.addf %622, %623 : vector<32x128xf32>
    %625 = arith.mulf %624, %620 : vector<32x128xf32>
    %cst_221 = arith.constant 1.42141378 : f32
    %626 = vector.broadcast %cst_221 : f32 to vector<32x128xf32>
    %627 = arith.addf %625, %626 : vector<32x128xf32>
    %628 = arith.mulf %627, %620 : vector<32x128xf32>
    %cst_222 = arith.constant -0.284496725 : f32
    %629 = vector.broadcast %cst_222 : f32 to vector<32x128xf32>
    %630 = arith.addf %628, %629 : vector<32x128xf32>
    %631 = arith.mulf %630, %620 : vector<32x128xf32>
    %cst_223 = arith.constant 0.254829586 : f32
    %632 = vector.broadcast %cst_223 : f32 to vector<32x128xf32>
    %633 = arith.addf %631, %632 : vector<32x128xf32>
    %634 = arith.mulf %633, %620 : vector<32x128xf32>
    %cst_224 = arith.constant 0.000000e+00 : f32
    %635 = vector.broadcast %cst_224 : f32 to vector<32x128xf32>
    %636 = arith.subf %635, %614 : vector<32x128xf32>
    %637 = arith.mulf %636, %614 : vector<32x128xf32>
    %638 = math.exp %637 : vector<32x128xf32>
    %639 = arith.mulf %634, %638 : vector<32x128xf32>
    %cst_225 = arith.constant 1.000000e+00 : f32
    %640 = vector.broadcast %cst_225 : f32 to vector<32x128xf32>
    %641 = arith.subf %640, %639 : vector<32x128xf32>
    %642 = arith.mulf %613, %641 : vector<32x128xf32>
    %cst_226 = arith.constant 1.000000e+00 : f32
    %643 = vector.broadcast %cst_226 : f32 to vector<32x128xf32>
    %644 = arith.addf %643, %642 : vector<32x128xf32>
    %645 = arith.mulf %606, %644 : vector<32x128xf32>
    %c416 = arith.constant 416 : index
    %c0_227 = arith.constant 0 : index
    %646 = vector.load %arg4[%c416, %c0_227] : memref<1037x32xf32, #tpu.memory_space<vmem>>, vector<128x32xf32>
    %cst_228 = arith.constant dense<0.000000e+00> : vector<32x32xf32>
    %647 = tpu.matmul %645, %646, %cst_228 {dimension_numbers = #tpu.dot_dimension_numbers<[1], [0], [0], [1], [0, 0, 1, 1], [], []>} : vector<32x128xf32>, vector<128x32xf32>, vector<32x32xf32> -> vector<32x32xf32>
    %c1004 = arith.constant 1004 : index
    %c0_229 = arith.constant 0 : index
    %648 = vector.load %arg4[%c1004, %c0_229] : memref<1037x32xf32, #tpu.memory_space<vmem>>, vector<1x32xf32>
    %649 = vector.broadcast %648 : vector<1x32xf32> to vector<32x32xf32>
    %650 = arith.addf %647, %649 : vector<32x32xf32>
    %651 = arith.addf %525, %650 : vector<32x32xf32>
    %cst_230 = arith.constant dense<0.000000e+00> : vector<32xf32>
    %652 = vector.multi_reduction <add>, %651, %cst_230 [1] : vector<32x32xf32> to vector<32xf32>
    %653 = vector.shape_cast %652 : vector<32xf32> to vector<32x1xf32>
    %cst_231 = arith.constant 3.200000e+01 : f32
    %654 = vector.broadcast %cst_231 : f32 to vector<32x1xf32>
    %655 = arith.divf %653, %654 : vector<32x1xf32>
    %656 = vector.broadcast %655 : vector<32x1xf32> to vector<32x32xf32>
    %657 = arith.subf %651, %656 : vector<32x32xf32>
    %658 = arith.mulf %657, %657 : vector<32x32xf32>
    %cst_232 = arith.constant dense<0.000000e+00> : vector<32xf32>
    %659 = vector.multi_reduction <add>, %658, %cst_232 [1] : vector<32x32xf32> to vector<32xf32>
    %660 = vector.shape_cast %659 : vector<32xf32> to vector<32x1xf32>
    %cst_233 = arith.constant 3.200000e+01 : f32
    %661 = vector.broadcast %cst_233 : f32 to vector<32x1xf32>
    %662 = arith.divf %660, %661 : vector<32x1xf32>
    %cst_234 = arith.constant 9.99999974E-6 : f32
    %663 = vector.broadcast %cst_234 : f32 to vector<32x1xf32>
    %664 = arith.addf %662, %663 : vector<32x1xf32>
    %665 = math.rsqrt %664 : vector<32x1xf32>
    %666 = vector.broadcast %665 : vector<32x1xf32> to vector<32x32xf32>
    %667 = arith.mulf %657, %666 : vector<32x32xf32>
    %c1015 = arith.constant 1015 : index
    %c0_235 = arith.constant 0 : index
    %668 = vector.load %arg4[%c1015, %c0_235] : memref<1037x32xf32, #tpu.memory_space<vmem>>, vector<1x32xf32>
    %669 = vector.broadcast %668 : vector<1x32xf32> to vector<32x32xf32>
    %670 = arith.mulf %667, %669 : vector<32x32xf32>
    %c1016 = arith.constant 1016 : index
    %c0_236 = arith.constant 0 : index
    %671 = vector.load %arg4[%c1016, %c0_236] : memref<1037x32xf32, #tpu.memory_space<vmem>>, vector<1x32xf32>
    %672 = vector.broadcast %671 : vector<1x32xf32> to vector<32x32xf32>
    %673 = arith.addf %670, %672 : vector<32x32xf32>
    %674 = arith.addf %599, %92 : vector<16x32xf32>
    %675 = arith.addf %673, %111 : vector<32x32xf32>
    %c64 = arith.constant 64 : index
    %c0_237 = arith.constant 0 : index
    %676 = vector.load %arg6[%c64, %c0_237] : memref<132x96xf32, #tpu.memory_space<vmem>>, vector<32x96xf32>
    %cst_238 = arith.constant dense<0.000000e+00> : vector<16x96xf32>
    %677 = tpu.matmul %674, %676, %cst_238 {dimension_numbers = #tpu.dot_dimension_numbers<[1], [0], [0], [1], [0, 0, 1, 1], [], []>} : vector<16x32xf32>, vector<32x96xf32>, vector<16x96xf32> -> vector<16x96xf32>
    %c130 = arith.constant 130 : index
    %c0_239 = arith.constant 0 : index
    %678 = vector.load %arg6[%c130, %c0_239] : memref<132x96xf32, #tpu.memory_space<vmem>>, vector<1x96xf32>
    %679 = vector.broadcast %678 : vector<1x96xf32> to vector<16x96xf32>
    %680 = arith.addf %677, %679 : vector<16x96xf32>
    %681 = vector.extract_strided_slice %680 {offsets = [0, 0], sizes = [16, 32], strides = [1, 1]} : vector<16x96xf32> to vector<16x32xf32>
    %682 = vector.extract_strided_slice %680 {offsets = [0, 32], sizes = [16, 32], strides = [1, 1]} : vector<16x96xf32> to vector<16x32xf32>
    %683 = vector.extract_strided_slice %680 {offsets = [0, 64], sizes = [16, 32], strides = [1, 1]} : vector<16x96xf32> to vector<16x32xf32>
    %c544 = arith.constant 544 : index
    %c0_240 = arith.constant 0 : index
    %684 = vector.load %arg4[%c544, %c0_240] : memref<1037x32xf32, #tpu.memory_space<vmem>>, vector<32x32xf32>
    %c1017 = arith.constant 1017 : index
    %c0_241 = arith.constant 0 : index
    %685 = vector.load %arg4[%c1017, %c0_241] : memref<1037x32xf32, #tpu.memory_space<vmem>>, vector<1x32xf32>
    %686 = vector.extract_strided_slice %681 {offsets = [0, 0], sizes = [16, 8], strides = [1, 1]} : vector<16x32xf32> to vector<16x8xf32>
    %687 = vector.extract_strided_slice %682 {offsets = [0, 0], sizes = [16, 8], strides = [1, 1]} : vector<16x32xf32> to vector<16x8xf32>
    %cst_242 = arith.constant dense<0.000000e+00> : vector<16x16xf32>
    %688 = tpu.matmul %686, %687, %cst_242 {dimension_numbers = #tpu.dot_dimension_numbers<[1], [1], [0], [0], [0, 0, 1, 0], [], []>} : vector<16x8xf32>, vector<16x8xf32>, vector<16x16xf32> -> vector<16x16xf32>
    %689 = arith.addf %688, %19 : vector<16x16xf32>
    %cst_243 = arith.constant dense<0xFF800000> : vector<16xf32>
    %690 = vector.multi_reduction <maximumf>, %689, %cst_243 [1] : vector<16x16xf32> to vector<16xf32>
    %691 = vector.shape_cast %690 : vector<16xf32> to vector<16x1xf32>
    %692 = vector.broadcast %691 : vector<16x1xf32> to vector<16x16xf32>
    %693 = arith.subf %689, %692 : vector<16x16xf32>
    %694 = math.exp %693 : vector<16x16xf32>
    %cst_244 = arith.constant dense<0.000000e+00> : vector<16xf32>
    %695 = vector.multi_reduction <add>, %694, %cst_244 [1] : vector<16x16xf32> to vector<16xf32>
    %696 = vector.shape_cast %695 : vector<16xf32> to vector<16x1xf32>
    %697 = tpu.reciprocal %696 {approx = true} : vector<16x1xf32> -> vector<16x1xf32>
    %698 = vector.broadcast %697 : vector<16x1xf32> to vector<16x16xf32>
    %699 = arith.mulf %694, %698 : vector<16x16xf32>
    %700 = vector.extract_strided_slice %683 {offsets = [0, 0], sizes = [16, 8], strides = [1, 1]} : vector<16x32xf32> to vector<16x8xf32>
    %cst_245 = arith.constant dense<0.000000e+00> : vector<16x8xf32>
    %701 = tpu.matmul %699, %700, %cst_245 {dimension_numbers = #tpu.dot_dimension_numbers<[1], [0], [0], [1], [0, 0, 1, 1], [], []>} : vector<16x16xf32>, vector<16x8xf32>, vector<16x8xf32> -> vector<16x8xf32>
    %702 = vector.extract_strided_slice %681 {offsets = [0, 8], sizes = [16, 8], strides = [1, 1]} : vector<16x32xf32> to vector<16x8xf32>
    %703 = vector.extract_strided_slice %682 {offsets = [0, 8], sizes = [16, 8], strides = [1, 1]} : vector<16x32xf32> to vector<16x8xf32>
    %cst_246 = arith.constant dense<0.000000e+00> : vector<16x16xf32>
    %704 = tpu.matmul %702, %703, %cst_246 {dimension_numbers = #tpu.dot_dimension_numbers<[1], [1], [0], [0], [0, 0, 1, 0], [], []>} : vector<16x8xf32>, vector<16x8xf32>, vector<16x16xf32> -> vector<16x16xf32>
    %705 = arith.addf %704, %19 : vector<16x16xf32>
    %cst_247 = arith.constant dense<0xFF800000> : vector<16xf32>
    %706 = vector.multi_reduction <maximumf>, %705, %cst_247 [1] : vector<16x16xf32> to vector<16xf32>
    %707 = vector.shape_cast %706 : vector<16xf32> to vector<16x1xf32>
    %708 = vector.broadcast %707 : vector<16x1xf32> to vector<16x16xf32>
    %709 = arith.subf %705, %708 : vector<16x16xf32>
    %710 = math.exp %709 : vector<16x16xf32>
    %cst_248 = arith.constant dense<0.000000e+00> : vector<16xf32>
    %711 = vector.multi_reduction <add>, %710, %cst_248 [1] : vector<16x16xf32> to vector<16xf32>
    %712 = vector.shape_cast %711 : vector<16xf32> to vector<16x1xf32>
    %713 = tpu.reciprocal %712 {approx = true} : vector<16x1xf32> -> vector<16x1xf32>
    %714 = vector.broadcast %713 : vector<16x1xf32> to vector<16x16xf32>
    %715 = arith.mulf %710, %714 : vector<16x16xf32>
    %716 = vector.extract_strided_slice %683 {offsets = [0, 8], sizes = [16, 8], strides = [1, 1]} : vector<16x32xf32> to vector<16x8xf32>
    %cst_249 = arith.constant dense<0.000000e+00> : vector<16x8xf32>
    %717 = tpu.matmul %715, %716, %cst_249 {dimension_numbers = #tpu.dot_dimension_numbers<[1], [0], [0], [1], [0, 0, 1, 1], [], []>} : vector<16x16xf32>, vector<16x8xf32>, vector<16x8xf32> -> vector<16x8xf32>
    %718 = vector.extract_strided_slice %681 {offsets = [0, 16], sizes = [16, 8], strides = [1, 1]} : vector<16x32xf32> to vector<16x8xf32>
    %719 = vector.extract_strided_slice %682 {offsets = [0, 16], sizes = [16, 8], strides = [1, 1]} : vector<16x32xf32> to vector<16x8xf32>
    %cst_250 = arith.constant dense<0.000000e+00> : vector<16x16xf32>
    %720 = tpu.matmul %718, %719, %cst_250 {dimension_numbers = #tpu.dot_dimension_numbers<[1], [1], [0], [0], [0, 0, 1, 0], [], []>} : vector<16x8xf32>, vector<16x8xf32>, vector<16x16xf32> -> vector<16x16xf32>
    %721 = arith.addf %720, %19 : vector<16x16xf32>
    %cst_251 = arith.constant dense<0xFF800000> : vector<16xf32>
    %722 = vector.multi_reduction <maximumf>, %721, %cst_251 [1] : vector<16x16xf32> to vector<16xf32>
    %723 = vector.shape_cast %722 : vector<16xf32> to vector<16x1xf32>
    %724 = vector.broadcast %723 : vector<16x1xf32> to vector<16x16xf32>
    %725 = arith.subf %721, %724 : vector<16x16xf32>
    %726 = math.exp %725 : vector<16x16xf32>
    %cst_252 = arith.constant dense<0.000000e+00> : vector<16xf32>
    %727 = vector.multi_reduction <add>, %726, %cst_252 [1] : vector<16x16xf32> to vector<16xf32>
    %728 = vector.shape_cast %727 : vector<16xf32> to vector<16x1xf32>
    %729 = tpu.reciprocal %728 {approx = true} : vector<16x1xf32> -> vector<16x1xf32>
    %730 = vector.broadcast %729 : vector<16x1xf32> to vector<16x16xf32>
    %731 = arith.mulf %726, %730 : vector<16x16xf32>
    %732 = vector.extract_strided_slice %683 {offsets = [0, 16], sizes = [16, 8], strides = [1, 1]} : vector<16x32xf32> to vector<16x8xf32>
    %cst_253 = arith.constant dense<0.000000e+00> : vector<16x8xf32>
    %733 = tpu.matmul %731, %732, %cst_253 {dimension_numbers = #tpu.dot_dimension_numbers<[1], [0], [0], [1], [0, 0, 1, 1], [], []>} : vector<16x16xf32>, vector<16x8xf32>, vector<16x8xf32> -> vector<16x8xf32>
    %734 = vector.extract_strided_slice %681 {offsets = [0, 24], sizes = [16, 8], strides = [1, 1]} : vector<16x32xf32> to vector<16x8xf32>
    %735 = vector.extract_strided_slice %682 {offsets = [0, 24], sizes = [16, 8], strides = [1, 1]} : vector<16x32xf32> to vector<16x8xf32>
    %cst_254 = arith.constant dense<0.000000e+00> : vector<16x16xf32>
    %736 = tpu.matmul %734, %735, %cst_254 {dimension_numbers = #tpu.dot_dimension_numbers<[1], [1], [0], [0], [0, 0, 1, 0], [], []>} : vector<16x8xf32>, vector<16x8xf32>, vector<16x16xf32> -> vector<16x16xf32>
    %737 = arith.addf %736, %19 : vector<16x16xf32>
    %cst_255 = arith.constant dense<0xFF800000> : vector<16xf32>
    %738 = vector.multi_reduction <maximumf>, %737, %cst_255 [1] : vector<16x16xf32> to vector<16xf32>
    %739 = vector.shape_cast %738 : vector<16xf32> to vector<16x1xf32>
    %740 = vector.broadcast %739 : vector<16x1xf32> to vector<16x16xf32>
    %741 = arith.subf %737, %740 : vector<16x16xf32>
    %742 = math.exp %741 : vector<16x16xf32>
    %cst_256 = arith.constant dense<0.000000e+00> : vector<16xf32>
    %743 = vector.multi_reduction <add>, %742, %cst_256 [1] : vector<16x16xf32> to vector<16xf32>
    %744 = vector.shape_cast %743 : vector<16xf32> to vector<16x1xf32>
    %745 = tpu.reciprocal %744 {approx = true} : vector<16x1xf32> -> vector<16x1xf32>
    %746 = vector.broadcast %745 : vector<16x1xf32> to vector<16x16xf32>
    %747 = arith.mulf %742, %746 : vector<16x16xf32>
    %748 = vector.extract_strided_slice %683 {offsets = [0, 24], sizes = [16, 8], strides = [1, 1]} : vector<16x32xf32> to vector<16x8xf32>
    %cst_257 = arith.constant dense<0.000000e+00> : vector<16x8xf32>
    %749 = tpu.matmul %747, %748, %cst_257 {dimension_numbers = #tpu.dot_dimension_numbers<[1], [0], [0], [1], [0, 0, 1, 1], [], []>} : vector<16x16xf32>, vector<16x8xf32>, vector<16x8xf32> -> vector<16x8xf32>
    %750 = tpu.concatenate %701, %717, %733, %749 in 1 : vector<16x8xf32>, vector<16x8xf32>, vector<16x8xf32>, vector<16x8xf32> -> vector<16x32xf32>
    %cst_258 = arith.constant dense<0.000000e+00> : vector<16x32xf32>
    %751 = tpu.matmul %750, %684, %cst_258 {dimension_numbers = #tpu.dot_dimension_numbers<[1], [0], [0], [1], [0, 0, 1, 1], [], []>} : vector<16x32xf32>, vector<32x32xf32>, vector<16x32xf32> -> vector<16x32xf32>
    %752 = vector.broadcast %685 : vector<1x32xf32> to vector<16x32xf32>
    %753 = arith.addf %751, %752 : vector<16x32xf32>
    %754 = arith.addf %674, %753 : vector<16x32xf32>
    %cst_259 = arith.constant dense<0.000000e+00> : vector<16xf32>
    %755 = vector.multi_reduction <add>, %754, %cst_259 [1] : vector<16x32xf32> to vector<16xf32>
    %756 = vector.shape_cast %755 : vector<16xf32> to vector<16x1xf32>
    %cst_260 = arith.constant 3.200000e+01 : f32
    %757 = vector.broadcast %cst_260 : f32 to vector<16x1xf32>
    %758 = arith.divf %756, %757 : vector<16x1xf32>
    %759 = vector.broadcast %758 : vector<16x1xf32> to vector<16x32xf32>
    %760 = arith.subf %754, %759 : vector<16x32xf32>
    %761 = arith.mulf %760, %760 : vector<16x32xf32>
    %cst_261 = arith.constant dense<0.000000e+00> : vector<16xf32>
    %762 = vector.multi_reduction <add>, %761, %cst_261 [1] : vector<16x32xf32> to vector<16xf32>
    %763 = vector.shape_cast %762 : vector<16xf32> to vector<16x1xf32>
    %cst_262 = arith.constant 3.200000e+01 : f32
    %764 = vector.broadcast %cst_262 : f32 to vector<16x1xf32>
    %765 = arith.divf %763, %764 : vector<16x1xf32>
    %cst_263 = arith.constant 9.99999974E-6 : f32
    %766 = vector.broadcast %cst_263 : f32 to vector<16x1xf32>
    %767 = arith.addf %765, %766 : vector<16x1xf32>
    %768 = math.rsqrt %767 : vector<16x1xf32>
    %769 = vector.broadcast %768 : vector<16x1xf32> to vector<16x32xf32>
    %770 = arith.mulf %760, %769 : vector<16x32xf32>
    %c1025 = arith.constant 1025 : index
    %c0_264 = arith.constant 0 : index
    %771 = vector.load %arg4[%c1025, %c0_264] : memref<1037x32xf32, #tpu.memory_space<vmem>>, vector<1x32xf32>
    %772 = vector.broadcast %771 : vector<1x32xf32> to vector<16x32xf32>
    %773 = arith.mulf %770, %772 : vector<16x32xf32>
    %c1026 = arith.constant 1026 : index
    %c0_265 = arith.constant 0 : index
    %774 = vector.load %arg4[%c1026, %c0_265] : memref<1037x32xf32, #tpu.memory_space<vmem>>, vector<1x32xf32>
    %775 = vector.broadcast %774 : vector<1x32xf32> to vector<16x32xf32>
    %776 = arith.addf %773, %775 : vector<16x32xf32>
    %c96_266 = arith.constant 96 : index
    %c0_267 = arith.constant 0 : index
    %777 = vector.load %arg6[%c96_266, %c0_267] : memref<132x96xf32, #tpu.memory_space<vmem>>, vector<32x96xf32>
    %cst_268 = arith.constant dense<0.000000e+00> : vector<32x96xf32>
    %778 = tpu.matmul %675, %777, %cst_268 {dimension_numbers = #tpu.dot_dimension_numbers<[1], [0], [0], [1], [0, 0, 1, 1], [], []>} : vector<32x32xf32>, vector<32x96xf32>, vector<32x96xf32> -> vector<32x96xf32>
    %c131 = arith.constant 131 : index
    %c0_269 = arith.constant 0 : index
    %779 = vector.load %arg6[%c131, %c0_269] : memref<132x96xf32, #tpu.memory_space<vmem>>, vector<1x96xf32>
    %780 = vector.broadcast %779 : vector<1x96xf32> to vector<32x96xf32>
    %781 = arith.addf %778, %780 : vector<32x96xf32>
    %782 = vector.extract_strided_slice %781 {offsets = [0, 0], sizes = [32, 32], strides = [1, 1]} : vector<32x96xf32> to vector<32x32xf32>
    %783 = vector.extract_strided_slice %781 {offsets = [0, 32], sizes = [32, 32], strides = [1, 1]} : vector<32x96xf32> to vector<32x32xf32>
    %784 = vector.extract_strided_slice %781 {offsets = [0, 64], sizes = [32, 32], strides = [1, 1]} : vector<32x96xf32> to vector<32x32xf32>
    %c576 = arith.constant 576 : index
    %c0_270 = arith.constant 0 : index
    %785 = vector.load %arg4[%c576, %c0_270] : memref<1037x32xf32, #tpu.memory_space<vmem>>, vector<32x32xf32>
    %c1018 = arith.constant 1018 : index
    %c0_271 = arith.constant 0 : index
    %786 = vector.load %arg4[%c1018, %c0_271] : memref<1037x32xf32, #tpu.memory_space<vmem>>, vector<1x32xf32>
    %787 = vector.extract_strided_slice %782 {offsets = [0, 0], sizes = [32, 8], strides = [1, 1]} : vector<32x32xf32> to vector<32x8xf32>
    %788 = vector.extract_strided_slice %783 {offsets = [0, 0], sizes = [32, 8], strides = [1, 1]} : vector<32x32xf32> to vector<32x8xf32>
    %cst_272 = arith.constant dense<0.000000e+00> : vector<32x32xf32>
    %789 = tpu.matmul %787, %788, %cst_272 {dimension_numbers = #tpu.dot_dimension_numbers<[1], [1], [0], [0], [0, 0, 1, 0], [], []>} : vector<32x8xf32>, vector<32x8xf32>, vector<32x32xf32> -> vector<32x32xf32>
    %790 = arith.addf %789, %37 : vector<32x32xf32>
    %cst_273 = arith.constant dense<0xFF800000> : vector<32xf32>
    %791 = vector.multi_reduction <maximumf>, %790, %cst_273 [1] : vector<32x32xf32> to vector<32xf32>
    %792 = vector.shape_cast %791 : vector<32xf32> to vector<32x1xf32>
    %793 = vector.broadcast %792 : vector<32x1xf32> to vector<32x32xf32>
    %794 = arith.subf %790, %793 : vector<32x32xf32>
    %795 = math.exp %794 : vector<32x32xf32>
    %cst_274 = arith.constant dense<0.000000e+00> : vector<32xf32>
    %796 = vector.multi_reduction <add>, %795, %cst_274 [1] : vector<32x32xf32> to vector<32xf32>
    %797 = vector.shape_cast %796 : vector<32xf32> to vector<32x1xf32>
    %798 = tpu.reciprocal %797 {approx = true} : vector<32x1xf32> -> vector<32x1xf32>
    %799 = vector.broadcast %798 : vector<32x1xf32> to vector<32x32xf32>
    %800 = arith.mulf %795, %799 : vector<32x32xf32>
    %801 = vector.extract_strided_slice %784 {offsets = [0, 0], sizes = [32, 8], strides = [1, 1]} : vector<32x32xf32> to vector<32x8xf32>
    %cst_275 = arith.constant dense<0.000000e+00> : vector<32x8xf32>
    %802 = tpu.matmul %800, %801, %cst_275 {dimension_numbers = #tpu.dot_dimension_numbers<[1], [0], [0], [1], [0, 0, 1, 1], [], []>} : vector<32x32xf32>, vector<32x8xf32>, vector<32x8xf32> -> vector<32x8xf32>
    %803 = vector.extract_strided_slice %782 {offsets = [0, 8], sizes = [32, 8], strides = [1, 1]} : vector<32x32xf32> to vector<32x8xf32>
    %804 = vector.extract_strided_slice %783 {offsets = [0, 8], sizes = [32, 8], strides = [1, 1]} : vector<32x32xf32> to vector<32x8xf32>
    %cst_276 = arith.constant dense<0.000000e+00> : vector<32x32xf32>
    %805 = tpu.matmul %803, %804, %cst_276 {dimension_numbers = #tpu.dot_dimension_numbers<[1], [1], [0], [0], [0, 0, 1, 0], [], []>} : vector<32x8xf32>, vector<32x8xf32>, vector<32x32xf32> -> vector<32x32xf32>
    %806 = arith.addf %805, %37 : vector<32x32xf32>
    %cst_277 = arith.constant dense<0xFF800000> : vector<32xf32>
    %807 = vector.multi_reduction <maximumf>, %806, %cst_277 [1] : vector<32x32xf32> to vector<32xf32>
    %808 = vector.shape_cast %807 : vector<32xf32> to vector<32x1xf32>
    %809 = vector.broadcast %808 : vector<32x1xf32> to vector<32x32xf32>
    %810 = arith.subf %806, %809 : vector<32x32xf32>
    %811 = math.exp %810 : vector<32x32xf32>
    %cst_278 = arith.constant dense<0.000000e+00> : vector<32xf32>
    %812 = vector.multi_reduction <add>, %811, %cst_278 [1] : vector<32x32xf32> to vector<32xf32>
    %813 = vector.shape_cast %812 : vector<32xf32> to vector<32x1xf32>
    %814 = tpu.reciprocal %813 {approx = true} : vector<32x1xf32> -> vector<32x1xf32>
    %815 = vector.broadcast %814 : vector<32x1xf32> to vector<32x32xf32>
    %816 = arith.mulf %811, %815 : vector<32x32xf32>
    %817 = vector.extract_strided_slice %784 {offsets = [0, 8], sizes = [32, 8], strides = [1, 1]} : vector<32x32xf32> to vector<32x8xf32>
    %cst_279 = arith.constant dense<0.000000e+00> : vector<32x8xf32>
    %818 = tpu.matmul %816, %817, %cst_279 {dimension_numbers = #tpu.dot_dimension_numbers<[1], [0], [0], [1], [0, 0, 1, 1], [], []>} : vector<32x32xf32>, vector<32x8xf32>, vector<32x8xf32> -> vector<32x8xf32>
    %819 = vector.extract_strided_slice %782 {offsets = [0, 16], sizes = [32, 8], strides = [1, 1]} : vector<32x32xf32> to vector<32x8xf32>
    %820 = vector.extract_strided_slice %783 {offsets = [0, 16], sizes = [32, 8], strides = [1, 1]} : vector<32x32xf32> to vector<32x8xf32>
    %cst_280 = arith.constant dense<0.000000e+00> : vector<32x32xf32>
    %821 = tpu.matmul %819, %820, %cst_280 {dimension_numbers = #tpu.dot_dimension_numbers<[1], [1], [0], [0], [0, 0, 1, 0], [], []>} : vector<32x8xf32>, vector<32x8xf32>, vector<32x32xf32> -> vector<32x32xf32>
    %822 = arith.addf %821, %37 : vector<32x32xf32>
    %cst_281 = arith.constant dense<0xFF800000> : vector<32xf32>
    %823 = vector.multi_reduction <maximumf>, %822, %cst_281 [1] : vector<32x32xf32> to vector<32xf32>
    %824 = vector.shape_cast %823 : vector<32xf32> to vector<32x1xf32>
    %825 = vector.broadcast %824 : vector<32x1xf32> to vector<32x32xf32>
    %826 = arith.subf %822, %825 : vector<32x32xf32>
    %827 = math.exp %826 : vector<32x32xf32>
    %cst_282 = arith.constant dense<0.000000e+00> : vector<32xf32>
    %828 = vector.multi_reduction <add>, %827, %cst_282 [1] : vector<32x32xf32> to vector<32xf32>
    %829 = vector.shape_cast %828 : vector<32xf32> to vector<32x1xf32>
    %830 = tpu.reciprocal %829 {approx = true} : vector<32x1xf32> -> vector<32x1xf32>
    %831 = vector.broadcast %830 : vector<32x1xf32> to vector<32x32xf32>
    %832 = arith.mulf %827, %831 : vector<32x32xf32>
    %833 = vector.extract_strided_slice %784 {offsets = [0, 16], sizes = [32, 8], strides = [1, 1]} : vector<32x32xf32> to vector<32x8xf32>
    %cst_283 = arith.constant dense<0.000000e+00> : vector<32x8xf32>
    %834 = tpu.matmul %832, %833, %cst_283 {dimension_numbers = #tpu.dot_dimension_numbers<[1], [0], [0], [1], [0, 0, 1, 1], [], []>} : vector<32x32xf32>, vector<32x8xf32>, vector<32x8xf32> -> vector<32x8xf32>
    %835 = vector.extract_strided_slice %782 {offsets = [0, 24], sizes = [32, 8], strides = [1, 1]} : vector<32x32xf32> to vector<32x8xf32>
    %836 = vector.extract_strided_slice %783 {offsets = [0, 24], sizes = [32, 8], strides = [1, 1]} : vector<32x32xf32> to vector<32x8xf32>
    %cst_284 = arith.constant dense<0.000000e+00> : vector<32x32xf32>
    %837 = tpu.matmul %835, %836, %cst_284 {dimension_numbers = #tpu.dot_dimension_numbers<[1], [1], [0], [0], [0, 0, 1, 0], [], []>} : vector<32x8xf32>, vector<32x8xf32>, vector<32x32xf32> -> vector<32x32xf32>
    %838 = arith.addf %837, %37 : vector<32x32xf32>
    %cst_285 = arith.constant dense<0xFF800000> : vector<32xf32>
    %839 = vector.multi_reduction <maximumf>, %838, %cst_285 [1] : vector<32x32xf32> to vector<32xf32>
    %840 = vector.shape_cast %839 : vector<32xf32> to vector<32x1xf32>
    %841 = vector.broadcast %840 : vector<32x1xf32> to vector<32x32xf32>
    %842 = arith.subf %838, %841 : vector<32x32xf32>
    %843 = math.exp %842 : vector<32x32xf32>
    %cst_286 = arith.constant dense<0.000000e+00> : vector<32xf32>
    %844 = vector.multi_reduction <add>, %843, %cst_286 [1] : vector<32x32xf32> to vector<32xf32>
    %845 = vector.shape_cast %844 : vector<32xf32> to vector<32x1xf32>
    %846 = tpu.reciprocal %845 {approx = true} : vector<32x1xf32> -> vector<32x1xf32>
    %847 = vector.broadcast %846 : vector<32x1xf32> to vector<32x32xf32>
    %848 = arith.mulf %843, %847 : vector<32x32xf32>
    %849 = vector.extract_strided_slice %784 {offsets = [0, 24], sizes = [32, 8], strides = [1, 1]} : vector<32x32xf32> to vector<32x8xf32>
    %cst_287 = arith.constant dense<0.000000e+00> : vector<32x8xf32>
    %850 = tpu.matmul %848, %849, %cst_287 {dimension_numbers = #tpu.dot_dimension_numbers<[1], [0], [0], [1], [0, 0, 1, 1], [], []>} : vector<32x32xf32>, vector<32x8xf32>, vector<32x8xf32> -> vector<32x8xf32>
    %851 = tpu.concatenate %802, %818, %834, %850 in 1 : vector<32x8xf32>, vector<32x8xf32>, vector<32x8xf32>, vector<32x8xf32> -> vector<32x32xf32>
    %cst_288 = arith.constant dense<0.000000e+00> : vector<32x32xf32>
    %852 = tpu.matmul %851, %785, %cst_288 {dimension_numbers = #tpu.dot_dimension_numbers<[1], [0], [0], [1], [0, 0, 1, 1], [], []>} : vector<32x32xf32>, vector<32x32xf32>, vector<32x32xf32> -> vector<32x32xf32>
    %853 = vector.broadcast %786 : vector<1x32xf32> to vector<32x32xf32>
    %854 = arith.addf %852, %853 : vector<32x32xf32>
    %855 = arith.addf %675, %854 : vector<32x32xf32>
    %cst_289 = arith.constant dense<0.000000e+00> : vector<32xf32>
    %856 = vector.multi_reduction <add>, %855, %cst_289 [1] : vector<32x32xf32> to vector<32xf32>
    %857 = vector.shape_cast %856 : vector<32xf32> to vector<32x1xf32>
    %cst_290 = arith.constant 3.200000e+01 : f32
    %858 = vector.broadcast %cst_290 : f32 to vector<32x1xf32>
    %859 = arith.divf %857, %858 : vector<32x1xf32>
    %860 = vector.broadcast %859 : vector<32x1xf32> to vector<32x32xf32>
    %861 = arith.subf %855, %860 : vector<32x32xf32>
    %862 = arith.mulf %861, %861 : vector<32x32xf32>
    %cst_291 = arith.constant dense<0.000000e+00> : vector<32xf32>
    %863 = vector.multi_reduction <add>, %862, %cst_291 [1] : vector<32x32xf32> to vector<32xf32>
    %864 = vector.shape_cast %863 : vector<32xf32> to vector<32x1xf32>
    %cst_292 = arith.constant 3.200000e+01 : f32
    %865 = vector.broadcast %cst_292 : f32 to vector<32x1xf32>
    %866 = arith.divf %864, %865 : vector<32x1xf32>
    %cst_293 = arith.constant 9.99999974E-6 : f32
    %867 = vector.broadcast %cst_293 : f32 to vector<32x1xf32>
    %868 = arith.addf %866, %867 : vector<32x1xf32>
    %869 = math.rsqrt %868 : vector<32x1xf32>
    %870 = vector.broadcast %869 : vector<32x1xf32> to vector<32x32xf32>
    %871 = arith.mulf %861, %870 : vector<32x32xf32>
    %c1031 = arith.constant 1031 : index
    %c0_294 = arith.constant 0 : index
    %872 = vector.load %arg4[%c1031, %c0_294] : memref<1037x32xf32, #tpu.memory_space<vmem>>, vector<1x32xf32>
    %873 = vector.broadcast %872 : vector<1x32xf32> to vector<32x32xf32>
    %874 = arith.mulf %871, %873 : vector<32x32xf32>
    %c1032 = arith.constant 1032 : index
    %c0_295 = arith.constant 0 : index
    %875 = vector.load %arg4[%c1032, %c0_295] : memref<1037x32xf32, #tpu.memory_space<vmem>>, vector<1x32xf32>
    %876 = vector.broadcast %875 : vector<1x32xf32> to vector<32x32xf32>
    %877 = arith.addf %874, %876 : vector<32x32xf32>
    %c608 = arith.constant 608 : index
    %c0_296 = arith.constant 0 : index
    %878 = vector.load %arg4[%c608, %c0_296] : memref<1037x32xf32, #tpu.memory_space<vmem>>, vector<32x32xf32>
    %cst_297 = arith.constant dense<0.000000e+00> : vector<16x32xf32>
    %879 = tpu.matmul %776, %878, %cst_297 {dimension_numbers = #tpu.dot_dimension_numbers<[1], [0], [0], [1], [0, 0, 1, 1], [], []>} : vector<16x32xf32>, vector<32x32xf32>, vector<16x32xf32> -> vector<16x32xf32>
    %c1019 = arith.constant 1019 : index
    %c0_298 = arith.constant 0 : index
    %880 = vector.load %arg4[%c1019, %c0_298] : memref<1037x32xf32, #tpu.memory_space<vmem>>, vector<1x32xf32>
    %881 = vector.broadcast %880 : vector<1x32xf32> to vector<16x32xf32>
    %882 = arith.addf %879, %881 : vector<16x32xf32>
    %c64_299 = arith.constant 64 : index
    %c0_300 = arith.constant 0 : index
    %883 = vector.load %arg5[%c64_299, %c0_300] : memref<132x64xf32, #tpu.memory_space<vmem>>, vector<32x64xf32>
    %cst_301 = arith.constant dense<0.000000e+00> : vector<32x64xf32>
    %884 = tpu.matmul %877, %883, %cst_301 {dimension_numbers = #tpu.dot_dimension_numbers<[1], [0], [0], [1], [0, 0, 1, 1], [], []>} : vector<32x32xf32>, vector<32x64xf32>, vector<32x64xf32> -> vector<32x64xf32>
    %c130_302 = arith.constant 130 : index
    %c0_303 = arith.constant 0 : index
    %885 = vector.load %arg5[%c130_302, %c0_303] : memref<132x64xf32, #tpu.memory_space<vmem>>, vector<1x64xf32>
    %886 = vector.broadcast %885 : vector<1x64xf32> to vector<32x64xf32>
    %887 = arith.addf %884, %886 : vector<32x64xf32>
    %888 = vector.extract_strided_slice %887 {offsets = [0, 0], sizes = [32, 32], strides = [1, 1]} : vector<32x64xf32> to vector<32x32xf32>
    %889 = vector.extract_strided_slice %887 {offsets = [0, 32], sizes = [32, 32], strides = [1, 1]} : vector<32x64xf32> to vector<32x32xf32>
    %c640 = arith.constant 640 : index
    %c0_304 = arith.constant 0 : index
    %890 = vector.load %arg4[%c640, %c0_304] : memref<1037x32xf32, #tpu.memory_space<vmem>>, vector<32x32xf32>
    %c1020 = arith.constant 1020 : index
    %c0_305 = arith.constant 0 : index
    %891 = vector.load %arg4[%c1020, %c0_305] : memref<1037x32xf32, #tpu.memory_space<vmem>>, vector<1x32xf32>
    %892 = vector.extract_strided_slice %882 {offsets = [0, 0], sizes = [16, 8], strides = [1, 1]} : vector<16x32xf32> to vector<16x8xf32>
    %893 = vector.extract_strided_slice %888 {offsets = [0, 0], sizes = [32, 8], strides = [1, 1]} : vector<32x32xf32> to vector<32x8xf32>
    %cst_306 = arith.constant dense<0.000000e+00> : vector<16x32xf32>
    %894 = tpu.matmul %892, %893, %cst_306 {dimension_numbers = #tpu.dot_dimension_numbers<[1], [1], [0], [0], [0, 0, 1, 0], [], []>} : vector<16x8xf32>, vector<32x8xf32>, vector<16x32xf32> -> vector<16x32xf32>
    %895 = arith.addf %894, %55 : vector<16x32xf32>
    %cst_307 = arith.constant dense<0xFF800000> : vector<16xf32>
    %896 = vector.multi_reduction <maximumf>, %895, %cst_307 [1] : vector<16x32xf32> to vector<16xf32>
    %897 = vector.shape_cast %896 : vector<16xf32> to vector<16x1xf32>
    %898 = vector.broadcast %897 : vector<16x1xf32> to vector<16x32xf32>
    %899 = arith.subf %895, %898 : vector<16x32xf32>
    %900 = math.exp %899 : vector<16x32xf32>
    %cst_308 = arith.constant dense<0.000000e+00> : vector<16xf32>
    %901 = vector.multi_reduction <add>, %900, %cst_308 [1] : vector<16x32xf32> to vector<16xf32>
    %902 = vector.shape_cast %901 : vector<16xf32> to vector<16x1xf32>
    %903 = tpu.reciprocal %902 {approx = true} : vector<16x1xf32> -> vector<16x1xf32>
    %904 = vector.broadcast %903 : vector<16x1xf32> to vector<16x32xf32>
    %905 = arith.mulf %900, %904 : vector<16x32xf32>
    %906 = vector.extract_strided_slice %889 {offsets = [0, 0], sizes = [32, 8], strides = [1, 1]} : vector<32x32xf32> to vector<32x8xf32>
    %cst_309 = arith.constant dense<0.000000e+00> : vector<16x8xf32>
    %907 = tpu.matmul %905, %906, %cst_309 {dimension_numbers = #tpu.dot_dimension_numbers<[1], [0], [0], [1], [0, 0, 1, 1], [], []>} : vector<16x32xf32>, vector<32x8xf32>, vector<16x8xf32> -> vector<16x8xf32>
    %908 = vector.extract_strided_slice %882 {offsets = [0, 8], sizes = [16, 8], strides = [1, 1]} : vector<16x32xf32> to vector<16x8xf32>
    %909 = vector.extract_strided_slice %888 {offsets = [0, 8], sizes = [32, 8], strides = [1, 1]} : vector<32x32xf32> to vector<32x8xf32>
    %cst_310 = arith.constant dense<0.000000e+00> : vector<16x32xf32>
    %910 = tpu.matmul %908, %909, %cst_310 {dimension_numbers = #tpu.dot_dimension_numbers<[1], [1], [0], [0], [0, 0, 1, 0], [], []>} : vector<16x8xf32>, vector<32x8xf32>, vector<16x32xf32> -> vector<16x32xf32>
    %911 = arith.addf %910, %55 : vector<16x32xf32>
    %cst_311 = arith.constant dense<0xFF800000> : vector<16xf32>
    %912 = vector.multi_reduction <maximumf>, %911, %cst_311 [1] : vector<16x32xf32> to vector<16xf32>
    %913 = vector.shape_cast %912 : vector<16xf32> to vector<16x1xf32>
    %914 = vector.broadcast %913 : vector<16x1xf32> to vector<16x32xf32>
    %915 = arith.subf %911, %914 : vector<16x32xf32>
    %916 = math.exp %915 : vector<16x32xf32>
    %cst_312 = arith.constant dense<0.000000e+00> : vector<16xf32>
    %917 = vector.multi_reduction <add>, %916, %cst_312 [1] : vector<16x32xf32> to vector<16xf32>
    %918 = vector.shape_cast %917 : vector<16xf32> to vector<16x1xf32>
    %919 = tpu.reciprocal %918 {approx = true} : vector<16x1xf32> -> vector<16x1xf32>
    %920 = vector.broadcast %919 : vector<16x1xf32> to vector<16x32xf32>
    %921 = arith.mulf %916, %920 : vector<16x32xf32>
    %922 = vector.extract_strided_slice %889 {offsets = [0, 8], sizes = [32, 8], strides = [1, 1]} : vector<32x32xf32> to vector<32x8xf32>
    %cst_313 = arith.constant dense<0.000000e+00> : vector<16x8xf32>
    %923 = tpu.matmul %921, %922, %cst_313 {dimension_numbers = #tpu.dot_dimension_numbers<[1], [0], [0], [1], [0, 0, 1, 1], [], []>} : vector<16x32xf32>, vector<32x8xf32>, vector<16x8xf32> -> vector<16x8xf32>
    %924 = vector.extract_strided_slice %882 {offsets = [0, 16], sizes = [16, 8], strides = [1, 1]} : vector<16x32xf32> to vector<16x8xf32>
    %925 = vector.extract_strided_slice %888 {offsets = [0, 16], sizes = [32, 8], strides = [1, 1]} : vector<32x32xf32> to vector<32x8xf32>
    %cst_314 = arith.constant dense<0.000000e+00> : vector<16x32xf32>
    %926 = tpu.matmul %924, %925, %cst_314 {dimension_numbers = #tpu.dot_dimension_numbers<[1], [1], [0], [0], [0, 0, 1, 0], [], []>} : vector<16x8xf32>, vector<32x8xf32>, vector<16x32xf32> -> vector<16x32xf32>
    %927 = arith.addf %926, %55 : vector<16x32xf32>
    %cst_315 = arith.constant dense<0xFF800000> : vector<16xf32>
    %928 = vector.multi_reduction <maximumf>, %927, %cst_315 [1] : vector<16x32xf32> to vector<16xf32>
    %929 = vector.shape_cast %928 : vector<16xf32> to vector<16x1xf32>
    %930 = vector.broadcast %929 : vector<16x1xf32> to vector<16x32xf32>
    %931 = arith.subf %927, %930 : vector<16x32xf32>
    %932 = math.exp %931 : vector<16x32xf32>
    %cst_316 = arith.constant dense<0.000000e+00> : vector<16xf32>
    %933 = vector.multi_reduction <add>, %932, %cst_316 [1] : vector<16x32xf32> to vector<16xf32>
    %934 = vector.shape_cast %933 : vector<16xf32> to vector<16x1xf32>
    %935 = tpu.reciprocal %934 {approx = true} : vector<16x1xf32> -> vector<16x1xf32>
    %936 = vector.broadcast %935 : vector<16x1xf32> to vector<16x32xf32>
    %937 = arith.mulf %932, %936 : vector<16x32xf32>
    %938 = vector.extract_strided_slice %889 {offsets = [0, 16], sizes = [32, 8], strides = [1, 1]} : vector<32x32xf32> to vector<32x8xf32>
    %cst_317 = arith.constant dense<0.000000e+00> : vector<16x8xf32>
    %939 = tpu.matmul %937, %938, %cst_317 {dimension_numbers = #tpu.dot_dimension_numbers<[1], [0], [0], [1], [0, 0, 1, 1], [], []>} : vector<16x32xf32>, vector<32x8xf32>, vector<16x8xf32> -> vector<16x8xf32>
    %940 = vector.extract_strided_slice %882 {offsets = [0, 24], sizes = [16, 8], strides = [1, 1]} : vector<16x32xf32> to vector<16x8xf32>
    %941 = vector.extract_strided_slice %888 {offsets = [0, 24], sizes = [32, 8], strides = [1, 1]} : vector<32x32xf32> to vector<32x8xf32>
    %cst_318 = arith.constant dense<0.000000e+00> : vector<16x32xf32>
    %942 = tpu.matmul %940, %941, %cst_318 {dimension_numbers = #tpu.dot_dimension_numbers<[1], [1], [0], [0], [0, 0, 1, 0], [], []>} : vector<16x8xf32>, vector<32x8xf32>, vector<16x32xf32> -> vector<16x32xf32>
    %943 = arith.addf %942, %55 : vector<16x32xf32>
    %cst_319 = arith.constant dense<0xFF800000> : vector<16xf32>
    %944 = vector.multi_reduction <maximumf>, %943, %cst_319 [1] : vector<16x32xf32> to vector<16xf32>
    %945 = vector.shape_cast %944 : vector<16xf32> to vector<16x1xf32>
    %946 = vector.broadcast %945 : vector<16x1xf32> to vector<16x32xf32>
    %947 = arith.subf %943, %946 : vector<16x32xf32>
    %948 = math.exp %947 : vector<16x32xf32>
    %cst_320 = arith.constant dense<0.000000e+00> : vector<16xf32>
    %949 = vector.multi_reduction <add>, %948, %cst_320 [1] : vector<16x32xf32> to vector<16xf32>
    %950 = vector.shape_cast %949 : vector<16xf32> to vector<16x1xf32>
    %951 = tpu.reciprocal %950 {approx = true} : vector<16x1xf32> -> vector<16x1xf32>
    %952 = vector.broadcast %951 : vector<16x1xf32> to vector<16x32xf32>
    %953 = arith.mulf %948, %952 : vector<16x32xf32>
    %954 = vector.extract_strided_slice %889 {offsets = [0, 24], sizes = [32, 8], strides = [1, 1]} : vector<32x32xf32> to vector<32x8xf32>
    %cst_321 = arith.constant dense<0.000000e+00> : vector<16x8xf32>
    %955 = tpu.matmul %953, %954, %cst_321 {dimension_numbers = #tpu.dot_dimension_numbers<[1], [0], [0], [1], [0, 0, 1, 1], [], []>} : vector<16x32xf32>, vector<32x8xf32>, vector<16x8xf32> -> vector<16x8xf32>
    %956 = tpu.concatenate %907, %923, %939, %955 in 1 : vector<16x8xf32>, vector<16x8xf32>, vector<16x8xf32>, vector<16x8xf32> -> vector<16x32xf32>
    %cst_322 = arith.constant dense<0.000000e+00> : vector<16x32xf32>
    %957 = tpu.matmul %956, %890, %cst_322 {dimension_numbers = #tpu.dot_dimension_numbers<[1], [0], [0], [1], [0, 0, 1, 1], [], []>} : vector<16x32xf32>, vector<32x32xf32>, vector<16x32xf32> -> vector<16x32xf32>
    %958 = vector.broadcast %891 : vector<1x32xf32> to vector<16x32xf32>
    %959 = arith.addf %957, %958 : vector<16x32xf32>
    %960 = arith.addf %776, %959 : vector<16x32xf32>
    %cst_323 = arith.constant dense<0.000000e+00> : vector<16xf32>
    %961 = vector.multi_reduction <add>, %960, %cst_323 [1] : vector<16x32xf32> to vector<16xf32>
    %962 = vector.shape_cast %961 : vector<16xf32> to vector<16x1xf32>
    %cst_324 = arith.constant 3.200000e+01 : f32
    %963 = vector.broadcast %cst_324 : f32 to vector<16x1xf32>
    %964 = arith.divf %962, %963 : vector<16x1xf32>
    %965 = vector.broadcast %964 : vector<16x1xf32> to vector<16x32xf32>
    %966 = arith.subf %960, %965 : vector<16x32xf32>
    %967 = arith.mulf %966, %966 : vector<16x32xf32>
    %cst_325 = arith.constant dense<0.000000e+00> : vector<16xf32>
    %968 = vector.multi_reduction <add>, %967, %cst_325 [1] : vector<16x32xf32> to vector<16xf32>
    %969 = vector.shape_cast %968 : vector<16xf32> to vector<16x1xf32>
    %cst_326 = arith.constant 3.200000e+01 : f32
    %970 = vector.broadcast %cst_326 : f32 to vector<16x1xf32>
    %971 = arith.divf %969, %970 : vector<16x1xf32>
    %cst_327 = arith.constant 9.99999974E-6 : f32
    %972 = vector.broadcast %cst_327 : f32 to vector<16x1xf32>
    %973 = arith.addf %971, %972 : vector<16x1xf32>
    %974 = math.rsqrt %973 : vector<16x1xf32>
    %975 = vector.broadcast %974 : vector<16x1xf32> to vector<16x32xf32>
    %976 = arith.mulf %966, %975 : vector<16x32xf32>
    %c1027 = arith.constant 1027 : index
    %c0_328 = arith.constant 0 : index
    %977 = vector.load %arg4[%c1027, %c0_328] : memref<1037x32xf32, #tpu.memory_space<vmem>>, vector<1x32xf32>
    %978 = vector.broadcast %977 : vector<1x32xf32> to vector<16x32xf32>
    %979 = arith.mulf %976, %978 : vector<16x32xf32>
    %c1028 = arith.constant 1028 : index
    %c0_329 = arith.constant 0 : index
    %980 = vector.load %arg4[%c1028, %c0_329] : memref<1037x32xf32, #tpu.memory_space<vmem>>, vector<1x32xf32>
    %981 = vector.broadcast %980 : vector<1x32xf32> to vector<16x32xf32>
    %982 = arith.addf %979, %981 : vector<16x32xf32>
    %c672 = arith.constant 672 : index
    %c0_330 = arith.constant 0 : index
    %983 = vector.load %arg4[%c672, %c0_330] : memref<1037x32xf32, #tpu.memory_space<vmem>>, vector<32x32xf32>
    %cst_331 = arith.constant dense<0.000000e+00> : vector<32x32xf32>
    %984 = tpu.matmul %877, %983, %cst_331 {dimension_numbers = #tpu.dot_dimension_numbers<[1], [0], [0], [1], [0, 0, 1, 1], [], []>} : vector<32x32xf32>, vector<32x32xf32>, vector<32x32xf32> -> vector<32x32xf32>
    %c1021 = arith.constant 1021 : index
    %c0_332 = arith.constant 0 : index
    %985 = vector.load %arg4[%c1021, %c0_332] : memref<1037x32xf32, #tpu.memory_space<vmem>>, vector<1x32xf32>
    %986 = vector.broadcast %985 : vector<1x32xf32> to vector<32x32xf32>
    %987 = arith.addf %984, %986 : vector<32x32xf32>
    %c96_333 = arith.constant 96 : index
    %c0_334 = arith.constant 0 : index
    %988 = vector.load %arg5[%c96_333, %c0_334] : memref<132x64xf32, #tpu.memory_space<vmem>>, vector<32x64xf32>
    %cst_335 = arith.constant dense<0.000000e+00> : vector<16x64xf32>
    %989 = tpu.matmul %982, %988, %cst_335 {dimension_numbers = #tpu.dot_dimension_numbers<[1], [0], [0], [1], [0, 0, 1, 1], [], []>} : vector<16x32xf32>, vector<32x64xf32>, vector<16x64xf32> -> vector<16x64xf32>
    %c131_336 = arith.constant 131 : index
    %c0_337 = arith.constant 0 : index
    %990 = vector.load %arg5[%c131_336, %c0_337] : memref<132x64xf32, #tpu.memory_space<vmem>>, vector<1x64xf32>
    %991 = vector.broadcast %990 : vector<1x64xf32> to vector<16x64xf32>
    %992 = arith.addf %989, %991 : vector<16x64xf32>
    %993 = vector.extract_strided_slice %992 {offsets = [0, 0], sizes = [16, 32], strides = [1, 1]} : vector<16x64xf32> to vector<16x32xf32>
    %994 = vector.extract_strided_slice %992 {offsets = [0, 32], sizes = [16, 32], strides = [1, 1]} : vector<16x64xf32> to vector<16x32xf32>
    %c704 = arith.constant 704 : index
    %c0_338 = arith.constant 0 : index
    %995 = vector.load %arg4[%c704, %c0_338] : memref<1037x32xf32, #tpu.memory_space<vmem>>, vector<32x32xf32>
    %c1022 = arith.constant 1022 : index
    %c0_339 = arith.constant 0 : index
    %996 = vector.load %arg4[%c1022, %c0_339] : memref<1037x32xf32, #tpu.memory_space<vmem>>, vector<1x32xf32>
    %997 = vector.extract_strided_slice %987 {offsets = [0, 0], sizes = [32, 8], strides = [1, 1]} : vector<32x32xf32> to vector<32x8xf32>
    %998 = vector.extract_strided_slice %993 {offsets = [0, 0], sizes = [16, 8], strides = [1, 1]} : vector<16x32xf32> to vector<16x8xf32>
    %cst_340 = arith.constant dense<0.000000e+00> : vector<32x16xf32>
    %999 = tpu.matmul %997, %998, %cst_340 {dimension_numbers = #tpu.dot_dimension_numbers<[1], [1], [0], [0], [0, 0, 1, 0], [], []>} : vector<32x8xf32>, vector<16x8xf32>, vector<32x16xf32> -> vector<32x16xf32>
    %1000 = arith.addf %999, %73 : vector<32x16xf32>
    %cst_341 = arith.constant dense<0xFF800000> : vector<32xf32>
    %1001 = vector.multi_reduction <maximumf>, %1000, %cst_341 [1] : vector<32x16xf32> to vector<32xf32>
    %1002 = vector.shape_cast %1001 : vector<32xf32> to vector<32x1xf32>
    %1003 = vector.broadcast %1002 : vector<32x1xf32> to vector<32x16xf32>
    %1004 = arith.subf %1000, %1003 : vector<32x16xf32>
    %1005 = math.exp %1004 : vector<32x16xf32>
    %cst_342 = arith.constant dense<0.000000e+00> : vector<32xf32>
    %1006 = vector.multi_reduction <add>, %1005, %cst_342 [1] : vector<32x16xf32> to vector<32xf32>
    %1007 = vector.shape_cast %1006 : vector<32xf32> to vector<32x1xf32>
    %1008 = tpu.reciprocal %1007 {approx = true} : vector<32x1xf32> -> vector<32x1xf32>
    %1009 = vector.broadcast %1008 : vector<32x1xf32> to vector<32x16xf32>
    %1010 = arith.mulf %1005, %1009 : vector<32x16xf32>
    %1011 = vector.extract_strided_slice %994 {offsets = [0, 0], sizes = [16, 8], strides = [1, 1]} : vector<16x32xf32> to vector<16x8xf32>
    %cst_343 = arith.constant dense<0.000000e+00> : vector<32x8xf32>
    %1012 = tpu.matmul %1010, %1011, %cst_343 {dimension_numbers = #tpu.dot_dimension_numbers<[1], [0], [0], [1], [0, 0, 1, 1], [], []>} : vector<32x16xf32>, vector<16x8xf32>, vector<32x8xf32> -> vector<32x8xf32>
    %1013 = vector.extract_strided_slice %987 {offsets = [0, 8], sizes = [32, 8], strides = [1, 1]} : vector<32x32xf32> to vector<32x8xf32>
    %1014 = vector.extract_strided_slice %993 {offsets = [0, 8], sizes = [16, 8], strides = [1, 1]} : vector<16x32xf32> to vector<16x8xf32>
    %cst_344 = arith.constant dense<0.000000e+00> : vector<32x16xf32>
    %1015 = tpu.matmul %1013, %1014, %cst_344 {dimension_numbers = #tpu.dot_dimension_numbers<[1], [1], [0], [0], [0, 0, 1, 0], [], []>} : vector<32x8xf32>, vector<16x8xf32>, vector<32x16xf32> -> vector<32x16xf32>
    %1016 = arith.addf %1015, %73 : vector<32x16xf32>
    %cst_345 = arith.constant dense<0xFF800000> : vector<32xf32>
    %1017 = vector.multi_reduction <maximumf>, %1016, %cst_345 [1] : vector<32x16xf32> to vector<32xf32>
    %1018 = vector.shape_cast %1017 : vector<32xf32> to vector<32x1xf32>
    %1019 = vector.broadcast %1018 : vector<32x1xf32> to vector<32x16xf32>
    %1020 = arith.subf %1016, %1019 : vector<32x16xf32>
    %1021 = math.exp %1020 : vector<32x16xf32>
    %cst_346 = arith.constant dense<0.000000e+00> : vector<32xf32>
    %1022 = vector.multi_reduction <add>, %1021, %cst_346 [1] : vector<32x16xf32> to vector<32xf32>
    %1023 = vector.shape_cast %1022 : vector<32xf32> to vector<32x1xf32>
    %1024 = tpu.reciprocal %1023 {approx = true} : vector<32x1xf32> -> vector<32x1xf32>
    %1025 = vector.broadcast %1024 : vector<32x1xf32> to vector<32x16xf32>
    %1026 = arith.mulf %1021, %1025 : vector<32x16xf32>
    %1027 = vector.extract_strided_slice %994 {offsets = [0, 8], sizes = [16, 8], strides = [1, 1]} : vector<16x32xf32> to vector<16x8xf32>
    %cst_347 = arith.constant dense<0.000000e+00> : vector<32x8xf32>
    %1028 = tpu.matmul %1026, %1027, %cst_347 {dimension_numbers = #tpu.dot_dimension_numbers<[1], [0], [0], [1], [0, 0, 1, 1], [], []>} : vector<32x16xf32>, vector<16x8xf32>, vector<32x8xf32> -> vector<32x8xf32>
    %1029 = vector.extract_strided_slice %987 {offsets = [0, 16], sizes = [32, 8], strides = [1, 1]} : vector<32x32xf32> to vector<32x8xf32>
    %1030 = vector.extract_strided_slice %993 {offsets = [0, 16], sizes = [16, 8], strides = [1, 1]} : vector<16x32xf32> to vector<16x8xf32>
    %cst_348 = arith.constant dense<0.000000e+00> : vector<32x16xf32>
    %1031 = tpu.matmul %1029, %1030, %cst_348 {dimension_numbers = #tpu.dot_dimension_numbers<[1], [1], [0], [0], [0, 0, 1, 0], [], []>} : vector<32x8xf32>, vector<16x8xf32>, vector<32x16xf32> -> vector<32x16xf32>
    %1032 = arith.addf %1031, %73 : vector<32x16xf32>
    %cst_349 = arith.constant dense<0xFF800000> : vector<32xf32>
    %1033 = vector.multi_reduction <maximumf>, %1032, %cst_349 [1] : vector<32x16xf32> to vector<32xf32>
    %1034 = vector.shape_cast %1033 : vector<32xf32> to vector<32x1xf32>
    %1035 = vector.broadcast %1034 : vector<32x1xf32> to vector<32x16xf32>
    %1036 = arith.subf %1032, %1035 : vector<32x16xf32>
    %1037 = math.exp %1036 : vector<32x16xf32>
    %cst_350 = arith.constant dense<0.000000e+00> : vector<32xf32>
    %1038 = vector.multi_reduction <add>, %1037, %cst_350 [1] : vector<32x16xf32> to vector<32xf32>
    %1039 = vector.shape_cast %1038 : vector<32xf32> to vector<32x1xf32>
    %1040 = tpu.reciprocal %1039 {approx = true} : vector<32x1xf32> -> vector<32x1xf32>
    %1041 = vector.broadcast %1040 : vector<32x1xf32> to vector<32x16xf32>
    %1042 = arith.mulf %1037, %1041 : vector<32x16xf32>
    %1043 = vector.extract_strided_slice %994 {offsets = [0, 16], sizes = [16, 8], strides = [1, 1]} : vector<16x32xf32> to vector<16x8xf32>
    %cst_351 = arith.constant dense<0.000000e+00> : vector<32x8xf32>
    %1044 = tpu.matmul %1042, %1043, %cst_351 {dimension_numbers = #tpu.dot_dimension_numbers<[1], [0], [0], [1], [0, 0, 1, 1], [], []>} : vector<32x16xf32>, vector<16x8xf32>, vector<32x8xf32> -> vector<32x8xf32>
    %1045 = vector.extract_strided_slice %987 {offsets = [0, 24], sizes = [32, 8], strides = [1, 1]} : vector<32x32xf32> to vector<32x8xf32>
    %1046 = vector.extract_strided_slice %993 {offsets = [0, 24], sizes = [16, 8], strides = [1, 1]} : vector<16x32xf32> to vector<16x8xf32>
    %cst_352 = arith.constant dense<0.000000e+00> : vector<32x16xf32>
    %1047 = tpu.matmul %1045, %1046, %cst_352 {dimension_numbers = #tpu.dot_dimension_numbers<[1], [1], [0], [0], [0, 0, 1, 0], [], []>} : vector<32x8xf32>, vector<16x8xf32>, vector<32x16xf32> -> vector<32x16xf32>
    %1048 = arith.addf %1047, %73 : vector<32x16xf32>
    %cst_353 = arith.constant dense<0xFF800000> : vector<32xf32>
    %1049 = vector.multi_reduction <maximumf>, %1048, %cst_353 [1] : vector<32x16xf32> to vector<32xf32>
    %1050 = vector.shape_cast %1049 : vector<32xf32> to vector<32x1xf32>
    %1051 = vector.broadcast %1050 : vector<32x1xf32> to vector<32x16xf32>
    %1052 = arith.subf %1048, %1051 : vector<32x16xf32>
    %1053 = math.exp %1052 : vector<32x16xf32>
    %cst_354 = arith.constant dense<0.000000e+00> : vector<32xf32>
    %1054 = vector.multi_reduction <add>, %1053, %cst_354 [1] : vector<32x16xf32> to vector<32xf32>
    %1055 = vector.shape_cast %1054 : vector<32xf32> to vector<32x1xf32>
    %1056 = tpu.reciprocal %1055 {approx = true} : vector<32x1xf32> -> vector<32x1xf32>
    %1057 = vector.broadcast %1056 : vector<32x1xf32> to vector<32x16xf32>
    %1058 = arith.mulf %1053, %1057 : vector<32x16xf32>
    %1059 = vector.extract_strided_slice %994 {offsets = [0, 24], sizes = [16, 8], strides = [1, 1]} : vector<16x32xf32> to vector<16x8xf32>
    %cst_355 = arith.constant dense<0.000000e+00> : vector<32x8xf32>
    %1060 = tpu.matmul %1058, %1059, %cst_355 {dimension_numbers = #tpu.dot_dimension_numbers<[1], [0], [0], [1], [0, 0, 1, 1], [], []>} : vector<32x16xf32>, vector<16x8xf32>, vector<32x8xf32> -> vector<32x8xf32>
    %1061 = tpu.concatenate %1012, %1028, %1044, %1060 in 1 : vector<32x8xf32>, vector<32x8xf32>, vector<32x8xf32>, vector<32x8xf32> -> vector<32x32xf32>
    %cst_356 = arith.constant dense<0.000000e+00> : vector<32x32xf32>
    %1062 = tpu.matmul %1061, %995, %cst_356 {dimension_numbers = #tpu.dot_dimension_numbers<[1], [0], [0], [1], [0, 0, 1, 1], [], []>} : vector<32x32xf32>, vector<32x32xf32>, vector<32x32xf32> -> vector<32x32xf32>
    %1063 = vector.broadcast %996 : vector<1x32xf32> to vector<32x32xf32>
    %1064 = arith.addf %1062, %1063 : vector<32x32xf32>
    %1065 = arith.addf %877, %1064 : vector<32x32xf32>
    %cst_357 = arith.constant dense<0.000000e+00> : vector<32xf32>
    %1066 = vector.multi_reduction <add>, %1065, %cst_357 [1] : vector<32x32xf32> to vector<32xf32>
    %1067 = vector.shape_cast %1066 : vector<32xf32> to vector<32x1xf32>
    %cst_358 = arith.constant 3.200000e+01 : f32
    %1068 = vector.broadcast %cst_358 : f32 to vector<32x1xf32>
    %1069 = arith.divf %1067, %1068 : vector<32x1xf32>
    %1070 = vector.broadcast %1069 : vector<32x1xf32> to vector<32x32xf32>
    %1071 = arith.subf %1065, %1070 : vector<32x32xf32>
    %1072 = arith.mulf %1071, %1071 : vector<32x32xf32>
    %cst_359 = arith.constant dense<0.000000e+00> : vector<32xf32>
    %1073 = vector.multi_reduction <add>, %1072, %cst_359 [1] : vector<32x32xf32> to vector<32xf32>
    %1074 = vector.shape_cast %1073 : vector<32xf32> to vector<32x1xf32>
    %cst_360 = arith.constant 3.200000e+01 : f32
    %1075 = vector.broadcast %cst_360 : f32 to vector<32x1xf32>
    %1076 = arith.divf %1074, %1075 : vector<32x1xf32>
    %cst_361 = arith.constant 9.99999974E-6 : f32
    %1077 = vector.broadcast %cst_361 : f32 to vector<32x1xf32>
    %1078 = arith.addf %1076, %1077 : vector<32x1xf32>
    %1079 = math.rsqrt %1078 : vector<32x1xf32>
    %1080 = vector.broadcast %1079 : vector<32x1xf32> to vector<32x32xf32>
    %1081 = arith.mulf %1071, %1080 : vector<32x32xf32>
    %c1033 = arith.constant 1033 : index
    %c0_362 = arith.constant 0 : index
    %1082 = vector.load %arg4[%c1033, %c0_362] : memref<1037x32xf32, #tpu.memory_space<vmem>>, vector<1x32xf32>
    %1083 = vector.broadcast %1082 : vector<1x32xf32> to vector<32x32xf32>
    %1084 = arith.mulf %1081, %1083 : vector<32x32xf32>
    %c1034 = arith.constant 1034 : index
    %c0_363 = arith.constant 0 : index
    %1085 = vector.load %arg4[%c1034, %c0_363] : memref<1037x32xf32, #tpu.memory_space<vmem>>, vector<1x32xf32>
    %1086 = vector.broadcast %1085 : vector<1x32xf32> to vector<32x32xf32>
    %1087 = arith.addf %1084, %1086 : vector<32x32xf32>
    %c64_364 = arith.constant 64 : index
    %c0_365 = arith.constant 0 : index
    %1088 = vector.load %arg7[%c64_364, %c0_365] : memref<132x128xf32, #tpu.memory_space<vmem>>, vector<32x128xf32>
    %cst_366 = arith.constant dense<0.000000e+00> : vector<16x128xf32>
    %1089 = tpu.matmul %982, %1088, %cst_366 {dimension_numbers = #tpu.dot_dimension_numbers<[1], [0], [0], [1], [0, 0, 1, 1], [], []>} : vector<16x32xf32>, vector<32x128xf32>, vector<16x128xf32> -> vector<16x128xf32>
    %c130_367 = arith.constant 130 : index
    %c0_368 = arith.constant 0 : index
    %1090 = vector.load %arg7[%c130_367, %c0_368] : memref<132x128xf32, #tpu.memory_space<vmem>>, vector<1x128xf32>
    %1091 = vector.broadcast %1090 : vector<1x128xf32> to vector<16x128xf32>
    %1092 = arith.addf %1089, %1091 : vector<16x128xf32>
    %cst_369 = arith.constant 5.000000e-01 : f32
    %1093 = vector.broadcast %cst_369 : f32 to vector<16x128xf32>
    %1094 = arith.mulf %1093, %1092 : vector<16x128xf32>
    %cst_370 = arith.constant 0.707106769 : f32
    %1095 = vector.broadcast %cst_370 : f32 to vector<16x128xf32>
    %1096 = arith.mulf %1092, %1095 : vector<16x128xf32>
    %cst_371 = arith.constant 0.000000e+00 : f32
    %1097 = vector.broadcast %cst_371 : f32 to vector<16x128xf32>
    %1098 = arith.cmpf oge, %1096, %1097 : vector<16x128xf32>
    %cst_372 = arith.constant 1.000000e+00 : f32
    %cst_373 = arith.constant -1.000000e+00 : f32
    %1099 = vector.broadcast %cst_372 : f32 to vector<16x128xf32>
    %1100 = vector.broadcast %cst_373 : f32 to vector<16x128xf32>
    %1101 = arith.select %1098, %1099, %1100 : vector<16x128xi1>, vector<16x128xf32>
    %1102 = math.absf %1096 : vector<16x128xf32>
    %cst_374 = arith.constant 0.327591091 : f32
    %1103 = vector.broadcast %cst_374 : f32 to vector<16x128xf32>
    %1104 = arith.mulf %1103, %1102 : vector<16x128xf32>
    %cst_375 = arith.constant 1.000000e+00 : f32
    %1105 = vector.broadcast %cst_375 : f32 to vector<16x128xf32>
    %1106 = arith.addf %1105, %1104 : vector<16x128xf32>
    %cst_376 = arith.constant 1.000000e+00 : f32
    %1107 = vector.broadcast %cst_376 : f32 to vector<16x128xf32>
    %1108 = arith.divf %1107, %1106 : vector<16x128xf32>
    %cst_377 = arith.constant 1.06140542 : f32
    %1109 = vector.broadcast %cst_377 : f32 to vector<16x128xf32>
    %1110 = arith.mulf %1109, %1108 : vector<16x128xf32>
    %cst_378 = arith.constant -1.45315206 : f32
    %1111 = vector.broadcast %cst_378 : f32 to vector<16x128xf32>
    %1112 = arith.addf %1110, %1111 : vector<16x128xf32>
    %1113 = arith.mulf %1112, %1108 : vector<16x128xf32>
    %cst_379 = arith.constant 1.42141378 : f32
    %1114 = vector.broadcast %cst_379 : f32 to vector<16x128xf32>
    %1115 = arith.addf %1113, %1114 : vector<16x128xf32>
    %1116 = arith.mulf %1115, %1108 : vector<16x128xf32>
    %cst_380 = arith.constant -0.284496725 : f32
    %1117 = vector.broadcast %cst_380 : f32 to vector<16x128xf32>
    %1118 = arith.addf %1116, %1117 : vector<16x128xf32>
    %1119 = arith.mulf %1118, %1108 : vector<16x128xf32>
    %cst_381 = arith.constant 0.254829586 : f32
    %1120 = vector.broadcast %cst_381 : f32 to vector<16x128xf32>
    %1121 = arith.addf %1119, %1120 : vector<16x128xf32>
    %1122 = arith.mulf %1121, %1108 : vector<16x128xf32>
    %cst_382 = arith.constant 0.000000e+00 : f32
    %1123 = vector.broadcast %cst_382 : f32 to vector<16x128xf32>
    %1124 = arith.subf %1123, %1102 : vector<16x128xf32>
    %1125 = arith.mulf %1124, %1102 : vector<16x128xf32>
    %1126 = math.exp %1125 : vector<16x128xf32>
    %1127 = arith.mulf %1122, %1126 : vector<16x128xf32>
    %cst_383 = arith.constant 1.000000e+00 : f32
    %1128 = vector.broadcast %cst_383 : f32 to vector<16x128xf32>
    %1129 = arith.subf %1128, %1127 : vector<16x128xf32>
    %1130 = arith.mulf %1101, %1129 : vector<16x128xf32>
    %cst_384 = arith.constant 1.000000e+00 : f32
    %1131 = vector.broadcast %cst_384 : f32 to vector<16x128xf32>
    %1132 = arith.addf %1131, %1130 : vector<16x128xf32>
    %1133 = arith.mulf %1094, %1132 : vector<16x128xf32>
    %c736 = arith.constant 736 : index
    %c0_385 = arith.constant 0 : index
    %1134 = vector.load %arg4[%c736, %c0_385] : memref<1037x32xf32, #tpu.memory_space<vmem>>, vector<128x32xf32>
    %cst_386 = arith.constant dense<0.000000e+00> : vector<16x32xf32>
    %1135 = tpu.matmul %1133, %1134, %cst_386 {dimension_numbers = #tpu.dot_dimension_numbers<[1], [0], [0], [1], [0, 0, 1, 1], [], []>} : vector<16x128xf32>, vector<128x32xf32>, vector<16x32xf32> -> vector<16x32xf32>
    %c1023 = arith.constant 1023 : index
    %c0_387 = arith.constant 0 : index
    %1136 = vector.load %arg4[%c1023, %c0_387] : memref<1037x32xf32, #tpu.memory_space<vmem>>, vector<1x32xf32>
    %1137 = vector.broadcast %1136 : vector<1x32xf32> to vector<16x32xf32>
    %1138 = arith.addf %1135, %1137 : vector<16x32xf32>
    %1139 = arith.addf %982, %1138 : vector<16x32xf32>
    %cst_388 = arith.constant dense<0.000000e+00> : vector<16xf32>
    %1140 = vector.multi_reduction <add>, %1139, %cst_388 [1] : vector<16x32xf32> to vector<16xf32>
    %1141 = vector.shape_cast %1140 : vector<16xf32> to vector<16x1xf32>
    %cst_389 = arith.constant 3.200000e+01 : f32
    %1142 = vector.broadcast %cst_389 : f32 to vector<16x1xf32>
    %1143 = arith.divf %1141, %1142 : vector<16x1xf32>
    %1144 = vector.broadcast %1143 : vector<16x1xf32> to vector<16x32xf32>
    %1145 = arith.subf %1139, %1144 : vector<16x32xf32>
    %1146 = arith.mulf %1145, %1145 : vector<16x32xf32>
    %cst_390 = arith.constant dense<0.000000e+00> : vector<16xf32>
    %1147 = vector.multi_reduction <add>, %1146, %cst_390 [1] : vector<16x32xf32> to vector<16xf32>
    %1148 = vector.shape_cast %1147 : vector<16xf32> to vector<16x1xf32>
    %cst_391 = arith.constant 3.200000e+01 : f32
    %1149 = vector.broadcast %cst_391 : f32 to vector<16x1xf32>
    %1150 = arith.divf %1148, %1149 : vector<16x1xf32>
    %cst_392 = arith.constant 9.99999974E-6 : f32
    %1151 = vector.broadcast %cst_392 : f32 to vector<16x1xf32>
    %1152 = arith.addf %1150, %1151 : vector<16x1xf32>
    %1153 = math.rsqrt %1152 : vector<16x1xf32>
    %1154 = vector.broadcast %1153 : vector<16x1xf32> to vector<16x32xf32>
    %1155 = arith.mulf %1145, %1154 : vector<16x32xf32>
    %c1029 = arith.constant 1029 : index
    %c0_393 = arith.constant 0 : index
    %1156 = vector.load %arg4[%c1029, %c0_393] : memref<1037x32xf32, #tpu.memory_space<vmem>>, vector<1x32xf32>
    %1157 = vector.broadcast %1156 : vector<1x32xf32> to vector<16x32xf32>
    %1158 = arith.mulf %1155, %1157 : vector<16x32xf32>
    %c1030 = arith.constant 1030 : index
    %c0_394 = arith.constant 0 : index
    %1159 = vector.load %arg4[%c1030, %c0_394] : memref<1037x32xf32, #tpu.memory_space<vmem>>, vector<1x32xf32>
    %1160 = vector.broadcast %1159 : vector<1x32xf32> to vector<16x32xf32>
    %1161 = arith.addf %1158, %1160 : vector<16x32xf32>
    %c96_395 = arith.constant 96 : index
    %c0_396 = arith.constant 0 : index
    %1162 = vector.load %arg7[%c96_395, %c0_396] : memref<132x128xf32, #tpu.memory_space<vmem>>, vector<32x128xf32>
    %cst_397 = arith.constant dense<0.000000e+00> : vector<32x128xf32>
    %1163 = tpu.matmul %1087, %1162, %cst_397 {dimension_numbers = #tpu.dot_dimension_numbers<[1], [0], [0], [1], [0, 0, 1, 1], [], []>} : vector<32x32xf32>, vector<32x128xf32>, vector<32x128xf32> -> vector<32x128xf32>
    %c131_398 = arith.constant 131 : index
    %c0_399 = arith.constant 0 : index
    %1164 = vector.load %arg7[%c131_398, %c0_399] : memref<132x128xf32, #tpu.memory_space<vmem>>, vector<1x128xf32>
    %1165 = vector.broadcast %1164 : vector<1x128xf32> to vector<32x128xf32>
    %1166 = arith.addf %1163, %1165 : vector<32x128xf32>
    %cst_400 = arith.constant 5.000000e-01 : f32
    %1167 = vector.broadcast %cst_400 : f32 to vector<32x128xf32>
    %1168 = arith.mulf %1167, %1166 : vector<32x128xf32>
    %cst_401 = arith.constant 0.707106769 : f32
    %1169 = vector.broadcast %cst_401 : f32 to vector<32x128xf32>
    %1170 = arith.mulf %1166, %1169 : vector<32x128xf32>
    %cst_402 = arith.constant 0.000000e+00 : f32
    %1171 = vector.broadcast %cst_402 : f32 to vector<32x128xf32>
    %1172 = arith.cmpf oge, %1170, %1171 : vector<32x128xf32>
    %cst_403 = arith.constant 1.000000e+00 : f32
    %cst_404 = arith.constant -1.000000e+00 : f32
    %1173 = vector.broadcast %cst_403 : f32 to vector<32x128xf32>
    %1174 = vector.broadcast %cst_404 : f32 to vector<32x128xf32>
    %1175 = arith.select %1172, %1173, %1174 : vector<32x128xi1>, vector<32x128xf32>
    %1176 = math.absf %1170 : vector<32x128xf32>
    %cst_405 = arith.constant 0.327591091 : f32
    %1177 = vector.broadcast %cst_405 : f32 to vector<32x128xf32>
    %1178 = arith.mulf %1177, %1176 : vector<32x128xf32>
    %cst_406 = arith.constant 1.000000e+00 : f32
    %1179 = vector.broadcast %cst_406 : f32 to vector<32x128xf32>
    %1180 = arith.addf %1179, %1178 : vector<32x128xf32>
    %cst_407 = arith.constant 1.000000e+00 : f32
    %1181 = vector.broadcast %cst_407 : f32 to vector<32x128xf32>
    %1182 = arith.divf %1181, %1180 : vector<32x128xf32>
    %cst_408 = arith.constant 1.06140542 : f32
    %1183 = vector.broadcast %cst_408 : f32 to vector<32x128xf32>
    %1184 = arith.mulf %1183, %1182 : vector<32x128xf32>
    %cst_409 = arith.constant -1.45315206 : f32
    %1185 = vector.broadcast %cst_409 : f32 to vector<32x128xf32>
    %1186 = arith.addf %1184, %1185 : vector<32x128xf32>
    %1187 = arith.mulf %1186, %1182 : vector<32x128xf32>
    %cst_410 = arith.constant 1.42141378 : f32
    %1188 = vector.broadcast %cst_410 : f32 to vector<32x128xf32>
    %1189 = arith.addf %1187, %1188 : vector<32x128xf32>
    %1190 = arith.mulf %1189, %1182 : vector<32x128xf32>
    %cst_411 = arith.constant -0.284496725 : f32
    %1191 = vector.broadcast %cst_411 : f32 to vector<32x128xf32>
    %1192 = arith.addf %1190, %1191 : vector<32x128xf32>
    %1193 = arith.mulf %1192, %1182 : vector<32x128xf32>
    %cst_412 = arith.constant 0.254829586 : f32
    %1194 = vector.broadcast %cst_412 : f32 to vector<32x128xf32>
    %1195 = arith.addf %1193, %1194 : vector<32x128xf32>
    %1196 = arith.mulf %1195, %1182 : vector<32x128xf32>
    %cst_413 = arith.constant 0.000000e+00 : f32
    %1197 = vector.broadcast %cst_413 : f32 to vector<32x128xf32>
    %1198 = arith.subf %1197, %1176 : vector<32x128xf32>
    %1199 = arith.mulf %1198, %1176 : vector<32x128xf32>
    %1200 = math.exp %1199 : vector<32x128xf32>
    %1201 = arith.mulf %1196, %1200 : vector<32x128xf32>
    %cst_414 = arith.constant 1.000000e+00 : f32
    %1202 = vector.broadcast %cst_414 : f32 to vector<32x128xf32>
    %1203 = arith.subf %1202, %1201 : vector<32x128xf32>
    %1204 = arith.mulf %1175, %1203 : vector<32x128xf32>
    %cst_415 = arith.constant 1.000000e+00 : f32
    %1205 = vector.broadcast %cst_415 : f32 to vector<32x128xf32>
    %1206 = arith.addf %1205, %1204 : vector<32x128xf32>
    %1207 = arith.mulf %1168, %1206 : vector<32x128xf32>
    %c864 = arith.constant 864 : index
    %c0_416 = arith.constant 0 : index
    %1208 = vector.load %arg4[%c864, %c0_416] : memref<1037x32xf32, #tpu.memory_space<vmem>>, vector<128x32xf32>
    %cst_417 = arith.constant dense<0.000000e+00> : vector<32x32xf32>
    %1209 = tpu.matmul %1207, %1208, %cst_417 {dimension_numbers = #tpu.dot_dimension_numbers<[1], [0], [0], [1], [0, 0, 1, 1], [], []>} : vector<32x128xf32>, vector<128x32xf32>, vector<32x32xf32> -> vector<32x32xf32>
    %c1024 = arith.constant 1024 : index
    %c0_418 = arith.constant 0 : index
    %1210 = vector.load %arg4[%c1024, %c0_418] : memref<1037x32xf32, #tpu.memory_space<vmem>>, vector<1x32xf32>
    %1211 = vector.broadcast %1210 : vector<1x32xf32> to vector<32x32xf32>
    %1212 = arith.addf %1209, %1211 : vector<32x32xf32>
    %1213 = arith.addf %1087, %1212 : vector<32x32xf32>
    %cst_419 = arith.constant dense<0.000000e+00> : vector<32xf32>
    %1214 = vector.multi_reduction <add>, %1213, %cst_419 [1] : vector<32x32xf32> to vector<32xf32>
    %1215 = vector.shape_cast %1214 : vector<32xf32> to vector<32x1xf32>
    %cst_420 = arith.constant 3.200000e+01 : f32
    %1216 = vector.broadcast %cst_420 : f32 to vector<32x1xf32>
    %1217 = arith.divf %1215, %1216 : vector<32x1xf32>
    %1218 = vector.broadcast %1217 : vector<32x1xf32> to vector<32x32xf32>
    %1219 = arith.subf %1213, %1218 : vector<32x32xf32>
    %1220 = arith.mulf %1219, %1219 : vector<32x32xf32>
    %cst_421 = arith.constant dense<0.000000e+00> : vector<32xf32>
    %1221 = vector.multi_reduction <add>, %1220, %cst_421 [1] : vector<32x32xf32> to vector<32xf32>
    %1222 = vector.shape_cast %1221 : vector<32xf32> to vector<32x1xf32>
    %cst_422 = arith.constant 3.200000e+01 : f32
    %1223 = vector.broadcast %cst_422 : f32 to vector<32x1xf32>
    %1224 = arith.divf %1222, %1223 : vector<32x1xf32>
    %cst_423 = arith.constant 9.99999974E-6 : f32
    %1225 = vector.broadcast %cst_423 : f32 to vector<32x1xf32>
    %1226 = arith.addf %1224, %1225 : vector<32x1xf32>
    %1227 = math.rsqrt %1226 : vector<32x1xf32>
    %1228 = vector.broadcast %1227 : vector<32x1xf32> to vector<32x32xf32>
    %1229 = arith.mulf %1219, %1228 : vector<32x32xf32>
    %c1035 = arith.constant 1035 : index
    %c0_424 = arith.constant 0 : index
    %1230 = vector.load %arg4[%c1035, %c0_424] : memref<1037x32xf32, #tpu.memory_space<vmem>>, vector<1x32xf32>
    %1231 = vector.broadcast %1230 : vector<1x32xf32> to vector<32x32xf32>
    %1232 = arith.mulf %1229, %1231 : vector<32x32xf32>
    %c1036 = arith.constant 1036 : index
    %c0_425 = arith.constant 0 : index
    %1233 = vector.load %arg4[%c1036, %c0_425] : memref<1037x32xf32, #tpu.memory_space<vmem>>, vector<1x32xf32>
    %1234 = vector.broadcast %1233 : vector<1x32xf32> to vector<32x32xf32>
    %1235 = arith.addf %1232, %1234 : vector<32x32xf32>
    %c32_426 = arith.constant 32 : index
    %c0_427 = arith.constant 0 : index
    %1236 = vector.load %arg4[%c32_426, %c0_427] : memref<1037x32xf32, #tpu.memory_space<vmem>>, vector<32x32xf32>
    %cst_428 = arith.constant dense<0.000000e+00> : vector<16x32xf32>
    %1237 = tpu.matmul %1161, %1236, %cst_428 {dimension_numbers = #tpu.dot_dimension_numbers<[1], [0], [0], [1], [0, 0, 1, 1], [], []>} : vector<16x32xf32>, vector<32x32xf32>, vector<16x32xf32> -> vector<16x32xf32>
    %c995 = arith.constant 995 : index
    %c0_429 = arith.constant 0 : index
    %1238 = vector.load %arg4[%c995, %c0_429] : memref<1037x32xf32, #tpu.memory_space<vmem>>, vector<1x32xf32>
    %1239 = vector.broadcast %1238 : vector<1x32xf32> to vector<16x32xf32>
    %1240 = arith.addf %1237, %1239 : vector<16x32xf32>
    %c0_430 = arith.constant 0 : index
    %c0_431 = arith.constant 0 : index
    %1241 = vector.load %arg8[%c0_430, %c0_431] : memref<16x32xf32, #tpu.memory_space<vmem>>, vector<16x32xf32>
    tpu.vector_store %arg8[%c0_430, %c0_431], %1240 {strides = array<i32>} : memref<16x32xf32, #tpu.memory_space<vmem>>, vector<16x32xf32>,
    %c64_432 = arith.constant 64 : index
    %c0_433 = arith.constant 0 : index
    %1242 = vector.load %arg4[%c64_432, %c0_433] : memref<1037x32xf32, #tpu.memory_space<vmem>>, vector<32x32xf32>
    %cst_434 = arith.constant dense<0.000000e+00> : vector<32x32xf32>
    %1243 = tpu.matmul %1235, %1242, %cst_434 {dimension_numbers = #tpu.dot_dimension_numbers<[1], [0], [0], [1], [0, 0, 1, 1], [], []>} : vector<32x32xf32>, vector<32x32xf32>, vector<32x32xf32> -> vector<32x32xf32>
    %c996 = arith.constant 996 : index
    %c0_435 = arith.constant 0 : index
    %1244 = vector.load %arg4[%c996, %c0_435] : memref<1037x32xf32, #tpu.memory_space<vmem>>, vector<1x32xf32>
    %1245 = vector.broadcast %1244 : vector<1x32xf32> to vector<32x32xf32>
    %1246 = arith.addf %1243, %1245 : vector<32x32xf32>
    %c0_436 = arith.constant 0 : index
    %c0_437 = arith.constant 0 : index
    %1247 = vector.load %arg9[%c0_436, %c0_437] : memref<32x32xf32, #tpu.memory_space<vmem>>, vector<32x32xf32>
    tpu.vector_store %arg9[%c0_436, %c0_437], %1246 {strides = array<i32>} : memref<32x32xf32, #tpu.memory_space<vmem>>, vector<32x32xf32>,
    return
  }
}

</mosaic_0001>

<bundles_post_ra>
// kernel: bidirectional_diffusion_forward.1
= control target key start
LH: loop header
LB: loop body
LE: loop exit
PB: predicated region body
PF: predicated region fallthrough
CT: control target
= control target key end

     0   :  { %15 = vsyncpa [#allocation3], 0  ;;  %v16357_v2 = vmov 0   ;;  %s19480_s0 = inlined_call_operand.vmem [shape: f32[16,32], index: 0, kind: input, shape index: {}]   ;;  %s19481_s1 = inlined_call_operand.vmem [shape: f32[32,32], index: 1, kind: input, shape index: {}]   ;;  %s19482_s2 = inlined_call_operand.vmem [shape: f32[16,1], index: 2, kind: input, shape index: {}]   ;;  %s19483_s3 = inlined_call_operand.vmem [shape: f32[32,1], index: 3, kind: input, shape index: {}]   ;;  %s19484_s4 = inlined_call_operand.vmem [shape: f32[1037,32], index: 4, kind: input, shape index: {}]   ;;  %s19485_s5 = inlined_call_operand.vmem [shape: f32[132,64], index: 5, kind: input, shape index: {}]   ;;  %s19486_s6 = inlined_call_operand.vmem [shape: f32[132,96], index: 6, kind: input, shape index: {}]   ;;  %s19487_s7 = inlined_call_operand.vmem [shape: f32[132,128], index: 7, kind: input, shape index: {}]   ;;  %s19488_s8 = inlined_call_operand.hbm [shape: f32[16,32], index: 8, kind: output, shape index: {0}]   ;;  %s19489_s9 = inlined_call_operand.hbm [shape: f32[32,32], index: 9, kind: output, shape index: {1}]  }
   0x1   :  { %v96_v0 = vld [vmem:[%s19482_s2] sm:$0xff]  ;;  %15329 = vset.pattern.permute.xlu0 %v16357_v2  ;;  %15330 = vset.pattern.permute.xlu1 %v16357_v2 }
   0x2   :  { %v227_v1 = vld [vmem:[%s19483_s3] sm:$0xff]  ;;  %101 = vperm.xlu0 %15329, %v96_v0  }
   0x3   :  { %233 = vperm.xlu1 %15330, %v227_v1  }
   0x4   :  { %16 = vsyncpa [#allocation5], 0  ;;  %v97_v3 = vld [vmem:[%s19482_s2 + $0x8] sm:$0xff]  ;;  %v229_v5 = vld [vmem:[%s19483_s3 + $0x10] sm:$0xff]  ;;  %vm145_vm0 = vcmask 261120   ;;  %vm491_vm1 = vcmask 64512  }
   0x5   :  { %v228_v4 = vld [vmem:[%s19483_s3 + $0x8] sm:$0xff]  ;;  %v136_v6 = vld [vmem:[%s19484_s4] sm:$0xff]  ;;  %v138_v9 = vld [vmem:[%s19484_s4 + $0x10] sm:$0xff]  ;;  %s16358_s24 = smov 88   ;;  %s16359_s25 = smov 96   ;;  %vm575_vm5 = vcmask 130048  }
   0x6   :  { %106 = vperm.xlu0 %15329, %v97_v3   ;;  %v137_v7 = vld [vmem:[%s19484_s4 + $0x8] sm:$0xff]  ;;  %v139_v10 = vld [vmem:[%s19484_s4 + $0x18] sm:$0xff]  ;;  %v390_v12 = vld [vmem:[%s19486_s6] sm:$0xff]  ;;  %s16360_s26 = smov 120   ;;  %s16362_s27 = smov 64   ;;  %vm1313_vm6 = vcmask 195584  }
   0x7   :  { %238 = vperm.xlu1 %15330, %v228_v4   ;;  %v14477_v8 = vpack.c.bf16 %v137_v7, %v136_v6  ;;  %v14481_v11 = vpack.c.bf16 %v139_v10, %v138_v9  ;;  %v391_v13 = vld [vmem:[%s19486_s6 + $0x8] sm:$0xff]  ;;  %v16463_v15 = vld [vmem:[%s19484_s4 + $0x3e0] ss:$0 sm:$0xff]  ;;  %v16468_v18 = vld [vmem:[%s19484_s4 + $0x3e1] ss:$0 sm:$0xff]  ;;  %s16363_s28 = smov 80  }
   0x8   :  { %v14493_v14 = vpack.c.bf16 %v391_v13, %v390_v12  ;;  %v392_v57 = vld [vmem:[%s19486_s6 + $0x10] sm:$0xff]  ;;  %v393_v58 = vld [vmem:[%s19486_s6 + $0x18] sm:$0xff]  ;;  %v16497_v61 = vld [vmem:[%s19484_s4 + $0x3e2] ss:$0 sm:$0xff]  ;;  %s16364_s29 = smov 56   ;;  %s16365_s30 = smov 112  }
   0x9   :  { %14478 = vmatprep.subr.bf16.mxu0 %v14477_v8  ;;  %14486 = vmatprep.subr.bf16.mxu1 %v14477_v8  ;;  %v14497_v59 = vpack.c.bf16 %v393_v58, %v392_v57  ;;  %v230_v60 = vld [vmem:[%s19483_s3 + $0x18] sm:$0xff]  ;;  %v33_v0 = vld [vmem:[%s19480_s0] sm:$0xff]  ;;  %v34_v2 = vld [vmem:[%s19480_s0 + $0x8] sm:$0xff]  ;;  %s16366_s10 = smov 72   ;;  %s16367_s11 = smov 104  }
   0xa   :  { %243 = vperm.xlu0 %15329, %v229_v5   ;;  %14480 = vmatpush3.bf16.msra.mxu0 %v14477_v8  ;;  %vm16555_vm2 = vmpackc.low %vm491_vm1, %vm491_vm1  ;;  %s16368_s12 = smov 48   ;;  %s16369_s16 = smov 8  }
   0xb   :  { %14488 = vmatpush3.bf16.msra.mxu1 %v14477_v8  ;;  %14482 = vmatprep.subr.bf16.mxu0 %v14481_v11  ;;  %s16370_s17 = smov 40   ;;  %s16371_s18 = smov 16  }
   0xc   :  { %14490 = vmatprep.subr.bf16.mxu1 %v14481_v11  ;;  %248 = vperm.xlu1 %15330, %v230_v60   ;;  %s16372_s13 = smov 24  }
   0xe   :  { %14484 = vmatpush3.bf16.msra.mxu0 %v14481_v11 }
   0xf   :  { %14492 = vmatpush3.bf16.msra.mxu1 %v14481_v11  ;;  %14494 = vmatprep.subr.bf16.mxu0 %v14493_v14 }
  0x81   :  { %v102_v16 = vpop.permute.xlu0 %101 }
  0x82   :  { %v234_v17 = vpop.permute.xlu1 %233  ;;  %v113_v19 = vmul.f32 %v16463_v15, %v102_v16 }
  0x83   :  { %v251_v20 = vmul.f32 %v16463_v15, %v234_v17 }
  0x84   :  { %v120_v21 = vadd.f32 %v16468_v18, %v113_v19 }
  0x85   :  { %v255_v22 = vadd.f32 %v16468_v18, %v251_v20  ;;  %v107_v23 = vpop.permute.xlu0 %106 }
  0x86   :  { %v239_v24 = vpop.permute.xlu1 %238  ;;  %v114_v25 = vmul.f32 %v16463_v15, %v107_v23  ;;  %v12220_v27 = vmul.f32 -1.442695, %v120_v21 }
  0x87   :  { %v252_v26 = vmul.f32 %v16463_v15, %v239_v24  ;;  %v12225_v28 = vmul.f32 -1.442695, %v255_v22 }
  0x88   :  { %v121_v29 = vadd.f32 %v16468_v18, %v114_v25  ;;  %15781 = vpow2.f32 %v12220_v27 }
  0x89   :  { %v256_v30 = vadd.f32 %v16468_v18, %v252_v26  ;;  %v244_v31 = vpop.permute.xlu0 %243  ;;  %15783 = vpow2.f32 %v12225_v28 }
  0x8a   :  { %v12221_v32 = vmul.f32 -1.442695, %v121_v29  ;;  %v253_v34 = vmul.f32 %v16463_v15, %v244_v31 }
  0x8b   :  { %v12226_v33 = vmul.f32 -1.442695, %v256_v30  ;;  %v249_v6 = vpop.permute.xlu1 %248 }
  0x8c   :  { %15785 = vpow2.f32 %v12221_v32  ;;  %v257_v35 = vadd.f32 %v16468_v18, %v253_v34  ;;  %v254_v7 = vmul.f32 %v16463_v15, %v249_v6 }
  0x8d   :  { %15787 = vpow2.f32 %v12226_v33 }
  0x8e   :  { %v12227_v36 = vmul.f32 -1.442695, %v257_v35  ;;  %v258_v8 = vadd.f32 %v16468_v18, %v254_v7 }
  0x90   :  { %15789 = vpow2.f32 %v12227_v36  ;;  %v12228_v9 = vmul.f32 -1.442695, %v258_v8 }
  0x92   :  { %v15782_v37 = vpop.eup %15781 }
  0x93   :  { %v15784_v38 = vpop.eup %15783  ;;  %v128_v39 = vadd.f32 1.0, %v15782_v37 }
  0x94   :  { %v271_v40 = vadd.f32 1.0, %v15784_v38 }
  0x95   :  { %15791 = vrcp.f32 %v128_v39 }
  0x96   :  { %v15786_v41 = vpop.eup %15785  ;;  %15793 = vrcp.f32 %v271_v40 }
  0x97   :  { %v15788_v42 = vpop.eup %15787  ;;  %v129_v43 = vadd.f32 1.0, %v15786_v41 }
  0x98   :  { %v272_v44 = vadd.f32 1.0, %v15788_v42 }
  0x99   :  { %15795 = vrcp.f32 %v129_v43 }
  0x9a   :  { %v15790_v45 = vpop.eup %15789  ;;  %15797 = vrcp.f32 %v272_v44 }
  0x9b   :  { %v273_v46 = vadd.f32 1.0, %v15790_v45 }
  0x9d   :  { %15799 = vrcp.f32 %v273_v46 }
  0x9e   :  { %15801 = vpow2.f32 %v12228_v9 }
  0x9f   :  { %v15792_v47 = vpop.eup %15791 }
  0xa0   :  { %v15794_v48 = vpop.eup %15793  ;;  %v134_v49 = vmul.f32 %v15792_v47, %v120_v21 }
  0xa1   :  { %v283_v50 = vmul.f32 %v15794_v48, %v255_v22 }
  0xa2   :  { %13317 = vmatprep.mubr.msk.f32.mxu0 %vm145_vm0, %v134_v49 }
  0xa3   :  { %v15796_v51 = vpop.eup %15795  ;;  %13328 = vmatprep.mubr.msk.f32.mxu1 %vm145_vm0, %v283_v50 }
  0xa4   :  { %v15798_v52 = vpop.eup %15797  ;;  %v135_v53 = vmul.f32 %v15796_v51, %v121_v29  ;;  %v19494_v51 = vmov -1e+09  }
  0xa5   :  { %v284_v54 = vmul.f32 %v15798_v52, %v256_v30 }
  0xa6   :  { %13318 = vmatmul.mubr.msk.f32.vlgmr.msra.gmra.mrb[0].mxu0 %vm145_vm0, %v135_v53 }
  0xa7   :  { %v15800_v55 = vpop.eup %15799  ;;  %13329 = vmatmul.mubr.msk.f32.vlgmr.msra.gmra.mrb[0].mxu1 %vm145_vm0, %v284_v54  ;;  %14496 = vmatpush3.bf16.msra.mxu0 %v14493_v14  ;;  %v12233_v14 = vld [vmem:[%s19486_s6 + $0x80] ss:$0 sm:$0xff] }
  0xa8   :  { %v285_v56 = vmul.f32 %v15800_v55, %v257_v35  ;;  %14498 = vmatprep.subr.bf16.mxu0 %v14497_v59  ;;  %v15802_v10 = vpop.eup %15801  ;;  %v39_v35 = vlaneseq }
  0xa9   :  { %v274_v11 = vadd.f32 1.0, %v15802_v10 }
  0xaa   :  { %13331 = vmatprep.mubr.msk.f32.mxu1 %vm145_vm0, %v285_v56  ;;  %v16571_v36 = vshrl.u32 %v39_v35, 7  ;;  %v45_v38 = vand.u32 127, %v39_v35 }
  0xab   :  { %14500 = vmatpush3.bf16.msra.mxu0 %v14497_v59  ;;  %15803 = vrcp.f32 %v274_v11 }
  0xac   :  { %v41_v37 = vadd.s32 8, %v16571_v36  ;;  %v46_v40 = vcvt.s32.f32 %v45_v38  ;;  %v42_v41 = vcvt.s32.f32 %v16571_v36 }
  0xae   :  { %v43_v39 = vcvt.s32.f32 %v41_v37  ;;  %v16577_v43 = vadd.f32 0.5, %v46_v40  ;;  %v16579_v44 = vadd.f32 0.5, %v42_v41 }
  0xb0   :  { %v16575_v42 = vadd.f32 0.5, %v43_v39  ;;  %v54_v46 = vmul.f32 0.125, %v16577_v43  ;;  %v16586_v47 = vmul.f32 0.125, %v16579_v44 }
  0xb2   :  { %v16582_v45 = vmul.f32 0.125, %v16575_v42  ;;  %v16589_v49 = vfloor.f32 %v54_v46  ;;  %v51_v50 = vfloor.f32 %v16586_v47 }
  0xb4   :  { %v52_v48 = vfloor.f32 %v16582_v45  ;;  %vm56_vm4 = vcmp.eq.f32.partialorder %v51_v50, %v16589_v49 }
  0xb5   :  { %v15804_v12 = vpop.eup %15803  ;;  %v16602_v53 = vsel %vm56_vm4, 0.0, %v19494_v51 }
  0xb6   :  { %v286_v13 = vmul.f32 %v15804_v12, %v258_v8  ;;  %vm57_vm3 = vcmp.eq.f32.partialorder %v52_v48, %v16589_v49 }
  0xb7   :  { %v16599_v52 = vsel %vm57_vm3, 0.0, %v19494_v51 }
  0xb8   :  { %13332 = vmatmul.mubr.msk.f32.gmra.mrb[2].mxu1 %vm145_vm0, %v286_v13 }
 0x179   :  { %v13319_v62 = vpop.f32.mrb[0].mxu0 }
 0x17a   :  { %v16500_v63 = vadd.f32 %v13319_v62, %v16497_v61  ;;  %v218_v1 = vpop.f32.mrb[1].mxu0  ;;  %v16545_v20 = vpop.f32.mrb[0].mxu1 }
 0x17b   :  { %v16509_v3 = vadd.f32 %v16497_v61, %v218_v1  ;;  %v16547_v21 = vpop.f32.mrb[1].mxu1 }
 0x17c   :  { %v16515_v5 = vadd.f32 %v16500_v63, %v34_v2 }
 0x17d   :  { %v16512_v4 = vadd.f32 %v16509_v3, %v33_v0 }
 0x17f   :  { %13342 = vmatprep.mubr.msk.f32.mxu0 %vm145_vm0, %v16512_v4 }
 0x180   :  { %13343 = vmatmul.mubr.msk.f32.vlgmr.msra.gmra.mrb[2].mxu0 %vm145_vm0, %v16515_v5 }
 0x18b   :  { %v16549_v22 = vpop.f32.mrb[2].mxu1 }
 0x18c   :  { %v16551_v23 = vpop.f32.mrb[3].mxu1 }
 0x253   :  { %v13344_v16 = vpop.f32.mrb[2].mxu0 }
 0x254   :  { %v16527_v17 = vadd.f32 %v13344_v16, %v12233_v14  ;;  %v471_v19 = vpop.f32.mrb[3].mxu0 }
 0x255   :  { %v16529_v15 = vadd.f32 %v12233_v14, %v471_v19 }
 0x257   :  { %13349 = vmatprep.mubr.msk.f32.mxu1 %vm491_vm1, %v16529_v15  ;;  %v16535_v18 = vpack.i.bf16 %v16527_v17, %v16529_v15 }
 0x259   :  { %15337 = vrot.lane.b32.xlu1 %v16535_v18, %s16358_s24  ;;  %15332 = vrot.lane.b32.xlu0 %v16535_v18, %s16359_s25 }
 0x25d   :  { %687 = vrot.lane.b32.xlu1 %v16527_v17, %s16360_s26  ;;  %685 = vrot.lane.b32.xlu0 %v16529_v15, %s16360_s26 }
 0x2cb   :  { %v15338_v24 = vpop.permute.xlu1 %15337  ;;  %v15333_v25 = vpop.permute.xlu0 %15332 }
 0x2cc   :  { %v15340_v26 = vunpack.i.h.bf16 %v15338_v24  ;;  %v15339_v27 = vunpack.i.l.bf16 %v15338_v24  ;;  %v15335_v28 = vunpack.i.h.bf16 %v15333_v25  ;;  %v15334_v29 = vunpack.i.l.bf16 %v15333_v25 }
 0x2ce   :  { %v14501_v31 = vpack.c.bf16 %v15335_v28, %v15334_v29  ;;  %v14511_v32 = vpack.c.bf16 %v15340_v26, %v15339_v27 }
 0x2cf   :  { %v686_v33 = vpop.permute.xlu0 %685  ;;  %v688_v34 = vpop.permute.xlu1 %687 }
 0x2d0   :  { %14503 = vmatprep.subr.msk.bf16.mxu1 %vm16555_vm2, %v14501_v31 }
 0x2d1   :  { %14506 = vmatpush3.bf16.xpose.msk.msra.mxu1 %vm16555_vm2, %v14501_v31 }
 0x2d2   :  { %14513 = vmatprep.subr.msk.bf16.mxu1 %vm16555_vm2, %v14511_v32 }
 0x2d8   :  { %13350 = vmatmul.mubr.msk.f32.vlgmr.msra.gmra.mrb[4].mxu1 %vm491_vm1, %v16527_v17 }
 0x2d9   :  { %14516 = vmatpush3.bf16.xpose.msk.msra.mxu1 %vm16555_vm2, %v14511_v32  ;;  %13363 = vmatprep.mubr.msk.f32.mxu1 %vm491_vm1, %v686_v33 }
 0x2e0   :  { %13364 = vmatmul.mubr.msk.f32.vlgmr.msra.gmra.mrb[6].mxu1 %vm491_vm1, %v688_v34 }
 0x3ab   :  { %v13351_v54 = vpop.f32.mrb[4].mxu1 }
 0x3ac   :  { %v572_v55 = vadd.f32 %v13351_v54, %v16599_v52  ;;  %v566_v56 = vpop.f32.mrb[5].mxu1 }
 0x3ad   :  { %v567_v57 = vadd.f32 %v566_v56, %v16602_v53 }
 0x3ae   :  { %v579_v58 = vsel %vm575_vm5, %v572_v55, -inf }
 0x3af   :  { %580 = vmax.xlane.f32.xlu1 %v579_v58  ;;  %v576_v59 = vsel %vm575_vm5, %v567_v57, -inf }
 0x3b0   :  { %577 = vmax.xlane.f32.xlu0 %v576_v59 }
 0x3b3   :  { %v13365_v60 = vpop.f32.mrb[6].mxu1 }
 0x3b4   :  { %v767_v62 = vpop.f32.mrb[7].mxu1  ;;  %v773_v1 = vadd.f32 %v13365_v60, %v16599_v52 }
 0x3b5   :  { %v768_v0 = vadd.f32 %v767_v62, %v16602_v53 }
 0x3b6   :  { %v779_v6 = vsel %vm575_vm5, %v773_v1, -inf }
 0x3b7   :  { %v776_v2 = vsel %vm575_vm5, %v768_v0, -inf }
 0x3b8   :  { %777 = vmax.xlane.f32.xlu0 %v776_v2 }
 0x3bc   :  { %780 = vmax.xlane.f32.xlu0 %v779_v6 }
 0x3c0   :  { %15342 = vrot.lane.b32.xlu1 %v16535_v18, %s16362_s27 }
 0x43c   :  { %v581_v7 = vpop.xlane.xlu1 %580 }
 0x43d   :  { %v583_v8 = vsub.f32 %v572_v55, %v581_v7  ;;  %v578_v9 = vpop.xlane.xlu0 %577 }
 0x43e   :  { %v582_v10 = vsub.f32 %v567_v57, %v578_v9 }
 0x43f   :  { %v586_v11 = vmul.f32 1.442695, %v583_v8 }
 0x440   :  { %v584_v12 = vmul.f32 1.442695, %v582_v10  ;;  %v15343_v13 = vpop.permute.xlu1 %15342 }
 0x441   :  { %15805 = vpow2.f32 %v586_v11  ;;  %v15345_v14 = vunpack.i.h.bf16 %v15343_v13  ;;  %v15344_v16 = vunpack.i.l.bf16 %v15343_v13 }
 0x442   :  { %15807 = vpow2.f32 %v584_v12 }
 0x443   :  { %v14507_v19 = vpack.c.bf16 %v15345_v14, %v15344_v16 }
 0x445   :  { %14508 = vmatprep.subr.bf16.mxu0 %v14507_v19  ;;  %v778_v24 = vpop.xlane.xlu0 %777 }
 0x446   :  { %14510 = vmatpush3.bf16.msra.mxu0 %v14507_v19  ;;  %v782_v35 = vsub.f32 %v768_v0, %v778_v24 }
 0x448   :  { %v784_v37 = vmul.f32 1.442695, %v782_v35 }
 0x449   :  { %v781_v25 = vpop.xlane.xlu0 %780 }
 0x44a   :  { %v783_v26 = vsub.f32 %v773_v1, %v781_v25 }
 0x44b   :  { %v15806_v27 = vpop.eup %15805 }
 0x44c   :  { %v15808_v28 = vpop.eup %15807  ;;  %v786_v29 = vmul.f32 1.442695, %v783_v26  ;;  %v591_v31 = vsel %vm575_vm5, %v15806_v27, 0.0 }
 0x44d   :  { %592 = vadd.xlane.f32.xlu0 %v591_v31  ;;  %v588_v32 = vsel %vm575_vm5, %v15808_v28, 0.0 }
 0x44e   :  { %15809 = vpow2.f32 %v786_v29  ;;  %589 = vadd.xlane.f32.xlu1 %v588_v32 }
 0x44f   :  { %15811 = vpow2.f32 %v784_v37 }
 0x458   :  { %v15810_v33 = vpop.eup %15809 }
 0x459   :  { %v791_v34 = vsel %vm575_vm5, %v15810_v33, 0.0  ;;  %v15812_v38 = vpop.eup %15811 }
 0x45a   :  { %792 = vadd.xlane.f32.xlu0 %v791_v34  ;;  %v788_v39 = vsel %vm575_vm5, %v15812_v38, 0.0 }
 0x45f   :  { %15352 = vrot.lane.b32.xlu1 %v16535_v18, %s16363_s28 }
 0x470   :  { %15347 = vrot.lane.b32.xlu0 %v16535_v18, %s16364_s29 }
 0x474   :  { %887 = vrot.lane.b32.xlu0 %v16527_v17, %s16365_s30 }
 0x483   :  { %789 = vadd.xlane.f32.xlu1 %v788_v39 }
 0x494   :  { %885 = vrot.lane.b32.xlu1 %v16529_v15, %s16365_s30 }
 0x4da   :  { %v593_v40 = vpop.xlane.xlu0 %592 }
 0x4db   :  { %15813 = vrcp.f32 %v593_v40  ;;  %v590_v41 = vpop.xlane.xlu1 %589 }
 0x4dc   :  { %15815 = vrcp.f32 %v590_v41 }
 0x4df   :  { %v15353_v58 = vpop.permute.xlu1 %15352 }
 0x4e0   :  { %v15355_v60 = vunpack.i.h.bf16 %v15353_v58  ;;  %v15354_v62 = vunpack.i.l.bf16 %v15353_v58 }
 0x4e2   :  { %v14521_v6 = vpack.c.bf16 %v15355_v60, %v15354_v62 }
 0x4e5   :  { %v15814_v46 = vpop.eup %15813 }
 0x4e6   :  { %v15816_v54 = vpop.eup %15815  ;;  %v597_v57 = vmul.f32 %v15814_v46, %v15806_v27 }
 0x4e7   :  { %v793_v55 = vpop.xlane.xlu0 %792  ;;  %v596_v56 = vmul.f32 %v15816_v54, %v15808_v28 }
 0x4e8   :  { %15817 = vrcp.f32 %v793_v55 }
 0x4e9   :  { %13356 = vmatprep.mubr.msk.f32.mxu0 %vm575_vm5, %v596_v56 }
 0x4ea   :  { %13357 = vmatmul.mubr.msk.f32.vlgmr.msra.gmra.mrb[4].mxu0 %vm575_vm5, %v597_v57 }
 0x4eb   :  { %v15348_v59 = vpop.permute.xlu0 %15347 }
 0x4ec   :  { %v15350_v0 = vunpack.i.h.bf16 %v15348_v59  ;;  %v15349_v1 = vunpack.i.l.bf16 %v15348_v59 }
 0x4ee   :  { %v14517_v2 = vpack.c.bf16 %v15350_v0, %v15349_v1 }
 0x4ef   :  { %v888_v13 = vpop.permute.xlu0 %887 }
 0x4f0   :  { %14518 = vmatprep.subr.bf16.mxu0 %v14517_v2 }
 0x4f1   :  { %14520 = vmatpush3.bf16.msra.mxu0 %v14517_v2 }
 0x4f2   :  { %14523 = vmatprep.subr.msk.bf16.mxu0 %vm16555_vm2, %v14521_v6  ;;  %v15818_v8 = vpop.eup %15817 }
 0x4f3   :  { %v797_v11 = vmul.f32 %v15818_v8, %v15810_v33  ;;  %v1445_v8 = vld [vmem:[%s19486_s6 + $0x28] sm:$0xff] }
 0x510   :  { %v790_v7 = vpop.xlane.xlu1 %789 }
 0x511   :  { %15819 = vrcp.f32 %v790_v7  ;;  %v1444_v7 = vld [vmem:[%s19486_s6 + $0x20] sm:$0xff] }
 0x514   :  { %v886_v12 = vpop.permute.xlu1 %885 }
 0x51b   :  { %v15820_v9 = vpop.eup %15819 }
 0x51c   :  { %v796_v10 = vmul.f32 %v15820_v9, %v15812_v38 }
 0x51e   :  { %13370 = vmatprep.mubr.msk.f32.mxu0 %vm575_vm5, %v796_v10  ;;  %v14549_v10 = vpack.c.bf16 %v1445_v8, %v1444_v7 }
 0x51f   :  { %13371 = vmatmul.mubr.msk.f32.vlgmr.msra.gmra.mrb[6].mxu0 %vm575_vm5, %v797_v11  ;;  %v16673_v11 = vadd.f32 %v16497_v61, %v16547_v21  ;;  %v16692_v21 = vadd.f32 %v16545_v20, %v16497_v61  ;;  %v16709_v20 = vadd.f32 %v16549_v22, %v16497_v61 }
 0x520   :  { %14526 = vmatpush3.bf16.xpose.msk.msra.mxu0 %vm16555_vm2, %v14521_v6  ;;  %13377 = vmatprep.mubr.msk.f32.mxu0 %vm491_vm1, %v886_v12  ;;  %v1446_v12 = vld [vmem:[%s19486_s6 + $0x30] sm:$0xff] }
 0x527   :  { %13378 = vmatmul.mubr.msk.f32.vlgmr.msra.gmra.mrb[8].mxu0 %vm491_vm1, %v888_v13  ;;  %v1447_v13 = vld [vmem:[%s19486_s6 + $0x38] sm:$0xff] }
 0x5bd   :  { %v16636_v14 = vpop.f32.mrb[4].mxu0 }
 0x5be   :  { %v16638_v16 = vpop.f32.mrb[5].mxu0 }
 0x5f2   :  { %v16640_v19 = vpop.f32.mrb[6].mxu0 }
 0x5f3   :  { %v16642_v24 = vpop.f32.mrb[7].mxu0 }
 0x5fa   :  { %v13379_v25 = vpop.f32.mrb[8].mxu0 }
 0x5fb   :  { %v973_v26 = vadd.f32 %v13379_v25, %v16599_v52  ;;  %v967_v27 = vpop.f32.mrb[9].mxu0  ;;  %v35_v25 = vld [vmem:[%s19481_s1] sm:$0xff] }
 0x5fc   :  { %v968_v28 = vadd.f32 %v967_v27, %v16602_v53  ;;  %v16685_v27 = vadd.f32 %v16673_v11, %v35_v25 }
 0x5fd   :  { %v979_v29 = vsel %vm575_vm5, %v973_v26, -inf }
 0x5fe   :  { %980 = vmax.xlane.f32.xlu0 %v979_v29  ;;  %v976_v31 = vsel %vm575_vm5, %v968_v28, -inf  ;;  %v36_v29 = vld [vmem:[%s19481_s1 + $0x8] sm:$0xff] }
 0x5ff   :  { %977 = vmax.xlane.f32.xlu1 %v976_v31  ;;  %v16699_v31 = vadd.f32 %v16497_v61, %v16551_v23 }
 0x68b   :  { %v981_v32 = vpop.xlane.xlu0 %980 }
 0x68c   :  { %v983_v33 = vsub.f32 %v973_v26, %v981_v32  ;;  %v978_v34 = vpop.xlane.xlu1 %977  ;;  %v14553_v26 = vpack.c.bf16 %v1447_v13, %v1446_v12  ;;  %v37_v32 = vld [vmem:[%s19481_s1 + $0x10] sm:$0xff] }
 0x68d   :  { %v982_v35 = vsub.f32 %v968_v28, %v978_v34  ;;  %v38_v34 = vld [vmem:[%s19481_s1 + $0x18] sm:$0xff] }
 0x68e   :  { %v986_v37 = vmul.f32 1.442695, %v983_v33  ;;  %v16705_v33 = vadd.f32 %v16692_v21, %v36_v29  ;;  %v16722_v23 = vadd.f32 %v16709_v20, %v38_v34 }
 0x68f   :  { %v984_v38 = vmul.f32 1.442695, %v982_v35  ;;  %v16715_v35 = vadd.f32 %v16699_v31, %v37_v32 }
 0x690   :  { %15821 = vpow2.f32 %v986_v37 }
 0x691   :  { %15823 = vpow2.f32 %v984_v38 }
 0x69a   :  { %v15822_v39 = vpop.eup %15821 }
 0x69b   :  { %v15824_v40 = vpop.eup %15823  ;;  %v991_v41 = vsel %vm575_vm5, %v15822_v39, 0.0 }
 0x69c   :  { %992 = vadd.xlane.f32.xlu1 %v991_v41  ;;  %v988_v46 = vsel %vm575_vm5, %v15824_v40, 0.0 }
 0x69d   :  { %989 = vadd.xlane.f32.xlu0 %v988_v46 }
 0x6ad   :  { %15362 = vrot.lane.b32.xlu1 %v16535_v18, %s16366_s10 }
 0x6b1   :  { %1085 = vrot.lane.b32.xlu1 %v16529_v15, %s16367_s11 }
 0x6b3   :  { %15357 = vrot.lane.b32.xlu0 %v16535_v18, %s16368_s12 }
 0x6b7   :  { %1087 = vrot.lane.b32.xlu0 %v16527_v17, %s16367_s11 }
 0x729   :  { %v993_v54 = vpop.xlane.xlu1 %992 }
 0x72a   :  { %15825 = vrcp.f32 %v993_v54  ;;  %v990_v55 = vpop.xlane.xlu0 %989 }
 0x72b   :  { %15827 = vrcp.f32 %v990_v55 }
 0x72d   :  { %v15363_v56 = vpop.permute.xlu1 %15362 }
 0x72e   :  { %v15358_v57 = vpop.permute.xlu0 %15357  ;;  %v15365_v58 = vunpack.i.h.bf16 %v15363_v56  ;;  %v15364_v59 = vunpack.i.l.bf16 %v15363_v56  ;;  %v12265_v56 = vld [vmem:[%s19486_s6 + $0x81] ss:$0 sm:$0xff] }
 0x72f   :  { %v15360_v60 = vunpack.i.h.bf16 %v15358_v57  ;;  %v15359_v62 = vunpack.i.l.bf16 %v15358_v57 }
 0x730   :  { %v14531_v1 = vpack.c.bf16 %v15365_v58, %v15364_v59 }
 0x731   :  { %v14527_v0 = vpack.c.bf16 %v15360_v60, %v15359_v62  ;;  %v1086_v9 = vpop.permute.xlu1 %1085 }
 0x732   :  { %v1088_v28 = vpop.permute.xlu0 %1087 }
 0x733   :  { %14528 = vmatprep.subr.bf16.mxu1 %v14527_v0 }
 0x734   :  { %v15826_v15 = vpop.eup %15825  ;;  %14530 = vmatpush3.bf16.msra.mxu1 %v14527_v0 }
 0x735   :  { %v15828_v2 = vpop.eup %15827  ;;  %14533 = vmatprep.subr.msk.bf16.mxu1 %vm16555_vm2, %v14531_v1  ;;  %v997_v6 = vmul.f32 %v15826_v15, %v15822_v39 }
 0x736   :  { %v996_v17 = vmul.f32 %v15828_v2, %v15824_v40 }
 0x738   :  { %13384 = vmatprep.mubr.msk.f32.mxu1 %vm575_vm5, %v996_v17 }
 0x739   :  { %13385 = vmatmul.mubr.msk.f32.vlgmr.msra.gmra.mrb[8].mxu1 %vm575_vm5, %v997_v6 }
 0x73a   :  { %13391 = vmatprep.mubr.msk.f32.mxu1 %vm491_vm1, %v1086_v9 }
 0x73d   :  { %14536 = vmatpush3.bf16.xpose.msk.msra.mxu1 %vm16555_vm2, %v14531_v1 }
 0x73e   :  { %14550 = vmatprep.subr.bf16.mxu1 %v14549_v10 }
 0x744   :  { %13392 = vmatmul.mubr.msk.f32.vlgmr.msra.gmra.mrb[10].mxu1 %vm491_vm1, %v1088_v28  ;;  %v481_v28 = vld [vmem:[%s19484_s4 + $0x68] sm:$0xff] }
 0x745   :  { %14552 = vmatpush3.bf16.msra.mxu1 %v14549_v10  ;;  %13420 = vmatprep.mubr.msk.f32.mxu1 %vm145_vm0, %v16685_v27 }
 0x746   :  { %14554 = vmatprep.subr.bf16.mxu1 %v14553_v26 }
 0x749   :  { %14556 = vmatpush3.bf16.msra.mxu1 %v14553_v26 }
 0x74c   :  { %13421 = vmatmul.mubr.msk.f32.vlgmr.msra.gmra.mrb[12].mxu1 %vm145_vm0, %v16705_v33 }
 0x74d   :  { %13423 = vmatprep.mubr.msk.f32.mxu1 %vm145_vm0, %v16715_v35 }
 0x750   :  { %13424 = vmatmul.mubr.msk.f32.gmra.mrb[14].mxu1 %vm145_vm0, %v16722_v23 }
 0x80c   :  { %v13386_v61 = vpop.f32.mrb[8].mxu1 }
 0x80d   :  { %v1076_v22 = vpop.f32.mrb[9].mxu1 }
 0x817   :  { %v13393_v37 = vpop.f32.mrb[10].mxu1 }
 0x818   :  { %v1173_v38 = vadd.f32 %v13393_v37, %v16599_v52  ;;  %v1167_v39 = vpop.f32.mrb[11].mxu1 }
 0x819   :  { %v1168_v40 = vadd.f32 %v1167_v39, %v16602_v53  ;;  %v483_v39 = vld [vmem:[%s19484_s4 + $0x78] sm:$0xff] }
 0x81a   :  { %v1179_v41 = vsel %vm575_vm5, %v1173_v38, -inf }
 0x81b   :  { %1180 = vmax.xlane.f32.xlu0 %v1179_v41  ;;  %v1176_v46 = vsel %vm575_vm5, %v1168_v40, -inf }
 0x81c   :  { %1177 = vmax.xlane.f32.xlu1 %v1176_v46 }
 0x81f   :  { %v13422_v54 = vpop.f32.mrb[12].mxu1 }
 0x820   :  { %v1531_v55 = vpop.f32.mrb[13].mxu1  ;;  %v16741_v10 = vadd.f32 %v13422_v54, %v12265_v56 }
 0x821   :  { %v16743_v12 = vadd.f32 %v12265_v56, %v1531_v55 }
 0x823   :  { %v13425_v57 = vpop.f32.mrb[14].mxu1  ;;  %v16751_v13 = vpack.i.bf16 %v16741_v10, %v16743_v12 }
 0x824   :  { %v16733_v58 = vadd.f32 %v13425_v57, %v12265_v56  ;;  %v1541_v59 = vpop.f32.mrb[15].mxu1 }
 0x825   :  { %v16735_v60 = vadd.f32 %v12265_v56, %v1541_v59 }
 0x8a8   :  { %v1181_v62 = vpop.xlane.xlu0 %1180 }
 0x8a9   :  { %v1183_v0 = vsub.f32 %v1173_v38, %v1181_v62  ;;  %v1178_v1 = vpop.xlane.xlu1 %1177  ;;  %v482_v38 = vld [vmem:[%s19484_s4 + $0x70] sm:$0xff] }
 0x8aa   :  { %v1182_v15 = vsub.f32 %v1168_v40, %v1178_v1  ;;  %v14545_v55 = vpack.c.bf16 %v483_v39, %v482_v38  ;;  %v16777_v1 = vpack.i.bf16 %v16733_v58, %v16735_v60  ;;  %v74_v38 = vmul.f32 0.0625, %v16577_v43 }
 0x8ab   :  { %v1186_v2 = vmul.f32 1.442695, %v1183_v0  ;;  %v16816_v39 = vmul.f32 0.0625, %v16579_v44 }
 0x8ac   :  { %v1184_v17 = vmul.f32 1.442695, %v1182_v15 }
 0x8ad   :  { %15829 = vpow2.f32 %v1186_v2 }
 0x8ae   :  { %15831 = vpow2.f32 %v1184_v17 }
 0x8b7   :  { %v15830_v6 = vpop.eup %15829 }
 0x8b8   :  { %v15832_v7 = vpop.eup %15831  ;;  %v1191_v8 = vsel %vm575_vm5, %v15830_v6, 0.0 }
 0x8b9   :  { %1192 = vadd.xlane.f32.xlu1 %v1191_v8  ;;  %v1188_v9 = vsel %vm575_vm5, %v15832_v7, 0.0 }
 0x8ba   :  { %1189 = vadd.xlane.f32.xlu0 %v1188_v9 }
 0x8ca   :  { %1287 = vrot.lane.b32.xlu1 %v16642_v24, %s16369_s16 }
 0x8ce   :  { %1289 = vrot.lane.b32.xlu1 %v16640_v19, %s16369_s16 }
 0x8d0   :  { %15367 = vrot.lane.b32.xlu0 %v16535_v18, %s16370_s17  ;;  %v480_v18 = vld [vmem:[%s19484_s4 + $0x60] sm:$0xff] }
 0x8d1   :  { %v14541_v37 = vpack.c.bf16 %v481_v28, %v480_v18  ;;  %v60_v28 = vadd.s32 16, %v16571_v36 }
 0x8d2   :  { %15372 = vrot.lane.b32.xlu1 %v16751_v13, %s16359_s25 }
 0x8d4   :  { %1295 = vrot.lane.b32.xlu0 %v1076_v22, %s16371_s18 }
 0x8d8   :  { %1297 = vrot.lane.b32.xlu0 %v13386_v61, %s16371_s18 }
 0x946   :  { %v1193_v24 = vpop.xlane.xlu1 %1192 }
 0x947   :  { %15833 = vrcp.f32 %v1193_v24  ;;  %v1190_v25 = vpop.xlane.xlu0 %1189 }
 0x948   :  { %15835 = vrcp.f32 %v1190_v25 }
 0x94a   :  { %v1288_v19 = vpop.permute.xlu1 %1287 }
 0x94b   :  { %v15368_v26 = vpop.permute.xlu0 %15367  ;;  %v1309_v17 = vsel %vm491_vm1, %v16638_v16, %v1288_v19 }
 0x94c   :  { %v15370_v29 = vunpack.i.h.bf16 %v15368_v26  ;;  %v15369_v32 = vunpack.i.l.bf16 %v15368_v26 }
 0x94e   :  { %v1290_v34 = vpop.permute.xlu1 %1289  ;;  %v14537_v22 = vpack.c.bf16 %v15370_v29, %v15369_v32  ;;  %v61_v29 = vadd.s32 24, %v16571_v36  ;;  %v19492_v36 = vfloor.f32 %v16816_v39 }
 0x94f   :  { %v1296_v15 = vpop.permute.xlu0 %1295 }
 0x950   :  { %14538 = vmatprep.subr.bf16.mxu0 %v14537_v22  ;;  %v1311_v8 = vsel %vm575_vm5, %v1309_v17, %v1296_v15 }
 0x951   :  { %v15834_v61 = vpop.eup %15833  ;;  %14540 = vmatpush3.bf16.msra.mxu0 %v14537_v22 }
 0x952   :  { %v15836_v40 = vpop.eup %15835  ;;  %14542 = vmatprep.subr.bf16.mxu0 %v14541_v37  ;;  %v15373_v41 = vpop.permute.xlu1 %15372  ;;  %v1197_v54 = vmul.f32 %v15834_v61, %v15830_v6  ;;  %v16812_v61 = vmul.f32 0.0625, %v16575_v42 }
 0x953   :  { %v1196_v46 = vmul.f32 %v15836_v40, %v15832_v7  ;;  %v15375_v56 = vunpack.i.h.bf16 %v15373_v41  ;;  %v15374_v57 = vunpack.i.l.bf16 %v15373_v41  ;;  %v1298_v2 = vpop.permute.xlu0 %1297  ;;  %v1310_v7 = vsel %vm491_vm1, %v16636_v14, %v1290_v34 }
 0x954   :  { %v1312_v24 = vsel %vm575_vm5, %v1310_v7, %v1298_v2  ;;  %v62_v34 = vcvt.s32.f32 %v60_v28 }
 0x955   :  { %13398 = vmatprep.mubr.msk.f32.mxu0 %vm575_vm5, %v1196_v46  ;;  %v14557_v59 = vpack.c.bf16 %v15375_v56, %v15374_v57  ;;  %v19493_v46 = vfloor.f32 %v16812_v61 }
 0x956   :  { %13399 = vmatmul.mubr.msk.f32.vlgmr.msra.gmra.mrb[10].mxu0 %vm575_vm5, %v1197_v54  ;;  %v64_v40 = vadd.f32 0.5, %v62_v34  ;;  %v16819_v54 = vfloor.f32 %v74_v38 }
 0x957   :  { %14544 = vmatpush3.bf16.msra.mxu0 %v14541_v37  ;;  %v63_v37 = vcvt.s32.f32 %v61_v29 }
 0x958   :  { %14546 = vmatprep.subr.bf16.mxu0 %v14545_v55  ;;  %vm77_vm7 = vcmp.eq.f32.partialorder %v19493_v46, %v16819_v54  ;;  %vm76_vm8 = vcmp.eq.f32.partialorder %v19492_v36, %v16819_v54  ;;  %vm85_vm11 = vcmp.eq.f32.partialorder %v52_v48, %v16819_v54  ;;  %vm84_vm12 = vcmp.eq.f32.partialorder %v51_v50, %v16819_v54 }
 0x959   :  { %v65_v41 = vadd.f32 0.5, %v63_v37  ;;  %v16834_v43 = vsel %vm77_vm7, 0.0, %v19494_v51  ;;  %v16838_v57 = vsel %vm76_vm8, 0.0, %v19494_v51 }
 0x95b   :  { %14548 = vmatpush3.bf16.msra.mxu0 %v14545_v55  ;;  %v16822_v55 = vmul.f32 0.0625, %v64_v40  ;;  %v16824_v56 = vmul.f32 0.0625, %v65_v41 }
 0x95c   :  { %14559 = vmatprep.subr.msk.bf16.mxu0 %vm16555_vm2, %v14557_v59 }
 0x95d   :  { %v19490_v42 = vfloor.f32 %v16822_v55  ;;  %v19491_v44 = vfloor.f32 %v16824_v56 }
 0x95f   :  { %vm78_vm9 = vcmp.eq.f32.partialorder %v19490_v42, %v16819_v54  ;;  %vm79_vm10 = vcmp.eq.f32.partialorder %v19491_v44, %v16819_v54 }
 0x960   :  { %v16850_v17 = vsel %vm78_vm9, 0.0, %v19494_v51 }
 0xa29   :  { %v13400_v62 = vpop.f32.mrb[10].mxu0 }
 0xa2a   :  { %1305 = vrot.lane.b32.xlu0 %v13400_v62, %s16372_s13  ;;  %v1276_v0 = vpop.f32.mrb[11].mxu0 }
 0xa2b   :  { %1303 = vrot.lane.b32.xlu1 %v1276_v0, %s16372_s13 }
 0xa2f   :  { %15377 = vrot.lane.b32.xlu1 %v16777_v1, %s16359_s25 }
 0xa9c   :  { %v1306_v6 = vpop.permute.xlu0 %1305 }
 0xa9d   :  { %v1304_v9 = vpop.permute.xlu1 %1303  ;;  %v1315_v26 = vsel %vm1313_vm6, %v1312_v24, %v1306_v6 }
 0xa9e   :  { %v1314_v25 = vsel %vm1313_vm6, %v1311_v8, %v1304_v9  ;;  %v16854_v8 = vsel %vm79_vm10, 0.0, %v19494_v51 }
 0xa9f   :  { %13409 = vmatprep.mubr.msk.f32.mxu0 %vm145_vm0, %v1314_v25 }
 0xaa0   :  { %13410 = vmatmul.mubr.msk.f32.vlgmr.msra.gmra.mrb[12].mxu0 %vm145_vm0, %v1315_v26 }
 0xaa1   :  { %14562 = vmatpush3.bf16.xpose.msk.msra.mxu0 %vm16555_vm2, %v14557_v59  ;;  %13434 = vmatprep.mubr.msk.f32.mxu0 %vm491_vm1, %v16743_v12  ;;  %v15378_v14 = vpop.permute.xlu1 %15377 }
 0xaa2   :  { %v15380_v16 = vunpack.i.h.bf16 %v15378_v14  ;;  %v15379_v19 = vunpack.i.l.bf16 %v15378_v14 }
 0xaa4   :  { %v14563_v18 = vpack.c.bf16 %v15380_v16, %v15379_v19 }
 0xaa6   :  { %14565 = vmatprep.subr.msk.bf16.mxu0 %vm16555_vm2, %v14563_v18 }
 0xaa9   :  { %14568 = vmatpush3.bf16.xpose.msk.msra.mxu0 %vm16555_vm2, %v14563_v18 }
 0xab0   :  { %13435 = vmatmul.mubr.msk.f32.vlgmr.msra.gmra.mrb[14].mxu0 %vm491_vm1, %v16741_v10 }
 0xab1   :  { %13437 = vmatprep.mubr.msk.f32.mxu0 %vm491_vm1, %v16735_v60 }
 0xab4   :  { %13438 = vmatmul.mubr.msk.f32.gmra.mrb[16].mxu0 %vm491_vm1, %v16733_v58 }
 0xb73   :  { %v16807_v32 = vpop.f32.mrb[12].mxu0 }
 0xb74   :  { %v16809_v22 = vpop.f32.mrb[13].mxu0 }
 0xb83   :  { %v13436_v59 = vpop.f32.mrb[14].mxu0 }
 0xb84   :  { %v1655_v62 = vadd.f32 %v13436_v59, %v16834_v43  ;;  %v1649_v0 = vpop.f32.mrb[15].mxu0 }
 0xb85   :  { %v1650_v15 = vadd.f32 %v1649_v0, %v16838_v57 }
 0xb86   :  { %v1671_v2 = vsel %vm145_vm0, %v1655_v62, -inf }
 0xb87   :  { %1672 = vmax.xlane.f32.xlu1 %v1671_v2  ;;  %v13439_v6 = vpop.f32.mrb[16].mxu0  ;;  %v1668_v7 = vsel %vm145_vm0, %v1650_v15, -inf }
 0xb88   :  { %v1659_v9 = vpop.f32.mrb[17].mxu0  ;;  %1669 = vmax.xlane.f32.xlu0 %v1668_v7  ;;  %v1665_v25 = vadd.f32 %v13439_v6, %v16854_v8 }
 0xb89   :  { %v1660_v24 = vadd.f32 %v1659_v9, %v16850_v17 }
 0xb8a   :  { %v1677_v14 = vsel %vm145_vm0, %v1665_v25, -inf }
 0xb8b   :  { %v1674_v26 = vsel %vm145_vm0, %v1660_v24, -inf }
 0xb8c   :  { %1675 = vmax.xlane.f32.xlu0 %v1674_v26 }
 0xb90   :  { %1678 = vmax.xlane.f32.xlu0 %v1677_v14 }
 0xb98   :  { %15382 = vrot.lane.b32.xlu1 %v16751_v13, %s16362_s27 }
 0xb9c   :  { %15392 = vrot.lane.b32.xlu1 %v16751_v13, %s16358_s24 }
 0xc14   :  { %v1673_v16 = vpop.xlane.xlu1 %1672 }
 0xc15   :  { %v1681_v19 = vsub.f32 %v1655_v62, %v1673_v16  ;;  %v1670_v18 = vpop.xlane.xlu0 %1669 }
 0xc16   :  { %v1680_v28 = vsub.f32 %v1650_v15, %v1670_v18 }
 0xc17   :  { %v1686_v29 = vmul.f32 1.442695, %v1681_v19 }
 0xc18   :  { %v1684_v34 = vmul.f32 1.442695, %v1680_v28  ;;  %v15383_v37 = vpop.permute.xlu1 %15382 }
 0xc19   :  { %15837 = vpow2.f32 %v1686_v29  ;;  %v15385_v38 = vunpack.i.h.bf16 %v15383_v37  ;;  %v15384_v40 = vunpack.i.l.bf16 %v15383_v37  ;;  %v1676_v62 = vpop.xlane.xlu0 %1675 }
 0xc1a   :  { %15839 = vpow2.f32 %v1684_v34  ;;  %v1682_v9 = vsub.f32 %v1660_v24, %v1676_v62 }
 0xc1b   :  { %v14569_v41 = vpack.c.bf16 %v15385_v38, %v15384_v40 }
 0xc1c   :  { %v1688_v14 = vmul.f32 1.442695, %v1682_v9  ;;  %v15393_v24 = vpop.permute.xlu1 %15392 }
 0xc1d   :  { %14570 = vmatprep.subr.bf16.mxu1 %v14569_v41  ;;  %v1679_v15 = vpop.xlane.xlu0 %1678  ;;  %v15395_v37 = vunpack.i.h.bf16 %v15393_v24  ;;  %v15394_v38 = vunpack.i.l.bf16 %v15393_v24 }
 0xc1e   :  { %14572 = vmatpush3.bf16.msra.mxu1 %v14569_v41  ;;  %v1683_v7 = vsub.f32 %v1665_v25, %v1679_v15 }
 0xc20   :  { %v1690_v26 = vmul.f32 1.442695, %v1683_v7 }
 0xc22   :  { %15841 = vpow2.f32 %v1690_v26 }
 0xc23   :  { %v15838_v59 = vpop.eup %15837  ;;  %15843 = vpow2.f32 %v1688_v14 }
 0xc24   :  { %v15840_v0 = vpop.eup %15839  ;;  %v1695_v2 = vsel %vm145_vm0, %v15838_v59, 0.0 }
 0xc25   :  { %1696 = vadd.xlane.f32.xlu0 %v1695_v2  ;;  %v1692_v6 = vsel %vm145_vm0, %v15840_v0, 0.0 }
 0xc26   :  { %1693 = vadd.xlane.f32.xlu1 %v1692_v6  ;;  %v14577_v6 = vpack.c.bf16 %v15395_v37, %v15394_v38 }
 0xc2c   :  { %v15842_v16 = vpop.eup %15841 }
 0xc2d   :  { %v15844_v19 = vpop.eup %15843  ;;  %v1701_v18 = vsel %vm145_vm0, %v15842_v16, 0.0 }
 0xc2e   :  { %v1698_v28 = vsel %vm145_vm0, %v15844_v19, 0.0 }
 0xc37   :  { %15397 = vrot.lane.b32.xlu1 %v16777_v1, %s16358_s24 }
 0xc3b   :  { %15387 = vrot.lane.b32.xlu0 %v16777_v1, %s16362_s27 }
 0xc5a   :  { %1702 = vadd.xlane.f32.xlu0 %v1701_v18 }
 0xc5b   :  { %1699 = vadd.xlane.f32.xlu1 %v1698_v28 }
 0xc6c   :  { %1823 = vrot.lane.b32.xlu1 %v16741_v10, %s16360_s26 }
 0xc70   :  { %1827 = vrot.lane.b32.xlu1 %v16733_v58, %s16360_s26  ;;  %1821 = vrot.lane.b32.xlu0 %v16743_v12, %s16360_s26 }
 0xc74   :  { %1825 = vrot.lane.b32.xlu0 %v16735_v60, %s16360_s26 }
 0xcb2   :  { %v1697_v25 = vpop.xlane.xlu0 %1696 }
 0xcb3   :  { %15845 = vrcp.f32 %v1697_v25  ;;  %v1694_v29 = vpop.xlane.xlu1 %1693 }
 0xcb4   :  { %15847 = vrcp.f32 %v1694_v29 }
 0xcb6   :  { %v15388_v34 = vpop.permute.xlu0 %15387 }
 0xcb7   :  { %v15390_v40 = vunpack.i.h.bf16 %v15388_v34  ;;  %v15389_v41 = vunpack.i.l.bf16 %v15388_v34  ;;  %v15398_v15 = vpop.permute.xlu1 %15397 }
 0xcb8   :  { %v15400_v14 = vunpack.i.h.bf16 %v15398_v15  ;;  %v15399_v18 = vunpack.i.l.bf16 %v15398_v15 }
 0xcb9   :  { %v14573_v2 = vpack.c.bf16 %v15390_v40, %v15389_v41 }
 0xcba   :  { %v14583_v28 = vpack.c.bf16 %v15400_v14, %v15399_v18 }
 0xcbb   :  { %14574 = vmatprep.subr.bf16.mxu1 %v14573_v2 }
 0xcbc   :  { %14576 = vmatpush3.bf16.msra.mxu1 %v14573_v2 }
 0xcbd   :  { %v15846_v62 = vpop.eup %15845  ;;  %14579 = vmatprep.subr.msk.bf16.mxu1 %vm16555_vm2, %v14577_v6 }
 0xcbe   :  { %v15848_v7 = vpop.eup %15847  ;;  %v1709_v26 = vmul.f32 %v15846_v62, %v15838_v59 }
 0xcbf   :  { %v1708_v9 = vmul.f32 %v15848_v7, %v15840_v0 }
 0xcc1   :  { %13448 = vmatprep.mubr.msk.f32.mxu1 %vm145_vm0, %v1708_v9 }
 0xcc2   :  { %13449 = vmatmul.mubr.msk.f32.vlgmr.msra.gmra.mrb[16].mxu1 %vm145_vm0, %v1709_v26 }
 0xcc5   :  { %14582 = vmatpush3.bf16.xpose.msk.msra.mxu1 %vm16555_vm2, %v14577_v6 }
 0xcc6   :  { %14585 = vmatprep.subr.msk.bf16.mxu1 %vm16555_vm2, %v14583_v28 }
 0xccd   :  { %14588 = vmatpush3.bf16.xpose.msk.msra.mxu1 %vm16555_vm2, %v14583_v28 }
 0xce7   :  { %v1703_v24 = vpop.xlane.xlu0 %1702 }
 0xce8   :  { %15849 = vrcp.f32 %v1703_v24  ;;  %v1700_v0 = vpop.xlane.xlu1 %1699 }
 0xce9   :  { %15851 = vrcp.f32 %v1700_v0 }
 0xceb   :  { %v1822_v34 = vpop.permute.xlu0 %1821 }
 0xcec   :  { %v1824_v38 = vpop.permute.xlu1 %1823 }
 0xcef   :  { %v1826_v40 = vpop.permute.xlu0 %1825 }
 0xcf0   :  { %v1828_v41 = vpop.permute.xlu1 %1827 }
 0xcf2   :  { %v15850_v59 = vpop.eup %15849 }
 0xcf3   :  { %v15852_v25 = vpop.eup %15851  ;;  %v1711_v37 = vmul.f32 %v15850_v59, %v15842_v16 }
 0xcf4   :  { %v1710_v29 = vmul.f32 %v15852_v25, %v15844_v19 }
 0xcf6   :  { %13451 = vmatprep.mubr.msk.f32.mxu1 %vm145_vm0, %v1710_v29 }
 0xcf7   :  { %13452 = vmatmul.mubr.msk.f32.gmra.mrb[18].mxu1 %vm145_vm0, %v1711_v37 }
 0xcf8   :  { %13462 = vmatprep.mubr.msk.f32.mxu1 %vm491_vm1, %v1822_v34 }
 0xcfb   :  { %13463 = vmatmul.mubr.msk.f32.vlgmr.msra.gmra.mrb[20].mxu1 %vm491_vm1, %v1824_v38 }
 0xcfc   :  { %13465 = vmatprep.mubr.msk.f32.mxu1 %vm491_vm1, %v1826_v40 }
 0xcff   :  { %13466 = vmatmul.mubr.msk.f32.gmra.mrb[22].mxu1 %vm491_vm1, %v1828_v41 }
 0xd95   :  { %v16896_v2 = vpop.f32.mrb[16].mxu1 }
 0xd96   :  { %v16898_v19 = vpop.f32.mrb[17].mxu1 }
 0xdca   :  { %v16900_v16 = vpop.f32.mrb[18].mxu1 }
 0xdcb   :  { %v16902_v6 = vpop.f32.mrb[19].mxu1 }
 0xdce   :  { %v13464_v62 = vpop.f32.mrb[20].mxu1 }
 0xdcf   :  { %v1925_v15 = vadd.f32 %v13464_v62, %v16834_v43  ;;  %v1919_v7 = vpop.f32.mrb[21].mxu1 }
 0xdd0   :  { %v1920_v9 = vadd.f32 %v1919_v7, %v16838_v57 }
 0xdd1   :  { %v1941_v26 = vsel %vm145_vm0, %v1925_v15, -inf }
 0xdd2   :  { %1942 = vmax.xlane.f32.xlu1 %v1941_v26  ;;  %v13467_v14 = vpop.f32.mrb[22].mxu1  ;;  %v1938_v18 = vsel %vm145_vm0, %v1920_v9, -inf }
 0xdd3   :  { %v1929_v28 = vpop.f32.mrb[23].mxu1  ;;  %1939 = vmax.xlane.f32.xlu0 %v1938_v18  ;;  %v1935_v0 = vadd.f32 %v13467_v14, %v16854_v8 }
 0xdd4   :  { %v1930_v24 = vadd.f32 %v1929_v28, %v16850_v17 }
 0xdd5   :  { %v1947_v25 = vsel %vm145_vm0, %v1935_v0, -inf }
 0xdd6   :  { %v1944_v59 = vsel %vm145_vm0, %v1930_v24, -inf }
 0xdd7   :  { %1945 = vmax.xlane.f32.xlu0 %v1944_v59 }
 0xddb   :  { %1948 = vmax.xlane.f32.xlu0 %v1947_v25 }
 0xde3   :  { %15402 = vrot.lane.b32.xlu1 %v16751_v13, %s16364_s29 }
 0xde7   :  { %15412 = vrot.lane.b32.xlu1 %v16751_v13, %s16363_s28 }
 0xe5f   :  { %v1943_v29 = vpop.xlane.xlu1 %1942 }
 0xe60   :  { %v1951_v34 = vsub.f32 %v1925_v15, %v1943_v29  ;;  %v1940_v37 = vpop.xlane.xlu0 %1939 }
 0xe61   :  { %v1950_v38 = vsub.f32 %v1920_v9, %v1940_v37 }
 0xe62   :  { %v1956_v40 = vmul.f32 1.442695, %v1951_v34 }
 0xe63   :  { %v1954_v41 = vmul.f32 1.442695, %v1950_v38  ;;  %v15403_v62 = vpop.permute.xlu1 %15402 }
 0xe64   :  { %15853 = vpow2.f32 %v1956_v40  ;;  %v15405_v7 = vunpack.i.h.bf16 %v15403_v62  ;;  %v15404_v26 = vunpack.i.l.bf16 %v15403_v62  ;;  %v1946_v15 = vpop.xlane.xlu0 %1945 }
 0xe65   :  { %15855 = vpow2.f32 %v1954_v41  ;;  %v1952_v34 = vsub.f32 %v1930_v24, %v1946_v15 }
 0xe66   :  { %v14589_v14 = vpack.c.bf16 %v15405_v7, %v15404_v26 }
 0xe67   :  { %v1958_v38 = vmul.f32 1.442695, %v1952_v34  ;;  %v15413_v24 = vpop.permute.xlu1 %15412 }
 0xe68   :  { %14590 = vmatprep.subr.bf16.mxu0 %v14589_v14  ;;  %v1949_v9 = vpop.xlane.xlu0 %1948 }
 0xe69   :  { %14592 = vmatpush3.bf16.msra.mxu0 %v14589_v14  ;;  %v1953_v29 = vsub.f32 %v1935_v0, %v1949_v9 }
 0xe6b   :  { %v1960_v37 = vmul.f32 1.442695, %v1953_v29 }
 0xe6d   :  { %15857 = vpow2.f32 %v1960_v37 }
 0xe6e   :  { %v15854_v18 = vpop.eup %15853  ;;  %15859 = vpow2.f32 %v1958_v38 }
 0xe6f   :  { %v15856_v28 = vpop.eup %15855  ;;  %v1965_v59 = vsel %vm145_vm0, %v15854_v18, 0.0 }
 0xe70   :  { %1966 = vadd.xlane.f32.xlu0 %v1965_v59  ;;  %v1962_v25 = vsel %vm145_vm0, %v15856_v28, 0.0  ;;  %v15415_v59 = vunpack.i.h.bf16 %v15413_v24 }
 0xe71   :  { %1963 = vadd.xlane.f32.xlu1 %v1962_v25  ;;  %v15414_v25 = vunpack.i.l.bf16 %v15413_v24 }
 0xe73   :  { %v14597_v34 = vpack.c.bf16 %v15415_v59, %v15414_v25 }
 0xe77   :  { %v15858_v40 = vpop.eup %15857 }
 0xe78   :  { %v15860_v41 = vpop.eup %15859  ;;  %v1971_v62 = vsel %vm145_vm0, %v15858_v40, 0.0 }
 0xe79   :  { %v1968_v7 = vsel %vm145_vm0, %v15860_v41, 0.0 }
 0xe82   :  { %15417 = vrot.lane.b32.xlu1 %v16777_v1, %s16363_s28 }
 0xe86   :  { %15407 = vrot.lane.b32.xlu0 %v16777_v1, %s16364_s29 }
 0xea5   :  { %1972 = vadd.xlane.f32.xlu0 %v1971_v62 }
 0xea6   :  { %1969 = vadd.xlane.f32.xlu1 %v1968_v7 }
 0xeb7   :  { %2093 = vrot.lane.b32.xlu1 %v16741_v10, %s16365_s30 }
 0xebb   :  { %2097 = vrot.lane.b32.xlu1 %v16733_v58, %s16365_s30  ;;  %2091 = vrot.lane.b32.xlu0 %v16743_v12, %s16365_s30 }
 0xebf   :  { %2095 = vrot.lane.b32.xlu0 %v16735_v60, %s16365_s30 }
 0xefd   :  { %v1967_v0 = vpop.xlane.xlu0 %1966 }
 0xefe   :  { %15861 = vrcp.f32 %v1967_v0  ;;  %v1964_v26 = vpop.xlane.xlu1 %1963 }
 0xeff   :  { %15863 = vrcp.f32 %v1964_v26 }
 0xf01   :  { %v15408_v14 = vpop.permute.xlu0 %15407 }
 0xf02   :  { %v15410_v15 = vunpack.i.h.bf16 %v15408_v14  ;;  %v15409_v9 = vunpack.i.l.bf16 %v15408_v14  ;;  %v15418_v38 = vpop.permute.xlu1 %15417 }
 0xf03   :  { %v15420_v0 = vunpack.i.h.bf16 %v15418_v38  ;;  %v15419_v44 = vunpack.i.l.bf16 %v15418_v38 }
 0xf04   :  { %v14593_v29 = vpack.c.bf16 %v15410_v15, %v15409_v9 }
 0xf05   :  { %v14603_v24 = vpack.c.bf16 %v15420_v0, %v15419_v44 }
 0xf06   :  { %14594 = vmatprep.subr.bf16.mxu0 %v14593_v29 }
 0xf07   :  { %14596 = vmatpush3.bf16.msra.mxu0 %v14593_v29 }
 0xf08   :  { %v15862_v37 = vpop.eup %15861  ;;  %14599 = vmatprep.subr.msk.bf16.mxu0 %vm16555_vm2, %v14597_v34 }
 0xf09   :  { %v15864_v62 = vpop.eup %15863  ;;  %v1979_v42 = vmul.f32 %v15862_v37, %v15854_v18 }
 0xf0a   :  { %v1978_v7 = vmul.f32 %v15864_v62, %v15856_v28 }
 0xf0c   :  { %13476 = vmatprep.mubr.msk.f32.mxu0 %vm145_vm0, %v1978_v7 }
 0xf0d   :  { %13477 = vmatmul.mubr.msk.f32.vlgmr.msra.gmra.mrb[18].mxu0 %vm145_vm0, %v1979_v42 }
 0xf10   :  { %14602 = vmatpush3.bf16.xpose.msk.msra.mxu0 %vm16555_vm2, %v14597_v34 }
 0xf11   :  { %14605 = vmatprep.subr.msk.bf16.mxu0 %vm16555_vm2, %v14603_v24 }
 0xf18   :  { %14608 = vmatpush3.bf16.xpose.msk.msra.mxu0 %vm16555_vm2, %v14603_v24 }
 0xf32   :  { %v1973_v26 = vpop.xlane.xlu0 %1972 }
 0xf33   :  { %15865 = vrcp.f32 %v1973_v26  ;;  %v1970_v28 = vpop.xlane.xlu1 %1969 }
 0xf34   :  { %15867 = vrcp.f32 %v1970_v28 }
 0xf36   :  { %v2092_v25 = vpop.permute.xlu0 %2091 }
 0xf37   :  { %v2094_v42 = vpop.permute.xlu1 %2093 }
 0xf3a   :  { %v2096_v44 = vpop.permute.xlu0 %2095 }
 0xf3b   :  { %v2098_v9 = vpop.permute.xlu1 %2097 }
 0xf3d   :  { %v15866_v18 = vpop.eup %15865 }
 0xf3e   :  { %v15868_v14 = vpop.eup %15867  ;;  %v1981_v15 = vmul.f32 %v15866_v18, %v15858_v40 }
 0xf3f   :  { %v1980_v59 = vmul.f32 %v15868_v14, %v15860_v41 }
 0xf41   :  { %13479 = vmatprep.mubr.msk.f32.mxu0 %vm145_vm0, %v1980_v59 }
 0xf42   :  { %13480 = vmatmul.mubr.msk.f32.gmra.mrb[20].mxu0 %vm145_vm0, %v1981_v15 }
 0xf43   :  { %13490 = vmatprep.mubr.msk.f32.mxu0 %vm491_vm1, %v2092_v25 }
 0xf46   :  { %13491 = vmatmul.mubr.msk.f32.vlgmr.msra.gmra.mrb[22].mxu0 %vm491_vm1, %v2094_v42 }
 0xf47   :  { %13493 = vmatprep.mubr.msk.f32.mxu0 %vm491_vm1, %v2096_v44 }
 0xf4a   :  { %13494 = vmatmul.mubr.msk.f32.gmra.mrb[24].mxu0 %vm491_vm1, %v2098_v9 }
 0xfe0   :  { %v16948_v29 = vpop.f32.mrb[18].mxu0 }
 0xfe1   :  { %v16950_v41 = vpop.f32.mrb[19].mxu0 }
0x1015   :  { %v16952_v40 = vpop.f32.mrb[20].mxu0 }
0x1016   :  { %v16954_v34 = vpop.f32.mrb[21].mxu0 }
0x1019   :  { %v13492_v37 = vpop.f32.mrb[22].mxu0 }
0x101a   :  { %v2195_v38 = vadd.f32 %v13492_v37, %v16834_v43  ;;  %v2189_v62 = vpop.f32.mrb[23].mxu0 }
0x101b   :  { %v2190_v7 = vadd.f32 %v2189_v62, %v16838_v57 }
0x101c   :  { %v2211_v0 = vsel %vm145_vm0, %v2195_v38, -inf }
0x101d   :  { %2212 = vmax.xlane.f32.xlu1 %v2211_v0  ;;  %v13495_v24 = vpop.f32.mrb[24].mxu0  ;;  %v2208_v26 = vsel %vm145_vm0, %v2190_v7, -inf }
0x101e   :  { %v2199_v28 = vpop.f32.mrb[25].mxu0  ;;  %2209 = vmax.xlane.f32.xlu0 %v2208_v26  ;;  %v2205_v14 = vadd.f32 %v13495_v24, %v16854_v8 }
0x101f   :  { %v2200_v18 = vadd.f32 %v2199_v28, %v16850_v17 }
0x1020   :  { %v2217_v25 = vsel %vm145_vm0, %v2205_v14, -inf }
0x1021   :  { %v2214_v59 = vsel %vm145_vm0, %v2200_v18, -inf }
0x1022   :  { %2215 = vmax.xlane.f32.xlu0 %v2214_v59 }
0x1026   :  { %2218 = vmax.xlane.f32.xlu0 %v2217_v25 }
0x102e   :  { %15422 = vrot.lane.b32.xlu1 %v16751_v13, %s16368_s12 }
0x1032   :  { %15432 = vrot.lane.b32.xlu1 %v16751_v13, %s16366_s10 }
0x10aa   :  { %v2213_v15 = vpop.xlane.xlu1 %2212 }
0x10ab   :  { %v2221_v42 = vsub.f32 %v2195_v38, %v2213_v15  ;;  %v2210_v44 = vpop.xlane.xlu0 %2209 }
0x10ac   :  { %v2220_v9 = vsub.f32 %v2190_v7, %v2210_v44 }
0x10ad   :  { %v2226_v37 = vmul.f32 1.442695, %v2221_v42 }
0x10ae   :  { %v2224_v62 = vmul.f32 1.442695, %v2220_v9  ;;  %v15423_v0 = vpop.permute.xlu1 %15422 }
0x10af   :  { %15869 = vpow2.f32 %v2226_v37  ;;  %v15425_v24 = vunpack.i.h.bf16 %v15423_v0  ;;  %v15424_v26 = vunpack.i.l.bf16 %v15423_v0  ;;  %v2216_v38 = vpop.xlane.xlu0 %2215 }
0x10b0   :  { %15871 = vpow2.f32 %v2224_v62  ;;  %v2222_v42 = vsub.f32 %v2200_v18, %v2216_v38 }
0x10b1   :  { %v14609_v28 = vpack.c.bf16 %v15425_v24, %v15424_v26 }
0x10b2   :  { %v2228_v9 = vmul.f32 1.442695, %v2222_v42  ;;  %v15433_v18 = vpop.permute.xlu1 %15432 }
0x10b3   :  { %14610 = vmatprep.subr.bf16.mxu1 %v14609_v28  ;;  %v2219_v7 = vpop.xlane.xlu0 %2218  ;;  %v15435_v26 = vunpack.i.h.bf16 %v15433_v18 }
0x10b4   :  { %14612 = vmatpush3.bf16.msra.mxu1 %v14609_v28  ;;  %v2223_v15 = vsub.f32 %v2205_v14, %v2219_v7  ;;  %v15434_v28 = vunpack.i.l.bf16 %v15433_v18 }
0x10b6   :  { %v2230_v44 = vmul.f32 1.442695, %v2223_v15  ;;  %v14617_v15 = vpack.c.bf16 %v15435_v26, %v15434_v28 }
0x10b8   :  { %15873 = vpow2.f32 %v2230_v44 }
0x10b9   :  { %v15870_v59 = vpop.eup %15869  ;;  %15875 = vpow2.f32 %v2228_v9 }
0x10ba   :  { %v15872_v25 = vpop.eup %15871  ;;  %v2235_v36 = vsel %vm145_vm0, %v15870_v59, 0.0 }
0x10bb   :  { %2236 = vadd.xlane.f32.xlu0 %v2235_v36  ;;  %v2232_v46 = vsel %vm145_vm0, %v15872_v25, 0.0 }
0x10bc   :  { %2233 = vadd.xlane.f32.xlu1 %v2232_v46 }
0x10c2   :  { %v15874_v37 = vpop.eup %15873 }
0x10c3   :  { %v15876_v62 = vpop.eup %15875  ;;  %v2241_v36 = vsel %vm145_vm0, %v15874_v37, 0.0 }
0x10c4   :  { %v2238_v46 = vsel %vm145_vm0, %v15876_v62, 0.0 }
0x10cd   :  { %15437 = vrot.lane.b32.xlu1 %v16777_v1, %s16366_s10 }
0x10d1   :  { %15427 = vrot.lane.b32.xlu0 %v16777_v1, %s16368_s12 }
0x10f0   :  { %2242 = vadd.xlane.f32.xlu0 %v2241_v36 }
0x10f1   :  { %2239 = vadd.xlane.f32.xlu1 %v2238_v46 }
0x1102   :  { %2363 = vrot.lane.b32.xlu1 %v16741_v10, %s16367_s11 }
0x1106   :  { %2367 = vrot.lane.b32.xlu1 %v16733_v58, %s16367_s11  ;;  %2361 = vrot.lane.b32.xlu0 %v16743_v12, %s16367_s11 }
0x110a   :  { %2365 = vrot.lane.b32.xlu0 %v16735_v60, %s16367_s11 }
0x1148   :  { %v2237_v14 = vpop.xlane.xlu0 %2236 }
0x1149   :  { %15877 = vrcp.f32 %v2237_v14  ;;  %v2234_v0 = vpop.xlane.xlu1 %2233 }
0x114a   :  { %15879 = vrcp.f32 %v2234_v0 }
0x114c   :  { %v15428_v24 = vpop.permute.xlu0 %15427 }
0x114d   :  { %v15430_v38 = vunpack.i.h.bf16 %v15428_v24  ;;  %v15429_v7 = vunpack.i.l.bf16 %v15428_v24  ;;  %v15438_v42 = vpop.permute.xlu1 %15437 }
0x114e   :  { %v15440_v9 = vunpack.i.h.bf16 %v15438_v42  ;;  %v15439_v36 = vunpack.i.l.bf16 %v15438_v42 }
0x114f   :  { %v14613_v10 = vpack.c.bf16 %v15430_v38, %v15429_v7 }
0x1150   :  { %v14623_v46 = vpack.c.bf16 %v15440_v9, %v15439_v36 }
0x1151   :  { %14614 = vmatprep.subr.bf16.mxu1 %v14613_v10 }
0x1152   :  { %14616 = vmatpush3.bf16.msra.mxu1 %v14613_v10 }
0x1153   :  { %v15878_v58 = vpop.eup %15877  ;;  %14619 = vmatprep.subr.msk.bf16.mxu1 %vm16555_vm2, %v14617_v15 }
0x1154   :  { %v15880_v60 = vpop.eup %15879  ;;  %v2249_v44 = vmul.f32 %v15878_v58, %v15870_v59 }
0x1155   :  { %v2248_v12 = vmul.f32 %v15880_v60, %v15872_v25 }
0x1157   :  { %13504 = vmatprep.mubr.msk.f32.mxu1 %vm145_vm0, %v2248_v12 }
0x1158   :  { %13505 = vmatmul.mubr.msk.f32.vlgmr.msra.gmra.mrb[24].mxu1 %vm145_vm0, %v2249_v44 }
0x115b   :  { %14622 = vmatpush3.bf16.xpose.msk.msra.mxu1 %vm16555_vm2, %v14617_v15 }
0x115c   :  { %14625 = vmatprep.subr.msk.bf16.mxu1 %vm16555_vm2, %v14623_v46 }
0x1163   :  { %14628 = vmatpush3.bf16.xpose.msk.msra.mxu1 %vm16555_vm2, %v14623_v46 }
0x117d   :  { %v2243_v18 = vpop.xlane.xlu0 %2242 }
0x117e   :  { %15881 = vrcp.f32 %v2243_v18  ;;  %v2240_v25 = vpop.xlane.xlu1 %2239 }
0x117f   :  { %15883 = vrcp.f32 %v2240_v25 }
0x1181   :  { %v2362_v24 = vpop.permute.xlu0 %2361 }
0x1182   :  { %v2364_v28 = vpop.permute.xlu1 %2363 }
0x1185   :  { %v2366_v38 = vpop.permute.xlu0 %2365 }
0x1186   :  { %v2368_v7 = vpop.permute.xlu1 %2367 }
0x1188   :  { %v15882_v59 = vpop.eup %15881 }
0x1189   :  { %v15884_v14 = vpop.eup %15883  ;;  %v2251_v26 = vmul.f32 %v15882_v59, %v15874_v37 }
0x118a   :  { %v2250_v0 = vmul.f32 %v15884_v14, %v15876_v62 }
0x118c   :  { %13507 = vmatprep.mubr.msk.f32.mxu1 %vm145_vm0, %v2250_v0 }
0x118d   :  { %13508 = vmatmul.mubr.msk.f32.gmra.mrb[26].mxu1 %vm145_vm0, %v2251_v26 }
0x118e   :  { %13518 = vmatprep.mubr.msk.f32.mxu1 %vm491_vm1, %v2362_v24 }
0x1191   :  { %13519 = vmatmul.mubr.msk.f32.vlgmr.msra.gmra.mrb[28].mxu1 %vm491_vm1, %v2364_v28 }
0x1192   :  { %13521 = vmatprep.mubr.msk.f32.mxu1 %vm491_vm1, %v2366_v38 }
0x1195   :  { %13522 = vmatmul.mubr.msk.f32.gmra.mrb[30].mxu1 %vm491_vm1, %v2368_v7 }
0x122b   :  { %v13506_v10 = vpop.f32.mrb[24].mxu1 }
0x122c   :  { %v2342_v15 = vpop.f32.mrb[25].mxu1 }
0x1260   :  { %v17000_v62 = vpop.f32.mrb[26].mxu1 }
0x1261   :  { %v17002_v37 = vpop.f32.mrb[27].mxu1 }
0x1264   :  { %v13520_v58 = vpop.f32.mrb[28].mxu1 }
0x1265   :  { %v2465_v42 = vadd.f32 %v13520_v58, %v16834_v43  ;;  %v2459_v60 = vpop.f32.mrb[29].mxu1 }
0x1266   :  { %v2460_v12 = vadd.f32 %v2459_v60, %v16838_v57 }
0x1267   :  { %v2481_v44 = vsel %vm145_vm0, %v2465_v42, -inf }
0x1268   :  { %2482 = vmax.xlane.f32.xlu1 %v2481_v44  ;;  %v13523_v9 = vpop.f32.mrb[30].mxu1  ;;  %v2478_v36 = vsel %vm145_vm0, %v2460_v12, -inf }
0x1269   :  { %v2469_v46 = vpop.f32.mrb[31].mxu1  ;;  %2479 = vmax.xlane.f32.xlu0 %v2478_v36  ;;  %v2475_v25 = vadd.f32 %v13523_v9, %v16854_v8 }
0x126a   :  { %v2470_v18 = vadd.f32 %v2469_v46, %v16850_v17 }
0x126b   :  { %v2487_v14 = vsel %vm145_vm0, %v2475_v25, -inf }
0x126c   :  { %v2484_v59 = vsel %vm145_vm0, %v2470_v18, -inf }
0x126d   :  { %2485 = vmax.xlane.f32.xlu0 %v2484_v59 }
0x1271   :  { %2488 = vmax.xlane.f32.xlu0 %v2487_v14 }
0x12f5   :  { %v2483_v0 = vpop.xlane.xlu1 %2482 }
0x12f6   :  { %v2491_v24 = vsub.f32 %v2465_v42, %v2483_v0  ;;  %v2480_v26 = vpop.xlane.xlu0 %2479 }
0x12f7   :  { %v2490_v28 = vsub.f32 %v2460_v12, %v2480_v26 }
0x12f8   :  { %v2496_v38 = vmul.f32 1.442695, %v2491_v24 }
0x12f9   :  { %v2494_v7 = vmul.f32 1.442695, %v2490_v28 }
0x12fa   :  { %15885 = vpow2.f32 %v2496_v38  ;;  %v2486_v58 = vpop.xlane.xlu0 %2485 }
0x12fb   :  { %15887 = vpow2.f32 %v2494_v7  ;;  %v2492_v60 = vsub.f32 %v2470_v18, %v2486_v58 }
0x12fd   :  { %v2498_v44 = vmul.f32 1.442695, %v2492_v60 }
0x12fe   :  { %v2489_v36 = vpop.xlane.xlu0 %2488 }
0x12ff   :  { %15889 = vpow2.f32 %v2498_v44  ;;  %v2493_v9 = vsub.f32 %v2475_v25, %v2489_v36 }
0x1301   :  { %v2500_v46 = vmul.f32 1.442695, %v2493_v9 }
0x1303   :  { %15891 = vpow2.f32 %v2500_v46 }
0x1304   :  { %v15886_v59 = vpop.eup %15885 }
0x1305   :  { %v15888_v51 = vpop.eup %15887  ;;  %v2505_v14 = vsel %vm145_vm0, %v15886_v59, 0.0 }
0x1306   :  { %2506 = vadd.xlane.f32.xlu0 %v2505_v14  ;;  %v2502_v42 = vsel %vm145_vm0, %v15888_v51, 0.0 }
0x1307   :  { %2503 = vadd.xlane.f32.xlu1 %v2502_v42  ;;  %v1551_v42 = vld [vmem:[%s19484_s4 + $0x88] sm:$0xff] }
0x1309   :  { %v15890_v12 = vpop.eup %15889 }
0x130a   :  { %v2508_v0 = vsel %vm145_vm0, %v15890_v12, 0.0 }
0x130b   :  { %2509 = vadd.xlane.f32.xlu1 %v2508_v0  ;;  %v1553_v0 = vld [vmem:[%s19484_s4 + $0x98] sm:$0xff] }
0x130d   :  { %v15892_v24 = vpop.eup %15891 }
0x130e   :  { %v2511_v18 = vsel %vm145_vm0, %v15892_v24, 0.0 }
0x130f   :  { %2512 = vadd.xlane.f32.xlu0 %v2511_v18 }
0x131c   :  { %15442 = vrot.lane.b32.xlu1 %v16751_v13, %s16370_s17 }
0x1320   :  { %2635 = vrot.lane.b32.xlu1 %v16950_v41, %s16369_s16 }
0x1324   :  { %2637 = vrot.lane.b32.xlu1 %v16948_v29, %s16369_s16 }
0x1325   :  { %15447 = vrot.lane.b32.xlu0 %v16777_v1, %s16370_s17 }
0x1328   :  { %2653 = vrot.lane.b32.xlu1 %v13506_v10, %s16371_s18 }
0x1329   :  { %2651 = vrot.lane.b32.xlu0 %v2342_v15, %s16371_s18 }
0x132c   :  { %2641 = vrot.lane.b32.xlu1 %v16952_v40, %s16369_s16 }
0x132d   :  { %2639 = vrot.lane.b32.xlu0 %v16954_v34, %s16369_s16 }
0x1393   :  { %v2507_v25 = vpop.xlane.xlu0 %2506 }
0x1394   :  { %v2504_v13 = vpop.xlane.xlu1 %2503 }
0x1395   :  { %15893 = vrcp.f32 %v2504_v13 }
0x1396   :  { %15895 = vrcp.f32 %v2507_v25 }
0x1398   :  { %v2510_v41 = vpop.xlane.xlu1 %2509 }
0x1399   :  { %15897 = vrcp.f32 %v2510_v41 }
0x139c   :  { %v15443_v29 = vpop.permute.xlu1 %15442  ;;  %v2513_v26 = vpop.xlane.xlu0 %2512 }
0x139d   :  { %v15445_v28 = vunpack.i.h.bf16 %v15443_v29  ;;  %v15444_v1 = vunpack.i.l.bf16 %v15443_v29  ;;  %15899 = vrcp.f32 %v2513_v26 }
0x139f   :  { %v15894_v10 = vpop.eup %15893  ;;  %v14629_v38 = vpack.c.bf16 %v15445_v28, %v15444_v1 }
0x13a0   :  { %v15448_v15 = vpop.permute.xlu0 %15447  ;;  %v2518_v7 = vmul.f32 %v15894_v10, %v15888_v51  ;;  %v15896_v60 = vpop.eup %15895  ;;  %v1550_v51 = vld [vmem:[%s19484_s4 + $0x80] sm:$0xff] }
0x13a1   :  { %v15450_v58 = vunpack.i.h.bf16 %v15448_v15  ;;  %v15449_v40 = vunpack.i.l.bf16 %v15448_v15  ;;  %14630 = vmatprep.subr.bf16.mxu0 %v14629_v38  ;;  %v2519_v36 = vmul.f32 %v15896_v60, %v15886_v59  ;;  %v1552_v59 = vld [vmem:[%s19484_s4 + $0x90] sm:$0xff]  ;;  %v2636_v29 = vpop.permute.xlu1 %2635 }
0x13a2   :  { %14632 = vmatpush3.bf16.msra.mxu0 %v14629_v38  ;;  %13532 = vmatprep.mubr.msk.f32.mxu0 %vm145_vm0, %v2518_v7  ;;  %v2679_v15 = vsel %vm491_vm1, %v16898_v19, %v2636_v29 }
0x13a3   :  { %v14633_v34 = vpack.c.bf16 %v15450_v58, %v15449_v40  ;;  %v15898_v44 = vpop.eup %15897 }
0x13a4   :  { %v2520_v46 = vmul.f32 %v15898_v44, %v15890_v12  ;;  %v14637_v12 = vpack.c.bf16 %v1551_v42, %v1550_v51  ;;  %v2652_v1 = vpop.permute.xlu0 %2651 }
0x13a5   :  { %14634 = vmatprep.subr.bf16.mxu0 %v14633_v34  ;;  %v2638_v26 = vpop.permute.xlu1 %2637  ;;  %v2683_v58 = vsel %vm575_vm5, %v2679_v15, %v2652_v1 }
0x13a6   :  { %14636 = vmatpush3.bf16.msra.mxu0 %v14633_v34 }
0x13a7   :  { %v15900_v9 = vpop.eup %15899  ;;  %14638 = vmatprep.subr.bf16.mxu0 %v14637_v12 }
0x13a8   :  { %v2521_v14 = vmul.f32 %v15900_v9, %v15892_v24  ;;  %v14641_v24 = vpack.c.bf16 %v1553_v0, %v1552_v59  ;;  %v2640_v38 = vpop.permute.xlu0 %2639 }
0x13a9   :  { %13533 = vmatmul.mubr.msk.f32.vlgmr.msra.gmra.mrb[26].mxu0 %vm145_vm0, %v2519_v36  ;;  %v2654_v28 = vpop.permute.xlu1 %2653  ;;  %v2681_v19 = vsel %vm491_vm1, %v16902_v6, %v2640_v38  ;;  %v12260_v6 = vld [vmem:[%s19484_s4 + $0x3e5] ss:$0 sm:$0xff] }
0x13aa   :  { %13535 = vmatprep.mubr.msk.f32.mxu0 %vm145_vm0, %v2520_v46  ;;  %14640 = vmatpush3.bf16.msra.mxu0 %v14637_v12  ;;  %v1393_v0 = vadd.f32 %v12260_v6, %v16809_v22 }
0x13ab   :  { %14642 = vmatprep.subr.bf16.mxu0 %v14641_v24 }
0x13ac   :  { %v1401_v29 = vadd.f32 %v1393_v0, %v16512_v4 }
0x13ad   :  { %13536 = vmatmul.mubr.msk.f32.gmra.mrb[28].mxu0 %vm145_vm0, %v2521_v14  ;;  %v2642_v10 = vpop.permute.xlu1 %2641 }
0x13ae   :  { %14644 = vmatpush3.bf16.msra.mxu0 %v14641_v24  ;;  %v1403_v38 = vsel %vm145_vm0, %v1401_v29, 0.0 }
0x147c   :  { %v13534_v18 = vpop.f32.mrb[26].mxu0 }
0x147d   :  { %2669 = vrot.lane.b32.xlu1 %v13534_v18, %s16372_s13  ;;  %v2612_v13 = vpop.f32.mrb[27].mxu0 }
0x147e   :  { %2667 = vrot.lane.b32.xlu0 %v2612_v13, %s16372_s13 }
0x1480   :  { %v13537_v25 = vpop.f32.mrb[28].mxu0 }
0x1481   :  { %2657 = vrot.lane.b32.xlu1 %v17000_v62, %s16371_s18  ;;  %v2622_v41 = vpop.f32.mrb[29].mxu0  ;;  %v2680_v62 = vsel %vm491_vm1, %v16896_v2, %v2638_v26  ;;  %v2682_v2 = vsel %vm491_vm1, %v16900_v16, %v2642_v10  ;;  %v12318_v16 = vld [vmem:[%s19484_s4 + $0x3e6] ss:$0 sm:$0xff] }
0x1482   :  { %2655 = vrot.lane.b32.xlu0 %v17002_v37, %s16371_s18  ;;  %v2684_v40 = vsel %vm575_vm5, %v2680_v62, %v2654_v28 }
0x1485   :  { %2673 = vrot.lane.b32.xlu1 %v13537_v25, %s16372_s13 }
0x1486   :  { %2671 = vrot.lane.b32.xlu0 %v2622_v41, %s16372_s13 }
0x14ef   :  { %v2670_v7 = vpop.permute.xlu1 %2669 }
0x14f0   :  { %v2668_v37 = vpop.permute.xlu0 %2667  ;;  %v2688_v60 = vsel %vm1313_vm6, %v2684_v40, %v2670_v7 }
0x14f1   :  { %v2687_v34 = vsel %vm1313_vm6, %v2683_v58, %v2668_v37 }
0x14f2   :  { %13546 = vmatprep.mubr.msk.f32.mxu0 %vm145_vm0, %v2687_v34 }
0x14f3   :  { %v2658_v44 = vpop.permute.xlu1 %2657  ;;  %13547 = vmatmul.mubr.msk.f32.vlgmr.msra.gmra.mrb[30].mxu0 %vm145_vm0, %v2688_v60 }
0x14f4   :  { %v2656_v36 = vpop.permute.xlu0 %2655  ;;  %v2686_v51 = vsel %vm575_vm5, %v2682_v2, %v2658_v44 }
0x14f5   :  { %v2685_v46 = vsel %vm575_vm5, %v2681_v19, %v2656_v36 }
0x14f7   :  { %v2674_v9 = vpop.permute.xlu1 %2673 }
0x14f8   :  { %v2672_v14 = vpop.permute.xlu0 %2671  ;;  %v2690_v59 = vsel %vm1313_vm6, %v2686_v51, %v2674_v9 }
0x14f9   :  { %v2689_v42 = vsel %vm1313_vm6, %v2685_v46, %v2672_v14 }
0x14fa   :  { %13549 = vmatprep.mubr.msk.f32.mxu0 %vm145_vm0, %v2689_v42 }
0x14fb   :  { %13550 = vmatmul.mubr.msk.f32.gmra.mrb[32].mxu0 %vm145_vm0, %v2690_v59 }
0x15c6   :  { %v13548_v12 = vpop.f32.mrb[30].mxu0 }
0x15c7   :  { %v2779_v24 = vadd.f32 %v13548_v12, %v12318_v16  ;;  %v2773_v18 = vpop.f32.mrb[31].mxu0 }
0x15c8   :  { %v2774_v13 = vadd.f32 %v12318_v16, %v2773_v18 }
0x15c9   :  { %v2793_v25 = vadd.f32 %v2779_v24, %v16705_v33  ;;  %v1398_v33 = vadd.f32 %v16807_v32, %v12260_v6 }
0x15ca   :  { %v2792_v41 = vadd.f32 %v2774_v13, %v16685_v27 }
0x15cb   :  { %v2799_v26 = vsel %vm145_vm0, %v2793_v25, 0.0  ;;  %v1402_v62 = vadd.f32 %v1398_v33, %v16515_v5 }
0x15cc   :  { %2800 = vadd.xlane.f32.xlu1 %v2799_v26  ;;  %v2796_v28 = vsel %vm145_vm0, %v2792_v41, 0.0 }
0x15cd   :  { %2797 = vadd.xlane.f32.xlu0 %v2796_v28  ;;  %v1406_v37 = vsel %vm145_vm0, %v1402_v62, 0.0 }
0x15ce   :  { %v13551_v1 = vpop.f32.mrb[32].mxu0 }
0x15cf   :  { %v2783_v10 = vpop.f32.mrb[33].mxu0  ;;  %v2789_v22 = vadd.f32 %v13551_v1, %v12318_v16 }
0x15d0   :  { %v2784_v15 = vadd.f32 %v12318_v16, %v2783_v10  ;;  %1404 = vadd.xlane.f32.xlu1 %v1403_v38  ;;  %v2956_v10 = vld [vmem:[%s19485_s5] sm:$0xff]  ;;  %v2957_v38 = vld [vmem:[%s19485_s5 + $0x8] sm:$0xff] }
0x15d1   :  { %v2795_v27 = vadd.f32 %v2789_v22, %v16722_v23  ;;  %v14653_v22 = vpack.c.bf16 %v2957_v38, %v2956_v10  ;;  %v12324_v10 = vld [vmem:[%s19484_s4 + $0x3f4] ss:$0 sm:$0xff] }
0x15d2   :  { %v2794_v7 = vadd.f32 %v2784_v15, %v16715_v35  ;;  %v2958_v15 = vld [vmem:[%s19485_s5 + $0x10] sm:$0xff] }
0x15d3   :  { %v2805_v58 = vsel %vm145_vm0, %v2795_v27, 0.0  ;;  %14654 = vmatprep.subr.bf16.mxu0 %v14653_v22 }
0x15d4   :  { %v2802_v4 = vsel %vm145_vm0, %v2794_v7, 0.0  ;;  %14656 = vmatpush3.bf16.msra.mxu0 %v14653_v22 }
0x15d5   :  { %2803 = vadd.xlane.f32.xlu0 %v2802_v4  ;;  %v2867_v4 = vld [vmem:[%s19484_s4 + $0xa8] sm:$0xff] }
0x15d9   :  { %2806 = vadd.xlane.f32.xlu0 %v2805_v58  ;;  %v2868_v58 = vld [vmem:[%s19484_s4 + $0xb0] sm:$0xff] }
0x15dd   :  { %1407 = vadd.xlane.f32.xlu0 %v1406_v37  ;;  %v2869_v37 = vld [vmem:[%s19484_s4 + $0xb8] sm:$0xff] }
0x1659   :  { %v2801_v40 = vpop.xlane.xlu1 %2800 }
0x165a   :  { %v2809_v34 = vmul.f32 0.03125, %v2801_v40  ;;  %v2798_v60 = vpop.xlane.xlu0 %2797  ;;  %v14649_v40 = vpack.c.bf16 %v2869_v37, %v2868_v58 }
0x165b   :  { %v2808_v44 = vmul.f32 0.03125, %v2798_v60 }
0x165c   :  { %v17094_v35 = vsub.f32 %v2793_v25, %v2809_v34 }
0x165d   :  { %v17096_v32 = vsub.f32 %v2792_v41, %v2808_v44  ;;  %v1405_v23 = vpop.xlane.xlu1 %1404 }
0x165e   :  { %v2817_v36 = vmul.f32 %v17094_v35, %v17094_v35  ;;  %v1410_v9 = vmul.f32 0.03125, %v1405_v23 }
0x165f   :  { %v2816_v5 = vmul.f32 %v17096_v32, %v17096_v32 }
0x1660   :  { %v2823_v19 = vsel %vm145_vm0, %v2817_v36, 0.0  ;;  %v17104_v51 = vsub.f32 %v1401_v29, %v1410_v9 }
0x1661   :  { %2824 = vadd.xlane.f32.xlu0 %v2823_v19  ;;  %v2820_v2 = vsel %vm145_vm0, %v2816_v5, 0.0 }
0x1662   :  { %2821 = vadd.xlane.f32.xlu1 %v2820_v2  ;;  %v2804_v46 = vpop.xlane.xlu0 %2803  ;;  %v1414_v24 = vmul.f32 %v17104_v51, %v17104_v51 }
0x1663   :  { %v2810_v14 = vmul.f32 0.03125, %v2804_v46 }
0x1664   :  { %v1416_v29 = vsel %vm145_vm0, %v1414_v24, 0.0 }
0x1665   :  { %v17106_v42 = vsub.f32 %v2794_v7, %v2810_v14  ;;  %v2959_v7 = vld [vmem:[%s19485_s5 + $0x18] sm:$0xff] }
0x1666   :  { %v2807_v59 = vpop.xlane.xlu0 %2806  ;;  %v14657_v33 = vpack.c.bf16 %v2959_v7, %v2958_v15 }
0x1667   :  { %v2811_v6 = vmul.f32 0.03125, %v2807_v59  ;;  %v2818_v16 = vmul.f32 %v17106_v42, %v17106_v42 }
0x1668   :  { %14658 = vmatprep.subr.bf16.mxu0 %v14657_v33 }
0x1669   :  { %v17110_v12 = vsub.f32 %v2795_v27, %v2811_v6  ;;  %v2826_v0 = vsel %vm145_vm0, %v2818_v16, 0.0  ;;  %14660 = vmatpush3.bf16.msra.mxu0 %v14657_v33  ;;  %v2866_v27 = vld [vmem:[%s19484_s4 + $0xa0] sm:$0xff] }
0x166a   :  { %2827 = vadd.xlane.f32.xlu1 %v2826_v0  ;;  %v1408_v18 = vpop.xlane.xlu0 %1407  ;;  %v12323_v0 = vld [vmem:[%s19484_s4 + $0x3f3] ss:$0 sm:$0xff] }
0x166b   :  { %v1411_v13 = vmul.f32 0.03125, %v1408_v18  ;;  %v2819_v25 = vmul.f32 %v17110_v12, %v17110_v12 }
0x166d   :  { %v17117_v41 = vsub.f32 %v1402_v62, %v1411_v13  ;;  %v2829_v26 = vsel %vm145_vm0, %v2819_v25, 0.0  ;;  %v14645_v62 = vpack.c.bf16 %v2867_v4, %v2866_v27  ;;  %v12263_v4 = vld [vmem:[%s19484_s4 + $0x3ed] ss:$0 sm:$0xff] }
0x166e   :  { %1417 = vadd.xlane.f32.xlu1 %v1416_v29  ;;  %2830 = vadd.xlane.f32.xlu0 %v2829_v26 }
0x166f   :  { %v1415_v28 = vmul.f32 %v17117_v41, %v17117_v41  ;;  %14646 = vmatprep.subr.bf16.mxu1 %v14645_v62 }
0x1670   :  { %14648 = vmatpush3.bf16.msra.mxu1 %v14645_v62 }
0x1671   :  { %v1419_v1 = vsel %vm145_vm0, %v1415_v28, 0.0  ;;  %14650 = vmatprep.subr.bf16.mxu1 %v14649_v40 }
0x1672   :  { %1420 = vadd.xlane.f32.xlu0 %v1419_v1 }
0x1674   :  { %14652 = vmatpush3.bf16.msra.mxu1 %v14649_v40  ;;  %v12264_v40 = vld [vmem:[%s19484_s4 + $0x3ee] ss:$0 sm:$0xff] }
0x16ee   :  { %v2825_v34 = vpop.xlane.xlu0 %2824 }
0x16ef   :  { %v2833_v60 = vmul.f32 0.03125, %v2825_v34  ;;  %v2822_v44 = vpop.xlane.xlu1 %2821 }
0x16f0   :  { %v2832_v23 = vmul.f32 0.03125, %v2822_v44 }
0x16f1   :  { %v2837_v36 = vadd.f32 1e-05, %v2833_v60 }
0x16f2   :  { %v2836_v5 = vadd.f32 1e-05, %v2832_v23 }
0x16f3   :  { %15901 = vrsqrt.f32 %v2837_v36 }
0x16f4   :  { %15903 = vrsqrt.f32 %v2836_v5 }
0x16f7   :  { %v2828_v19 = vpop.xlane.xlu1 %2827 }
0x16f8   :  { %v2834_v9 = vmul.f32 0.03125, %v2828_v19 }
0x16fa   :  { %v2838_v2 = vadd.f32 1e-05, %v2834_v9 }
0x16fb   :  { %v1418_v46 = vpop.xlane.xlu1 %1417  ;;  %v2831_v14 = vpop.xlane.xlu0 %2830 }
0x16fc   :  { %15905 = vrsqrt.f32 %v2838_v2  ;;  %v1422_v59 = vmul.f32 0.03125, %v1418_v46  ;;  %v2835_v6 = vmul.f32 0.03125, %v2831_v14 }
0x16fd   :  { %v15902_v16 = vpop.eup %15901 }
0x16fe   :  { %v15904_v24 = vpop.eup %15903  ;;  %v2845_v18 = vmul.f32 %v15902_v16, %v17094_v35  ;;  %v1424_v13 = vadd.f32 1e-05, %v1422_v59  ;;  %v2839_v25 = vadd.f32 1e-05, %v2835_v6 }
0x16ff   :  { %v1421_v29 = vpop.xlane.xlu0 %1420  ;;  %v2844_v26 = vmul.f32 %v15904_v24, %v17096_v32 }
0x1700   :  { %15907 = vrsqrt.f32 %v1424_v13  ;;  %v1423_v28 = vmul.f32 0.03125, %v1421_v29  ;;  %v2854_v1 = vmul.f32 %v12323_v0, %v2845_v18  ;;  %v12325_v18 = vld [vmem:[%s19484_s4 + $0x3e7] ss:$0 sm:$0xff] }
0x1701   :  { %15909 = vrsqrt.f32 %v2839_v25  ;;  %v2853_v38 = vmul.f32 %v12323_v0, %v2844_v26 }
0x1702   :  { %v1425_v22 = vadd.f32 1e-05, %v1423_v28  ;;  %v17158_v7 = vadd.f32 %v12324_v10, %v2854_v1 }
0x1703   :  { %v17156_v15 = vadd.f32 %v12324_v10, %v2853_v38 }
0x1704   :  { %15911 = vrsqrt.f32 %v1425_v22 }
0x1705   :  { %13571 = vmatprep.mubr.msk.f32.mxu0 %vm145_vm0, %v17156_v15 }
0x1706   :  { %v15906_v35 = vpop.eup %15905  ;;  %13572 = vmatmul.mubr.msk.f32.vlgmr.msra.gmra.mrb[34].mxu0 %vm145_vm0, %v17158_v7 }
0x1707   :  { %v2846_v32 = vmul.f32 %v15906_v35, %v17106_v42 }
0x1709   :  { %v2855_v33 = vmul.f32 %v12323_v0, %v2846_v32 }
0x170a   :  { %v15908_v27 = vpop.eup %15907 }
0x170b   :  { %v15910_v62 = vpop.eup %15909  ;;  %v17168_v58 = vadd.f32 %v12324_v10, %v2855_v33  ;;  %v1428_v37 = vmul.f32 %v15908_v27, %v17104_v51 }
0x170c   :  { %v2847_v34 = vmul.f32 %v15910_v62, %v17110_v12  ;;  %v12328_v12 = vld [vmem:[%s19485_s5 + $0x80] ss:$0 sm:$0xff] }
0x170d   :  { %13574 = vmatprep.mubr.msk.f32.mxu0 %vm145_vm0, %v17168_v58  ;;  %v1435_v42 = vmul.f32 %v12263_v4, %v1428_v37 }
0x170e   :  { %v15912_v60 = vpop.eup %15911  ;;  %v2856_v44 = vmul.f32 %v12323_v0, %v2847_v34 }
0x170f   :  { %v1429_v23 = vmul.f32 %v15912_v60, %v17117_v41  ;;  %v17178_v36 = vadd.f32 %v12264_v40, %v1435_v42 }
0x1710   :  { %v17180_v5 = vadd.f32 %v12324_v10, %v2856_v44  ;;  %v19506_v10 = vmov -1e+09  }
0x1711   :  { %v1436_v19 = vmul.f32 %v12263_v4, %v1429_v23  ;;  %13560 = vmatprep.mubr.msk.f32.mxu1 %vm145_vm0, %v17178_v36  ;;  %v17223_v38 = vsel %vm85_vm11, 0.0, %v19506_v10  ;;  %v17226_v22 = vsel %vm84_vm12, 0.0, %v19506_v10 }
0x1712   :  { %13575 = vmatmul.mubr.msk.f32.gmra.mrb[36].mxu0 %vm145_vm0, %v17180_v5 }
0x1713   :  { %v17186_v51 = vadd.f32 %v12264_v40, %v1436_v19 }
0x1715   :  { %13561 = vmatmul.mubr.msk.f32.vlgmr.msra.gmra.mrb[32].mxu1 %vm145_vm0, %v17186_v51 }
0x17d9   :  { %v13573_v41 = vpop.f32.mrb[34].mxu0 }
0x17da   :  { %v3049_v9 = vadd.f32 %v13573_v41, %v12328_v12  ;;  %v3043_v2 = vpop.f32.mrb[35].mxu0 }
0x17db   :  { %v3044_v46 = vadd.f32 %v12328_v12, %v3043_v2 }
0x17dd   :  { %v14661_v14 = vpack.c.bf16 %v3049_v9, %v3044_v46  ;;  %v17193_v59 = vpack.i.bf16 %v3049_v9, %v3044_v46 }
0x17df   :  { %14663 = vmatprep.subr.msk.bf16.mxu1 %vm16555_vm2, %v14661_v14 }
0x17e0   :  { %14666 = vmatpush3.bf16.xpose.msk.msra.mxu1 %vm16555_vm2, %v14661_v14 }
0x17e5   :  { %v13576_v6 = vpop.f32.mrb[36].mxu0 }
0x17e6   :  { %v3059_v16 = vadd.f32 %v13576_v6, %v12328_v12  ;;  %v3053_v0 = vpop.f32.mrb[37].mxu0 }
0x17e7   :  { %v3054_v24 = vadd.f32 %v12328_v12, %v3053_v0 }
0x17e8   :  { %v13562_v13 = vpop.f32.mrb[32].mxu1 }
0x17e9   :  { %v2947_v25 = vpop.f32.mrb[33].mxu1  ;;  %v14667_v29 = vpack.c.bf16 %v3059_v16, %v3054_v24  ;;  %v17202_v26 = vpack.i.bf16 %v3059_v16, %v3054_v24  ;;  %v17212_v1 = vadd.f32 %v13562_v13, %v12325_v18 }
0x17ea   :  { %v17204_v28 = vadd.f32 %v12325_v18, %v2947_v25 }
0x17eb   :  { %14669 = vmatprep.subr.msk.bf16.mxu1 %vm16555_vm2, %v14667_v29 }
0x17ec   :  { %14672 = vmatpush3.bf16.xpose.msk.msra.mxu1 %vm16555_vm2, %v14667_v29  ;;  %13585 = vmatprep.mubr.msk.f32.mxu1 %vm491_vm1, %v17204_v28 }
0x17f3   :  { %13586 = vmatmul.mubr.msk.f32.vlgmr.msra.gmra.mrb[34].mxu1 %vm491_vm1, %v17212_v1 }
0x18c6   :  { %v13587_v35 = vpop.f32.mrb[34].mxu1 }
0x18c7   :  { %v3157_v32 = vadd.f32 %v13587_v35, %v17223_v38  ;;  %v3151_v33 = vpop.f32.mrb[35].mxu1 }
0x18c8   :  { %v3152_v27 = vadd.f32 %v3151_v33, %v17226_v22 }
0x18c9   :  { %v3163_v4 = vsel %vm145_vm0, %v3157_v32, -inf }
0x18ca   :  { %3164 = vmax.xlane.f32.xlu0 %v3163_v4  ;;  %v3160_v45 = vsel %vm145_vm0, %v3152_v27, -inf }
0x18cb   :  { %3161 = vmax.xlane.f32.xlu1 %v3160_v45 }
0x18dc   :  { %15452 = vrot.lane.b32.xlu1 %v17193_v59, %s16359_s25 }
0x18e0   :  { %15462 = vrot.lane.b32.xlu1 %v17193_v59, %s16360_s26 }
0x1957   :  { %v3165_v47 = vpop.xlane.xlu0 %3164 }
0x1958   :  { %v3167_v48 = vsub.f32 %v3157_v32, %v3165_v47  ;;  %v3162_v50 = vpop.xlane.xlu1 %3161 }
0x1959   :  { %v3166_v54 = vsub.f32 %v3152_v27, %v3162_v50 }
0x195a   :  { %v3170_v62 = vmul.f32 1.442695, %v3167_v48 }
0x195b   :  { %v3168_v37 = vmul.f32 1.442695, %v3166_v54 }
0x195c   :  { %15913 = vpow2.f32 %v3170_v62  ;;  %v15453_v40 = vpop.permute.xlu1 %15452 }
0x195d   :  { %15915 = vpow2.f32 %v3168_v37  ;;  %v15455_v34 = vunpack.i.h.bf16 %v15453_v40  ;;  %v15454_v42 = vunpack.i.l.bf16 %v15453_v40 }
0x195f   :  { %v14673_v60 = vpack.c.bf16 %v15455_v34, %v15454_v42 }
0x1960   :  { %v15463_v41 = vpop.permute.xlu1 %15462 }
0x1961   :  { %14674 = vmatprep.subr.bf16.mxu0 %v14673_v60  ;;  %v15465_v14 = vunpack.i.h.bf16 %v15463_v41  ;;  %v15464_v6 = vunpack.i.l.bf16 %v15463_v41 }
0x1962   :  { %14676 = vmatpush3.bf16.msra.mxu0 %v14673_v60 }
0x1963   :  { %v14681_v18 = vpack.c.bf16 %v15465_v14, %v15464_v6 }
0x1966   :  { %v15914_v44 = vpop.eup %15913 }
0x1967   :  { %v15916_v23 = vpop.eup %15915  ;;  %v3175_v19 = vsel %vm145_vm0, %v15914_v44, 0.0 }
0x1968   :  { %3176 = vadd.xlane.f32.xlu0 %v3175_v19  ;;  %v3172_v12 = vsel %vm145_vm0, %v15916_v23, 0.0 }
0x1969   :  { %3173 = vadd.xlane.f32.xlu1 %v3172_v12 }
0x197a   :  { %15467 = vrot.lane.b32.xlu1 %v17202_v26, %s16360_s26 }
0x197e   :  { %15457 = vrot.lane.b32.xlu0 %v17202_v26, %s16359_s25  ;;  %3277 = vrot.lane.b32.xlu1 %v17212_v1, %s16360_s26 }
0x1982   :  { %3275 = vrot.lane.b32.xlu0 %v17204_v28, %s16360_s26 }
0x19f5   :  { %v3177_v9 = vpop.xlane.xlu0 %3176 }
0x19f6   :  { %15917 = vrcp.f32 %v3177_v9  ;;  %v3174_v2 = vpop.xlane.xlu1 %3173 }
0x19f7   :  { %15919 = vrcp.f32 %v3174_v2 }
0x19f9   :  { %v15458_v46 = vpop.permute.xlu0 %15457 }
0x19fa   :  { %v15460_v16 = vunpack.i.h.bf16 %v15458_v46  ;;  %v15459_v0 = vunpack.i.l.bf16 %v15458_v46  ;;  %v15468_v25 = vpop.permute.xlu1 %15467 }
0x19fb   :  { %v15470_v33 = vunpack.i.h.bf16 %v15468_v25  ;;  %v15469_v27 = vunpack.i.l.bf16 %v15468_v25 }
0x19fc   :  { %v14677_v24 = vpack.c.bf16 %v15460_v16, %v15459_v0 }
0x19fd   :  { %v3276_v4 = vpop.permute.xlu0 %3275  ;;  %v14687_v45 = vpack.c.bf16 %v15470_v33, %v15469_v27 }
0x19fe   :  { %14678 = vmatprep.subr.bf16.mxu0 %v14677_v24  ;;  %v3278_v47 = vpop.permute.xlu1 %3277 }
0x19ff   :  { %14680 = vmatpush3.bf16.msra.mxu0 %v14677_v24 }
0x1a00   :  { %v15918_v13 = vpop.eup %15917  ;;  %14683 = vmatprep.subr.msk.bf16.mxu0 %vm16555_vm2, %v14681_v18 }
0x1a01   :  { %v15920_v29 = vpop.eup %15919  ;;  %v3181_v32 = vmul.f32 %v15918_v13, %v15914_v44 }
0x1a02   :  { %v3180_v35 = vmul.f32 %v15920_v29, %v15916_v23 }
0x1a04   :  { %13596 = vmatprep.mubr.msk.f32.mxu0 %vm145_vm0, %v3180_v35 }
0x1a05   :  { %13597 = vmatmul.mubr.msk.f32.vlgmr.msra.gmra.mrb[38].mxu0 %vm145_vm0, %v3181_v32 }
0x1a06   :  { %13607 = vmatprep.mubr.msk.f32.mxu0 %vm491_vm1, %v3276_v4 }
0x1a08   :  { %14686 = vmatpush3.bf16.xpose.msk.msra.mxu0 %vm16555_vm2, %v14681_v18 }
0x1a09   :  { %14689 = vmatprep.subr.msk.bf16.mxu0 %vm16555_vm2, %v14687_v45 }
0x1a10   :  { %14692 = vmatpush3.bf16.xpose.msk.msra.mxu0 %vm16555_vm2, %v14687_v45 }
0x1a17   :  { %13608 = vmatmul.mubr.msk.f32.vlgmr.msra.gmra.mrb[40].mxu0 %vm491_vm1, %v3278_v47 }
0x1ad8   :  { %v17258_v48 = vpop.f32.mrb[38].mxu0 }
0x1ad9   :  { %v17260_v50 = vpop.f32.mrb[39].mxu0 }
0x1aea   :  { %v13609_v54 = vpop.f32.mrb[40].mxu0 }
0x1aeb   :  { %v3371_v62 = vadd.f32 %v13609_v54, %v17223_v38  ;;  %v3365_v37 = vpop.f32.mrb[41].mxu0 }
0x1aec   :  { %v3366_v40 = vadd.f32 %v3365_v37, %v17226_v22 }
0x1aed   :  { %v3377_v34 = vsel %vm145_vm0, %v3371_v62, -inf }
0x1aee   :  { %3378 = vmax.xlane.f32.xlu1 %v3377_v34  ;;  %v3374_v42 = vsel %vm145_vm0, %v3366_v40, -inf }
0x1aef   :  { %3375 = vmax.xlane.f32.xlu0 %v3374_v42 }
0x1aff   :  { %15472 = vrot.lane.b32.xlu1 %v17193_v59, %s16358_s24 }
0x1b03   :  { %15482 = vrot.lane.b32.xlu1 %v17193_v59, %s16365_s30 }
0x1b07   :  { %15487 = vrot.lane.b32.xlu1 %v17202_v26, %s16365_s30 }
0x1b0b   :  { %3491 = vrot.lane.b32.xlu1 %v17212_v1, %s16365_s30 }
0x1b7b   :  { %v3379_v60 = vpop.xlane.xlu1 %3378 }
0x1b7c   :  { %v3381_v44 = vsub.f32 %v3371_v62, %v3379_v60  ;;  %v3376_v23 = vpop.xlane.xlu0 %3375 }
0x1b7d   :  { %v3380_v19 = vsub.f32 %v3366_v40, %v3376_v23 }
0x1b7e   :  { %v3384_v12 = vmul.f32 1.442695, %v3381_v44 }
0x1b7f   :  { %v3382_v41 = vmul.f32 1.442695, %v3380_v19  ;;  %v15473_v9 = vpop.permute.xlu1 %15472 }
0x1b80   :  { %15921 = vpow2.f32 %v3384_v12  ;;  %v15475_v2 = vunpack.i.h.bf16 %v15473_v9  ;;  %v15474_v46 = vunpack.i.l.bf16 %v15473_v9 }
0x1b81   :  { %15923 = vpow2.f32 %v3382_v41 }
0x1b82   :  { %v14693_v14 = vpack.c.bf16 %v15475_v2, %v15474_v46 }
0x1b83   :  { %v15483_v25 = vpop.permute.xlu1 %15482 }
0x1b84   :  { %14694 = vmatprep.subr.bf16.mxu1 %v14693_v14  ;;  %v15485_v35 = vunpack.i.h.bf16 %v15483_v25  ;;  %v15484_v32 = vunpack.i.l.bf16 %v15483_v25 }
0x1b85   :  { %14696 = vmatpush3.bf16.msra.mxu1 %v14693_v14 }
0x1b86   :  { %v14701_v45 = vpack.c.bf16 %v15485_v35, %v15484_v32 }
0x1b87   :  { %v15488_v62 = vpop.permute.xlu1 %15487 }
0x1b88   :  { %v15490_v34 = vunpack.i.h.bf16 %v15488_v62  ;;  %v15489_v42 = vunpack.i.l.bf16 %v15488_v62 }
0x1b8a   :  { %v15922_v6 = vpop.eup %15921  ;;  %v14707_v44 = vpack.c.bf16 %v15490_v34, %v15489_v42 }
0x1b8b   :  { %v3389_v16 = vsel %vm145_vm0, %v15922_v6, 0.0  ;;  %v15924_v0 = vpop.eup %15923  ;;  %v3492_v23 = vpop.permute.xlu1 %3491 }
0x1b8c   :  { %3390 = vadd.xlane.f32.xlu0 %v3389_v16  ;;  %v3386_v24 = vsel %vm145_vm0, %v15924_v0, 0.0 }
0x1b90   :  { %3387 = vadd.xlane.f32.xlu0 %v3386_v24 }
0x1ba6   :  { %15477 = vrot.lane.b32.xlu0 %v17202_v26, %s16358_s24 }
0x1baa   :  { %3489 = vrot.lane.b32.xlu0 %v17204_v28, %s16365_s30 }
0x1c19   :  { %v3391_v18 = vpop.xlane.xlu0 %3390 }
0x1c1a   :  { %15925 = vrcp.f32 %v3391_v18 }
0x1c1d   :  { %v3388_v13 = vpop.xlane.xlu0 %3387 }
0x1c1e   :  { %15927 = vrcp.f32 %v3388_v13 }
0x1c21   :  { %v15478_v29 = vpop.permute.xlu0 %15477 }
0x1c22   :  { %v15480_v33 = vunpack.i.h.bf16 %v15478_v29  ;;  %v15479_v27 = vunpack.i.l.bf16 %v15478_v29 }
0x1c24   :  { %v14697_v4 = vpack.c.bf16 %v15480_v33, %v15479_v27  ;;  %v15926_v47 = vpop.eup %15925 }
0x1c25   :  { %v3395_v40 = vmul.f32 %v15926_v47, %v15922_v6  ;;  %v3490_v60 = vpop.permute.xlu0 %3489 }
0x1c26   :  { %14698 = vmatprep.subr.bf16.mxu1 %v14697_v4 }
0x1c27   :  { %14700 = vmatpush3.bf16.msra.mxu1 %v14697_v4 }
0x1c28   :  { %v15928_v54 = vpop.eup %15927  ;;  %14703 = vmatprep.subr.msk.bf16.mxu1 %vm16555_vm2, %v14701_v45 }
0x1c29   :  { %v3394_v37 = vmul.f32 %v15928_v54, %v15924_v0 }
0x1c2b   :  { %13618 = vmatprep.mubr.msk.f32.mxu1 %vm145_vm0, %v3394_v37 }
0x1c2c   :  { %13619 = vmatmul.mubr.msk.f32.vlgmr.msra.gmra.mrb[36].mxu1 %vm145_vm0, %v3395_v40 }
0x1c2d   :  { %13629 = vmatprep.mubr.msk.f32.mxu1 %vm491_vm1, %v3490_v60 }
0x1c30   :  { %14706 = vmatpush3.bf16.xpose.msk.msra.mxu1 %vm16555_vm2, %v14701_v45 }
0x1c31   :  { %14709 = vmatprep.subr.msk.bf16.mxu1 %vm16555_vm2, %v14707_v44 }
0x1c38   :  { %14712 = vmatpush3.bf16.xpose.msk.msra.mxu1 %vm16555_vm2, %v14707_v44 }
0x1c3f   :  { %13630 = vmatmul.mubr.msk.f32.vlgmr.msra.gmra.mrb[38].mxu1 %vm491_vm1, %v3492_v23 }
0x1cff   :  { %v17292_v19 = vpop.f32.mrb[36].mxu1 }
0x1d00   :  { %v17294_v12 = vpop.f32.mrb[37].mxu1 }
0x1d12   :  { %v13631_v41 = vpop.f32.mrb[38].mxu1 }
0x1d13   :  { %v3585_v9 = vadd.f32 %v13631_v41, %v17223_v38  ;;  %v3579_v2 = vpop.f32.mrb[39].mxu1 }
0x1d14   :  { %v3580_v46 = vadd.f32 %v3579_v2, %v17226_v22 }
0x1d15   :  { %v3591_v14 = vsel %vm145_vm0, %v3585_v9, -inf }
0x1d16   :  { %3592 = vmax.xlane.f32.xlu1 %v3591_v14  ;;  %v3588_v6 = vsel %vm145_vm0, %v3580_v46, -inf }
0x1d17   :  { %3589 = vmax.xlane.f32.xlu0 %v3588_v6 }
0x1d27   :  { %15492 = vrot.lane.b32.xlu1 %v17193_v59, %s16363_s28 }
0x1d2b   :  { %15502 = vrot.lane.b32.xlu1 %v17193_v59, %s16367_s11 }
0x1d2f   :  { %15507 = vrot.lane.b32.xlu1 %v17202_v26, %s16367_s11 }
0x1d33   :  { %3705 = vrot.lane.b32.xlu1 %v17212_v1, %s16367_s11 }
0x1da3   :  { %v3593_v16 = vpop.xlane.xlu1 %3592 }
0x1da4   :  { %v3595_v0 = vsub.f32 %v3585_v9, %v3593_v16  ;;  %v3590_v24 = vpop.xlane.xlu0 %3589 }
0x1da5   :  { %v3594_v18 = vsub.f32 %v3580_v46, %v3590_v24  ;;  %v4074_v24 = vld [vmem:[%s19484_s4 + $0xe0] sm:$0xff] }
0x1da6   :  { %v3598_v13 = vmul.f32 1.442695, %v3595_v0 }
0x1da7   :  { %v3596_v25 = vmul.f32 1.442695, %v3594_v18  ;;  %v15493_v29 = vpop.permute.xlu1 %15492  ;;  %v4075_v18 = vld [vmem:[%s19484_s4 + $0xe8] sm:$0xff] }
0x1da8   :  { %15929 = vpow2.f32 %v3598_v13  ;;  %v15495_v35 = vunpack.i.h.bf16 %v15493_v29  ;;  %v15494_v32 = vunpack.i.l.bf16 %v15493_v29  ;;  %v14749_v13 = vpack.c.bf16 %v4075_v18, %v4074_v24  ;;  %v4077_v29 = vld [vmem:[%s19484_s4 + $0xf8] sm:$0xff] }
0x1da9   :  { %15931 = vpow2.f32 %v3596_v25  ;;  %v4076_v25 = vld [vmem:[%s19484_s4 + $0xf0] sm:$0xff] }
0x1daa   :  { %v14713_v33 = vpack.c.bf16 %v15495_v35, %v15494_v32  ;;  %v14753_v35 = vpack.c.bf16 %v4077_v29, %v4076_v25 }
0x1dab   :  { %v15503_v62 = vpop.permute.xlu1 %15502 }
0x1dac   :  { %14714 = vmatprep.subr.bf16.mxu0 %v14713_v33  ;;  %v15505_v40 = vunpack.i.h.bf16 %v15503_v62  ;;  %v15504_v34 = vunpack.i.l.bf16 %v15503_v62 }
0x1dad   :  { %14716 = vmatpush3.bf16.msra.mxu0 %v14713_v33 }
0x1dae   :  { %v14721_v23 = vpack.c.bf16 %v15505_v40, %v15504_v34 }
0x1daf   :  { %v15508_v2 = vpop.permute.xlu1 %15507 }
0x1db0   :  { %v15510_v14 = vunpack.i.h.bf16 %v15508_v2  ;;  %v15509_v6 = vunpack.i.l.bf16 %v15508_v2 }
0x1db2   :  { %v15930_v27 = vpop.eup %15929  ;;  %v14727_v0 = vpack.c.bf16 %v15510_v14, %v15509_v6 }
0x1db3   :  { %v3603_v4 = vsel %vm145_vm0, %v15930_v27, 0.0  ;;  %v15932_v45 = vpop.eup %15931  ;;  %v3706_v32 = vpop.permute.xlu1 %3705 }
0x1db4   :  { %3604 = vadd.xlane.f32.xlu0 %v3603_v4  ;;  %v3600_v1 = vsel %vm145_vm0, %v15932_v45, 0.0 }
0x1db8   :  { %3601 = vadd.xlane.f32.xlu0 %v3600_v1 }
0x1dce   :  { %15497 = vrot.lane.b32.xlu0 %v17202_v26, %s16363_s28 }
0x1dd2   :  { %3703 = vrot.lane.b32.xlu0 %v17204_v28, %s16367_s11 }
0x1e41   :  { %v3605_v47 = vpop.xlane.xlu0 %3604 }
0x1e42   :  { %15933 = vrcp.f32 %v3605_v47 }
0x1e45   :  { %v3602_v54 = vpop.xlane.xlu0 %3601 }
0x1e46   :  { %15935 = vrcp.f32 %v3602_v54 }
0x1e49   :  { %v15498_v37 = vpop.permute.xlu0 %15497 }
0x1e4a   :  { %v15500_v42 = vunpack.i.h.bf16 %v15498_v37  ;;  %v15499_v60 = vunpack.i.l.bf16 %v15498_v37  ;;  %v12370_v37 = vld [vmem:[%s19484_s4 + $0x3e9] ss:$0 sm:$0xff] }
0x1e4c   :  { %v14717_v44 = vpack.c.bf16 %v15500_v42, %v15499_v60  ;;  %v15934_v41 = vpop.eup %15933 }
0x1e4d   :  { %v3609_v46 = vmul.f32 %v15934_v41, %v15930_v27  ;;  %v3704_v16 = vpop.permute.xlu0 %3703 }
0x1e4e   :  { %14718 = vmatprep.subr.bf16.mxu0 %v14717_v44 }
0x1e4f   :  { %14720 = vmatpush3.bf16.msra.mxu0 %v14717_v44 }
0x1e50   :  { %v15936_v9 = vpop.eup %15935  ;;  %14723 = vmatprep.subr.msk.bf16.mxu0 %vm16555_vm2, %v14721_v23 }
0x1e51   :  { %v3608_v28 = vmul.f32 %v15936_v9, %v15932_v45 }
0x1e53   :  { %13640 = vmatprep.mubr.msk.f32.mxu0 %vm145_vm0, %v3608_v28 }
0x1e54   :  { %13641 = vmatmul.mubr.msk.f32.vlgmr.msra.gmra.mrb[42].mxu0 %vm145_vm0, %v3609_v46 }
0x1e55   :  { %13651 = vmatprep.mubr.msk.f32.mxu0 %vm491_vm1, %v3704_v16 }
0x1e58   :  { %14726 = vmatpush3.bf16.xpose.msk.msra.mxu0 %vm16555_vm2, %v14721_v23 }
0x1e59   :  { %14729 = vmatprep.subr.msk.bf16.mxu0 %vm16555_vm2, %v14727_v0 }
0x1e60   :  { %14732 = vmatpush3.bf16.xpose.msk.msra.mxu0 %vm16555_vm2, %v14727_v0 }
0x1e61   :  { %14750 = vmatprep.subr.bf16.mxu0 %v14749_v13 }
0x1e67   :  { %13652 = vmatmul.mubr.msk.f32.vlgmr.msra.gmra.mrb[44].mxu0 %vm491_vm1, %v3706_v32 }
0x1e68   :  { %14752 = vmatpush3.bf16.msra.mxu0 %v14749_v13  ;;  %13684 = vmatprep.mubr.msk.f32.mxu0 %vm145_vm0, %v17156_v15 }
0x1e69   :  { %14754 = vmatprep.subr.bf16.mxu0 %v14753_v35 }
0x1e6c   :  { %14756 = vmatpush3.bf16.msra.mxu0 %v14753_v35 }
0x1e6f   :  { %13685 = vmatmul.mubr.msk.f32.vlgmr.msra.gmra.mrb[46].mxu0 %vm145_vm0, %v17158_v7 }
0x1e70   :  { %13687 = vmatprep.mubr.msk.f32.mxu0 %vm145_vm0, %v17168_v58 }
0x1e73   :  { %13688 = vmatmul.mubr.msk.f32.gmra.mrb[48].mxu0 %vm145_vm0, %v17180_v5 }
0x1f27   :  { %v13642_v33 = vpop.f32.mrb[42].mxu0 }
0x1f28   :  { %v3694_v27 = vpop.f32.mrb[43].mxu0 }
0x1f3a   :  { %v13653_v4 = vpop.f32.mrb[44].mxu0 }
0x1f3b   :  { %v3799_v45 = vadd.f32 %v13653_v4, %v17223_v38  ;;  %v3793_v1 = vpop.f32.mrb[45].mxu0 }
0x1f3c   :  { %v3794_v47 = vadd.f32 %v3793_v1, %v17226_v22 }
0x1f3d   :  { %v3805_v54 = vsel %vm145_vm0, %v3799_v45, -inf }
0x1f3e   :  { %3806 = vmax.xlane.f32.xlu1 %v3805_v54  ;;  %v3802_v62 = vsel %vm145_vm0, %v3794_v47, -inf }
0x1f3f   :  { %3803 = vmax.xlane.f32.xlu0 %v3802_v62 }
0x1f42   :  { %v13686_v40 = vpop.f32.mrb[46].mxu0 }
0x1f43   :  { %v17353_v34 = vadd.f32 %v13686_v40, %v12370_v37  ;;  %v4149_v42 = vpop.f32.mrb[47].mxu0 }
0x1f44   :  { %v17355_v60 = vadd.f32 %v12370_v37, %v4149_v42  ;;  %v3065_v42 = vld [vmem:[%s19484_s4 + $0xd8] sm:$0xff] }
0x1f46   :  { %v13689_v44 = vpop.f32.mrb[48].mxu0  ;;  %13705 = vmatprep.mubr.msk.f32.mxu0 %vm491_vm1, %v17355_v60 }
0x1f47   :  { %v17359_v23 = vadd.f32 %v13689_v44, %v12370_v37  ;;  %v4159_v41 = vpop.f32.mrb[49].mxu0 }
0x1f48   :  { %v17361_v9 = vadd.f32 %v12370_v37, %v4159_v41  ;;  %v3064_v37 = vld [vmem:[%s19484_s4 + $0xd0] sm:$0xff] }
0x1f49   :  { %v14745_v44 = vpack.c.bf16 %v3065_v42, %v3064_v37 }
0x1f4f   :  { %15512 = vrot.lane.b32.xlu1 %v17193_v59, %s16366_s10 }
0x1f53   :  { %3919 = vrot.lane.b32.xlu1 %v17294_v12, %s16369_s16 }
0x1f57   :  { %3921 = vrot.lane.b32.xlu1 %v17292_v19, %s16369_s16 }
0x1f5b   :  { %3929 = vrot.lane.b32.xlu1 %v13642_v33, %s16371_s18 }
0x1fcb   :  { %v3807_v2 = vpop.xlane.xlu1 %3806 }
0x1fcc   :  { %v3809_v28 = vsub.f32 %v3799_v45, %v3807_v2  ;;  %v3804_v46 = vpop.xlane.xlu0 %3803 }
0x1fcd   :  { %v3808_v14 = vsub.f32 %v3794_v47, %v3804_v46 }
0x1fce   :  { %v3812_v6 = vmul.f32 1.442695, %v3809_v28 }
0x1fcf   :  { %v3810_v16 = vmul.f32 1.442695, %v3808_v14  ;;  %v15513_v0 = vpop.permute.xlu1 %15512 }
0x1fd0   :  { %15937 = vpow2.f32 %v3812_v6  ;;  %v15515_v24 = vunpack.i.h.bf16 %v15513_v0  ;;  %v15514_v18 = vunpack.i.l.bf16 %v15513_v0 }
0x1fd1   :  { %15939 = vpow2.f32 %v3810_v16 }
0x1fd2   :  { %v14733_v59 = vpack.c.bf16 %v15515_v24, %v15514_v18 }
0x1fd3   :  { %v3920_v28 = vpop.permute.xlu1 %3919 }
0x1fd4   :  { %14734 = vmatprep.subr.bf16.mxu1 %v14733_v59  ;;  %v3941_v16 = vsel %vm491_vm1, %v17260_v50, %v3920_v28  ;;  %v12365_v50 = vld [vmem:[%s19484_s4 + $0x3e8] ss:$0 sm:$0xff]  ;;  %v4171_v28 = vld [vmem:[%s19485_s5 + $0x38] sm:$0xff] }
0x1fd5   :  { %14736 = vmatpush3.bf16.msra.mxu1 %v14733_v59 }
0x1fd7   :  { %v3922_v46 = vpop.permute.xlu1 %3921 }
0x1fd8   :  { %v3942_v24 = vsel %vm491_vm1, %v17258_v48, %v3922_v46 }
0x1fda   :  { %v15938_v12 = vpop.eup %15937 }
0x1fdb   :  { %v3817_v13 = vsel %vm145_vm0, %v15938_v12, 0.0  ;;  %v15940_v19 = vpop.eup %15939  ;;  %v3930_v14 = vpop.permute.xlu1 %3929 }
0x1fdc   :  { %3818 = vadd.xlane.f32.xlu0 %v3817_v13  ;;  %v3814_v25 = vsel %vm145_vm0, %v15940_v19, 0.0 }
0x1fe0   :  { %3815 = vadd.xlane.f32.xlu0 %v3814_v25 }
0x1ff6   :  { %15517 = vrot.lane.b32.xlu0 %v17202_v26, %s16366_s10  ;;  %v3062_v26 = vld [vmem:[%s19484_s4 + $0xc0] sm:$0xff] }
0x1ffa   :  { %3927 = vrot.lane.b32.xlu0 %v3694_v27, %s16371_s18  ;;  %v3063_v27 = vld [vmem:[%s19484_s4 + $0xc8] sm:$0xff] }
0x1ffb   :  { %v14741_v40 = vpack.c.bf16 %v3063_v27, %v3062_v26 }
0x2069   :  { %v3819_v29 = vpop.xlane.xlu0 %3818 }
0x206a   :  { %15941 = vrcp.f32 %v3819_v29 }
0x206d   :  { %v3816_v35 = vpop.xlane.xlu0 %3815 }
0x206e   :  { %15943 = vrcp.f32 %v3816_v35 }
0x2071   :  { %v15518_v32 = vpop.permute.xlu0 %15517 }
0x2072   :  { %v15520_v33 = vunpack.i.h.bf16 %v15518_v32  ;;  %v15519_v4 = vunpack.i.l.bf16 %v15518_v32 }
0x2074   :  { %v14737_v45 = vpack.c.bf16 %v15520_v33, %v15519_v4  ;;  %v15942_v1 = vpop.eup %15941 }
0x2075   :  { %v3823_v62 = vmul.f32 %v15942_v1, %v15938_v12  ;;  %v3928_v6 = vpop.permute.xlu0 %3927  ;;  %v3944_v12 = vsel %vm575_vm5, %v3942_v24, %v3930_v14 }
0x2076   :  { %14738 = vmatprep.subr.bf16.mxu1 %v14737_v45  ;;  %v3943_v18 = vsel %vm575_vm5, %v3941_v16, %v3928_v6 }
0x2077   :  { %14740 = vmatpush3.bf16.msra.mxu1 %v14737_v45 }
0x2078   :  { %v15944_v47 = vpop.eup %15943  ;;  %14742 = vmatprep.subr.bf16.mxu1 %v14741_v40 }
0x2079   :  { %v3822_v54 = vmul.f32 %v15944_v47, %v15940_v19 }
0x207b   :  { %13662 = vmatprep.mubr.msk.f32.mxu1 %vm145_vm0, %v3822_v54 }
0x207c   :  { %13663 = vmatmul.mubr.msk.f32.vlgmr.msra.gmra.mrb[40].mxu1 %vm145_vm0, %v3823_v62 }
0x207d   :  { %14744 = vmatpush3.bf16.msra.mxu1 %v14741_v40 }
0x207e   :  { %14746 = vmatprep.subr.bf16.mxu1 %v14745_v44 }
0x2081   :  { %14748 = vmatpush3.bf16.msra.mxu1 %v14745_v44  ;;  %v4169_v44 = vld [vmem:[%s19485_s5 + $0x28] sm:$0xff] }
0x214f   :  { %v13664_v41 = vpop.f32.mrb[40].mxu1 }
0x2150   :  { %3937 = vrot.lane.b32.xlu1 %v13664_v41, %s16372_s13  ;;  %v3908_v2 = vpop.f32.mrb[41].mxu1  ;;  %v4170_v41 = vld [vmem:[%s19485_s5 + $0x30] sm:$0xff] }
0x2151   :  { %3935 = vrot.lane.b32.xlu0 %v3908_v2, %s16372_s13  ;;  %v14761_v46 = vpack.c.bf16 %v4171_v28, %v4170_v41 }
0x21c2   :  { %v3938_v0 = vpop.permute.xlu1 %3937 }
0x21c3   :  { %v3936_v59 = vpop.permute.xlu0 %3935  ;;  %v3946_v19 = vsel %vm1313_vm6, %v3944_v12, %v3938_v0  ;;  %v12368_v12 = vld [vmem:[%s19484_s4 + $0x3ef] ss:$0 sm:$0xff] }
0x21c4   :  { %v3945_v13 = vsel %vm1313_vm6, %v3943_v18, %v3936_v59 }
0x21c5   :  { %13673 = vmatprep.mubr.msk.f32.mxu1 %vm145_vm0, %v3945_v13 }
0x21c6   :  { %13674 = vmatmul.mubr.msk.f32.vlgmr.msra.gmra.mrb[42].mxu1 %vm145_vm0, %v3946_v19  ;;  %v12369_v19 = vld [vmem:[%s19484_s4 + $0x3f0] ss:$0 sm:$0xff] }
0x2299   :  { %v13675_v25 = vpop.f32.mrb[42].mxu1 }
0x229a   :  { %v4029_v29 = vadd.f32 %v13675_v25, %v12365_v50  ;;  %v4023_v48 = vpop.f32.mrb[43].mxu1 }
0x229b   :  { %v4024_v35 = vadd.f32 %v12365_v50, %v4023_v48 }
0x229c   :  { %v4033_v32 = vadd.f32 %v4029_v29, %v17186_v51 }
0x229d   :  { %v4032_v33 = vadd.f32 %v4024_v35, %v17178_v36  ;;  %v4168_v36 = vld [vmem:[%s19485_s5 + $0x20] sm:$0xff] }
0x229e   :  { %v4037_v4 = vsel %vm145_vm0, %v4033_v32, 0.0  ;;  %v14757_v2 = vpack.c.bf16 %v4169_v44, %v4168_v36 }
0x229f   :  { %4038 = vadd.xlane.f32.xlu1 %v4037_v4  ;;  %v4034_v45 = vsel %vm145_vm0, %v4032_v33, 0.0 }
0x22a0   :  { %4035 = vadd.xlane.f32.xlu0 %v4034_v45  ;;  %14758 = vmatprep.subr.bf16.mxu1 %v14757_v2 }
0x22a1   :  { %14760 = vmatpush3.bf16.msra.mxu1 %v14757_v2 }
0x22a2   :  { %14762 = vmatprep.subr.bf16.mxu1 %v14761_v46 }
0x22a5   :  { %14764 = vmatpush3.bf16.msra.mxu1 %v14761_v46 }
0x232c   :  { %v4039_v1 = vpop.xlane.xlu1 %4038 }
0x232d   :  { %v4041_v47 = vmul.f32 0.03125, %v4039_v1  ;;  %v4036_v54 = vpop.xlane.xlu0 %4035 }
0x232e   :  { %v4040_v62 = vmul.f32 0.03125, %v4036_v54 }
0x232f   :  { %v4043_v26 = vsub.f32 %v4033_v32, %v4041_v47 }
0x2330   :  { %v4042_v27 = vsub.f32 %v4032_v33, %v4040_v62  ;;  %v12375_v33 = vld [vmem:[%s19485_s5 + $0x81] ss:$0 sm:$0xff] }
0x2331   :  { %v4045_v42 = vmul.f32 %v4043_v26, %v4043_v26 }
0x2332   :  { %v4044_v37 = vmul.f32 %v4042_v27, %v4042_v27 }
0x2333   :  { %v4049_v51 = vsel %vm145_vm0, %v4045_v42, 0.0  ;;  %v19510_v42 = vfloor.f32 %v16824_v56 }
0x2334   :  { %v4046_v40 = vsel %vm145_vm0, %v4044_v37, 0.0 }
0x2335   :  { %4047 = vadd.xlane.f32.xlu0 %v4046_v40  ;;  %vm91_vm15 = vcmp.eq.f32.partialorder %v19510_v42, %v16589_v49 }
0x2336   :  { %v17469_v41 = vsel %vm91_vm15, 0.0, %v19506_v10 }
0x2337   :  { %19511 = vst [vmem:[#allocation9_spill] sm:$0xff] %v17469_v41 }
0x2339   :  { %4050 = vadd.xlane.f32.xlu0 %v4049_v51 }
0x23c2   :  { %v4048_v14 = vpop.xlane.xlu0 %4047 }
0x23c3   :  { %v4052_v6 = vmul.f32 0.03125, %v4048_v14 }
0x23c5   :  { %v4054_v16 = vadd.f32 1e-05, %v4052_v6  ;;  %v19512_v6 = vfloor.f32 %v16822_v55 }
0x23c6   :  { %v4051_v0 = vpop.xlane.xlu0 %4050 }
0x23c7   :  { %15945 = vrsqrt.f32 %v4054_v16  ;;  %v4053_v24 = vmul.f32 0.03125, %v4051_v0  ;;  %vm90_vm3 = vcmp.eq.f32.partialorder %v19512_v6, %v16589_v49 }
0x23c8   :  { %v17485_v16 = vsel %vm90_vm3, 0.0, %v19506_v10 }
0x23c9   :  { %v4055_v18 = vadd.f32 1e-05, %v4053_v24  ;;  %19513 = vst [vmem:[#allocation10_spill] sm:$0xff] %v17485_v16 }
0x23cb   :  { %15947 = vrsqrt.f32 %v4055_v18 }
0x23d1   :  { %v15946_v59 = vpop.eup %15945 }
0x23d2   :  { %v4058_v13 = vmul.f32 %v15946_v59, %v4042_v27  ;;  %v19508_v27 = vfloor.f32 %v16816_v39 }
0x23d4   :  { %v4065_v50 = vmul.f32 %v12368_v12, %v4058_v13  ;;  %vm88_vm14 = vcmp.eq.f32.partialorder %v19508_v27, %v16589_v49 }
0x23d5   :  { %v15948_v25 = vpop.eup %15947  ;;  %v17461_v40 = vsel %vm88_vm14, 0.0, %v19506_v10 }
0x23d6   :  { %v4059_v29 = vmul.f32 %v15948_v25, %v4043_v26  ;;  %v17428_v48 = vadd.f32 %v12369_v19, %v4065_v50  ;;  %v19507_v26 = vfloor.f32 %v16812_v61  ;;  %19509 = vst [vmem:[#allocation8_spill] sm:$0xff] %v17461_v40 }
0x23d8   :  { %v4066_v35 = vmul.f32 %v12368_v12, %v4059_v29  ;;  %13698 = vmatprep.mubr.msk.f32.mxu1 %vm145_vm0, %v17428_v48  ;;  %vm89_vm13 = vcmp.eq.f32.partialorder %v19507_v26, %v16589_v49 }
0x23d9   :  { %v17458_v37 = vsel %vm89_vm13, 0.0, %v19506_v10 }
0x23da   :  { %v17432_v32 = vadd.f32 %v12369_v19, %v4066_v35 }
0x23dc   :  { %13699 = vmatmul.mubr.msk.f32.vlgmr.msra.gmra.mrb[44].mxu1 %vm145_vm0, %v17432_v32 }
0x24af   :  { %v13700_v4 = vpop.f32.mrb[44].mxu1 }
0x24b0   :  { %v4255_v45 = vadd.f32 %v13700_v4, %v12375_v33  ;;  %v4249_v1 = vpop.f32.mrb[45].mxu1 }
0x24b1   :  { %v4250_v47 = vadd.f32 %v12375_v33, %v4249_v1 }
0x24b3   :  { %v14765_v54 = vpack.c.bf16 %v4255_v45, %v4250_v47  ;;  %v17439_v62 = vpack.i.bf16 %v4255_v45, %v4250_v47 }
0x24b5   :  { %14767 = vmatprep.subr.msk.bf16.mxu0 %vm16555_vm2, %v14765_v54 }
0x24b6   :  { %14770 = vmatpush3.bf16.xpose.msk.msra.mxu0 %vm16555_vm2, %v14765_v54 }
0x24bd   :  { %13706 = vmatmul.mubr.msk.f32.vlgmr.msra.gmra.mrb[50].mxu0 %vm491_vm1, %v17353_v34 }
0x24be   :  { %13708 = vmatprep.mubr.msk.f32.mxu0 %vm491_vm1, %v17361_v9 }
0x24c1   :  { %13709 = vmatmul.mubr.msk.f32.gmra.mrb[52].mxu0 %vm491_vm1, %v17359_v23 }
0x2590   :  { %v13707_v51 = vpop.f32.mrb[50].mxu0 }
0x2591   :  { %v4353_v36 = vadd.f32 %v13707_v51, %v17458_v37  ;;  %v4347_v44 = vpop.f32.mrb[51].mxu0 }
0x2592   :  { %v4348_v61 = vadd.f32 %v4347_v44, %v17461_v40 }
0x2593   :  { %v4369_v39 = vsel %vm575_vm5, %v4353_v36, -inf }
0x2594   :  { %4370 = vmax.xlane.f32.xlu0 %v4369_v39  ;;  %v13710_v2 = vpop.f32.mrb[52].mxu0  ;;  %v4366_v28 = vsel %vm575_vm5, %v4348_v61, -inf }
0x2595   :  { %v4363_v46 = vadd.f32 %v13710_v2, %v17469_v41  ;;  %v4357_v14 = vpop.f32.mrb[53].mxu0  ;;  %4367 = vmax.xlane.f32.xlu1 %v4366_v28 }
0x2596   :  { %v4358_v0 = vadd.f32 %v4357_v14, %v17485_v16 }
0x2597   :  { %v4375_v56 = vsel %vm575_vm5, %v4363_v46, -inf }
0x2598   :  { %4376 = vmax.xlane.f32.xlu0 %v4375_v56  ;;  %v4372_v24 = vsel %vm575_vm5, %v4358_v0, -inf }
0x25a6   :  { %15522 = vrot.lane.b32.xlu1 %v17439_v62, %s16359_s25 }
0x25aa   :  { %15532 = vrot.lane.b32.xlu1 %v17439_v62, %s16365_s30 }
0x25ae   :  { %15527 = vrot.lane.b32.xlu0 %v17439_v62, %s16360_s26 }
0x25ce   :  { %4373 = vmax.xlane.f32.xlu1 %v4372_v24 }
0x25df   :  { %4513 = vrot.lane.b32.xlu1 %v17355_v60, %s16360_s26 }
0x2621   :  { %v4371_v18 = vpop.xlane.xlu0 %4370 }
0x2622   :  { %v4379_v59 = vsub.f32 %v4353_v36, %v4371_v18  ;;  %v4368_v12 = vpop.xlane.xlu1 %4367 }
0x2623   :  { %v4378_v13 = vsub.f32 %v4348_v61, %v4368_v12 }
0x2624   :  { %v4384_v19 = vmul.f32 1.442695, %v4379_v59 }
0x2625   :  { %v4382_v50 = vmul.f32 1.442695, %v4378_v13  ;;  %v4377_v25 = vpop.xlane.xlu0 %4376 }
0x2626   :  { %15949 = vpow2.f32 %v4384_v19  ;;  %v4381_v49 = vsub.f32 %v4363_v46, %v4377_v25  ;;  %v15523_v55 = vpop.permute.xlu1 %15522 }
0x2627   :  { %15951 = vpow2.f32 %v4382_v50  ;;  %v15525_v10 = vunpack.i.h.bf16 %v15523_v55  ;;  %v15524_v29 = vunpack.i.l.bf16 %v15523_v55 }
0x2628   :  { %v4388_v35 = vmul.f32 1.442695, %v4381_v49 }
0x2629   :  { %v15528_v33 = vpop.permute.xlu0 %15527  ;;  %v14771_v4 = vpack.c.bf16 %v15525_v10, %v15524_v29 }
0x262a   :  { %15953 = vpow2.f32 %v4388_v35  ;;  %v15530_v45 = vunpack.i.h.bf16 %v15528_v33  ;;  %v15529_v1 = vunpack.i.l.bf16 %v15528_v33  ;;  %v15533_v44 = vpop.permute.xlu1 %15532 }
0x262b   :  { %14772 = vmatprep.subr.bf16.mxu1 %v14771_v4  ;;  %v15534_v24 = vunpack.i.l.bf16 %v15533_v44 }
0x262c   :  { %v14775_v47 = vpack.c.bf16 %v15530_v45, %v15529_v1  ;;  %14774 = vmatpush3.bf16.msra.mxu1 %v14771_v4 }
0x262e   :  { %14777 = vmatprep.subr.msk.bf16.mxu1 %vm16555_vm2, %v14775_v47 }
0x2630   :  { %v15950_v54 = vpop.eup %15949 }
0x2631   :  { %v15952_v26 = vpop.eup %15951  ;;  %v4393_v27 = vsel %vm575_vm5, %v15950_v54, 0.0 }
0x2632   :  { %4394 = vadd.xlane.f32.xlu0 %v4393_v27  ;;  %v4390_v42 = vsel %vm575_vm5, %v15952_v26, 0.0 }
0x2633   :  { %4391 = vadd.xlane.f32.xlu1 %v4390_v42 }
0x2634   :  { %v15954_v51 = vpop.eup %15953 }
0x2635   :  { %v4399_v36 = vsel %vm575_vm5, %v15954_v51, 0.0 }
0x2636   :  { %4400 = vadd.xlane.f32.xlu0 %v4399_v36 }
0x2644   :  { %4517 = vrot.lane.b32.xlu1 %v17361_v9, %s16360_s26 }
0x264c   :  { %4515 = vrot.lane.b32.xlu0 %v17353_v34, %s16360_s26 }
0x2650   :  { %4519 = vrot.lane.b32.xlu0 %v17359_v23, %s16360_s26 }
0x2654   :  { %4769 = vrot.lane.b32.xlu0 %v17355_v60, %s16365_s30 }
0x2658   :  { %4773 = vrot.lane.b32.xlu0 %v17361_v9, %s16365_s30 }
0x265b   :  { %v4374_v61 = vpop.xlane.xlu1 %4373 }
0x265c   :  { %v4380_v39 = vsub.f32 %v4358_v0, %v4374_v61  ;;  %5025 = vrot.lane.b32.xlu0 %v17355_v60, %s16367_s11  ;;  %v15535_v0 = vunpack.i.h.bf16 %v15533_v44 }
0x265e   :  { %v4386_v2 = vmul.f32 1.442695, %v4380_v39  ;;  %v14785_v12 = vpack.c.bf16 %v15535_v0, %v15534_v24 }
0x265f   :  { %v4514_v60 = vpop.permute.xlu1 %4513 }
0x2660   :  { %15955 = vpow2.f32 %v4386_v2  ;;  %5029 = vrot.lane.b32.xlu0 %v17361_v9, %s16367_s11 }
0x266a   :  { %v15956_v28 = vpop.eup %15955 }
0x266b   :  { %v4396_v46 = vsel %vm575_vm5, %v15956_v28, 0.0 }
0x266c   :  { %4397 = vadd.xlane.f32.xlu1 %v4396_v46 }
0x267d   :  { %15537 = vrot.lane.b32.xlu1 %v17439_v62, %s16367_s11 }
0x2681   :  { %4771 = vrot.lane.b32.xlu1 %v17353_v34, %s16365_s30 }
0x2685   :  { %4775 = vrot.lane.b32.xlu1 %v17359_v23, %s16365_s30 }
0x2689   :  { %5027 = vrot.lane.b32.xlu1 %v17353_v34, %s16367_s11 }
0x268d   :  { %5031 = vrot.lane.b32.xlu1 %v17359_v23, %s16367_s11 }
0x26bf   :  { %v4395_v9 = vpop.xlane.xlu0 %4394 }
0x26c0   :  { %15957 = vrcp.f32 %v4395_v9  ;;  %v4392_v14 = vpop.xlane.xlu1 %4391 }
0x26c1   :  { %15959 = vrcp.f32 %v4392_v14 }
0x26c3   :  { %v4401_v23 = vpop.xlane.xlu0 %4400 }
0x26c4   :  { %v4518_v34 = vpop.permute.xlu1 %4517  ;;  %15961 = vrcp.f32 %v4401_v23 }
0x26c7   :  { %v4516_v19 = vpop.permute.xlu0 %4515 }
0x26ca   :  { %v15958_v56 = vpop.eup %15957 }
0x26cb   :  { %v15960_v6 = vpop.eup %15959  ;;  %v4407_v59 = vmul.f32 %v15958_v56, %v15950_v54  ;;  %v4520_v49 = vpop.permute.xlu0 %4519 }
0x26cc   :  { %v4406_v18 = vmul.f32 %v15960_v6, %v15952_v26 }
0x26ce   :  { %13715 = vmatprep.mubr.msk.f32.mxu1 %vm575_vm5, %v4406_v18  ;;  %v15962_v50 = vpop.eup %15961 }
0x26cf   :  { %13716 = vmatmul.mubr.msk.f32.vlgmr.msra.gmra.mrb[46].mxu1 %vm575_vm5, %v4407_v59  ;;  %v4409_v29 = vmul.f32 %v15962_v50, %v15954_v51  ;;  %v4770_v4 = vpop.permute.xlu0 %4769 }
0x26d0   :  { %14780 = vmatpush3.bf16.xpose.msk.msra.mxu1 %vm16555_vm2, %v14775_v47 }
0x26d1   :  { %14787 = vmatprep.subr.msk.bf16.mxu1 %vm16555_vm2, %v14785_v12 }
0x26d3   :  { %v4774_v47 = vpop.permute.xlu0 %4773 }
0x26d7   :  { %v5026_v26 = vpop.permute.xlu0 %5025 }
0x26db   :  { %v5030_v42 = vpop.permute.xlu0 %5029 }
0x26f9   :  { %v4398_v13 = vpop.xlane.xlu1 %4397 }
0x26fa   :  { %15963 = vrcp.f32 %v4398_v13 }
0x26fd   :  { %v15538_v55 = vpop.permute.xlu1 %15537 }
0x26fe   :  { %v15540_v35 = vunpack.i.h.bf16 %v15538_v55  ;;  %v15539_v33 = vunpack.i.l.bf16 %v15538_v55 }
0x2700   :  { %v14795_v45 = vpack.c.bf16 %v15540_v35, %v15539_v33 }
0x2701   :  { %v4772_v1 = vpop.permute.xlu1 %4771 }
0x2704   :  { %v15964_v25 = vpop.eup %15963 }
0x2705   :  { %v4408_v10 = vmul.f32 %v15964_v25, %v15956_v28  ;;  %v4776_v54 = vpop.permute.xlu1 %4775 }
0x2707   :  { %13718 = vmatprep.mubr.msk.f32.mxu1 %vm575_vm5, %v4408_v10 }
0x2708   :  { %13719 = vmatmul.mubr.msk.f32.gmra.mrb[48].mxu1 %vm575_vm5, %v4409_v29 }
0x2709   :  { %13725 = vmatprep.mubr.msk.f32.mxu1 %vm491_vm1, %v4514_v60  ;;  %v5028_v27 = vpop.permute.xlu1 %5027 }
0x270c   :  { %13726 = vmatmul.mubr.msk.f32.vlgmr.msra.gmra.mrb[50].mxu1 %vm491_vm1, %v4516_v19 }
0x270d   :  { %14790 = vmatpush3.bf16.xpose.msk.msra.mxu1 %vm16555_vm2, %v14785_v12  ;;  %13728 = vmatprep.mubr.msk.f32.mxu1 %vm491_vm1, %v4518_v34  ;;  %v5032_v51 = vpop.permute.xlu1 %5031 }
0x270e   :  { %14797 = vmatprep.subr.msk.bf16.mxu1 %vm16555_vm2, %v14795_v45 }
0x2710   :  { %13729 = vmatmul.mubr.msk.f32.gmra.mrb[52].mxu1 %vm491_vm1, %v4520_v49 }
0x2711   :  { %13745 = vmatprep.mubr.msk.f32.mxu1 %vm491_vm1, %v4770_v4 }
0x2714   :  { %13746 = vmatmul.mubr.msk.f32.vlgmr.msra.gmra.mrb[54].mxu1 %vm491_vm1, %v4772_v1 }
0x2715   :  { %14800 = vmatpush3.bf16.xpose.msk.msra.mxu1 %vm16555_vm2, %v14795_v45  ;;  %13748 = vmatprep.mubr.msk.f32.mxu1 %vm491_vm1, %v4774_v47 }
0x2718   :  { %13749 = vmatmul.mubr.msk.f32.gmra.mrb[56].mxu1 %vm491_vm1, %v4776_v54 }
0x2719   :  { %13765 = vmatprep.mubr.msk.f32.mxu1 %vm491_vm1, %v5026_v26 }
0x271c   :  { %13766 = vmatmul.mubr.msk.f32.vlgmr.msra.gmra.mrb[58].mxu1 %vm491_vm1, %v5028_v27 }
0x271d   :  { %13768 = vmatprep.mubr.msk.f32.mxu1 %vm491_vm1, %v5030_v42 }
0x2720   :  { %13769 = vmatmul.mubr.msk.f32.gmra.mrb[60].mxu1 %vm491_vm1, %v5032_v51 }
0x27a2   :  { %v17547_v36 = vpop.f32.mrb[46].mxu1 }
0x27a3   :  { %v17549_v44 = vpop.f32.mrb[47].mxu1 }
0x27db   :  { %v17551_v61 = vpop.f32.mrb[48].mxu1 }
0x27dc   :  { %v17553_v39 = vpop.f32.mrb[49].mxu1 }
0x27df   :  { %v13727_v2 = vpop.f32.mrb[50].mxu1 }
0x27e0   :  { %v4609_v28 = vadd.f32 %v13727_v2, %v17458_v37  ;;  %v4603_v46 = vpop.f32.mrb[51].mxu1 }
0x27e1   :  { %v4604_v60 = vadd.f32 %v4603_v46, %v17461_v40 }
0x27e2   :  { %v4625_v9 = vsel %vm575_vm5, %v4609_v28, -inf }
0x27e3   :  { %4626 = vmax.xlane.f32.xlu1 %v4625_v9  ;;  %v13730_v14 = vpop.f32.mrb[52].mxu1  ;;  %v4622_v56 = vsel %vm575_vm5, %v4604_v60, -inf }
0x27e4   :  { %v4613_v6 = vpop.f32.mrb[53].mxu1  ;;  %4623 = vmax.xlane.f32.xlu0 %v4622_v56  ;;  %v4619_v24 = vadd.f32 %v13730_v14, %v17469_v41 }
0x27e5   :  { %v4614_v0 = vadd.f32 %v4613_v6, %v17485_v16 }
0x27e6   :  { %v4631_v50 = vsel %vm575_vm5, %v4619_v24, -inf }
0x27e7   :  { %v13747_v18 = vpop.f32.mrb[54].mxu1  ;;  %v4628_v59 = vsel %vm575_vm5, %v4614_v0, -inf }
0x27e8   :  { %v4859_v12 = vpop.f32.mrb[55].mxu1  ;;  %4629 = vmax.xlane.f32.xlu0 %v4628_v59  ;;  %v4865_v23 = vadd.f32 %v13747_v18, %v17458_v37 }
0x27e9   :  { %v4860_v34 = vadd.f32 %v4859_v12, %v17461_v40 }
0x27ea   :  { %v4881_v35 = vsel %vm575_vm5, %v4865_v23, -inf }
0x27eb   :  { %v13750_v13 = vpop.f32.mrb[56].mxu1  ;;  %v4878_v19 = vsel %vm575_vm5, %v4860_v34, -inf }
0x27ec   :  { %v4869_v25 = vpop.f32.mrb[57].mxu1  ;;  %4879 = vmax.xlane.f32.xlu1 %v4878_v19  ;;  %4632 = vmax.xlane.f32.xlu0 %v4631_v50  ;;  %v17568_v55 = vadd.f32 %v13750_v13, %v17469_v41 }
0x27ed   :  { %v4870_v49 = vadd.f32 %v4869_v25, %v17485_v16 }
0x27ee   :  { %v4887_v54 = vsel %vm575_vm5, %v17568_v55, -inf }
0x27ef   :  { %v13767_v10 = vpop.f32.mrb[58].mxu1  ;;  %v4884_v29 = vsel %vm575_vm5, %v4870_v49, -inf }
0x27f0   :  { %v5115_v33 = vpop.f32.mrb[59].mxu1  ;;  %4885 = vmax.xlane.f32.xlu1 %v4884_v29  ;;  %4882 = vmax.xlane.f32.xlu0 %v4881_v35  ;;  %v17574_v45 = vadd.f32 %v13767_v10, %v17458_v37 }
0x27f1   :  { %v5116_v4 = vadd.f32 %v5115_v33, %v17461_v40 }
0x27f2   :  { %v5137_v2 = vsel %vm575_vm5, %v17574_v45, -inf }
0x27f3   :  { %v13770_v1 = vpop.f32.mrb[60].mxu1  ;;  %v5134_v47 = vsel %vm575_vm5, %v5116_v4, -inf }
0x27f4   :  { %v5125_v26 = vpop.f32.mrb[61].mxu1  ;;  %5135 = vmax.xlane.f32.xlu1 %v5134_v47  ;;  %4888 = vmax.xlane.f32.xlu0 %v4887_v54  ;;  %v17583_v42 = vadd.f32 %v13770_v1, %v17469_v41 }
0x27f5   :  { %v17580_v27 = vadd.f32 %v5125_v26, %v17485_v16 }
0x27f6   :  { %v5143_v46 = vsel %vm575_vm5, %v17583_v42, -inf }
0x27f7   :  { %v5140_v51 = vsel %vm575_vm5, %v17580_v27, -inf }
0x27f8   :  { %5141 = vmax.xlane.f32.xlu1 %v5140_v51  ;;  %5138 = vmax.xlane.f32.xlu0 %v5137_v2 }
0x27fc   :  { %5144 = vmax.xlane.f32.xlu0 %v5143_v46 }
0x2809   :  { %15542 = vrot.lane.b32.xlu1 %v17439_v62, %s16358_s24 }
0x2870   :  { %v4627_v9 = vpop.xlane.xlu1 %4626 }
0x2871   :  { %v4635_v14 = vsub.f32 %v4609_v28, %v4627_v9  ;;  %v4624_v56 = vpop.xlane.xlu0 %4623 }
0x2872   :  { %v4634_v6 = vsub.f32 %v4604_v60, %v4624_v56 }
0x2873   :  { %v4640_v18 = vmul.f32 1.442695, %v4635_v14 }
0x2874   :  { %v4638_v59 = vmul.f32 1.442695, %v4634_v6 }
0x2875   :  { %15965 = vpow2.f32 %v4640_v18  ;;  %v4630_v12 = vpop.xlane.xlu0 %4629 }
0x2876   :  { %15967 = vpow2.f32 %v4638_v59  ;;  %v4636_v13 = vsub.f32 %v4614_v0, %v4630_v12 }
0x2878   :  { %v4642_v19 = vmul.f32 1.442695, %v4636_v13 }
0x2879   :  { %v4880_v50 = vpop.xlane.xlu1 %4879  ;;  %v4633_v25 = vpop.xlane.xlu0 %4632 }
0x287a   :  { %15969 = vpow2.f32 %v4642_v19  ;;  %v4890_v10 = vsub.f32 %v4860_v34, %v4880_v50  ;;  %v4637_v29 = vsub.f32 %v4619_v24, %v4633_v25 }
0x287c   :  { %v4894_v35 = vmul.f32 1.442695, %v4890_v10  ;;  %v4644_v33 = vmul.f32 1.442695, %v4637_v29 }
0x287d   :  { %v4886_v1 = vpop.xlane.xlu1 %4885  ;;  %v4883_v47 = vpop.xlane.xlu0 %4882 }
0x287e   :  { %15971 = vpow2.f32 %v4894_v35  ;;  %v4892_v28 = vsub.f32 %v4870_v49, %v4886_v1  ;;  %v4891_v54 = vsub.f32 %v4865_v23, %v4883_v47 }
0x287f   :  { %v17593_v60 = vpop.eup %15965  ;;  %15973 = vpow2.f32 %v4644_v33 }
0x2880   :  { %v17595_v26 = vpop.eup %15967  ;;  %v4898_v51 = vmul.f32 1.442695, %v4892_v28  ;;  %v4896_v0 = vmul.f32 1.442695, %v4891_v54  ;;  %v4649_v2 = vsel %vm575_vm5, %v17593_v60, 0.0 }
0x2881   :  { %v5136_v46 = vpop.xlane.xlu1 %5135  ;;  %4650 = vadd.xlane.f32.xlu0 %v4649_v2  ;;  %v4889_v24 = vpop.xlane.xlu0 %4888  ;;  %v4646_v34 = vsel %vm575_vm5, %v17595_v26, 0.0 }
0x2882   :  { %15975 = vpow2.f32 %v4898_v51  ;;  %v5146_v9 = vsub.f32 %v5116_v4, %v5136_v46  ;;  %v4893_v23 = vsub.f32 %v17568_v55, %v4889_v24  ;;  %4647 = vadd.xlane.f32.xlu1 %v4646_v34 }
0x2883   :  { %15977 = vpow2.f32 %v4896_v0 }
0x2884   :  { %v17602_v49 = vpop.eup %15969  ;;  %v5150_v14 = vmul.f32 1.442695, %v5146_v9  ;;  %v4900_v56 = vmul.f32 1.442695, %v4893_v23 }
0x2885   :  { %v5142_v6 = vpop.xlane.xlu1 %5141  ;;  %v5139_v18 = vpop.xlane.xlu0 %5138  ;;  %v4652_v59 = vsel %vm575_vm5, %v17602_v49, 0.0 }
0x2886   :  { %15979 = vpow2.f32 %v5150_v14  ;;  %v5147_v12 = vsub.f32 %v17574_v45, %v5139_v18  ;;  %4653 = vadd.xlane.f32.xlu1 %v4652_v59  ;;  %v5148_v24 = vsub.f32 %v17580_v27, %v5142_v6 }
0x2887   :  { %15981 = vpow2.f32 %v4900_v56 }
0x2888   :  { %v17607_v13 = vpop.eup %15971  ;;  %v5152_v4 = vmul.f32 1.442695, %v5147_v12  ;;  %v5154_v9 = vmul.f32 1.442695, %v5148_v24 }
0x2889   :  { %v17609_v55 = vpop.eup %15973  ;;  %v15543_v19 = vpop.permute.xlu1 %15542  ;;  %v4902_v50 = vsel %vm575_vm5, %v17607_v13, 0.0 }
0x288a   :  { %v15545_v25 = vunpack.i.h.bf16 %v15543_v19  ;;  %v15544_v10 = vunpack.i.l.bf16 %v15543_v19  ;;  %4903 = vadd.xlane.f32.xlu1 %v4902_v50  ;;  %15983 = vpow2.f32 %v5152_v4  ;;  %v4655_v29 = vsel %vm575_vm5, %v17609_v55, 0.0  ;;  %v5145_v34 = vpop.xlane.xlu0 %5144 }
0x288b   :  { %4656 = vadd.xlane.f32.xlu0 %v4655_v29  ;;  %v5149_v23 = vsub.f32 %v17583_v42, %v5145_v34  ;;  %15985 = vpow2.f32 %v5154_v9 }
0x288c   :  { %v17615_v35 = vpop.eup %15975  ;;  %v14781_v45 = vpack.c.bf16 %v15545_v25, %v15544_v10 }
0x288d   :  { %v17617_v33 = vpop.eup %15977  ;;  %v4908_v1 = vsel %vm575_vm5, %v17615_v35, 0.0  ;;  %v5156_v14 = vmul.f32 1.442695, %v5149_v23 }
0x288e   :  { %14782 = vmatprep.subr.bf16.mxu0 %v14781_v45  ;;  %4909 = vadd.xlane.f32.xlu1 %v4908_v1  ;;  %v4905_v47 = vsel %vm575_vm5, %v17617_v33, 0.0 }
0x288f   :  { %14784 = vmatpush3.bf16.msra.mxu0 %v14781_v45  ;;  %4906 = vadd.xlane.f32.xlu0 %v4905_v47  ;;  %15987 = vpow2.f32 %v5156_v14 }
0x2890   :  { %v17623_v28 = vpop.eup %15979 }
0x2891   :  { %v17625_v54 = vpop.eup %15981  ;;  %v5158_v51 = vsel %vm575_vm5, %v17623_v28, 0.0 }
0x2892   :  { %5159 = vadd.xlane.f32.xlu1 %v5158_v51  ;;  %v4911_v0 = vsel %vm575_vm5, %v17625_v54, 0.0 }
0x2893   :  { %4912 = vadd.xlane.f32.xlu0 %v4911_v0 }
0x2894   :  { %v17631_v2 = vpop.eup %15983 }
0x2895   :  { %v5161_v46 = vsel %vm575_vm5, %v17631_v2, 0.0  ;;  %v17641_v56 = vpop.eup %15985 }
0x2896   :  { %v5164_v18 = vsel %vm575_vm5, %v17641_v56, 0.0 }
0x2897   :  { %5162 = vadd.xlane.f32.xlu0 %v5161_v46 }
0x2899   :  { %v17645_v59 = vpop.eup %15987 }
0x28a3   :  { %15552 = vrot.lane.b32.xlu1 %v17439_v62, %s16366_s10 }
0x28ad   :  { %15547 = vrot.lane.b32.xlu0 %v17439_v62, %s16363_s28  ;;  %v5167_v62 = vsel %vm575_vm5, %v17645_v59, 0.0 }
0x28c7   :  { %5165 = vadd.xlane.f32.xlu1 %v5164_v18 }
0x28cc   :  { %5168 = vadd.xlane.f32.xlu0 %v5167_v62 }
0x290e   :  { %v4651_v27 = vpop.xlane.xlu0 %4650 }
0x290f   :  { %15989 = vrcp.f32 %v4651_v27  ;;  %v4648_v6 = vpop.xlane.xlu1 %4647 }
0x2910   :  { %15991 = vrcp.f32 %v4648_v6 }
0x2913   :  { %v4654_v42 = vpop.xlane.xlu1 %4653 }
0x2914   :  { %15993 = vrcp.f32 %v4654_v42 }
0x2917   :  { %v4904_v12 = vpop.xlane.xlu1 %4903 }
0x2918   :  { %15995 = vrcp.f32 %v4904_v12  ;;  %v4657_v19 = vpop.xlane.xlu0 %4656 }
0x2919   :  { %v15990_v4 = vpop.eup %15989  ;;  %15997 = vrcp.f32 %v4657_v19 }
0x291a   :  { %v15992_v50 = vpop.eup %15991  ;;  %v4663_v29 = vmul.f32 %v15990_v4, %v17593_v60 }
0x291b   :  { %v4910_v25 = vpop.xlane.xlu1 %4909  ;;  %v4662_v10 = vmul.f32 %v15992_v50, %v17595_v26 }
0x291c   :  { %v4907_v45 = vpop.xlane.xlu0 %4906 }
0x291d   :  { %13735 = vmatprep.mubr.msk.f32.mxu0 %vm575_vm5, %v4662_v10  ;;  %15999 = vrcp.f32 %v4907_v45 }
0x291e   :  { %v15994_v1 = vpop.eup %15993  ;;  %13736 = vmatmul.mubr.msk.f32.vlgmr.msra.gmra.mrb[54].mxu0 %vm575_vm5, %v4663_v29  ;;  %16001 = vrcp.f32 %v4910_v25 }
0x291f   :  { %v4664_v47 = vmul.f32 %v15994_v1, %v17602_v49  ;;  %v5160_v51 = vpop.xlane.xlu1 %5159 }
0x2920   :  { %v4913_v0 = vpop.xlane.xlu0 %4912 }
0x2921   :  { %13738 = vmatprep.mubr.msk.f32.mxu0 %vm575_vm5, %v4664_v47  ;;  %16003 = vrcp.f32 %v4913_v0 }
0x2922   :  { %v15996_v46 = vpop.eup %15995  ;;  %16005 = vrcp.f32 %v5160_v51 }
0x2923   :  { %v15998_v24 = vpop.eup %15997  ;;  %v4918_v26 = vmul.f32 %v15996_v46, %v17607_v13  ;;  %v15553_v9 = vpop.permute.xlu1 %15552  ;;  %v5516_v13 = vld [vmem:[%s19487_s7] sm:$0xff] }
0x2924   :  { %v5163_v34 = vpop.xlane.xlu0 %5162  ;;  %v4665_v60 = vmul.f32 %v15998_v24, %v17609_v55  ;;  %v15555_v23 = vunpack.i.h.bf16 %v15553_v9  ;;  %v15554_v14 = vunpack.i.l.bf16 %v15553_v9  ;;  %v5517_v55 = vld [vmem:[%s19487_s7 + $0x8] sm:$0xff] }
0x2925   :  { %16007 = vrcp.f32 %v5163_v34  ;;  %v14813_v19 = vpack.c.bf16 %v5517_v55, %v5516_v13  ;;  %v5654_v55 = vld [vmem:[%s19484_s4 + $0x120] sm:$0xff] }
0x2926   :  { %13739 = vmatmul.mubr.msk.f32.gmra.mrb[56].mxu0 %vm575_vm5, %v4665_v60  ;;  %v14801_v12 = vpack.c.bf16 %v15555_v23, %v15554_v14  ;;  %v4261_v23 = vld [vmem:[%s19484_s4 + $0x118] sm:$0xff] }
0x2927   :  { %13755 = vmatprep.mubr.msk.f32.mxu0 %vm575_vm5, %v4918_v26  ;;  %v16000_v6 = vpop.eup %15999 }
0x2928   :  { %v15548_v49 = vpop.permute.xlu0 %15547  ;;  %v16002_v42 = vpop.eup %16001  ;;  %v4919_v4 = vmul.f32 %v16000_v6, %v17617_v33  ;;  %v5518_v33 = vld [vmem:[%s19487_s7 + $0x10] sm:$0xff] }
0x2929   :  { %v15550_v18 = vunpack.i.h.bf16 %v15548_v49  ;;  %v15549_v62 = vunpack.i.l.bf16 %v15548_v49  ;;  %v4920_v25 = vmul.f32 %v16002_v42, %v17615_v35  ;;  %v5519_v35 = vld [vmem:[%s19487_s7 + $0x18] sm:$0xff]  ;;  %v4260_v49 = vld [vmem:[%s19484_s4 + $0x110] sm:$0xff]  ;;  %v5655_v42 = vld [vmem:[%s19484_s4 + $0x128] sm:$0xff] }
0x292a   :  { %v14817_v51 = vpack.c.bf16 %v5519_v35, %v5518_v33 }
0x292b   :  { %v14791_v27 = vpack.c.bf16 %v15550_v18, %v15549_v62  ;;  %v16004_v50 = vpop.eup %16003  ;;  %v14809_v18 = vpack.c.bf16 %v4261_v23, %v4260_v49  ;;  %v5656_v49 = vld [vmem:[%s19484_s4 + $0x130] sm:$0xff]  ;;  %v5657_v23 = vld [vmem:[%s19484_s4 + $0x138] sm:$0xff] }
0x292c   :  { %v16006_v10 = vpop.eup %16005  ;;  %v4921_v29 = vmul.f32 %v16004_v50, %v17625_v54 }
0x292d   :  { %14792 = vmatprep.subr.bf16.mxu0 %v14791_v27  ;;  %v5174_v1 = vmul.f32 %v16006_v10, %v17623_v28 }
0x292e   :  { %14794 = vmatpush3.bf16.msra.mxu0 %v14791_v27 }
0x292f   :  { %14802 = vmatprep.subr.bf16.mxu0 %v14801_v12  ;;  %v16008_v45 = vpop.eup %16007 }
0x2930   :  { %v5175_v47 = vmul.f32 %v16008_v45, %v17631_v2  ;;  %v12425_v45 = vld [vmem:[%s19487_s7 + $0x80] ss:$0 sm:$0xff] }
0x2931   :  { %13756 = vmatmul.mubr.msk.f32.vlgmr.msra.gmra.mrb[58].mxu0 %vm575_vm5, %v4919_v4 }
0x2932   :  { %13758 = vmatprep.mubr.msk.f32.mxu0 %vm575_vm5, %v4920_v25  ;;  %14804 = vmatpush3.bf16.msra.mxu0 %v14801_v12  ;;  %v14821_v12 = vpack.c.bf16 %v5655_v42, %v5654_v55 }
0x2933   :  { %14814 = vmatprep.subr.bf16.mxu0 %v14813_v19 }
0x2935   :  { %13759 = vmatmul.mubr.msk.f32.gmra.mrb[60].mxu0 %vm575_vm5, %v4921_v29 }
0x2936   :  { %13775 = vmatprep.mubr.msk.f32.mxu0 %vm575_vm5, %v5174_v1 }
0x2939   :  { %13776 = vmatmul.mubr.msk.f32.vlgmr.msra.gmra.mrb[62].mxu0 %vm575_vm5, %v5175_v47 }
0x293a   :  { %14816 = vmatpush3.bf16.msra.mxu0 %v14813_v19 }
0x293b   :  { %14818 = vmatprep.subr.bf16.mxu0 %v14817_v51 }
0x293e   :  { %14820 = vmatpush3.bf16.msra.mxu0 %v14817_v51 }
0x2954   :  { %v5166_v28 = vpop.xlane.xlu1 %5165 }
0x2955   :  { %16009 = vrcp.f32 %v5166_v28 }
0x2959   :  { %v5169_v54 = vpop.xlane.xlu0 %5168 }
0x295a   :  { %16011 = vrcp.f32 %v5169_v54 }
0x295f   :  { %v16010_v0 = vpop.eup %16009 }
0x2960   :  { %v5176_v46 = vmul.f32 %v16010_v0, %v17641_v56  ;;  %v4258_v56 = vld [vmem:[%s19484_s4 + $0x100] sm:$0xff] }
0x2962   :  { %13778 = vmatprep.mubr.msk.f32.mxu0 %vm575_vm5, %v5176_v46 }
0x2964   :  { %v16012_v24 = vpop.eup %16011 }
0x2965   :  { %v5177_v26 = vmul.f32 %v16012_v24, %v17645_v59  ;;  %v4259_v59 = vld [vmem:[%s19484_s4 + $0x108] sm:$0xff] }
0x2966   :  { %v14805_v9 = vpack.c.bf16 %v4259_v59, %v4258_v56 }
0x2967   :  { %13779 = vmatmul.mubr.msk.f32.gmra.mrb[64].mxu0 %vm575_vm5, %v5177_v26 }
0x2968   :  { %13803 = vmatprep.mubr.msk.f32.mxu0 %vm145_vm0, %v17428_v48  ;;  %14806 = vmatprep.subr.bf16.mxu1 %v14805_v9 }
0x2969   :  { %14808 = vmatpush3.bf16.msra.mxu1 %v14805_v9 }
0x296a   :  { %14810 = vmatprep.subr.bf16.mxu1 %v14809_v18 }
0x296b   :  { %13804 = vmatmul.mubr.msk.f32.vlgmr.msra.gmra.mrb[66].mxu0 %vm145_vm0, %v17432_v32 }
0x296d   :  { %14812 = vmatpush3.bf16.msra.mxu1 %v14809_v18 }
0x296e   :  { %14822 = vmatprep.subr.bf16.mxu1 %v14821_v12 }
0x29f1   :  { %v13737_v2 = vpop.f32.mrb[54].mxu0 }
0x29f2   :  { %5287 = vrot.lane.b32.xlu1 %v13737_v2, %s16369_s16  ;;  %v4750_v34 = vpop.f32.mrb[55].mxu0 }
0x29f3   :  { %5285 = vrot.lane.b32.xlu0 %v4750_v34, %s16369_s16 }
0x29f9   :  { %v13740_v60 = vpop.f32.mrb[56].mxu0 }
0x29fa   :  { %v4760_v14 = vpop.f32.mrb[57].mxu0 }
0x2a04   :  { %v13757_v62 = vpop.f32.mrb[58].mxu0 }
0x2a05   :  { %5303 = vrot.lane.b32.xlu0 %v13757_v62, %s16371_s18  ;;  %v5006_v27 = vpop.f32.mrb[59].mxu0 }
0x2a06   :  { %5301 = vrot.lane.b32.xlu1 %v5006_v27, %s16371_s18 }
0x2a08   :  { %v13760_v6 = vpop.f32.mrb[60].mxu0 }
0x2a09   :  { %v5016_v13 = vpop.f32.mrb[61].mxu0 }
0x2a0c   :  { %v13777_v4 = vpop.f32.mrb[62].mxu0 }
0x2a0d   :  { %5319 = vrot.lane.b32.xlu0 %v13777_v4, %s16372_s13  ;;  %v5262_v19 = vpop.f32.mrb[63].mxu0 }
0x2a0e   :  { %5317 = vrot.lane.b32.xlu1 %v5262_v19, %s16372_s13  ;;  %v14825_v19 = vpack.c.bf16 %v5657_v23, %v5656_v49 }
0x2a11   :  { %5291 = vrot.lane.b32.xlu0 %v13740_v60, %s16369_s16 }
0x2a12   :  { %5289 = vrot.lane.b32.xlu1 %v4760_v14, %s16369_s16 }
0x2a15   :  { %5307 = vrot.lane.b32.xlu0 %v13760_v6, %s16371_s18 }
0x2a16   :  { %5305 = vrot.lane.b32.xlu1 %v5016_v13, %s16371_s18 }
0x2a3a   :  { %v13780_v50 = vpop.f32.mrb[64].mxu0 }
0x2a3b   :  { %5323 = vrot.lane.b32.xlu0 %v13780_v50, %s16372_s13  ;;  %v5272_v25 = vpop.f32.mrb[65].mxu0 }
0x2a3c   :  { %5321 = vrot.lane.b32.xlu1 %v5272_v25, %s16372_s13 }
0x2a3e   :  { %v13805_v10 = vpop.f32.mrb[66].mxu0 }
0x2a3f   :  { %v5591_v29 = vpop.f32.mrb[67].mxu0  ;;  %v17724_v33 = vadd.f32 %v13805_v10, %v12425_v45 }
0x2a40   :  { %v17722_v1 = vadd.f32 %v12425_v45, %v5591_v29  ;;  %v5660_v45 = vld [vmem:[%s19484_s4 + $0x150] sm:$0xff] }
0x2a41   :  { %v17730_v47 = vmul.f32 0.70710677, %v17724_v33 }
0x2a42   :  { %v17727_v35 = vmul.f32 0.70710677, %v17722_v1 }
0x2a43   :  { %v5609_v28 = vand.u32 2147483647, %v17730_v47  ;;  %vm5605_vm7 = vcmp.ge.f32.partialorder %v17730_v47, 0.0 }
0x2a44   :  { %v5608_v51 = vand.u32 2147483647, %v17727_v35  ;;  %vm5604_vm4 = vcmp.ge.f32.partialorder %v17727_v35, 0.0  ;;  %v5600_v35 = vmul.f32 0.5, %v17722_v1 }
0x2a45   :  { %v5611_v0 = vmul.f32 0.3275911, %v5609_v28 }
0x2a46   :  { %v5610_v54 = vmul.f32 0.3275911, %v5608_v51 }
0x2a47   :  { %v5613_v24 = vadd.f32 1.0, %v5611_v0 }
0x2a48   :  { %v5612_v46 = vadd.f32 1.0, %v5610_v54  ;;  %v5661_v54 = vld [vmem:[%s19484_s4 + $0x158] sm:$0xff] }
0x2a4a   :  { %16013 = vrcp.f32 %v5612_v46 }
0x2a4b   :  { %16015 = vrcp.f32 %v5613_v24  ;;  %v5636_v24 = vsub.f32 0.0, %v5608_v51 }
0x2a4d   :  { %v5638_v49 = vmul.f32 %v5636_v24, %v5608_v51  ;;  %v5666_v51 = vld [vmem:[%s19484_s4 + $0x180] sm:$0xff] }
0x2a54   :  { %v17734_v34 = vpop.eup %16013 }
0x2a55   :  { %v17736_v59 = vpop.eup %16015  ;;  %v5618_v9 = vmul.f32 1.0614054, %v17734_v34 }
0x2a56   :  { %v5619_v14 = vmul.f32 1.0614054, %v17736_v59 }
0x2a57   :  { %v5620_v55 = vadd.f32 -1.4531521, %v5618_v9 }
0x2a58   :  { %v5621_v25 = vadd.f32 -1.4531521, %v5619_v14  ;;  %v5664_v14 = vld [vmem:[%s19484_s4 + $0x170] sm:$0xff] }
0x2a59   :  { %v5622_v10 = vmul.f32 %v17734_v34, %v5620_v55 }
0x2a5a   :  { %v5623_v0 = vmul.f32 %v17736_v59, %v5621_v25 }
0x2a5b   :  { %v5624_v46 = vadd.f32 1.4214138, %v5622_v10 }
0x2a5d   :  { %v5626_v9 = vmul.f32 %v17734_v34, %v5624_v46 }
0x2a64   :  { %v5288_v2 = vpop.permute.xlu1 %5287 }
0x2a65   :  { %v5286_v26 = vpop.permute.xlu0 %5285  ;;  %v5330_v27 = vsel %vm491_vm1, %v17547_v36, %v5288_v2  ;;  %v5659_v36 = vld [vmem:[%s19484_s4 + $0x148] sm:$0xff] }
0x2a66   :  { %v5329_v18 = vsel %vm491_vm1, %v17549_v44, %v5286_v26  ;;  %v5658_v44 = vld [vmem:[%s19484_s4 + $0x140] sm:$0xff]  ;;  %v14833_v26 = vpack.c.bf16 %v5661_v54, %v5660_v45  ;;  %v5663_v2 = vld [vmem:[%s19484_s4 + $0x168] sm:$0xff] }
0x2a67   :  { %v14829_v29 = vpack.c.bf16 %v5659_v36, %v5658_v44  ;;  %v5668_v44 = vld [vmem:[%s19484_s4 + $0x190] sm:$0xff]  ;;  %v5669_v36 = vld [vmem:[%s19484_s4 + $0x198] sm:$0xff] }
0x2a77   :  { %v5304_v56 = vpop.permute.xlu0 %5303 }
0x2a78   :  { %v5302_v60 = vpop.permute.xlu1 %5301  ;;  %v5334_v42 = vsel %vm575_vm5, %v5330_v27, %v5304_v56  ;;  %v5625_v56 = vadd.f32 1.4214138, %v5623_v0 }
0x2a79   :  { %v5333_v6 = vsel %vm575_vm5, %v5329_v18, %v5302_v60  ;;  %v5637_v60 = vsub.f32 0.0, %v5609_v28  ;;  %v5665_v18 = vld [vmem:[%s19484_s4 + $0x178] sm:$0xff] }
0x2a7a   :  { %v14841_v55 = vpack.c.bf16 %v5665_v18, %v5664_v14 }
0x2a7b   :  { %v5639_v27 = vmul.f32 %v5637_v60, %v5609_v28 }
0x2a7f   :  { %v5320_v62 = vpop.permute.xlu0 %5319 }
0x2a80   :  { %v5318_v13 = vpop.permute.xlu1 %5317  ;;  %v5338_v50 = vsel %vm1313_vm6, %v5334_v42, %v5320_v62  ;;  %v5627_v62 = vmul.f32 %v17736_v59, %v5625_v56  ;;  %v5667_v42 = vld [vmem:[%s19484_s4 + $0x188] sm:$0xff] }
0x2a81   :  { %v5337_v4 = vsel %vm1313_vm6, %v5333_v6, %v5318_v13  ;;  %v5628_v6 = vadd.f32 -0.28449672, %v5626_v9  ;;  %v5640_v13 = vmul.f32 1.442695, %v5638_v49  ;;  %v14845_v28 = vpack.c.bf16 %v5667_v42, %v5666_v51 }
0x2a82   :  { %13789 = vmatprep.mubr.msk.f32.mxu1 %vm145_vm0, %v5337_v4  ;;  %v5629_v4 = vadd.f32 -0.28449672, %v5627_v62  ;;  %v19496_v49 = vmov -1.0  }
0x2a83   :  { %13790 = vmatmul.mubr.msk.f32.vlgmr.msra.gmra.mrb[62].mxu1 %vm145_vm0, %v5338_v50  ;;  %v5630_v50 = vmul.f32 %v17734_v34, %v5628_v6  ;;  %16017 = vpow2.f32 %v5640_v13  ;;  %v5607_v18 = vsel %vm5605_vm7, 1.0, %v19496_v49 }
0x2a84   :  { %14824 = vmatpush3.bf16.msra.mxu1 %v14821_v12  ;;  %v5662_v12 = vld [vmem:[%s19484_s4 + $0x160] sm:$0xff]  ;;  %v5631_v25 = vmul.f32 %v17736_v59, %v5629_v4  ;;  %v5290_v56 = vpop.permute.xlu1 %5289 }
0x2a85   :  { %14826 = vmatprep.subr.bf16.mxu1 %v14825_v19  ;;  %v14837_v23 = vpack.c.bf16 %v5663_v2, %v5662_v12  ;;  %v5632_v10 = vadd.f32 0.2548296, %v5630_v50  ;;  %v5292_v2 = vpop.permute.xlu0 %5291  ;;  %v5331_v6 = vsel %vm491_vm1, %v17553_v39, %v5290_v56  ;;  %v5601_v39 = vmul.f32 0.5, %v17724_v33 }
0x2a86   :  { %v5633_v45 = vadd.f32 0.2548296, %v5631_v25  ;;  %v5332_v47 = vsel %vm491_vm1, %v17551_v61, %v5292_v2 }
0x2a87   :  { %v5634_v54 = vmul.f32 %v17734_v34, %v5632_v10  ;;  %v12428_v10 = vld [vmem:[%s19484_s4 + $0x3eb] ss:$0 sm:$0xff] }
0x2a88   :  { %14828 = vmatpush3.bf16.msra.mxu1 %v14825_v19  ;;  %v5642_v19 = vmul.f32 1.442695, %v5639_v27  ;;  %v5635_v46 = vmul.f32 %v17736_v59, %v5633_v45  ;;  %v5306_v59 = vpop.permute.xlu1 %5305 }
0x2a89   :  { %14830 = vmatprep.subr.bf16.mxu1 %v14829_v29  ;;  %v5308_v14 = vpop.permute.xlu0 %5307 }
0x2a8a   :  { %16019 = vpow2.f32 %v5642_v19  ;;  %v5336_v4 = vsel %vm575_vm5, %v5332_v47, %v5308_v14 }
0x2a8c   :  { %14832 = vmatpush3.bf16.msra.mxu1 %v14829_v29  ;;  %v14849_v29 = vpack.c.bf16 %v5669_v36, %v5668_v44 }
0x2a8d   :  { %14834 = vmatprep.subr.bf16.mxu1 %v14833_v26  ;;  %v16018_v0 = vpop.eup %16017 }
0x2a8e   :  { %v5644_v24 = vmul.f32 %v16018_v0, %v5634_v54 }
0x2a90   :  { %14836 = vmatpush3.bf16.msra.mxu1 %v14833_v26  ;;  %v5646_v60 = vsub.f32 1.0, %v5644_v24 }
0x2a91   :  { %14838 = vmatprep.subr.bf16.mxu1 %v14837_v23 }
0x2a94   :  { %14840 = vmatpush3.bf16.msra.mxu1 %v14837_v23  ;;  %v16020_v26 = vpop.eup %16019  ;;  %v5606_v23 = vsel %vm5604_vm4, 1.0, %v19496_v49 }
0x2a95   :  { %14842 = vmatprep.subr.bf16.mxu1 %v14841_v55  ;;  %v5645_v12 = vmul.f32 %v16020_v26, %v5635_v46  ;;  %v5648_v34 = vmul.f32 %v5646_v60, %v5606_v23 }
0x2a97   :  { %v5647_v9 = vsub.f32 1.0, %v5645_v12  ;;  %v5650_v27 = vadd.f32 1.0, %v5648_v34 }
0x2a98   :  { %14844 = vmatpush3.bf16.msra.mxu1 %v14841_v55  ;;  %v5335_v55 = vsel %vm575_vm5, %v5331_v6, %v5306_v59  ;;  %v6193_v59 = vld [vmem:[%s19486_s6 + $0x48] sm:$0xff]  ;;  %v6195_v6 = vld [vmem:[%s19486_s6 + $0x58] sm:$0xff] }
0x2a99   :  { %14846 = vmatprep.subr.bf16.mxu1 %v14845_v28  ;;  %v5649_v62 = vmul.f32 %v5647_v9, %v5607_v18 }
0x2a9b   :  { %v5651_v42 = vadd.f32 1.0, %v5649_v62 }
0x2a9c   :  { %14848 = vmatpush3.bf16.msra.mxu1 %v14845_v28  ;;  %v5652_v28 = vmul.f32 %v5650_v27, %v5600_v35  ;;  %v6194_v27 = vld [vmem:[%s19486_s6 + $0x50] sm:$0xff] }
0x2a9d   :  { %14850 = vmatprep.subr.bf16.mxu1 %v14849_v29  ;;  %v5653_v1 = vmul.f32 %v5651_v42, %v5601_v39 }
0x2aa0   :  { %14852 = vmatpush3.bf16.msra.mxu1 %v14849_v29 }
0x2aad   :  { %v5324_v13 = vpop.permute.xlu0 %5323 }
0x2aae   :  { %v5322_v51 = vpop.permute.xlu1 %5321  ;;  %v5340_v50 = vsel %vm1313_vm6, %v5336_v4, %v5324_v13  ;;  %v14897_v13 = vpack.c.bf16 %v6195_v6, %v6194_v27 }
0x2aaf   :  { %v5339_v19 = vsel %vm1313_vm6, %v5335_v55, %v5322_v51 }
0x2ab0   :  { %13792 = vmatprep.mubr.msk.f32.mxu1 %vm145_vm0, %v5339_v19 }
0x2ab1   :  { %13793 = vmatmul.mubr.msk.f32.gmra.mrb[64].mxu1 %vm145_vm0, %v5340_v50  ;;  %v12429_v50 = vld [vmem:[%s19484_s4 + $0x3f1] ss:$0 sm:$0xff] }
0x2ab2   :  { %13838 = vmatprep.mubr.f32.mxu1 %v5652_v28 }
0x2ab5   :  { %13839 = vmatmul.mubr.f32.vlgmr.msra.gmra.mrb[66].mxu1 %v5653_v1 }
0x2b56   :  { %v17816_v61 = vpop.f32.mrb[62].mxu1 }
0x2b57   :  { %v17818_v44 = vpop.f32.mrb[63].mxu1 }
0x2b84   :  { %v17820_v36 = vpop.f32.mrb[64].mxu1 }
0x2b85   :  { %v17822_v25 = vpop.f32.mrb[65].mxu1 }
0x2b88   :  { %v13840_v29 = vpop.f32.mrb[66].mxu1 }
0x2b89   :  { %v5747_v45 = vadd.f32 %v13840_v29, %v12428_v10  ;;  %v5741_v33 = vpop.f32.mrb[67].mxu1 }
0x2b8a   :  { %v5742_v54 = vadd.f32 %v12428_v10, %v5741_v33  ;;  %v12430_v10 = vld [vmem:[%s19484_s4 + $0x3f2] ss:$0 sm:$0xff] }
0x2b8b   :  { %v5751_v0 = vadd.f32 %v5747_v45, %v17432_v32 }
0x2b8c   :  { %v5750_v46 = vadd.f32 %v5742_v54, %v17428_v48  ;;  %v6192_v48 = vld [vmem:[%s19486_s6 + $0x40] sm:$0xff] }
0x2b8d   :  { %v5755_v24 = vsel %vm145_vm0, %v5751_v0, 0.0  ;;  %v14893_v62 = vpack.c.bf16 %v6193_v59, %v6192_v48 }
0x2b8e   :  { %5756 = vadd.xlane.f32.xlu0 %v5755_v24  ;;  %v5752_v26 = vsel %vm145_vm0, %v5750_v46, 0.0  ;;  %v12439_v24 = vld [vmem:[%s19486_s6 + $0x82] ss:$0 sm:$0xff] }
0x2b8f   :  { %5753 = vadd.xlane.f32.xlu1 %v5752_v26  ;;  %14894 = vmatprep.subr.bf16.mxu1 %v14893_v62 }
0x2b90   :  { %14896 = vmatpush3.bf16.msra.mxu1 %v14893_v62 }
0x2b91   :  { %14898 = vmatprep.subr.bf16.mxu1 %v14897_v13 }
0x2b94   :  { %14900 = vmatpush3.bf16.msra.mxu1 %v14897_v13 }
0x2c1b   :  { %v5757_v12 = vpop.xlane.xlu0 %5756 }
0x2c1c   :  { %v5759_v2 = vmul.f32 0.03125, %v5757_v12  ;;  %v5754_v56 = vpop.xlane.xlu1 %5753 }
0x2c1d   :  { %v5758_v60 = vmul.f32 0.03125, %v5754_v56 }
0x2c1e   :  { %v5761_v9 = vsub.f32 %v5751_v0, %v5759_v2 }
0x2c1f   :  { %v5760_v23 = vsub.f32 %v5750_v46, %v5758_v60 }
0x2c20   :  { %v5763_v34 = vmul.f32 %v5761_v9, %v5761_v9 }
0x2c21   :  { %v5762_v14 = vmul.f32 %v5760_v23, %v5760_v23 }
0x2c22   :  { %v5767_v18 = vsel %vm145_vm0, %v5763_v34, 0.0 }
0x2c23   :  { %5768 = vadd.xlane.f32.xlu1 %v5767_v18  ;;  %v5764_v32 = vsel %vm145_vm0, %v5762_v14, 0.0 }
0x2c24   :  { %5765 = vadd.xlane.f32.xlu0 %v5764_v32 }
0x2cb0   :  { %v5769_v35 = vpop.xlane.xlu1 %5768 }
0x2cb1   :  { %v5771_v47 = vmul.f32 0.03125, %v5769_v35  ;;  %v5766_v55 = vpop.xlane.xlu0 %5765 }
0x2cb2   :  { %v5770_v51 = vmul.f32 0.03125, %v5766_v55 }
0x2cb3   :  { %v5773_v42 = vadd.f32 1e-05, %v5771_v47 }
0x2cb4   :  { %v5772_v4 = vadd.f32 1e-05, %v5770_v51 }
0x2cb5   :  { %16021 = vrsqrt.f32 %v5773_v42 }
0x2cb6   :  { %16023 = vrsqrt.f32 %v5772_v4 }
0x2cbf   :  { %v16022_v19 = vpop.eup %16021 }
0x2cc0   :  { %v16024_v28 = vpop.eup %16023  ;;  %v5777_v39 = vmul.f32 %v16022_v19, %v5761_v9 }
0x2cc1   :  { %v5776_v1 = vmul.f32 %v16024_v28, %v5760_v23 }
0x2cc2   :  { %v5784_v29 = vmul.f32 %v12429_v50, %v5777_v39 }
0x2cc3   :  { %v5783_v45 = vmul.f32 %v12429_v50, %v5776_v1 }
0x2cc4   :  { %v5791_v33 = vadd.f32 %v12430_v10, %v5784_v29 }
0x2cc5   :  { %v5790_v54 = vadd.f32 %v12430_v10, %v5783_v45 }
0x2cc6   :  { %v17855_v46 = vadd.f32 %v5791_v33, %v16500_v63 }
0x2cc7   :  { %v17852_v0 = vadd.f32 %v5790_v54, %v16509_v3  ;;  %v12418_v3 = vld [vmem:[%s19484_s4 + $0x3ea] ss:$0 sm:$0xff] }
0x2cc8   :  { %v5429_v60 = vadd.f32 %v17816_v61, %v12418_v3  ;;  %v5434_v23 = vadd.f32 %v12418_v3, %v17822_v25  ;;  %v5424_v34 = vadd.f32 %v12418_v3, %v17818_v44  ;;  %v5439_v14 = vadd.f32 %v17820_v36, %v12418_v3 }
0x2cc9   :  { %13901 = vmatprep.mubr.msk.f32.mxu1 %vm145_vm0, %v17852_v0 }
0x2cca   :  { %13902 = vmatmul.mubr.msk.f32.vlgmr.msra.gmra.mrb[68].mxu1 %vm145_vm0, %v17855_v46  ;;  %v5443_v9 = vadd.f32 %v5429_v60, %v17158_v7  ;;  %v5444_v18 = vadd.f32 %v5434_v23, %v17168_v58  ;;  %v5442_v48 = vadd.f32 %v5424_v34, %v17156_v15  ;;  %v5445_v59 = vadd.f32 %v5439_v14, %v17180_v5  ;;  %v5793_v23 = vld [vmem:[%s19487_s7 + $0x28] sm:$0xff]  ;;  %v5794_v14 = vld [vmem:[%s19487_s7 + $0x30] sm:$0xff] }
0x2ccc   :  { %v5449_v32 = vsel %vm145_vm0, %v5443_v9, 0.0  ;;  %v5452_v62 = vsel %vm145_vm0, %v5444_v18, 0.0  ;;  %v5446_v7 = vsel %vm145_vm0, %v5442_v48, 0.0  ;;  %v5455_v61 = vsel %vm145_vm0, %v5445_v59, 0.0 }
0x2d9d   :  { %v13903_v26 = vpop.f32.mrb[68].mxu1 }
0x2d9e   :  { %v17864_v12 = vadd.f32 %v13903_v26, %v12439_v24  ;;  %v6273_v2 = vpop.f32.mrb[69].mxu1 }
0x2d9f   :  { %v17866_v56 = vadd.f32 %v12439_v24, %v6273_v2 }
0x2da1   :  { %13908 = vmatprep.mubr.msk.f32.mxu1 %vm491_vm1, %v17866_v56  ;;  %v17872_v63 = vpack.i.bf16 %v17864_v12, %v17866_v56 }
0x2da3   :  { %15562 = vrot.lane.b32.xlu1 %v17872_v63, %s16358_s24  ;;  %15557 = vrot.lane.b32.xlu0 %v17872_v63, %s16359_s25 }
0x2dc2   :  { %5450 = vadd.xlane.f32.xlu0 %v5449_v32 }
0x2dc6   :  { %5453 = vadd.xlane.f32.xlu0 %v5452_v62 }
0x2dc7   :  { %5447 = vadd.xlane.f32.xlu1 %v5446_v7 }
0x2dca   :  { %5456 = vadd.xlane.f32.xlu0 %v5455_v61 }
0x2dd8   :  { %6485 = vrot.lane.b32.xlu1 %v17866_v56, %s16360_s26 }
0x2de0   :  { %6487 = vrot.lane.b32.xlu0 %v17864_v12, %s16360_s26 }
0x2e15   :  { %v15563_v58 = vpop.permute.xlu1 %15562  ;;  %v15558_v15 = vpop.permute.xlu0 %15557 }
0x2e16   :  { %v15565_v44 = vunpack.i.h.bf16 %v15563_v58  ;;  %v15564_v36 = vunpack.i.l.bf16 %v15563_v58  ;;  %v15560_v5 = vunpack.i.h.bf16 %v15558_v15  ;;  %v15559_v25 = vunpack.i.l.bf16 %v15558_v15 }
0x2e18   :  { %v14901_v27 = vpack.c.bf16 %v15560_v5, %v15559_v25  ;;  %v14911_v6 = vpack.c.bf16 %v15565_v44, %v15564_v36 }
0x2e1a   :  { %14903 = vmatprep.subr.msk.bf16.mxu1 %vm16555_vm2, %v14901_v27 }
0x2e1b   :  { %14906 = vmatpush3.bf16.xpose.msk.msra.mxu1 %vm16555_vm2, %v14901_v27 }
0x2e1c   :  { %14913 = vmatprep.subr.msk.bf16.mxu1 %vm16555_vm2, %v14911_v6 }
0x2e22   :  { %13909 = vmatmul.mubr.msk.f32.vlgmr.msra.gmra.mrb[70].mxu1 %vm491_vm1, %v17864_v12 }
0x2e23   :  { %14916 = vmatpush3.bf16.xpose.msk.msra.mxu1 %vm16555_vm2, %v14911_v6 }
0x2e4f   :  { %v5451_v13 = vpop.xlane.xlu0 %5450 }
0x2e50   :  { %v5459_v35 = vmul.f32 0.03125, %v5451_v13 }
0x2e52   :  { %v5463_v47 = vsub.f32 %v5443_v9, %v5459_v35  ;;  %v5792_v9 = vld [vmem:[%s19487_s7 + $0x20] sm:$0xff] }
0x2e53   :  { %v5454_v55 = vpop.xlane.xlu0 %5453  ;;  %v14853_v34 = vpack.c.bf16 %v5793_v23, %v5792_v9 }
0x2e54   :  { %v5460_v51 = vmul.f32 0.03125, %v5454_v55  ;;  %v5448_v42 = vpop.xlane.xlu1 %5447  ;;  %v5467_v4 = vmul.f32 %v5463_v47, %v5463_v47 }
0x2e55   :  { %v5458_v19 = vmul.f32 0.03125, %v5448_v42  ;;  %14854 = vmatprep.subr.bf16.mxu0 %v14853_v34 }
0x2e56   :  { %v5473_v50 = vsel %vm145_vm0, %v5467_v4, 0.0  ;;  %v17908_v28 = vsub.f32 %v5444_v18, %v5460_v51  ;;  %14856 = vmatpush3.bf16.msra.mxu0 %v14853_v34  ;;  %v5795_v18 = vld [vmem:[%s19487_s7 + $0x38] sm:$0xff]  ;;  %v12423_v4 = vld [vmem:[%s19484_s4 + $0x3f5] ss:$0 sm:$0xff] }
0x2e57   :  { %v5462_v39 = vsub.f32 %v5442_v48, %v5458_v19  ;;  %5474 = vadd.xlane.f32.xlu0 %v5473_v50  ;;  %v5457_v1 = vpop.xlane.xlu0 %5456  ;;  %v14857_v32 = vpack.c.bf16 %v5795_v18, %v5794_v14 }
0x2e58   :  { %v5461_v10 = vmul.f32 0.03125, %v5457_v1  ;;  %v6486_v29 = vpop.permute.xlu1 %6485  ;;  %v5468_v26 = vmul.f32 %v17908_v28, %v17908_v28 }
0x2e59   :  { %13922 = vmatprep.mubr.msk.f32.mxu1 %vm491_vm1, %v6486_v29  ;;  %v5466_v45 = vmul.f32 %v5462_v39, %v5462_v39  ;;  %14858 = vmatprep.subr.bf16.mxu0 %v14857_v32 }
0x2e5a   :  { %v5465_v33 = vsub.f32 %v5445_v59, %v5461_v10  ;;  %v5476_v2 = vsel %vm145_vm0, %v5468_v26, 0.0  ;;  %14860 = vmatpush3.bf16.msra.mxu0 %v14857_v32 }
0x2e5b   :  { %v6488_v54 = vpop.permute.xlu0 %6487  ;;  %v5470_v24 = vsel %vm145_vm0, %v5466_v45, 0.0  ;;  %v12424_v45 = vld [vmem:[%s19484_s4 + $0x3f6] ss:$0 sm:$0xff] }
0x2e5c   :  { %5471 = vadd.xlane.f32.xlu1 %v5470_v24  ;;  %13923 = vmatmul.mubr.msk.f32.vlgmr.msra.gmra.mrb[72].mxu1 %vm491_vm1, %v6488_v54  ;;  %v5469_v3 = vmul.f32 %v5465_v33, %v5465_v33 }
0x2e5e   :  { %v5479_v60 = vsel %vm145_vm0, %v5469_v3, 0.0 }
0x2e60   :  { %5477 = vadd.xlane.f32.xlu1 %v5476_v2 }
0x2e64   :  { %5480 = vadd.xlane.f32.xlu1 %v5479_v60 }
0x2ee4   :  { %v5475_v48 = vpop.xlane.xlu0 %5474 }
0x2ee5   :  { %v5483_v59 = vmul.f32 0.03125, %v5475_v48 }
0x2ee7   :  { %v5487_v62 = vadd.f32 1e-05, %v5483_v59  ;;  %v6006_v59 = vld [vmem:[%s19484_s4 + $0x1a0] sm:$0xff] }
0x2ee9   :  { %16025 = vrsqrt.f32 %v5487_v62  ;;  %v5472_v7 = vpop.xlane.xlu1 %5471  ;;  %v6007_v62 = vld [vmem:[%s19484_s4 + $0x1a8] sm:$0xff] }
0x2eea   :  { %v5482_v61 = vmul.f32 0.03125, %v5472_v7  ;;  %v14861_v7 = vpack.c.bf16 %v6007_v62, %v6006_v59 }
0x2eec   :  { %v5486_v58 = vadd.f32 1e-05, %v5482_v61  ;;  %14862 = vmatprep.subr.bf16.mxu0 %v14861_v7  ;;  %v6008_v61 = vld [vmem:[%s19484_s4 + $0x1b0] sm:$0xff] }
0x2eed   :  { %v5478_v15 = vpop.xlane.xlu1 %5477 }
0x2eee   :  { %16027 = vrsqrt.f32 %v5486_v58  ;;  %v5484_v44 = vmul.f32 0.03125, %v5478_v15  ;;  %v6009_v58 = vld [vmem:[%s19484_s4 + $0x1b8] sm:$0xff] }
0x2eef   :  { %v14865_v15 = vpack.c.bf16 %v6009_v58, %v6008_v61 }
0x2ef0   :  { %v5488_v36 = vadd.f32 1e-05, %v5484_v44  ;;  %v6010_v44 = vld [vmem:[%s19484_s4 + $0x1c0] sm:$0xff] }
0x2ef1   :  { %v5481_v5 = vpop.xlane.xlu1 %5480 }
0x2ef2   :  { %16029 = vrsqrt.f32 %v5488_v36  ;;  %v5485_v25 = vmul.f32 0.03125, %v5481_v5  ;;  %v6011_v36 = vld [vmem:[%s19484_s4 + $0x1c8] sm:$0xff] }
0x2ef3   :  { %v16026_v27 = vpop.eup %16025  ;;  %v14869_v5 = vpack.c.bf16 %v6011_v36, %v6010_v44 }
0x2ef4   :  { %v5489_v6 = vadd.f32 1e-05, %v5485_v25  ;;  %v5495_v35 = vmul.f32 %v16026_v27, %v5463_v47  ;;  %v6012_v25 = vld [vmem:[%s19484_s4 + $0x1d0] sm:$0xff]  ;;  %v6013_v27 = vld [vmem:[%s19484_s4 + $0x1d8] sm:$0xff] }
0x2ef5   :  { %v13910_v13 = vpop.f32.mrb[70].mxu1 }
0x2ef6   :  { %16031 = vrsqrt.f32 %v5489_v6  ;;  %v17930_v55 = vadd.f32 %v13910_v13, %v16599_v52  ;;  %v6367_v51 = vpop.f32.mrb[71].mxu1  ;;  %v5504_v10 = vmul.f32 %v12423_v4, %v5495_v35  ;;  %v14873_v6 = vpack.c.bf16 %v6013_v27, %v6012_v25  ;;  %v6014_v13 = vld [vmem:[%s19484_s4 + $0x1e0] sm:$0xff]  ;;  %v6015_v35 = vld [vmem:[%s19484_s4 + $0x1e8] sm:$0xff] }
0x2ef7   :  { %v17933_v42 = vadd.f32 %v6367_v51, %v16602_v53  ;;  %v14877_v51 = vpack.c.bf16 %v6015_v35, %v6014_v13 }
0x2ef8   :  { %v16028_v19 = vpop.eup %16027  ;;  %v6379_v50 = vsel %vm575_vm5, %v17930_v55, -inf  ;;  %v17948_v2 = vadd.f32 %v12424_v45, %v5504_v10 }
0x2ef9   :  { %6380 = vmax.xlane.f32.xlu1 %v6379_v50  ;;  %v6376_v47 = vsel %vm575_vm5, %v17933_v42, -inf  ;;  %v5494_v1 = vmul.f32 %v16028_v19, %v5462_v39  ;;  %v6017_v19 = vld [vmem:[%s19484_s4 + $0x1f8] sm:$0xff] }
0x2efa   :  { %6377 = vmax.xlane.f32.xlu0 %v6376_v47  ;;  %v6018_v47 = vld [vmem:[%s19484_s4 + $0x200] sm:$0xff] }
0x2efb   :  { %v5503_v29 = vmul.f32 %v12423_v4, %v5494_v1  ;;  %v6019_v1 = vld [vmem:[%s19484_s4 + $0x208] sm:$0xff] }
0x2efc   :  { %v16030_v54 = vpop.eup %16029  ;;  %v14885_v10 = vpack.c.bf16 %v6019_v1, %v6018_v47 }
0x2efd   :  { %v17945_v24 = vadd.f32 %v12424_v45, %v5503_v29  ;;  %v5496_v26 = vmul.f32 %v16030_v54, %v17908_v28  ;;  %v6020_v29 = vld [vmem:[%s19484_s4 + $0x210] sm:$0xff] }
0x2eff   :  { %13849 = vmatprep.mubr.msk.f32.mxu0 %vm145_vm0, %v17945_v24  ;;  %v5505_v3 = vmul.f32 %v12423_v4, %v5496_v26 }
0x2f00   :  { %v16032_v60 = vpop.eup %16031  ;;  %13850 = vmatmul.mubr.msk.f32.vlgmr.msra.gmra.mrb[68].mxu0 %vm145_vm0, %v17948_v2 }
0x2f01   :  { %v17954_v39 = vadd.f32 %v12424_v45, %v5505_v3  ;;  %v5497_v9 = vmul.f32 %v16032_v60, %v5465_v33  ;;  %14864 = vmatpush3.bf16.msra.mxu0 %v14861_v7 }
0x2f02   :  { %14866 = vmatprep.subr.bf16.mxu0 %v14865_v15 }
0x2f03   :  { %13852 = vmatprep.mubr.msk.f32.mxu0 %vm145_vm0, %v17954_v39  ;;  %v5506_v23 = vmul.f32 %v12423_v4, %v5497_v9  ;;  %v6016_v4 = vld [vmem:[%s19484_s4 + $0x1f0] sm:$0xff] }
0x2f04   :  { %v14881_v50 = vpack.c.bf16 %v6017_v19, %v6016_v4 }
0x2f05   :  { %v17958_v34 = vadd.f32 %v12424_v45, %v5506_v23  ;;  %14868 = vmatpush3.bf16.msra.mxu0 %v14865_v15  ;;  %v6021_v45 = vld [vmem:[%s19484_s4 + $0x218] sm:$0xff] }
0x2f06   :  { %14870 = vmatprep.subr.bf16.mxu0 %v14869_v5  ;;  %v14889_v54 = vpack.c.bf16 %v6021_v45, %v6020_v29 }
0x2f07   :  { %13853 = vmatmul.mubr.msk.f32.gmra.mrb[70].mxu0 %vm145_vm0, %v17958_v34 }
0x2f09   :  { %14872 = vmatpush3.bf16.msra.mxu0 %v14869_v5 }
0x2f0a   :  { %14874 = vmatprep.subr.bf16.mxu0 %v14873_v6 }
0x2f0d   :  { %14876 = vmatpush3.bf16.msra.mxu0 %v14873_v6 }
0x2f0e   :  { %14878 = vmatprep.subr.bf16.mxu0 %v14877_v51 }
0x2f11   :  { %14880 = vmatpush3.bf16.msra.mxu0 %v14877_v51 }
0x2f12   :  { %14882 = vmatprep.subr.bf16.mxu0 %v14881_v50 }
0x2f15   :  { %14884 = vmatpush3.bf16.msra.mxu0 %v14881_v50 }
0x2f16   :  { %14886 = vmatprep.subr.bf16.mxu0 %v14885_v10 }
0x2f19   :  { %14888 = vmatpush3.bf16.msra.mxu0 %v14885_v10 }
0x2f1a   :  { %14890 = vmatprep.subr.bf16.mxu0 %v14889_v54 }
0x2f1d   :  { %14892 = vmatpush3.bf16.msra.mxu0 %v14889_v54 }
0x2f2f   :  { %v13924_v28 = vpop.f32.mrb[72].mxu1 }
0x2f30   :  { %v17963_v14 = vadd.f32 %v13924_v28, %v16599_v52  ;;  %v6567_v18 = vpop.f32.mrb[73].mxu1 }
0x2f31   :  { %v17966_v32 = vadd.f32 %v6567_v18, %v16602_v53 }
0x2f32   :  { %v6579_v33 = vsel %vm575_vm5, %v17963_v14, -inf }
0x2f33   :  { %6580 = vmax.xlane.f32.xlu1 %v6579_v33  ;;  %v6576_v48 = vsel %vm575_vm5, %v17966_v32, -inf }
0x2f34   :  { %6577 = vmax.xlane.f32.xlu0 %v6576_v48 }
0x2f86   :  { %v6381_v26 = vpop.xlane.xlu1 %6380 }
0x2f87   :  { %v6383_v3 = vsub.f32 %v17930_v55, %v6381_v26  ;;  %v6378_v60 = vpop.xlane.xlu0 %6377 }
0x2f88   :  { %v6382_v9 = vsub.f32 %v17933_v42, %v6378_v60 }
0x2f89   :  { %v6386_v23 = vmul.f32 1.442695, %v6383_v3 }
0x2f8a   :  { %v6384_v28 = vmul.f32 1.442695, %v6382_v9 }
0x2f8b   :  { %16033 = vpow2.f32 %v6386_v23 }
0x2f8c   :  { %16035 = vpow2.f32 %v6384_v28 }
0x2f95   :  { %v18022_v18 = vpop.eup %16033 }
0x2f96   :  { %v18024_v33 = vpop.eup %16035  ;;  %v6391_v48 = vsel %vm575_vm5, %v18022_v18, 0.0 }
0x2f97   :  { %6392 = vadd.xlane.f32.xlu1 %v6391_v48  ;;  %v6388_v59 = vsel %vm575_vm5, %v18024_v33, 0.0 }
0x2f98   :  { %6389 = vadd.xlane.f32.xlu0 %v6388_v59 }
0x2fc0   :  { %v6581_v55 = vpop.xlane.xlu1 %6580 }
0x2fc1   :  { %v6583_v62 = vsub.f32 %v17963_v14, %v6581_v55  ;;  %v6578_v42 = vpop.xlane.xlu0 %6577  ;;  %v12431_v14 = vld [vmem:[%s19487_s7 + $0x81] ss:$0 sm:$0xff] }
0x2fc2   :  { %v6582_v7 = vsub.f32 %v17966_v32, %v6578_v42 }
0x2fc3   :  { %v6586_v61 = vmul.f32 1.442695, %v6583_v62 }
0x2fc4   :  { %v6584_v58 = vmul.f32 1.442695, %v6582_v7 }
0x2fc5   :  { %16037 = vpow2.f32 %v6586_v61 }
0x2fc6   :  { %16039 = vpow2.f32 %v6584_v58 }
0x2fcf   :  { %v18032_v15 = vpop.eup %16037 }
0x2fd0   :  { %v18034_v44 = vpop.eup %16039  ;;  %v6591_v36 = vsel %vm575_vm5, %v18032_v15, 0.0 }
0x2fd1   :  { %6592 = vadd.xlane.f32.xlu1 %v6591_v36  ;;  %v6588_v5 = vsel %vm575_vm5, %v18034_v44, 0.0 }
0x2fd2   :  { %6589 = vadd.xlane.f32.xlu0 %v6588_v5 }
0x2fd3   :  { %v13851_v32 = vpop.f32.mrb[68].mxu0 }
0x2fd4   :  { %v18043_v25 = vadd.f32 %v13851_v32, %v12431_v14  ;;  %v5879_v27 = vpop.f32.mrb[69].mxu0 }
0x2fd5   :  { %v18045_v6 = vadd.f32 %v12431_v14, %v5879_v27 }
0x2fd6   :  { %v18048_v13 = vmul.f32 0.70710677, %v18043_v25 }
0x2fd7   :  { %v18051_v35 = vmul.f32 0.70710677, %v18045_v6 }
0x2fd8   :  { %v5915_v51 = vand.u32 2147483647, %v18048_v13  ;;  %vm5907_vm8 = vcmp.ge.f32.partialorder %v18048_v13, 0.0 }
0x2fd9   :  { %v5914_v4 = vand.u32 2147483647, %v18051_v35  ;;  %vm5906_vm9 = vcmp.ge.f32.partialorder %v18051_v35, 0.0  ;;  %v5898_v35 = vmul.f32 0.5, %v18045_v6 }
0x2fda   :  { %v5919_v19 = vmul.f32 0.3275911, %v5915_v51  ;;  %v13854_v50 = vpop.f32.mrb[70].mxu0  ;;  %v5971_v59 = vsub.f32 0.0, %v5915_v51 }
0x2fdb   :  { %v5918_v47 = vmul.f32 0.3275911, %v5914_v4  ;;  %v18055_v1 = vadd.f32 %v13854_v50, %v12431_v14  ;;  %v5889_v10 = vpop.f32.mrb[71].mxu0  ;;  %v5970_v62 = vsub.f32 0.0, %v5914_v4 }
0x2fdc   :  { %v5923_v29 = vadd.f32 1.0, %v5919_v19  ;;  %v18057_v45 = vadd.f32 %v12431_v14, %v5889_v10  ;;  %v5975_v7 = vmul.f32 %v5971_v59, %v5915_v51 }
0x2fdd   :  { %v5922_v54 = vadd.f32 1.0, %v5918_v47  ;;  %v18060_v26 = vmul.f32 0.70710677, %v18055_v1  ;;  %v5974_v36 = vmul.f32 %v5970_v62, %v5914_v4 }
0x2fde   :  { %16041 = vrcp.f32 %v5923_v29  ;;  %v18063_v3 = vmul.f32 0.70710677, %v18057_v45  ;;  %v5980_v27 = vmul.f32 1.442695, %v5975_v7 }
0x2fdf   :  { %16043 = vrcp.f32 %v5922_v54  ;;  %v5917_v60 = vand.u32 2147483647, %v18060_v26  ;;  %v5978_v51 = vmul.f32 1.442695, %v5974_v36  ;;  %vm5909_vm10 = vcmp.ge.f32.partialorder %v18060_v26, 0.0 }
0x2fe0   :  { %v5916_v9 = vand.u32 2147483647, %v18063_v3  ;;  %vm5908_vm11 = vcmp.ge.f32.partialorder %v18063_v3, 0.0 }
0x2fe1   :  { %v5921_v23 = vmul.f32 0.3275911, %v5917_v60  ;;  %v5973_v32 = vsub.f32 0.0, %v5917_v60 }
0x2fe2   :  { %v5920_v28 = vmul.f32 0.3275911, %v5916_v9  ;;  %15572 = vrot.lane.b32.xlu1 %v17872_v63, %s16364_s29  ;;  %v5972_v19 = vsub.f32 0.0, %v5916_v9 }
0x2fe3   :  { %v5925_v48 = vadd.f32 1.0, %v5921_v23  ;;  %v5977_v23 = vmul.f32 %v5973_v32, %v5917_v60 }
0x2fe4   :  { %v5924_v55 = vadd.f32 1.0, %v5920_v28  ;;  %v5976_v4 = vmul.f32 %v5972_v19, %v5916_v9 }
0x2fe5   :  { %16045 = vrcp.f32 %v5925_v48  ;;  %v5984_v16 = vmul.f32 1.442695, %v5977_v23 }
0x2fe6   :  { %16047 = vrcp.f32 %v5924_v55  ;;  %15577 = vrot.lane.b32.xlu1 %v17872_v63, %s16363_s28 }
0x2fe7   :  { %16049 = vpow2.f32 %v5980_v27 }
0x2fe8   :  { %v16042_v42 = vpop.eup %16041  ;;  %15567 = vrot.lane.b32.xlu0 %v17872_v63, %s16362_s27  ;;  %16051 = vpow2.f32 %v5978_v51 }
0x2fe9   :  { %v16044_v61 = vpop.eup %16043  ;;  %v5935_v58 = vmul.f32 1.0614054, %v16042_v42  ;;  %16053 = vpow2.f32 %v5984_v16 }
0x2fea   :  { %6687 = vrot.lane.b32.xlu1 %v17864_v12, %s16365_s30  ;;  %v5934_v5 = vmul.f32 1.0614054, %v16044_v61 }
0x2feb   :  { %v5939_v14 = vadd.f32 -1.4531521, %v5935_v58 }
0x2fec   :  { %6685 = vrot.lane.b32.xlu0 %v17866_v56, %s16365_s30  ;;  %v5938_v50 = vadd.f32 -1.4531521, %v5934_v5  ;;  %v5982_v5 = vmul.f32 1.442695, %v5976_v4 }
0x2fed   :  { %v5943_v47 = vmul.f32 %v16042_v42, %v5939_v14 }
0x2fee   :  { %v5942_v10 = vmul.f32 %v16044_v61, %v5938_v50  ;;  %16055 = vpow2.f32 %v5982_v5 }
0x2fef   :  { %v16046_v29 = vpop.eup %16045  ;;  %v5947_v54 = vadd.f32 1.4214138, %v5943_v47 }
0x2ff0   :  { %v16048_v28 = vpop.eup %16047  ;;  %v5946_v48 = vadd.f32 1.4214138, %v5942_v10  ;;  %v5937_v59 = vmul.f32 1.0614054, %v16046_v29 }
0x2ff1   :  { %v5951_v55 = vmul.f32 %v16042_v42, %v5947_v54  ;;  %v5936_v62 = vmul.f32 1.0614054, %v16048_v28  ;;  %v16050_v54 = vpop.eup %16049 }
0x2ff2   :  { %v5950_v7 = vmul.f32 %v16044_v61, %v5946_v48  ;;  %v5941_v58 = vadd.f32 -1.4531521, %v5937_v59  ;;  %v16052_v23 = vpop.eup %16051 }
0x2ff3   :  { %v5955_v49 = vadd.f32 -0.28449672, %v5951_v55  ;;  %v5940_v41 = vadd.f32 -1.4531521, %v5936_v62 }
0x2ff4   :  { %v5954_v14 = vadd.f32 -0.28449672, %v5950_v7  ;;  %v5945_v36 = vmul.f32 %v16046_v29, %v5941_v58 }
0x2ff5   :  { %v5959_v50 = vmul.f32 %v16042_v42, %v5955_v49  ;;  %v5944_v40 = vmul.f32 %v16048_v28, %v5940_v41 }
0x2ff6   :  { %v5958_v47 = vmul.f32 %v16044_v61, %v5954_v14  ;;  %v5949_v60 = vadd.f32 1.4214138, %v5945_v36 }
0x2ff7   :  { %v5963_v32 = vadd.f32 0.2548296, %v5959_v50  ;;  %v5948_v9 = vadd.f32 1.4214138, %v5944_v40  ;;  %v19514_v40 = vmov -1.0  }
0x2ff8   :  { %v5962_v27 = vadd.f32 0.2548296, %v5958_v47  ;;  %v5953_v19 = vmul.f32 %v16046_v29, %v5949_v60  ;;  %v5911_v7 = vsel %vm5907_vm8, 1.0, %v19514_v40  ;;  %v5910_v14 = vsel %vm5906_vm9, 1.0, %v19514_v40  ;;  %v16054_v47 = vpop.eup %16053 }
0x2ff9   :  { %v5967_v51 = vmul.f32 %v16042_v42, %v5963_v32  ;;  %v5952_v10 = vmul.f32 %v16048_v28, %v5948_v9  ;;  %v16056_v32 = vpop.eup %16055 }
0x2ffa   :  { %v5966_v48 = vmul.f32 %v16044_v61, %v5962_v27  ;;  %v5957_v59 = vadd.f32 -0.28449672, %v5953_v19  ;;  %v5899_v19 = vmul.f32 0.5, %v18043_v25  ;;  %v5901_v25 = vmul.f32 0.5, %v18055_v1 }
0x2ffb   :  { %v5987_v4 = vmul.f32 %v16050_v54, %v5967_v51  ;;  %v5956_v55 = vadd.f32 -0.28449672, %v5952_v10 }
0x2ffc   :  { %v5986_v41 = vmul.f32 %v16052_v23, %v5966_v48  ;;  %v5961_v49 = vmul.f32 %v16046_v29, %v5957_v59 }
0x2ffd   :  { %v5991_v62 = vsub.f32 1.0, %v5987_v4  ;;  %v5960_v16 = vmul.f32 %v16048_v28, %v5956_v55  ;;  %v5900_v4 = vmul.f32 0.5, %v18057_v45 }
0x2ffe   :  { %v5990_v58 = vsub.f32 1.0, %v5986_v41  ;;  %v5965_v5 = vadd.f32 0.2548296, %v5961_v49 }
0x2fff   :  { %v5995_v42 = vmul.f32 %v5991_v62, %v5911_v7  ;;  %v5964_v61 = vadd.f32 0.2548296, %v5960_v16 }
0x3000   :  { %v5994_v36 = vmul.f32 %v5990_v58, %v5910_v14  ;;  %v5969_v50 = vmul.f32 %v16046_v29, %v5965_v5  ;;  %v5913_v29 = vsel %vm5909_vm10, 1.0, %v19514_v40 }
0x3001   :  { %v5999_v13 = vadd.f32 1.0, %v5995_v42  ;;  %v5968_v60 = vmul.f32 %v16048_v28, %v5964_v61  ;;  %v5912_v28 = vsel %vm5908_vm11, 1.0, %v19514_v40 }
0x3002   :  { %v5998_v9 = vadd.f32 1.0, %v5994_v36  ;;  %v5989_v27 = vmul.f32 %v16054_v47, %v5969_v50 }
0x3003   :  { %v5988_v51 = vmul.f32 %v16056_v32, %v5968_v60  ;;  %v6003_v48 = vmul.f32 %v5999_v13, %v5899_v19 }
0x3004   :  { %v6002_v10 = vmul.f32 %v5998_v9, %v5898_v35  ;;  %v5993_v54 = vsub.f32 1.0, %v5989_v27 }
0x3005   :  { %v5992_v59 = vsub.f32 1.0, %v5988_v51 }
0x3006   :  { %13887 = vmatprep.mubr.f32.mxu0 %v6002_v10  ;;  %v5997_v23 = vmul.f32 %v5993_v54, %v5913_v29 }
0x3007   :  { %13888 = vmatmul.mubr.f32.vlgmr.msra.gmra.mrb[72].mxu0 %v6003_v48  ;;  %v5996_v6 = vmul.f32 %v5992_v59, %v5912_v28 }
0x3008   :  { %v6001_v26 = vadd.f32 1.0, %v5997_v23 }
0x3009   :  { %v6000_v55 = vadd.f32 1.0, %v5996_v6 }
0x300a   :  { %v6005_v41 = vmul.f32 %v6001_v26, %v5901_v25 }
0x300b   :  { %v6004_v3 = vmul.f32 %v6000_v55, %v5900_v4 }
0x300d   :  { %13890 = vmatprep.mubr.f32.mxu0 %v6004_v3 }
0x300e   :  { %13891 = vmatmul.mubr.f32.gmra.mrb[74].mxu0 %v6005_v41 }
0x3024   :  { %v6393_v7 = vpop.xlane.xlu1 %6392 }
0x3025   :  { %v6390_v49 = vpop.xlane.xlu0 %6389 }
0x3026   :  { %16057 = vrcp.f32 %v6390_v49 }
0x3027   :  { %16059 = vrcp.f32 %v6393_v7 }
0x3030   :  { %v16058_v62 = vpop.eup %16057 }
0x3031   :  { %v6396_v16 = vmul.f32 %v16058_v62, %v18024_v33  ;;  %v16060_v13 = vpop.eup %16059 }
0x3032   :  { %v6397_v9 = vmul.f32 %v16060_v13, %v18022_v18 }
0x3033   :  { %13915 = vmatprep.mubr.msk.f32.mxu0 %vm575_vm5, %v6396_v16 }
0x305e   :  { %v6593_v58 = vpop.xlane.xlu1 %6592 }
0x305f   :  { %v6590_v5 = vpop.xlane.xlu0 %6589 }
0x3060   :  { %16061 = vrcp.f32 %v6590_v5 }
0x3061   :  { %16063 = vrcp.f32 %v6593_v58 }
0x3062   :  { %v15573_v45 = vpop.permute.xlu1 %15572 }
0x3063   :  { %v15568_v42 = vpop.permute.xlu0 %15567  ;;  %v15575_v1 = vunpack.i.h.bf16 %v15573_v45  ;;  %v15574_v14 = vunpack.i.l.bf16 %v15573_v45 }
0x3064   :  { %v15570_v61 = vunpack.i.h.bf16 %v15568_v42  ;;  %v15569_v36 = vunpack.i.l.bf16 %v15568_v42 }
0x3065   :  { %v14917_v33 = vpack.c.bf16 %v15575_v1, %v15574_v14 }
0x3066   :  { %v15578_v50 = vpop.permute.xlu1 %15577  ;;  %v14907_v47 = vpack.c.bf16 %v15570_v61, %v15569_v36 }
0x3067   :  { %v15580_v60 = vunpack.i.h.bf16 %v15578_v50  ;;  %v15579_v32 = vunpack.i.l.bf16 %v15578_v50  ;;  %v6686_v54 = vpop.permute.xlu0 %6685 }
0x3068   :  { %14908 = vmatprep.subr.bf16.mxu0 %v14907_v47 }
0x3069   :  { %14910 = vmatpush3.bf16.msra.mxu0 %v14907_v47  ;;  %v14921_v51 = vpack.c.bf16 %v15580_v60, %v15579_v32 }
0x306a   :  { %v16062_v35 = vpop.eup %16061  ;;  %14918 = vmatprep.subr.bf16.mxu0 %v14917_v33  ;;  %v6688_v18 = vpop.permute.xlu1 %6687 }
0x306b   :  { %v16064_v27 = vpop.eup %16063  ;;  %v6596_v19 = vmul.f32 %v16062_v35, %v18034_v44  ;;  %v12436_v44 = vld [vmem:[%s19484_s4 + $0x3ec] ss:$0 sm:$0xff] }
0x306c   :  { %13916 = vmatmul.mubr.msk.f32.vlgmr.msra.gmra.mrb[76].mxu0 %vm575_vm5, %v6397_v9  ;;  %v6597_v10 = vmul.f32 %v16064_v27, %v18032_v15 }
0x306d   :  { %14920 = vmatpush3.bf16.msra.mxu0 %v14917_v33  ;;  %13929 = vmatprep.mubr.msk.f32.mxu0 %vm575_vm5, %v6596_v19 }
0x306e   :  { %14923 = vmatprep.subr.msk.bf16.mxu0 %vm16555_vm2, %v14921_v51 }
0x3070   :  { %13930 = vmatmul.mubr.msk.f32.vlgmr.msra.gmra.mrb[78].mxu0 %vm575_vm5, %v6597_v10 }
0x3071   :  { %13936 = vmatprep.mubr.msk.f32.mxu0 %vm491_vm1, %v6686_v54 }
0x3076   :  { %14926 = vmatpush3.bf16.xpose.msk.msra.mxu0 %vm16555_vm2, %v14921_v51 }
0x307d   :  { %13937 = vmatmul.mubr.msk.f32.vlgmr.msra.gmra.mrb[80].mxu0 %vm491_vm1, %v6688_v18 }
0x30da   :  { %v13889_v48 = vpop.f32.mrb[72].mxu0 }
0x30db   :  { %v6093_v29 = vpop.f32.mrb[73].mxu0  ;;  %v6099_v7 = vadd.f32 %v13889_v48, %v12436_v44 }
0x30dc   :  { %v6094_v59 = vadd.f32 %v12436_v44, %v6093_v29 }
0x30dd   :  { %v18127_v58 = vadd.f32 %v6099_v7, %v17948_v2 }
0x30de   :  { %v6112_v9 = vadd.f32 %v6094_v59, %v17945_v24 }
0x30df   :  { %v6119_v42 = vsel %vm145_vm0, %v18127_v58, 0.0 }
0x30e0   :  { %v6116_v27 = vsel %vm145_vm0, %v6112_v9, 0.0 }
0x30e1   :  { %v13892_v28 = vpop.f32.mrb[74].mxu0 }
0x30e2   :  { %v18106_v15 = vadd.f32 %v13892_v28, %v12436_v44  ;;  %v6103_v23 = vpop.f32.mrb[75].mxu0 }
0x30e3   :  { %v6104_v5 = vadd.f32 %v12436_v44, %v6103_v23 }
0x30e5   :  { %v6114_v45 = vadd.f32 %v6104_v5, %v17954_v39 }
0x30e7   :  { %v6122_v1 = vsel %vm145_vm0, %v6114_v45, 0.0 }
0x313f   :  { %v18108_v6 = vpop.f32.mrb[76].mxu0 }
0x3140   :  { %v18110_v26 = vpop.f32.mrb[77].mxu0 }
0x3143   :  { %v18112_v4 = vpop.f32.mrb[78].mxu0 }
0x3144   :  { %v18114_v55 = vpop.f32.mrb[79].mxu0 }
0x3150   :  { %v13938_v25 = vpop.f32.mrb[80].mxu0 }
0x3151   :  { %v6773_v3 = vadd.f32 %v13938_v25, %v16599_v52  ;;  %v6767_v41 = vpop.f32.mrb[81].mxu0 }
0x3152   :  { %v6768_v49 = vadd.f32 %v6767_v41, %v16602_v53 }
0x3153   :  { %v6779_v62 = vsel %vm575_vm5, %v6773_v3, -inf }
0x3154   :  { %6780 = vmax.xlane.f32.xlu1 %v6779_v62  ;;  %v6776_v16 = vsel %vm575_vm5, %v6768_v49, -inf }
0x3155   :  { %6777 = vmax.xlane.f32.xlu0 %v6776_v16 }
0x3165   :  { %15582 = vrot.lane.b32.xlu1 %v17872_v63, %s16368_s12 }
0x3169   :  { %6885 = vrot.lane.b32.xlu1 %v17866_v56, %s16367_s11 }
0x316d   :  { %6887 = vrot.lane.b32.xlu1 %v17864_v12, %s16367_s11 }
0x3191   :  { %6120 = vadd.xlane.f32.xlu1 %v6119_v42 }
0x3195   :  { %6123 = vadd.xlane.f32.xlu1 %v6122_v1 }
0x31e1   :  { %v6781_v14 = vpop.xlane.xlu1 %6780 }
0x31e2   :  { %v6783_v61 = vsub.f32 %v6773_v3, %v6781_v14  ;;  %v6778_v56 = vpop.xlane.xlu0 %6777 }
0x31e3   :  { %v6782_v36 = vsub.f32 %v6768_v49, %v6778_v56 }
0x31e4   :  { %v6786_v50 = vmul.f32 1.442695, %v6783_v61 }
0x31e5   :  { %v6784_v12 = vmul.f32 1.442695, %v6782_v36  ;;  %v15583_v47 = vpop.permute.xlu1 %15582 }
0x31e6   :  { %16065 = vpow2.f32 %v6786_v50  ;;  %v15585_v2 = vunpack.i.h.bf16 %v15583_v47  ;;  %v15584_v13 = vunpack.i.l.bf16 %v15583_v47  ;;  %v18161_v47 = vld [vmem:[%s19484_s4 + $0x3f8] ss:$0 sm:$0xff] }
0x31e7   :  { %16067 = vpow2.f32 %v6784_v12 }
0x31e8   :  { %v14927_v60 = vpack.c.bf16 %v15585_v2, %v15584_v13 }
0x31e9   :  { %v6886_v24 = vpop.permute.xlu1 %6885 }
0x31ea   :  { %14928 = vmatprep.subr.bf16.mxu1 %v14927_v60 }
0x31eb   :  { %14930 = vmatpush3.bf16.msra.mxu1 %v14927_v60 }
0x31ed   :  { %v6888_v59 = vpop.permute.xlu1 %6887 }
0x31f0   :  { %v16066_v39 = vpop.eup %16065 }
0x31f1   :  { %v6791_v32 = vsel %vm575_vm5, %v16066_v39, 0.0  ;;  %v16068_v33 = vpop.eup %16067 }
0x31f2   :  { %6792 = vadd.xlane.f32.xlu0 %v6791_v32  ;;  %v6788_v35 = vsel %vm575_vm5, %v16068_v33, 0.0 }
0x31f6   :  { %6789 = vadd.xlane.f32.xlu0 %v6788_v35 }
0x320c   :  { %15587 = vrot.lane.b32.xlu0 %v17872_v63, %s16366_s10 }
0x321e   :  { %v6121_v25 = vpop.xlane.xlu1 %6120 }
0x3222   :  { %v6124_v3 = vpop.xlane.xlu1 %6123 }
0x3223   :  { %v6130_v41 = vmul.f32 0.03125, %v6124_v3 }
0x3225   :  { %v18147_v16 = vsub.f32 %v6114_v45, %v6130_v41  ;;  %v18156_v45 = vld [vmem:[%s19484_s4 + $0x3f7] ss:$0 sm:$0xff] }
0x3227   :  { %v6138_v1 = vmul.f32 %v18147_v16, %v18147_v16 }
0x3229   :  { %v6146_v14 = vsel %vm145_vm0, %v6138_v1, 0.0 }
0x322b   :  { %6117 = vadd.xlane.f32.xlu0 %v6116_v27  ;;  %v6129_v27 = vmul.f32 0.03125, %v6121_v25 }
0x327f   :  { %v6793_v19 = vpop.xlane.xlu0 %6792 }
0x3280   :  { %16069 = vrcp.f32 %v6793_v19 }
0x3283   :  { %v6790_v51 = vpop.xlane.xlu0 %6789 }
0x3284   :  { %16071 = vrcp.f32 %v6790_v51 }
0x3287   :  { %v15588_v10 = vpop.permute.xlu0 %15587 }
0x3288   :  { %v15590_v54 = vunpack.i.h.bf16 %v15588_v10  ;;  %v15589_v18 = vunpack.i.l.bf16 %v15588_v10  ;;  %v6133_v10 = vsub.f32 %v18127_v58, %v6129_v27  ;;  %v7244_v58 = vld [vmem:[%s19486_s6 + $0x70] sm:$0xff] }
0x328a   :  { %v14931_v44 = vpack.c.bf16 %v15590_v54, %v15589_v18  ;;  %v16070_v48 = vpop.eup %16069 }
0x328b   :  { %v6797_v23 = vmul.f32 %v16070_v48, %v16066_v39  ;;  %v7245_v48 = vld [vmem:[%s19486_s6 + $0x78] sm:$0xff] }
0x328c   :  { %14933 = vmatprep.subr.msk.bf16.mxu1 %vm16555_vm2, %v14931_v44 }
0x328e   :  { %v16072_v29 = vpop.eup %16071 }
0x328f   :  { %v6796_v28 = vmul.f32 %v16072_v29, %v16068_v33  ;;  %v14953_v29 = vpack.c.bf16 %v7245_v48, %v7244_v58 }
0x3291   :  { %13943 = vmatprep.mubr.msk.f32.mxu1 %vm575_vm5, %v6796_v28 }
0x3292   :  { %13944 = vmatmul.mubr.msk.f32.vlgmr.msra.gmra.mrb[74].mxu1 %vm575_vm5, %v6797_v23 }
0x3293   :  { %14936 = vmatpush3.bf16.xpose.msk.msra.mxu1 %vm16555_vm2, %v14931_v44  ;;  %13950 = vmatprep.mubr.msk.f32.mxu1 %vm491_vm1, %v6886_v24  ;;  %v6137_v44 = vmul.f32 %v6133_v10, %v6133_v10 }
0x329a   :  { %13951 = vmatmul.mubr.msk.f32.vlgmr.msra.gmra.mrb[76].mxu1 %vm491_vm1, %v6888_v59 }
0x32b8   :  { %v6118_v49 = vpop.xlane.xlu0 %6117 }
0x32b9   :  { %v6128_v62 = vmul.f32 0.03125, %v6118_v49 }
0x32bb   :  { %v6132_v7 = vsub.f32 %v6112_v9, %v6128_v62 }
0x32bd   :  { %v6136_v5 = vmul.f32 %v6132_v7, %v6132_v7 }
0x32bf   :  { %v6140_v42 = vsel %vm145_vm0, %v6136_v5, 0.0 }
0x32c0   :  { %6141 = vadd.xlane.f32.xlu1 %v6140_v42 }
0x32c4   :  { %6147 = vadd.xlane.f32.xlu1 %v6146_v14 }
0x334d   :  { %v6142_v61 = vpop.xlane.xlu1 %6141 }
0x334e   :  { %v6152_v56 = vmul.f32 0.03125, %v6142_v61 }
0x3350   :  { %v6156_v36 = vadd.f32 1e-05, %v6152_v56 }
0x3351   :  { %v6148_v28 = vpop.xlane.xlu1 %6147 }
0x3352   :  { %16073 = vrsqrt.f32 %v6156_v36  ;;  %v6154_v59 = vmul.f32 0.03125, %v6148_v28 }
0x3354   :  { %v6158_v49 = vadd.f32 1e-05, %v6154_v59 }
0x335c   :  { %v16074_v50 = vpop.eup %16073 }
0x335d   :  { %v6164_v12 = vmul.f32 %v16074_v50, %v6132_v7 }
0x335f   :  { %v6173_v2 = vmul.f32 %v18156_v45, %v6164_v12 }
0x3361   :  { %v6182_v13 = vadd.f32 %v18161_v47, %v6173_v2 }
0x3363   :  { %v18166_v60 = vadd.f32 %v6182_v13, %v16673_v11  ;;  %v6115_v11 = vadd.f32 %v18106_v15, %v17958_v34  ;;  %v7243_v34 = vld [vmem:[%s19486_s6 + $0x68] sm:$0xff] }
0x3365   :  { %v18168_v39 = vpop.f32.mrb[74].mxu1  ;;  %13979 = vmatprep.mubr.msk.f32.mxu1 %vm145_vm0, %v18166_v60  ;;  %v6125_v18 = vsel %vm145_vm0, %v6115_v11, 0.0 }
0x3366   :  { %v18172_v32 = vpop.f32.mrb[75].mxu1 }
0x336d   :  { %v13952_v33 = vpop.f32.mrb[76].mxu1 }
0x336e   :  { %v6967_v35 = vpop.f32.mrb[77].mxu1  ;;  %v6973_v19 = vadd.f32 %v13952_v33, %v16599_v52  ;;  %v7242_v52 = vld [vmem:[%s19486_s6 + $0x60] sm:$0xff] }
0x336f   :  { %v6968_v9 = vadd.f32 %v6967_v35, %v16602_v53  ;;  %v6143_v53 = vsel %vm145_vm0, %v6137_v44, 0.0  ;;  %v14949_v15 = vpack.c.bf16 %v7243_v34, %v7242_v52 }
0x3370   :  { %v6979_v54 = vsel %vm575_vm5, %v6973_v19, -inf }
0x3371   :  { %v6976_v51 = vsel %vm575_vm5, %v6968_v9, -inf  ;;  %14950 = vmatprep.subr.bf16.mxu1 %v14949_v15 }
0x3372   :  { %6977 = vmax.xlane.f32.xlu0 %v6976_v51  ;;  %14952 = vmatpush3.bf16.msra.mxu1 %v14949_v15 }
0x3373   :  { %14954 = vmatprep.subr.bf16.mxu1 %v14953_v29 }
0x3376   :  { %6980 = vmax.xlane.f32.xlu0 %v6979_v54  ;;  %14956 = vmatpush3.bf16.msra.mxu1 %v14953_v29 }
0x337a   :  { %6126 = vadd.xlane.f32.xlu0 %v6125_v18 }
0x337e   :  { %6144 = vadd.xlane.f32.xlu0 %v6143_v53 }
0x33ff   :  { %v6978_v23 = vpop.xlane.xlu0 %6977 }
0x3400   :  { %v6982_v24 = vsub.f32 %v6968_v9, %v6978_v23 }
0x3402   :  { %v6984_v25 = vmul.f32 1.442695, %v6982_v24 }
0x3403   :  { %v6981_v3 = vpop.xlane.xlu0 %6980 }
0x3404   :  { %16075 = vpow2.f32 %v6984_v25  ;;  %v6983_v41 = vsub.f32 %v6973_v19, %v6981_v3  ;;  %v6284_v3 = vld [vmem:[%s19484_s4 + $0x230] sm:$0xff] }
0x3406   :  { %v6986_v62 = vmul.f32 1.442695, %v6983_v41  ;;  %v6285_v41 = vld [vmem:[%s19484_s4 + $0x238] sm:$0xff] }
0x3407   :  { %v6127_v7 = vpop.xlane.xlu0 %6126 }
0x3408   :  { %16077 = vpow2.f32 %v6986_v62  ;;  %v6131_v5 = vmul.f32 0.03125, %v6127_v7 }
0x3409   :  { %16079 = vrsqrt.f32 %v6158_v49 }
0x340a   :  { %v6135_v42 = vsub.f32 %v6115_v11, %v6131_v5 }
0x340b   :  { %v6145_v1 = vpop.xlane.xlu0 %6144 }
0x340c   :  { %v6153_v14 = vmul.f32 0.03125, %v6145_v1  ;;  %v6139_v61 = vmul.f32 %v6135_v42, %v6135_v42 }
0x340e   :  { %v16076_v56 = vpop.eup %16075  ;;  %v6157_v36 = vadd.f32 1e-05, %v6153_v14  ;;  %v6149_v50 = vsel %vm145_vm0, %v6139_v61, 0.0 }
0x340f   :  { %6150 = vadd.xlane.f32.xlu0 %v6149_v50  ;;  %v6988_v12 = vsel %vm575_vm5, %v16076_v56, 0.0 }
0x3410   :  { %16081 = vrsqrt.f32 %v6157_v36  ;;  %6989 = vadd.xlane.f32.xlu1 %v6988_v12 }
0x3412   :  { %v16078_v2 = vpop.eup %16077 }
0x3413   :  { %v16080_v13 = vpop.eup %16079  ;;  %v6991_v33 = vsel %vm575_vm5, %v16078_v2, 0.0 }
0x3414   :  { %6992 = vadd.xlane.f32.xlu0 %v6991_v33  ;;  %v6166_v35 = vmul.f32 %v16080_v13, %v18147_v16 }
0x3416   :  { %v6175_v27 = vmul.f32 %v18156_v45, %v6166_v35 }
0x3418   :  { %v6184_v11 = vadd.f32 %v18161_v47, %v6175_v27 }
0x341a   :  { %v16082_v9 = vpop.eup %16081  ;;  %v18209_v44 = vadd.f32 %v6184_v11, %v16699_v31 }
0x341b   :  { %v6165_v19 = vmul.f32 %v16082_v9, %v6133_v10 }
0x341d   :  { %v6174_v51 = vmul.f32 %v18156_v45, %v6165_v19 }
0x341f   :  { %v6183_v54 = vadd.f32 %v18161_v47, %v6174_v51 }
0x3421   :  { %15592 = vrot.lane.b32.xlu1 %v17872_v63, %s16370_s17  ;;  %v18206_v18 = vadd.f32 %v6183_v54, %v16692_v21 }
0x3423   :  { %13980 = vmatmul.mubr.msk.f32.vlgmr.msra.gmra.mrb[78].mxu1 %vm145_vm0, %v18206_v18 }
0x3424   :  { %13982 = vmatprep.mubr.msk.f32.mxu1 %vm145_vm0, %v18209_v44 }
0x3425   :  { %7089 = vrot.lane.b32.xlu1 %v18112_v4, %s16369_s16  ;;  %v6282_v4 = vld [vmem:[%s19484_s4 + $0x220] sm:$0xff] }
0x3429   :  { %7095 = vrot.lane.b32.xlu1 %v18172_v32, %s16371_s18  ;;  %v6283_v32 = vld [vmem:[%s19484_s4 + $0x228] sm:$0xff] }
0x342a   :  { %7087 = vrot.lane.b32.xlu0 %v18114_v55, %s16369_s16  ;;  %v14941_v34 = vpack.c.bf16 %v6283_v32, %v6282_v4 }
0x342d   :  { %7097 = vrot.lane.b32.xlu1 %v18168_v39, %s16371_s18 }
0x349c   :  { %v6151_v21 = vpop.xlane.xlu0 %6150 }
0x349d   :  { %v6155_v31 = vmul.f32 0.03125, %v6151_v21  ;;  %v6990_v63 = vpop.xlane.xlu1 %6989 }
0x349e   :  { %16083 = vrcp.f32 %v6990_v63 }
0x349f   :  { %v6159_v16 = vadd.f32 1e-05, %v6155_v31 }
0x34a1   :  { %16085 = vrsqrt.f32 %v6159_v16  ;;  %v15593_v10 = vpop.permute.xlu1 %15592  ;;  %v6993_v53 = vpop.xlane.xlu0 %6992 }
0x34a2   :  { %v15595_v55 = vunpack.i.h.bf16 %v15593_v10  ;;  %v15594_v52 = vunpack.i.l.bf16 %v15593_v10  ;;  %16087 = vrcp.f32 %v6993_v53 }
0x34a4   :  { %v14937_v39 = vpack.c.bf16 %v15595_v55, %v15594_v52 }
0x34a5   :  { %v7090_v9 = vpop.permute.xlu1 %7089 }
0x34a6   :  { %14938 = vmatprep.subr.bf16.mxu0 %v14937_v39  ;;  %v7110_v54 = vsel %vm491_vm1, %v18108_v6, %v7090_v9 }
0x34a7   :  { %14940 = vmatpush3.bf16.msra.mxu0 %v14937_v39 }
0x34a8   :  { %v16084_v15 = vpop.eup %16083  ;;  %14942 = vmatprep.subr.bf16.mxu0 %v14941_v34 }
0x34a9   :  { %v6996_v58 = vmul.f32 %v16084_v15, %v16076_v56  ;;  %v7096_v27 = vpop.permute.xlu1 %7095 }
0x34ab   :  { %v16086_v48 = vpop.eup %16085  ;;  %13957 = vmatprep.mubr.msk.f32.mxu0 %vm575_vm5, %v6996_v58 }
0x34ac   :  { %v16088_v29 = vpop.eup %16087  ;;  %v6167_v28 = vmul.f32 %v16086_v48, %v6135_v42  ;;  %v7088_v42 = vpop.permute.xlu0 %7087 }
0x34ad   :  { %v6997_v23 = vmul.f32 %v16088_v29, %v16078_v2  ;;  %v7098_v19 = vpop.permute.xlu1 %7097  ;;  %v7109_v51 = vsel %vm491_vm1, %v18110_v26, %v7088_v42 }
0x34ae   :  { %v6176_v24 = vmul.f32 %v18156_v45, %v6167_v28  ;;  %v14945_v45 = vpack.c.bf16 %v6285_v41, %v6284_v3  ;;  %v7111_v21 = vsel %vm575_vm5, %v7109_v51, %v7096_v27  ;;  %v7112_v63 = vsel %vm575_vm5, %v7110_v54, %v7098_v19 }
0x34af   :  { %13958 = vmatmul.mubr.msk.f32.vlgmr.msra.gmra.mrb[82].mxu0 %vm575_vm5, %v6997_v23 }
0x34b0   :  { %v6185_v59 = vadd.f32 %v18161_v47, %v6176_v24  ;;  %14944 = vmatpush3.bf16.msra.mxu0 %v14941_v34  ;;  %v12471_v47 = vld [vmem:[%s19486_s6 + $0x83] ss:$0 sm:$0xff] }
0x34b1   :  { %14946 = vmatprep.subr.bf16.mxu0 %v14945_v45 }
0x34b2   :  { %v18234_v25 = vadd.f32 %v6185_v59, %v16709_v20 }
0x34b4   :  { %13983 = vmatmul.mubr.msk.f32.gmra.mrb[80].mxu1 %vm145_vm0, %v18234_v25  ;;  %14948 = vmatpush3.bf16.msra.mxu0 %v14945_v45 }
0x34f6   :  { %v13981_v20 = vpop.f32.mrb[78].mxu1 }
0x34f7   :  { %v18247_v49 = vadd.f32 %v13981_v20, %v12471_v47  ;;  %v7329_v62 = vpop.f32.mrb[79].mxu1 }
0x34f8   :  { %v18249_v7 = vadd.f32 %v12471_v47, %v7329_v62 }
0x34fa   :  { %v18253_v5 = vpack.i.bf16 %v18247_v49, %v18249_v7 }
0x34fc   :  { %15597 = vrot.lane.b32.xlu0 %v18253_v5, %s16359_s25 }
0x356e   :  { %v15598_v1 = vpop.permute.xlu0 %15597 }
0x356f   :  { %v15600_v14 = vunpack.i.h.bf16 %v15598_v1  ;;  %v15599_v61 = vunpack.i.l.bf16 %v15598_v1 }
0x3571   :  { %v14957_v56 = vpack.c.bf16 %v15600_v14, %v15599_v61 }
0x3573   :  { %14959 = vmatprep.subr.msk.bf16.mxu0 %vm16555_vm2, %v14957_v56 }
0x3582   :  { %v13959_v36 = vpop.f32.mrb[82].mxu0 }
0x3583   :  { %7105 = vrot.lane.b32.xlu1 %v13959_v36, %s16372_s13  ;;  %v7076_v50 = vpop.f32.mrb[83].mxu0 }
0x3584   :  { %7103 = vrot.lane.b32.xlu0 %v7076_v50, %s16372_s13 }
0x3587   :  { %v13984_v12 = vpop.f32.mrb[80].mxu1 }
0x3588   :  { %v18261_v2 = vadd.f32 %v13984_v12, %v12471_v47  ;;  %v7339_v13 = vpop.f32.mrb[81].mxu1 }
0x3589   :  { %v18263_v33 = vadd.f32 %v12471_v47, %v7339_v13 }
0x358b   :  { %v18267_v35 = vpack.i.bf16 %v18261_v2, %v18263_v33 }
0x358d   :  { %15602 = vrot.lane.b32.xlu0 %v18267_v35, %s16359_s25 }
0x35f5   :  { %v7106_v11 = vpop.permute.xlu1 %7105 }
0x35f6   :  { %v7104_v31 = vpop.permute.xlu0 %7103  ;;  %v7114_v10 = vsel %vm1313_vm6, %v7112_v63, %v7106_v11 }
0x35f7   :  { %v7113_v16 = vsel %vm1313_vm6, %v7111_v21, %v7104_v31 }
0x35f8   :  { %13968 = vmatprep.mubr.msk.f32.mxu0 %vm145_vm0, %v7113_v16 }
0x35f9   :  { %13969 = vmatmul.mubr.msk.f32.vlgmr.msra.gmra.mrb[84].mxu0 %vm145_vm0, %v7114_v10 }
0x35fa   :  { %14962 = vmatpush3.bf16.xpose.msk.msra.mxu0 %vm16555_vm2, %v14957_v56  ;;  %13993 = vmatprep.mubr.msk.f32.mxu0 %vm491_vm1, %v18249_v7 }
0x35ff   :  { %v15603_v6 = vpop.permute.xlu0 %15602 }
0x3600   :  { %v15605_v26 = vunpack.i.h.bf16 %v15603_v6  ;;  %v15604_v53 = vunpack.i.l.bf16 %v15603_v6 }
0x3602   :  { %v14963_v4 = vpack.c.bf16 %v15605_v26, %v15604_v53 }
0x3604   :  { %14965 = vmatprep.subr.msk.bf16.mxu0 %vm16555_vm2, %v14963_v4 }
0x3605   :  { %14968 = vmatpush3.bf16.xpose.msk.msra.mxu0 %vm16555_vm2, %v14963_v4 }
0x360c   :  { %13994 = vmatmul.mubr.msk.f32.vlgmr.msra.gmra.mrb[86].mxu0 %vm491_vm1, %v18247_v49 }
0x360d   :  { %13996 = vmatprep.mubr.msk.f32.mxu0 %vm491_vm1, %v18263_v33 }
0x3610   :  { %13997 = vmatmul.mubr.msk.f32.gmra.mrb[88].mxu0 %vm491_vm1, %v18261_v2 }
0x36cc   :  { %v18295_v32 = vpop.f32.mrb[84].mxu0 }
0x36cd   :  { %v18297_v55 = vpop.f32.mrb[85].mxu0 }
0x36df   :  { %v13995_v52 = vpop.f32.mrb[86].mxu0 }
0x36e0   :  { %v7453_v39 = vadd.f32 %v13995_v52, %v16834_v43  ;;  %v7447_v34 = vpop.f32.mrb[87].mxu0 }
0x36e1   :  { %v7448_v15 = vadd.f32 %v7447_v34, %v16838_v57 }
0x36e2   :  { %v7469_v58 = vsel %vm145_vm0, %v7453_v39, -inf }
0x36e3   :  { %7470 = vmax.xlane.f32.xlu0 %v7469_v58  ;;  %v13998_v48 = vpop.f32.mrb[88].mxu0  ;;  %v7466_v29 = vsel %vm145_vm0, %v7448_v15, -inf }
0x36e4   :  { %v7463_v28 = vadd.f32 %v13998_v48, %v16854_v8  ;;  %v7457_v23 = vpop.f32.mrb[89].mxu0  ;;  %7467 = vmax.xlane.f32.xlu1 %v7466_v29 }
0x36e5   :  { %v7458_v24 = vadd.f32 %v7457_v23, %v16850_v17 }
0x36e6   :  { %v7475_v59 = vsel %vm145_vm0, %v7463_v28, -inf }
0x36e7   :  { %v7472_v3 = vsel %vm145_vm0, %v7458_v24, -inf }
0x36e8   :  { %7473 = vmax.xlane.f32.xlu0 %v7472_v3  ;;  %7476 = vmax.xlane.f32.xlu1 %v7475_v59 }
0x36f9   :  { %15612 = vrot.lane.b32.xlu1 %v18267_v35, %s16362_s27 }
0x36fe   :  { %15607 = vrot.lane.b32.xlu0 %v18253_v5, %s16362_s27 }
0x3770   :  { %v7471_v41 = vpop.xlane.xlu0 %7470 }
0x3771   :  { %v7479_v45 = vsub.f32 %v7453_v39, %v7471_v41  ;;  %v7468_v47 = vpop.xlane.xlu1 %7467 }
0x3772   :  { %v7478_v20 = vsub.f32 %v7448_v15, %v7468_v47 }
0x3773   :  { %v7484_v62 = vmul.f32 1.442695, %v7479_v45 }
0x3774   :  { %v7482_v42 = vmul.f32 1.442695, %v7478_v20 }
0x3775   :  { %16089 = vpow2.f32 %v7484_v62  ;;  %v7474_v1 = vpop.xlane.xlu0 %7473  ;;  %v7477_v14 = vpop.xlane.xlu1 %7476 }
0x3776   :  { %16091 = vpow2.f32 %v7482_v42  ;;  %v7480_v61 = vsub.f32 %v7458_v24, %v7474_v1  ;;  %v7481_v10 = vsub.f32 %v7463_v28, %v7477_v14 }
0x3778   :  { %v7486_v56 = vmul.f32 1.442695, %v7480_v61  ;;  %v7488_v6 = vmul.f32 1.442695, %v7481_v10 }
0x3779   :  { %v15608_v36 = vpop.permute.xlu0 %15607  ;;  %v15613_v50 = vpop.permute.xlu1 %15612 }
0x377a   :  { %16093 = vpow2.f32 %v7486_v56  ;;  %v15610_v12 = vunpack.i.h.bf16 %v15608_v36  ;;  %v15609_v13 = vunpack.i.l.bf16 %v15608_v36  ;;  %v15615_v9 = vunpack.i.h.bf16 %v15613_v50 }
0x377b   :  { %v15614_v27 = vunpack.i.l.bf16 %v15613_v50  ;;  %16095 = vpow2.f32 %v7488_v6 }
0x377c   :  { %v14969_v19 = vpack.c.bf16 %v15610_v12, %v15609_v13 }
0x377d   :  { %v14973_v51 = vpack.c.bf16 %v15615_v9, %v15614_v27 }
0x377e   :  { %14970 = vmatprep.subr.bf16.mxu1 %v14969_v19 }
0x377f   :  { %v16090_v11 = vpop.eup %16089  ;;  %14972 = vmatpush3.bf16.msra.mxu1 %v14969_v19 }
0x3780   :  { %v16092_v54 = vpop.eup %16091  ;;  %14974 = vmatprep.subr.bf16.mxu1 %v14973_v51  ;;  %v7493_v21 = vsel %vm145_vm0, %v16090_v11, 0.0 }
0x3781   :  { %7494 = vadd.xlane.f32.xlu1 %v7493_v21  ;;  %v7490_v31 = vsel %vm145_vm0, %v16092_v54, 0.0 }
0x3782   :  { %7491 = vadd.xlane.f32.xlu0 %v7490_v31 }
0x3783   :  { %14976 = vmatpush3.bf16.msra.mxu1 %v14973_v51 }
0x3784   :  { %v16094_v63 = vpop.eup %16093 }
0x3785   :  { %v7496_v16 = vsel %vm145_vm0, %v16094_v63, 0.0  ;;  %v16096_v26 = vpop.eup %16095 }
0x3786   :  { %7497 = vadd.xlane.f32.xlu0 %v7496_v16  ;;  %v7499_v53 = vsel %vm145_vm0, %v16096_v26, 0.0 }
0x3792   :  { %15617 = vrot.lane.b32.xlu1 %v18253_v5, %s16358_s24 }
0x379c   :  { %15622 = vrot.lane.b32.xlu0 %v18267_v35, %s16358_s24 }
0x37a0   :  { %7621 = vrot.lane.b32.xlu0 %v18247_v49, %s16360_s26 }
0x37a4   :  { %7625 = vrot.lane.b32.xlu0 %v18261_v2, %s16360_s26 }
0x37b6   :  { %7500 = vadd.xlane.f32.xlu1 %v7499_v53 }
0x37c7   :  { %7619 = vrot.lane.b32.xlu1 %v18249_v7, %s16360_s26 }
0x37cb   :  { %7623 = vrot.lane.b32.xlu1 %v18263_v33, %s16360_s26 }
0x380e   :  { %v7495_v4 = vpop.xlane.xlu1 %7494 }
0x380f   :  { %16097 = vrcp.f32 %v7495_v4  ;;  %v7492_v52 = vpop.xlane.xlu0 %7491 }
0x3810   :  { %16099 = vrcp.f32 %v7492_v52 }
0x3812   :  { %v15618_v39 = vpop.permute.xlu1 %15617 }
0x3813   :  { %v15620_v34 = vunpack.i.h.bf16 %v15618_v39  ;;  %v15619_v15 = vunpack.i.l.bf16 %v15618_v39  ;;  %v7498_v58 = vpop.xlane.xlu0 %7497 }
0x3814   :  { %16101 = vrcp.f32 %v7498_v58 }
0x3815   :  { %v14977_v48 = vpack.c.bf16 %v15620_v34, %v15619_v15 }
0x3817   :  { %v15623_v29 = vpop.permute.xlu0 %15622  ;;  %14979 = vmatprep.subr.msk.bf16.mxu1 %vm16555_vm2, %v14977_v48 }
0x3818   :  { %v15625_v24 = vunpack.i.h.bf16 %v15623_v29  ;;  %v15624_v59 = vunpack.i.l.bf16 %v15623_v29 }
0x3819   :  { %v16098_v28 = vpop.eup %16097 }
0x381a   :  { %v16100_v23 = vpop.eup %16099  ;;  %v7507_v41 = vmul.f32 %v16098_v28, %v16090_v11  ;;  %v14983_v47 = vpack.c.bf16 %v15625_v24, %v15624_v59 }
0x381b   :  { %v7506_v3 = vmul.f32 %v16100_v23, %v16092_v54  ;;  %v7622_v61 = vpop.permute.xlu0 %7621 }
0x381d   :  { %14007 = vmatprep.mubr.msk.f32.mxu1 %vm145_vm0, %v7506_v3 }
0x381e   :  { %v16102_v45 = vpop.eup %16101  ;;  %14008 = vmatmul.mubr.msk.f32.vlgmr.msra.gmra.mrb[82].mxu1 %vm145_vm0, %v7507_v41 }
0x381f   :  { %14982 = vmatpush3.bf16.xpose.msk.msra.mxu1 %vm16555_vm2, %v14977_v48  ;;  %v7508_v20 = vmul.f32 %v16102_v45, %v16094_v63  ;;  %v7626_v36 = vpop.permute.xlu0 %7625 }
0x3820   :  { %14985 = vmatprep.subr.msk.bf16.mxu1 %vm16555_vm2, %v14983_v47 }
0x3821   :  { %14010 = vmatprep.mubr.msk.f32.mxu1 %vm145_vm0, %v7508_v20 }
0x3827   :  { %14988 = vmatpush3.bf16.xpose.msk.msra.mxu1 %vm16555_vm2, %v14983_v47 }
0x3843   :  { %v7501_v62 = vpop.xlane.xlu1 %7500 }
0x3844   :  { %16103 = vrcp.f32 %v7501_v62 }
0x3847   :  { %v7620_v1 = vpop.permute.xlu1 %7619 }
0x384b   :  { %v7624_v56 = vpop.permute.xlu1 %7623 }
0x384e   :  { %v16104_v42 = vpop.eup %16103 }
0x384f   :  { %v7509_v14 = vmul.f32 %v16104_v42, %v16096_v26 }
0x3851   :  { %14011 = vmatmul.mubr.msk.f32.gmra.mrb[84].mxu1 %vm145_vm0, %v7509_v14 }
0x3852   :  { %14021 = vmatprep.mubr.msk.f32.mxu1 %vm491_vm1, %v7620_v1 }
0x3855   :  { %14022 = vmatmul.mubr.msk.f32.vlgmr.msra.gmra.mrb[86].mxu1 %vm491_vm1, %v7622_v61 }
0x3856   :  { %14024 = vmatprep.mubr.msk.f32.mxu1 %vm491_vm1, %v7624_v56 }
0x3859   :  { %14025 = vmatmul.mubr.msk.f32.gmra.mrb[88].mxu1 %vm491_vm1, %v7626_v36 }
0x38f1   :  { %v18343_v50 = vpop.f32.mrb[82].mxu1 }
0x38f2   :  { %v18345_v12 = vpop.f32.mrb[83].mxu1 }
0x3924   :  { %v18347_v13 = vpop.f32.mrb[84].mxu1 }
0x3925   :  { %v18349_v9 = vpop.f32.mrb[85].mxu1 }
0x3928   :  { %v14023_v27 = vpop.f32.mrb[86].mxu1 }
0x3929   :  { %v7723_v19 = vadd.f32 %v14023_v27, %v16834_v43  ;;  %v7717_v51 = vpop.f32.mrb[87].mxu1 }
0x392a   :  { %v7718_v11 = vadd.f32 %v7717_v51, %v16838_v57 }
0x392b   :  { %v7739_v54 = vsel %vm145_vm0, %v7723_v19, -inf }
0x392c   :  { %7740 = vmax.xlane.f32.xlu0 %v7739_v54  ;;  %v14026_v21 = vpop.f32.mrb[88].mxu1  ;;  %v7736_v31 = vsel %vm145_vm0, %v7718_v11, -inf }
0x392d   :  { %v7733_v63 = vadd.f32 %v14026_v21, %v16854_v8  ;;  %v7727_v16 = vpop.f32.mrb[89].mxu1  ;;  %7737 = vmax.xlane.f32.xlu1 %v7736_v31 }
0x392e   :  { %v7728_v10 = vadd.f32 %v7727_v16, %v16850_v17 }
0x392f   :  { %v7745_v6 = vsel %vm145_vm0, %v7733_v63, -inf }
0x3930   :  { %v7742_v26 = vsel %vm145_vm0, %v7728_v10, -inf }
0x3931   :  { %7743 = vmax.xlane.f32.xlu0 %v7742_v26  ;;  %7746 = vmax.xlane.f32.xlu1 %v7745_v6 }
0x3942   :  { %15632 = vrot.lane.b32.xlu1 %v18267_v35, %s16364_s29 }
0x3947   :  { %15627 = vrot.lane.b32.xlu0 %v18253_v5, %s16364_s29 }
0x39b9   :  { %v7741_v53 = vpop.xlane.xlu0 %7740 }
0x39ba   :  { %v7749_v4 = vsub.f32 %v7723_v19, %v7741_v53  ;;  %v7738_v52 = vpop.xlane.xlu1 %7737 }
0x39bb   :  { %v7748_v39 = vsub.f32 %v7718_v11, %v7738_v52 }
0x39bc   :  { %v7754_v34 = vmul.f32 1.442695, %v7749_v4 }
0x39bd   :  { %v7752_v15 = vmul.f32 1.442695, %v7748_v39 }
0x39be   :  { %16105 = vpow2.f32 %v7754_v34  ;;  %v7744_v58 = vpop.xlane.xlu0 %7743  ;;  %v7747_v48 = vpop.xlane.xlu1 %7746 }
0x39bf   :  { %16107 = vpow2.f32 %v7752_v15  ;;  %v7750_v29 = vsub.f32 %v7728_v10, %v7744_v58  ;;  %v7751_v36 = vsub.f32 %v7733_v63, %v7747_v48 }
0x39c1   :  { %v7756_v28 = vmul.f32 1.442695, %v7750_v29  ;;  %v7758_v27 = vmul.f32 1.442695, %v7751_v36 }
0x39c2   :  { %v15628_v23 = vpop.permute.xlu0 %15627  ;;  %v15633_v24 = vpop.permute.xlu1 %15632 }
0x39c3   :  { %16109 = vpow2.f32 %v7756_v28  ;;  %v15630_v59 = vunpack.i.h.bf16 %v15628_v23  ;;  %v15629_v3 = vunpack.i.l.bf16 %v15628_v23  ;;  %v15635_v41 = vunpack.i.h.bf16 %v15633_v24 }
0x39c4   :  { %v15634_v45 = vunpack.i.l.bf16 %v15633_v24  ;;  %16111 = vpow2.f32 %v7758_v27 }
0x39c5   :  { %v14989_v47 = vpack.c.bf16 %v15630_v59, %v15629_v3 }
0x39c6   :  { %v14993_v20 = vpack.c.bf16 %v15635_v41, %v15634_v45 }
0x39c7   :  { %14990 = vmatprep.subr.bf16.mxu0 %v14989_v47 }
0x39c8   :  { %v16106_v62 = vpop.eup %16105  ;;  %14992 = vmatpush3.bf16.msra.mxu0 %v14989_v47 }
0x39c9   :  { %v16108_v42 = vpop.eup %16107  ;;  %14994 = vmatprep.subr.bf16.mxu0 %v14993_v20  ;;  %v7763_v1 = vsel %vm145_vm0, %v16106_v62, 0.0 }
0x39ca   :  { %7764 = vadd.xlane.f32.xlu1 %v7763_v1  ;;  %v7760_v14 = vsel %vm145_vm0, %v16108_v42, 0.0 }
0x39cb   :  { %7761 = vadd.xlane.f32.xlu0 %v7760_v14 }
0x39cc   :  { %14996 = vmatpush3.bf16.msra.mxu0 %v14993_v20 }
0x39cd   :  { %v16110_v61 = vpop.eup %16109 }
0x39ce   :  { %v7766_v56 = vsel %vm145_vm0, %v16110_v61, 0.0  ;;  %v16112_v19 = vpop.eup %16111 }
0x39cf   :  { %7767 = vadd.xlane.f32.xlu0 %v7766_v56  ;;  %v7769_v51 = vsel %vm145_vm0, %v16112_v19, 0.0 }
0x39db   :  { %15637 = vrot.lane.b32.xlu1 %v18253_v5, %s16363_s28 }
0x39e5   :  { %15642 = vrot.lane.b32.xlu0 %v18267_v35, %s16363_s28 }
0x39e9   :  { %7891 = vrot.lane.b32.xlu0 %v18247_v49, %s16365_s30 }
0x39ed   :  { %7895 = vrot.lane.b32.xlu0 %v18261_v2, %s16365_s30 }
0x39ff   :  { %7770 = vadd.xlane.f32.xlu1 %v7769_v51 }
0x3a10   :  { %7889 = vrot.lane.b32.xlu1 %v18249_v7, %s16365_s30 }
0x3a14   :  { %7893 = vrot.lane.b32.xlu1 %v18263_v33, %s16365_s30 }
0x3a57   :  { %v7765_v11 = vpop.xlane.xlu1 %7764 }
0x3a58   :  { %16113 = vrcp.f32 %v7765_v11  ;;  %v7762_v54 = vpop.xlane.xlu0 %7761 }
0x3a59   :  { %16115 = vrcp.f32 %v7762_v54 }
0x3a5b   :  { %v15638_v21 = vpop.permute.xlu1 %15637 }
0x3a5c   :  { %v15640_v31 = vunpack.i.h.bf16 %v15638_v21  ;;  %v15639_v63 = vunpack.i.l.bf16 %v15638_v21  ;;  %v7768_v16 = vpop.xlane.xlu0 %7767 }
0x3a5d   :  { %16117 = vrcp.f32 %v7768_v16 }
0x3a5e   :  { %v14997_v10 = vpack.c.bf16 %v15640_v31, %v15639_v63 }
0x3a60   :  { %v15643_v6 = vpop.permute.xlu0 %15642  ;;  %14999 = vmatprep.subr.msk.bf16.mxu0 %vm16555_vm2, %v14997_v10 }
0x3a61   :  { %v15645_v4 = vunpack.i.h.bf16 %v15643_v6  ;;  %v15644_v52 = vunpack.i.l.bf16 %v15643_v6 }
0x3a62   :  { %v16114_v26 = vpop.eup %16113 }
0x3a63   :  { %v16116_v53 = vpop.eup %16115  ;;  %v7777_v34 = vmul.f32 %v16114_v26, %v16106_v62  ;;  %v15003_v58 = vpack.c.bf16 %v15645_v4, %v15644_v52 }
0x3a64   :  { %v7776_v39 = vmul.f32 %v16116_v53, %v16108_v42  ;;  %v7892_v59 = vpop.permute.xlu0 %7891 }
0x3a66   :  { %14035 = vmatprep.mubr.msk.f32.mxu0 %vm145_vm0, %v7776_v39 }
0x3a67   :  { %v16118_v15 = vpop.eup %16117  ;;  %14036 = vmatmul.mubr.msk.f32.vlgmr.msra.gmra.mrb[90].mxu0 %vm145_vm0, %v7777_v34 }
0x3a68   :  { %15002 = vmatpush3.bf16.xpose.msk.msra.mxu0 %vm16555_vm2, %v14997_v10  ;;  %v7778_v48 = vmul.f32 %v16118_v15, %v16110_v61  ;;  %v7896_v41 = vpop.permute.xlu0 %7895 }
0x3a69   :  { %15005 = vmatprep.subr.msk.bf16.mxu0 %vm16555_vm2, %v15003_v58 }
0x3a6a   :  { %14038 = vmatprep.mubr.msk.f32.mxu0 %vm145_vm0, %v7778_v48 }
0x3a70   :  { %15008 = vmatpush3.bf16.xpose.msk.msra.mxu0 %vm16555_vm2, %v15003_v58 }
0x3a8c   :  { %v7771_v29 = vpop.xlane.xlu1 %7770 }
0x3a8d   :  { %16119 = vrcp.f32 %v7771_v29 }
0x3a90   :  { %v7890_v23 = vpop.permute.xlu1 %7889 }
0x3a94   :  { %v7894_v3 = vpop.permute.xlu1 %7893 }
0x3a97   :  { %v16120_v28 = vpop.eup %16119 }
0x3a98   :  { %v7779_v24 = vmul.f32 %v16120_v28, %v16112_v19 }
0x3a9a   :  { %14039 = vmatmul.mubr.msk.f32.gmra.mrb[92].mxu0 %vm145_vm0, %v7779_v24 }
0x3a9b   :  { %14049 = vmatprep.mubr.msk.f32.mxu0 %vm491_vm1, %v7890_v23 }
0x3a9e   :  { %14050 = vmatmul.mubr.msk.f32.vlgmr.msra.gmra.mrb[94].mxu0 %vm491_vm1, %v7892_v59 }
0x3a9f   :  { %14052 = vmatprep.mubr.msk.f32.mxu0 %vm491_vm1, %v7894_v3 }
0x3aa2   :  { %14053 = vmatmul.mubr.msk.f32.gmra.mrb[96].mxu0 %vm491_vm1, %v7896_v41 }
0x3b3a   :  { %v18395_v45 = vpop.f32.mrb[90].mxu0 }
0x3b3b   :  { %v18397_v47 = vpop.f32.mrb[91].mxu0 }
0x3b6d   :  { %v18399_v20 = vpop.f32.mrb[92].mxu0 }
0x3b6e   :  { %v18401_v62 = vpop.f32.mrb[93].mxu0 }
0x3b71   :  { %v14051_v42 = vpop.f32.mrb[94].mxu0 }
0x3b72   :  { %v7993_v1 = vadd.f32 %v14051_v42, %v16834_v43  ;;  %v7987_v14 = vpop.f32.mrb[95].mxu0 }
0x3b73   :  { %v7988_v61 = vadd.f32 %v7987_v14, %v16838_v57 }
0x3b74   :  { %v8009_v56 = vsel %vm145_vm0, %v7993_v1, -inf }
0x3b75   :  { %8010 = vmax.xlane.f32.xlu0 %v8009_v56  ;;  %v14054_v36 = vpop.f32.mrb[96].mxu0  ;;  %v8006_v27 = vsel %vm145_vm0, %v7988_v61, -inf }
0x3b76   :  { %v8003_v19 = vadd.f32 %v14054_v36, %v16854_v8  ;;  %v7997_v51 = vpop.f32.mrb[97].mxu0  ;;  %8007 = vmax.xlane.f32.xlu1 %v8006_v27 }
0x3b77   :  { %v7998_v11 = vadd.f32 %v7997_v51, %v16850_v17 }
0x3b78   :  { %v8015_v54 = vsel %vm145_vm0, %v8003_v19, -inf }
0x3b79   :  { %v8012_v21 = vsel %vm145_vm0, %v7998_v11, -inf }
0x3b7a   :  { %8013 = vmax.xlane.f32.xlu0 %v8012_v21  ;;  %8016 = vmax.xlane.f32.xlu1 %v8015_v54 }
0x3b8b   :  { %15652 = vrot.lane.b32.xlu1 %v18267_v35, %s16368_s12 }
0x3b90   :  { %15647 = vrot.lane.b32.xlu0 %v18253_v5, %s16368_s12 }
0x3c02   :  { %v8011_v31 = vpop.xlane.xlu0 %8010 }
0x3c03   :  { %v8019_v63 = vsub.f32 %v7993_v1, %v8011_v31  ;;  %v8008_v16 = vpop.xlane.xlu1 %8007 }
0x3c04   :  { %v8018_v10 = vsub.f32 %v7988_v61, %v8008_v16 }
0x3c05   :  { %v8024_v6 = vmul.f32 1.442695, %v8019_v63 }
0x3c06   :  { %v8022_v26 = vmul.f32 1.442695, %v8018_v10 }
0x3c07   :  { %16121 = vpow2.f32 %v8024_v6  ;;  %v8014_v53 = vpop.xlane.xlu0 %8013  ;;  %v8017_v4 = vpop.xlane.xlu1 %8016 }
0x3c08   :  { %16123 = vpow2.f32 %v8022_v26  ;;  %v8020_v52 = vsub.f32 %v7998_v11, %v8014_v53  ;;  %v8021_v61 = vsub.f32 %v8003_v19, %v8017_v4 }
0x3c0a   :  { %v8026_v39 = vmul.f32 1.442695, %v8020_v52  ;;  %v8028_v56 = vmul.f32 1.442695, %v8021_v61 }
0x3c0b   :  { %v15648_v34 = vpop.permute.xlu0 %15647  ;;  %v15653_v15 = vpop.permute.xlu1 %15652 }
0x3c0c   :  { %16125 = vpow2.f32 %v8026_v39  ;;  %v15650_v58 = vunpack.i.h.bf16 %v15648_v34  ;;  %v15649_v48 = vunpack.i.l.bf16 %v15648_v34  ;;  %v15655_v29 = vunpack.i.h.bf16 %v15653_v15 }
0x3c0d   :  { %v15654_v28 = vunpack.i.l.bf16 %v15653_v15  ;;  %16127 = vpow2.f32 %v8028_v56 }
0x3c0e   :  { %v15009_v23 = vpack.c.bf16 %v15650_v58, %v15649_v48 }
0x3c0f   :  { %v15013_v24 = vpack.c.bf16 %v15655_v29, %v15654_v28 }
0x3c10   :  { %15010 = vmatprep.subr.bf16.mxu1 %v15009_v23 }
0x3c11   :  { %v16122_v59 = vpop.eup %16121  ;;  %15012 = vmatpush3.bf16.msra.mxu1 %v15009_v23 }
0x3c12   :  { %v16124_v3 = vpop.eup %16123  ;;  %15014 = vmatprep.subr.bf16.mxu1 %v15013_v24  ;;  %v8033_v41 = vsel %vm145_vm0, %v16122_v59, 0.0 }
0x3c13   :  { %8034 = vadd.xlane.f32.xlu1 %v8033_v41  ;;  %v8030_v42 = vsel %vm145_vm0, %v16124_v3, 0.0 }
0x3c14   :  { %8031 = vadd.xlane.f32.xlu0 %v8030_v42 }
0x3c15   :  { %15016 = vmatpush3.bf16.msra.mxu1 %v15013_v24 }
0x3c16   :  { %v16126_v1 = vpop.eup %16125 }
0x3c17   :  { %v8036_v14 = vsel %vm145_vm0, %v16126_v1, 0.0  ;;  %v16128_v36 = vpop.eup %16127 }
0x3c18   :  { %8037 = vadd.xlane.f32.xlu0 %v8036_v14  ;;  %v8039_v27 = vsel %vm145_vm0, %v16128_v36, 0.0 }
0x3c24   :  { %15657 = vrot.lane.b32.xlu1 %v18253_v5, %s16366_s10 }
0x3c2e   :  { %15662 = vrot.lane.b32.xlu0 %v18267_v35, %s16366_s10 }
0x3c32   :  { %8161 = vrot.lane.b32.xlu0 %v18247_v49, %s16367_s11 }
0x3c36   :  { %8165 = vrot.lane.b32.xlu0 %v18261_v2, %s16367_s11 }
0x3c48   :  { %8040 = vadd.xlane.f32.xlu1 %v8039_v27 }
0x3c59   :  { %8159 = vrot.lane.b32.xlu1 %v18249_v7, %s16367_s11 }
0x3c5d   :  { %8163 = vrot.lane.b32.xlu1 %v18263_v33, %s16367_s11 }
0x3ca0   :  { %v8035_v51 = vpop.xlane.xlu1 %8034 }
0x3ca1   :  { %16129 = vrcp.f32 %v8035_v51  ;;  %v8032_v19 = vpop.xlane.xlu0 %8031 }
0x3ca2   :  { %16131 = vrcp.f32 %v8032_v19 }
0x3ca4   :  { %v15658_v49 = vpop.permute.xlu1 %15657 }
0x3ca5   :  { %v15660_v11 = vunpack.i.h.bf16 %v15658_v49  ;;  %v15659_v54 = vunpack.i.l.bf16 %v15658_v49  ;;  %v8038_v21 = vpop.xlane.xlu0 %8037 }
0x3ca6   :  { %16133 = vrcp.f32 %v8038_v21 }
0x3ca7   :  { %v15017_v2 = vpack.c.bf16 %v15660_v11, %v15659_v54 }
0x3ca9   :  { %v15663_v31 = vpop.permute.xlu0 %15662  ;;  %15019 = vmatprep.subr.msk.bf16.mxu1 %vm16555_vm2, %v15017_v2 }
0x3caa   :  { %v15665_v7 = vunpack.i.h.bf16 %v15663_v31  ;;  %v15664_v10 = vunpack.i.l.bf16 %v15663_v31 }
0x3cab   :  { %v16130_v63 = vpop.eup %16129 }
0x3cac   :  { %v16132_v16 = vpop.eup %16131  ;;  %v8047_v33 = vmul.f32 %v16130_v63, %v16122_v59  ;;  %v15023_v53 = vpack.c.bf16 %v15665_v7, %v15664_v10 }
0x3cad   :  { %v8046_v6 = vmul.f32 %v16132_v16, %v16124_v3  ;;  %v8162_v58 = vpop.permute.xlu0 %8161 }
0x3caf   :  { %14063 = vmatprep.mubr.msk.f32.mxu1 %vm145_vm0, %v8046_v6 }
0x3cb0   :  { %v16134_v26 = vpop.eup %16133  ;;  %14064 = vmatmul.mubr.msk.f32.vlgmr.msra.gmra.mrb[90].mxu1 %vm145_vm0, %v8047_v33 }
0x3cb1   :  { %15022 = vmatpush3.bf16.xpose.msk.msra.mxu1 %vm16555_vm2, %v15017_v2  ;;  %v8048_v4 = vmul.f32 %v16134_v26, %v16126_v1  ;;  %v8166_v29 = vpop.permute.xlu0 %8165 }
0x3cb2   :  { %15025 = vmatprep.subr.msk.bf16.mxu1 %vm16555_vm2, %v15023_v53 }
0x3cb3   :  { %14066 = vmatprep.mubr.msk.f32.mxu1 %vm145_vm0, %v8048_v4 }
0x3cb9   :  { %15028 = vmatpush3.bf16.xpose.msk.msra.mxu1 %vm16555_vm2, %v15023_v53 }
0x3cd5   :  { %v8041_v52 = vpop.xlane.xlu1 %8040 }
0x3cd6   :  { %16135 = vrcp.f32 %v8041_v52 }
0x3cd9   :  { %v8160_v34 = vpop.permute.xlu1 %8159 }
0x3cdd   :  { %v8164_v48 = vpop.permute.xlu1 %8163 }
0x3ce0   :  { %v16136_v39 = vpop.eup %16135 }
0x3ce1   :  { %v8049_v15 = vmul.f32 %v16136_v39, %v16128_v36 }
0x3ce3   :  { %14067 = vmatmul.mubr.msk.f32.gmra.mrb[92].mxu1 %vm145_vm0, %v8049_v15 }
0x3ce4   :  { %14077 = vmatprep.mubr.msk.f32.mxu1 %vm491_vm1, %v8160_v34 }
0x3ce7   :  { %14078 = vmatmul.mubr.msk.f32.vlgmr.msra.gmra.mrb[94].mxu1 %vm491_vm1, %v8162_v58 }
0x3ce8   :  { %14080 = vmatprep.mubr.msk.f32.mxu1 %vm491_vm1, %v8164_v48 }
0x3ceb   :  { %14081 = vmatmul.mubr.msk.f32.gmra.mrb[96].mxu1 %vm491_vm1, %v8166_v29 }
0x3d83   :  { %v14065_v28 = vpop.f32.mrb[90].mxu1 }
0x3d84   :  { %v8140_v23 = vpop.f32.mrb[91].mxu1 }
0x3db6   :  { %v18447_v24 = vpop.f32.mrb[92].mxu1 }
0x3db7   :  { %v18449_v59 = vpop.f32.mrb[93].mxu1 }
0x3dba   :  { %v14079_v3 = vpop.f32.mrb[94].mxu1 }
0x3dbb   :  { %v8263_v41 = vadd.f32 %v14079_v3, %v16834_v43  ;;  %v8257_v42 = vpop.f32.mrb[95].mxu1 }
0x3dbc   :  { %v8258_v1 = vadd.f32 %v8257_v42, %v16838_v57 }
0x3dbd   :  { %v8279_v14 = vsel %vm145_vm0, %v8263_v41, -inf }
0x3dbe   :  { %8280 = vmax.xlane.f32.xlu0 %v8279_v14  ;;  %v14082_v61 = vpop.f32.mrb[96].mxu1  ;;  %v8276_v56 = vsel %vm145_vm0, %v8258_v1, -inf }
0x3dbf   :  { %v8273_v36 = vadd.f32 %v14082_v61, %v16854_v8  ;;  %v8267_v27 = vpop.f32.mrb[97].mxu1  ;;  %8277 = vmax.xlane.f32.xlu1 %v8276_v56 }
0x3dc0   :  { %v8268_v51 = vadd.f32 %v8267_v27, %v16850_v17  ;;  %v7349_v27 = vld [vmem:[%s19484_s4 + $0x248] sm:$0xff] }
0x3dc1   :  { %v8285_v19 = vsel %vm145_vm0, %v8273_v36, -inf }
0x3dc2   :  { %v8282_v49 = vsel %vm145_vm0, %v8268_v51, -inf }
0x3dc3   :  { %8283 = vmax.xlane.f32.xlu0 %v8282_v49  ;;  %8286 = vmax.xlane.f32.xlu1 %v8285_v19  ;;  %v7351_v49 = vld [vmem:[%s19484_s4 + $0x258] sm:$0xff] }
0x3e4b   :  { %v8281_v43 = vpop.xlane.xlu0 %8280 }
0x3e4c   :  { %v8289_v57 = vsub.f32 %v8263_v41, %v8281_v43  ;;  %v8278_v11 = vpop.xlane.xlu1 %8277 }
0x3e4d   :  { %v8288_v54 = vsub.f32 %v8258_v1, %v8278_v11 }
0x3e4e   :  { %v8294_v21 = vmul.f32 1.442695, %v8289_v57 }
0x3e4f   :  { %v8292_v2 = vmul.f32 1.442695, %v8288_v54 }
0x3e50   :  { %16137 = vpow2.f32 %v8294_v21  ;;  %v8284_v31 = vpop.xlane.xlu0 %8283  ;;  %v8287_v63 = vpop.xlane.xlu1 %8286 }
0x3e51   :  { %16139 = vpow2.f32 %v8292_v2  ;;  %v8290_v8 = vsub.f32 %v8268_v51, %v8284_v31  ;;  %v8291_v16 = vsub.f32 %v8273_v36, %v8287_v63  ;;  %v7348_v36 = vld [vmem:[%s19484_s4 + $0x240] sm:$0xff]  ;;  %v7350_v51 = vld [vmem:[%s19484_s4 + $0x250] sm:$0xff] }
0x3e52   :  { %v15037_v19 = vpack.c.bf16 %v7349_v27, %v7348_v36  ;;  %v15041_v43 = vpack.c.bf16 %v7351_v49, %v7350_v51 }
0x3e53   :  { %v8296_v7 = vmul.f32 1.442695, %v8290_v8  ;;  %v8298_v17 = vmul.f32 1.442695, %v8291_v16 }
0x3e55   :  { %16141 = vpow2.f32 %v8296_v7 }
0x3e56   :  { %16143 = vpow2.f32 %v8298_v17 }
0x3e5a   :  { %v16138_v10 = vpop.eup %16137 }
0x3e5b   :  { %v16140_v6 = vpop.eup %16139  ;;  %v8303_v33 = vsel %vm145_vm0, %v16138_v10, 0.0 }
0x3e5c   :  { %8304 = vadd.xlane.f32.xlu1 %v8303_v33  ;;  %v8300_v26 = vsel %vm145_vm0, %v16140_v6, 0.0 }
0x3e5d   :  { %8301 = vadd.xlane.f32.xlu0 %v8300_v26 }
0x3e5f   :  { %v16142_v53 = vpop.eup %16141 }
0x3e60   :  { %v16144_v4 = vpop.eup %16143  ;;  %v8306_v52 = vsel %vm145_vm0, %v16142_v53, 0.0 }
0x3e61   :  { %8307 = vadd.xlane.f32.xlu0 %v8306_v52  ;;  %v8309_v39 = vsel %vm145_vm0, %v16144_v4, 0.0 }
0x3e62   :  { %8310 = vadd.xlane.f32.xlu1 %v8309_v39 }
0x3e73   :  { %15672 = vrot.lane.b32.xlu1 %v18267_v35, %s16370_s17 }
0x3e77   :  { %8433 = vrot.lane.b32.xlu1 %v18397_v47, %s16369_s16  ;;  %15667 = vrot.lane.b32.xlu0 %v18253_v5, %s16370_s17 }
0x3e7b   :  { %8449 = vrot.lane.b32.xlu1 %v8140_v23, %s16371_s18  ;;  %8435 = vrot.lane.b32.xlu0 %v18395_v45, %s16369_s16 }
0x3e7f   :  { %8437 = vrot.lane.b32.xlu1 %v18401_v62, %s16369_s16  ;;  %8451 = vrot.lane.b32.xlu0 %v14065_v28, %s16371_s18 }
0x3e83   :  { %8439 = vrot.lane.b32.xlu0 %v18399_v20, %s16369_s16 }
0x3ee9   :  { %v8305_v35 = vpop.xlane.xlu1 %8304 }
0x3eea   :  { %v8302_v34 = vpop.xlane.xlu0 %8301 }
0x3eeb   :  { %16145 = vrcp.f32 %v8302_v34 }
0x3eec   :  { %16147 = vrcp.f32 %v8305_v35 }
0x3eee   :  { %v8308_v47 = vpop.xlane.xlu0 %8307 }
0x3eef   :  { %v8311_v15 = vpop.xlane.xlu1 %8310  ;;  %16149 = vrcp.f32 %v8308_v47 }
0x3ef0   :  { %16151 = vrcp.f32 %v8311_v15 }
0x3ef2   :  { %v15668_v5 = vpop.permute.xlu0 %15667 }
0x3ef3   :  { %v15670_v58 = vunpack.i.h.bf16 %v15668_v5  ;;  %v15669_v48 = vunpack.i.l.bf16 %v15668_v5  ;;  %v15673_v29 = vpop.permute.xlu1 %15672 }
0x3ef4   :  { %v15675_v45 = vunpack.i.h.bf16 %v15673_v29  ;;  %v15674_v23 = vunpack.i.l.bf16 %v15673_v29 }
0x3ef5   :  { %v16146_v62 = vpop.eup %16145  ;;  %v15029_v3 = vpack.c.bf16 %v15670_v58, %v15669_v48 }
0x3ef6   :  { %v8316_v28 = vmul.f32 %v16146_v62, %v16140_v6  ;;  %v15033_v41 = vpack.c.bf16 %v15675_v45, %v15674_v23  ;;  %v16148_v20 = vpop.eup %16147  ;;  %v8436_v2 = vpop.permute.xlu0 %8435 }
0x3ef7   :  { %15030 = vmatprep.subr.bf16.mxu0 %v15029_v3  ;;  %v8317_v1 = vmul.f32 %v16148_v20, %v16138_v10  ;;  %v8434_v31 = vpop.permute.xlu1 %8433 }
0x3ef8   :  { %15032 = vmatpush3.bf16.msra.mxu0 %v15029_v3  ;;  %14091 = vmatprep.mubr.msk.f32.mxu0 %vm145_vm0, %v8316_v28  ;;  %v8477_v17 = vsel %vm491_vm1, %v18345_v12, %v8434_v31  ;;  %v12466_v3 = vld [vmem:[%s19484_s4 + $0x3f9] ss:$0 sm:$0xff] }
0x3ef9   :  { %15034 = vmatprep.subr.bf16.mxu0 %v15033_v41  ;;  %v16150_v42 = vpop.eup %16149  ;;  %v7197_v20 = vadd.f32 %v18295_v32, %v12466_v3 }
0x3efa   :  { %v16152_v14 = vpop.eup %16151  ;;  %v8318_v61 = vmul.f32 %v16150_v42, %v16142_v53  ;;  %v8452_v63 = vpop.permute.xlu0 %8451 }
0x3efb   :  { %v8319_v56 = vmul.f32 %v16152_v14, %v16144_v4  ;;  %v8450_v8 = vpop.permute.xlu1 %8449  ;;  %v7192_v14 = vadd.f32 %v12466_v3, %v18297_v55 }
0x3efc   :  { %15036 = vmatpush3.bf16.msra.mxu0 %v15033_v41  ;;  %v8481_v6 = vsel %vm575_vm5, %v8477_v17, %v8450_v8 }
0x3efd   :  { %15038 = vmatprep.subr.bf16.mxu0 %v15037_v19  ;;  %v7200_v27 = vadd.f32 %v7192_v14, %v17852_v0 }
0x3efe   :  { %v8440_v16 = vpop.permute.xlu0 %8439 }
0x3eff   :  { %14092 = vmatmul.mubr.msk.f32.vlgmr.msra.gmra.mrb[98].mxu0 %vm145_vm0, %v8317_v1  ;;  %v8438_v7 = vpop.permute.xlu1 %8437  ;;  %v7202_v55 = vsel %vm145_vm0, %v7200_v27, 0.0 }
0x3f00   :  { %14094 = vmatprep.mubr.msk.f32.mxu0 %vm145_vm0, %v8318_v61  ;;  %15040 = vmatpush3.bf16.msra.mxu0 %v15037_v19  ;;  %v8479_v12 = vsel %vm491_vm1, %v18349_v9, %v8438_v7  ;;  %v12524_v9 = vld [vmem:[%s19484_s4 + $0x3fa] ss:$0 sm:$0xff] }
0x3f01   :  { %15042 = vmatprep.subr.bf16.mxu0 %v15041_v43 }
0x3f03   :  { %14095 = vmatmul.mubr.msk.f32.gmra.mrb[100].mxu0 %vm145_vm0, %v8319_v56  ;;  %v7201_v56 = vadd.f32 %v7197_v20, %v17855_v46 }
0x3f04   :  { %15044 = vmatpush3.bf16.msra.mxu0 %v15041_v43 }
0x3f05   :  { %v7205_v32 = vsel %vm145_vm0, %v7201_v56, 0.0 }
0x3fd2   :  { %v14093_v57 = vpop.f32.mrb[98].mxu0 }
0x3fd3   :  { %8467 = vrot.lane.b32.xlu0 %v14093_v57, %s16372_s13  ;;  %v8410_v11 = vpop.f32.mrb[99].mxu0 }
0x3fd4   :  { %8465 = vrot.lane.b32.xlu1 %v8410_v11, %s16372_s13 }
0x3fd6   :  { %v14096_v54 = vpop.f32.mrb[100].mxu0 }
0x3fd7   :  { %8455 = vrot.lane.b32.xlu0 %v18447_v24, %s16371_s18  ;;  %v8420_v21 = vpop.f32.mrb[101].mxu0  ;;  %v8478_v24 = vsel %vm491_vm1, %v18343_v50, %v8436_v2  ;;  %v8480_v50 = vsel %vm491_vm1, %v18347_v13, %v8440_v16 }
0x3fd8   :  { %8453 = vrot.lane.b32.xlu1 %v18449_v59, %s16371_s18  ;;  %v8482_v33 = vsel %vm575_vm5, %v8478_v24, %v8452_v63 }
0x3fdb   :  { %8471 = vrot.lane.b32.xlu0 %v14096_v54, %s16372_s13 }
0x3fdc   :  { %8469 = vrot.lane.b32.xlu1 %v8420_v21, %s16372_s13 }
0x4045   :  { %v8468_v10 = vpop.permute.xlu0 %8467 }
0x4046   :  { %v8466_v59 = vpop.permute.xlu1 %8465  ;;  %v8486_v53 = vsel %vm1313_vm6, %v8482_v33, %v8468_v10 }
0x4047   :  { %v8485_v26 = vsel %vm1313_vm6, %v8481_v6, %v8466_v59 }
0x4048   :  { %14105 = vmatprep.mubr.msk.f32.mxu0 %vm145_vm0, %v8485_v26 }
0x4049   :  { %v8456_v4 = vpop.permute.xlu0 %8455  ;;  %14106 = vmatmul.mubr.msk.f32.vlgmr.msra.gmra.mrb[102].mxu0 %vm145_vm0, %v8486_v53 }
0x404a   :  { %v8454_v52 = vpop.permute.xlu1 %8453  ;;  %v8484_v47 = vsel %vm575_vm5, %v8480_v50, %v8456_v4 }
0x404b   :  { %v8483_v35 = vsel %vm575_vm5, %v8479_v12, %v8454_v52 }
0x404d   :  { %v8472_v39 = vpop.permute.xlu0 %8471 }
0x404e   :  { %v8470_v34 = vpop.permute.xlu1 %8469  ;;  %v8488_v5 = vsel %vm1313_vm6, %v8484_v47, %v8472_v39 }
0x404f   :  { %v8487_v15 = vsel %vm1313_vm6, %v8483_v35, %v8470_v34  ;;  %v8754_v35 = vld [vmem:[%s19485_s5 + $0x40] sm:$0xff]  ;;  %v8755_v34 = vld [vmem:[%s19485_s5 + $0x48] sm:$0xff] }
0x4050   :  { %14108 = vmatprep.mubr.msk.f32.mxu0 %vm145_vm0, %v8487_v15  ;;  %v15053_v47 = vpack.c.bf16 %v8755_v34, %v8754_v35  ;;  %v8756_v15 = vld [vmem:[%s19485_s5 + $0x50] sm:$0xff] }
0x4051   :  { %14109 = vmatmul.mubr.msk.f32.gmra.mrb[104].mxu0 %vm145_vm0, %v8488_v5  ;;  %v8757_v5 = vld [vmem:[%s19485_s5 + $0x58] sm:$0xff] }
0x4052   :  { %15054 = vmatprep.subr.bf16.mxu0 %v15053_v47 }
0x4053   :  { %15056 = vmatpush3.bf16.msra.mxu0 %v15053_v47 }
0x411c   :  { %v14107_v58 = vpop.f32.mrb[102].mxu0 }
0x411d   :  { %v8577_v48 = vadd.f32 %v14107_v58, %v12524_v9  ;;  %v8571_v13 = vpop.f32.mrb[103].mxu0  ;;  %v8664_v58 = vld [vmem:[%s19484_s4 + $0x260] sm:$0xff] }
0x411e   :  { %v8572_v29 = vadd.f32 %v12524_v9, %v8571_v13 }
0x411f   :  { %v8591_v45 = vadd.f32 %v8577_v48, %v18206_v18  ;;  %v8665_v48 = vld [vmem:[%s19484_s4 + $0x268] sm:$0xff] }
0x4120   :  { %v8590_v23 = vadd.f32 %v8572_v29, %v18166_v60  ;;  %v15045_v13 = vpack.c.bf16 %v8665_v48, %v8664_v58  ;;  %v8666_v29 = vld [vmem:[%s19484_s4 + $0x270] sm:$0xff] }
0x4121   :  { %v8597_v62 = vsel %vm145_vm0, %v8591_v45, 0.0 }
0x4122   :  { %8598 = vadd.xlane.f32.xlu0 %v8597_v62  ;;  %v8594_v28 = vsel %vm145_vm0, %v8590_v23, 0.0  ;;  %15046 = vmatprep.subr.bf16.mxu1 %v15045_v13 }
0x4123   :  { %8595 = vadd.xlane.f32.xlu1 %v8594_v28  ;;  %15048 = vmatpush3.bf16.msra.mxu1 %v15045_v13 }
0x4124   :  { %v14110_v41 = vpop.f32.mrb[104].mxu0 }
0x4125   :  { %v8587_v42 = vadd.f32 %v14110_v41, %v12524_v9  ;;  %v8581_v1 = vpop.f32.mrb[105].mxu0 }
0x4126   :  { %v8582_v18 = vadd.f32 %v12524_v9, %v8581_v1  ;;  %v15057_v9 = vpack.c.bf16 %v8757_v5, %v8756_v15 }
0x4127   :  { %v8593_v60 = vadd.f32 %v8587_v42, %v18234_v25 }
0x4128   :  { %v8592_v61 = vadd.f32 %v8582_v18, %v18209_v44  ;;  %15058 = vmatprep.subr.bf16.mxu0 %v15057_v9 }
0x4129   :  { %v8603_v36 = vsel %vm145_vm0, %v8593_v60, 0.0  ;;  %15060 = vmatpush3.bf16.msra.mxu0 %v15057_v9 }
0x412a   :  { %8604 = vadd.xlane.f32.xlu1 %v8603_v36  ;;  %v8600_v51 = vsel %vm145_vm0, %v8592_v61, 0.0 }
0x412b   :  { %8601 = vadd.xlane.f32.xlu0 %v8600_v51 }
0x412e   :  { %7206 = vadd.xlane.f32.xlu1 %v7205_v32 }
0x412f   :  { %7203 = vadd.xlane.f32.xlu0 %v7202_v55 }
0x41af   :  { %v8599_v19 = vpop.xlane.xlu0 %8598 }
0x41b0   :  { %v8607_v25 = vmul.f32 0.03125, %v8599_v19  ;;  %v8596_v49 = vpop.xlane.xlu1 %8595 }
0x41b1   :  { %v8606_v44 = vmul.f32 0.03125, %v8596_v49 }
0x41b2   :  { %v18541_v43 = vsub.f32 %v8591_v45, %v8607_v25  ;;  %v8667_v45 = vld [vmem:[%s19484_s4 + $0x278] sm:$0xff]  ;;  %v12529_v25 = vld [vmem:[%s19484_s4 + $0x407] ss:$0 sm:$0xff] }
0x41b3   :  { %v18543_v46 = vsub.f32 %v8590_v23, %v8606_v44  ;;  %v15049_v23 = vpack.c.bf16 %v8667_v45, %v8666_v29  ;;  %v12531_v45 = vld [vmem:[%s19484_s4 + $0x3fb] ss:$0 sm:$0xff] }
0x41b4   :  { %v8615_v0 = vmul.f32 %v18541_v43, %v18541_v43 }
0x41b5   :  { %v8614_v57 = vmul.f32 %v18543_v46, %v18543_v46  ;;  %15050 = vmatprep.subr.bf16.mxu1 %v15049_v23 }
0x41b6   :  { %v8621_v11 = vsel %vm145_vm0, %v8615_v0, 0.0  ;;  %15052 = vmatpush3.bf16.msra.mxu1 %v15049_v23 }
0x41b7   :  { %8622 = vadd.xlane.f32.xlu1 %v8621_v11  ;;  %v8605_v54 = vpop.xlane.xlu1 %8604  ;;  %v8618_v21 = vsel %vm145_vm0, %v8614_v57, 0.0 }
0x41b8   :  { %v8609_v2 = vmul.f32 0.03125, %v8605_v54  ;;  %v8602_v31 = vpop.xlane.xlu0 %8601  ;;  %8619 = vadd.xlane.f32.xlu0 %v8618_v21  ;;  %v12530_v54 = vld [vmem:[%s19484_s4 + $0x408] ss:$0 sm:$0xff] }
0x41b9   :  { %v8608_v63 = vmul.f32 0.03125, %v8602_v31 }
0x41ba   :  { %v18551_v8 = vsub.f32 %v8593_v60, %v8609_v2 }
0x41bb   :  { %v18553_v16 = vsub.f32 %v8592_v61, %v8608_v63  ;;  %v7207_v7 = vpop.xlane.xlu1 %7206 }
0x41bc   :  { %v7209_v17 = vmul.f32 0.03125, %v7207_v7  ;;  %v7204_v10 = vpop.xlane.xlu0 %7203  ;;  %v8617_v24 = vmul.f32 %v18551_v8, %v18551_v8 }
0x41bd   :  { %v7208_v6 = vmul.f32 0.03125, %v7204_v10  ;;  %v8616_v59 = vmul.f32 %v18553_v16, %v18553_v16 }
0x41be   :  { %v18559_v33 = vsub.f32 %v7201_v56, %v7209_v17  ;;  %v8627_v26 = vsel %vm145_vm0, %v8617_v24, 0.0 }
0x41bf   :  { %v18562_v53 = vsub.f32 %v7200_v27, %v7208_v6  ;;  %8628 = vadd.xlane.f32.xlu1 %v8627_v26  ;;  %v8624_v4 = vsel %vm145_vm0, %v8616_v59, 0.0  ;;  %v12469_v6 = vld [vmem:[%s19484_s4 + $0x401] ss:$0 sm:$0xff] }
0x41c0   :  { %8625 = vadd.xlane.f32.xlu0 %v8624_v4  ;;  %v7213_v52 = vmul.f32 %v18559_v33, %v18559_v33 }
0x41c1   :  { %v7212_v12 = vmul.f32 %v18562_v53, %v18562_v53 }
0x41c2   :  { %v7217_v39 = vsel %vm145_vm0, %v7213_v52, 0.0 }
0x41c3   :  { %7218 = vadd.xlane.f32.xlu1 %v7217_v39  ;;  %v7214_v50 = vsel %vm145_vm0, %v7212_v12, 0.0 }
0x41c4   :  { %7215 = vadd.xlane.f32.xlu0 %v7214_v50 }
0x4244   :  { %v8623_v62 = vpop.xlane.xlu1 %8622 }
0x4245   :  { %v8631_v3 = vmul.f32 0.03125, %v8623_v62  ;;  %v8620_v28 = vpop.xlane.xlu0 %8619 }
0x4246   :  { %v8630_v41 = vmul.f32 0.03125, %v8620_v28 }
0x4247   :  { %v8635_v20 = vadd.f32 1e-05, %v8631_v3 }
0x4248   :  { %v8634_v42 = vadd.f32 1e-05, %v8630_v41 }
0x4249   :  { %16153 = vrsqrt.f32 %v8635_v20 }
0x424a   :  { %16155 = vrsqrt.f32 %v8634_v42 }
0x424c   :  { %v8629_v1 = vpop.xlane.xlu1 %8628 }
0x424d   :  { %v8633_v14 = vmul.f32 0.03125, %v8629_v1  ;;  %v8626_v18 = vpop.xlane.xlu0 %8625 }
0x424e   :  { %v8632_v60 = vmul.f32 0.03125, %v8626_v18 }
0x424f   :  { %v8637_v61 = vadd.f32 1e-05, %v8633_v14 }
0x4250   :  { %v8636_v56 = vadd.f32 1e-05, %v8632_v60  ;;  %v7219_v36 = vpop.xlane.xlu1 %7218 }
0x4251   :  { %16157 = vrsqrt.f32 %v8637_v61  ;;  %v7221_v27 = vmul.f32 0.03125, %v7219_v36  ;;  %v7216_v51 = vpop.xlane.xlu0 %7215 }
0x4252   :  { %16159 = vrsqrt.f32 %v8636_v56  ;;  %v7220_v32 = vmul.f32 0.03125, %v7216_v51 }
0x4253   :  { %v16154_v55 = vpop.eup %16153  ;;  %v7223_v19 = vadd.f32 1e-05, %v7221_v27 }
0x4254   :  { %v16156_v49 = vpop.eup %16155  ;;  %v8643_v44 = vmul.f32 %v16154_v55, %v18541_v43  ;;  %v7222_v0 = vadd.f32 1e-05, %v7220_v32 }
0x4255   :  { %16161 = vrsqrt.f32 %v7223_v19  ;;  %v8642_v57 = vmul.f32 %v16156_v49, %v18543_v46 }
0x4256   :  { %16163 = vrsqrt.f32 %v7222_v0  ;;  %v8652_v11 = vmul.f32 %v12529_v25, %v8643_v44 }
0x4257   :  { %v8651_v21 = vmul.f32 %v12529_v25, %v8642_v57 }
0x4258   :  { %v18605_v31 = vadd.f32 %v12530_v54, %v8652_v11 }
0x4259   :  { %v18603_v2 = vadd.f32 %v12530_v54, %v8651_v21 }
0x425b   :  { %v16158_v63 = vpop.eup %16157  ;;  %14130 = vmatprep.mubr.msk.f32.mxu0 %vm145_vm0, %v18603_v2 }
0x425c   :  { %v16160_v43 = vpop.eup %16159  ;;  %14131 = vmatmul.mubr.msk.f32.vlgmr.msra.gmra.mrb[106].mxu0 %vm145_vm0, %v18605_v31  ;;  %v8645_v46 = vmul.f32 %v16158_v63, %v18551_v8  ;;  %v12470_v8 = vld [vmem:[%s19484_s4 + $0x402] ss:$0 sm:$0xff] }
0x425d   :  { %v8644_v7 = vmul.f32 %v16160_v43, %v18553_v16 }
0x425e   :  { %v8654_v17 = vmul.f32 %v12529_v25, %v8645_v46 }
0x425f   :  { %v16162_v10 = vpop.eup %16161  ;;  %v8653_v24 = vmul.f32 %v12529_v25, %v8644_v7 }
0x4260   :  { %v16164_v59 = vpop.eup %16163  ;;  %v7227_v26 = vmul.f32 %v16162_v10, %v18559_v33  ;;  %v18620_v12 = vadd.f32 %v12530_v54, %v8654_v17 }
0x4261   :  { %v18617_v4 = vadd.f32 %v12530_v54, %v8653_v24  ;;  %v7226_v52 = vmul.f32 %v16164_v59, %v18562_v53  ;;  %v12534_v53 = vld [vmem:[%s19485_s5 + $0x82] ss:$0 sm:$0xff] }
0x4262   :  { %v7234_v39 = vmul.f32 %v12469_v6, %v7227_v26 }
0x4263   :  { %14133 = vmatprep.mubr.msk.f32.mxu0 %vm145_vm0, %v18617_v4  ;;  %v7233_v16 = vmul.f32 %v12469_v6, %v7226_v52 }
0x4264   :  { %14134 = vmatmul.mubr.msk.f32.gmra.mrb[108].mxu0 %vm145_vm0, %v18620_v12  ;;  %v18631_v33 = vadd.f32 %v12470_v8, %v7234_v39 }
0x4265   :  { %v18629_v50 = vadd.f32 %v12470_v8, %v7233_v16 }
0x4267   :  { %14119 = vmatprep.mubr.msk.f32.mxu1 %vm145_vm0, %v18629_v50 }
0x4268   :  { %14120 = vmatmul.mubr.msk.f32.vlgmr.msra.gmra.mrb[98].mxu1 %vm145_vm0, %v18631_v33 }
0x432f   :  { %v14132_v35 = vpop.f32.mrb[106].mxu0 }
0x4330   :  { %v8847_v34 = vadd.f32 %v14132_v35, %v12534_v53  ;;  %v8841_v47 = vpop.f32.mrb[107].mxu0 }
0x4331   :  { %v8842_v15 = vadd.f32 %v12534_v53, %v8841_v47 }
0x4333   :  { %v15061_v5 = vpack.c.bf16 %v8847_v34, %v8842_v15  ;;  %v18640_v9 = vpack.i.bf16 %v8847_v34, %v8842_v15 }
0x4335   :  { %15063 = vmatprep.subr.msk.bf16.mxu1 %vm16555_vm2, %v15061_v5 }
0x4336   :  { %15066 = vmatpush3.bf16.xpose.msk.msra.mxu1 %vm16555_vm2, %v15061_v5 }
0x4337   :  { %v14135_v58 = vpop.f32.mrb[108].mxu0 }
0x4338   :  { %v8857_v48 = vadd.f32 %v14135_v58, %v12534_v53  ;;  %v8851_v13 = vpop.f32.mrb[109].mxu0 }
0x4339   :  { %v8852_v29 = vadd.f32 %v12534_v53, %v8851_v13 }
0x433b   :  { %v14121_v23 = vpop.f32.mrb[98].mxu1  ;;  %v15067_v62 = vpack.c.bf16 %v8857_v48, %v8852_v29  ;;  %v18649_v3 = vpack.i.bf16 %v8857_v48, %v8852_v29 }
0x433c   :  { %v8745_v28 = vpop.f32.mrb[99].mxu1  ;;  %v18659_v20 = vadd.f32 %v14121_v23, %v12531_v45 }
0x433d   :  { %v18651_v41 = vadd.f32 %v12531_v45, %v8745_v28  ;;  %15069 = vmatprep.subr.msk.bf16.mxu1 %vm16555_vm2, %v15067_v62 }
0x433e   :  { %15072 = vmatpush3.bf16.xpose.msk.msra.mxu1 %vm16555_vm2, %v15067_v62 }
0x433f   :  { %14144 = vmatprep.mubr.msk.f32.mxu1 %vm491_vm1, %v18651_v41 }
0x4345   :  { %14145 = vmatmul.mubr.msk.f32.vlgmr.msra.gmra.mrb[100].mxu1 %vm491_vm1, %v18659_v20 }
0x4418   :  { %v14146_v42 = vpop.f32.mrb[100].mxu1 }
0x4419   :  { %v8955_v1 = vadd.f32 %v14146_v42, %v17223_v38  ;;  %v8949_v14 = vpop.f32.mrb[101].mxu1 }
0x441a   :  { %v8950_v18 = vadd.f32 %v8949_v14, %v17226_v22 }
0x441b   :  { %v8961_v60 = vsel %vm145_vm0, %v8955_v1, -inf }
0x441c   :  { %8962 = vmax.xlane.f32.xlu1 %v8961_v60  ;;  %v8958_v61 = vsel %vm145_vm0, %v8950_v18, -inf }
0x441d   :  { %8959 = vmax.xlane.f32.xlu0 %v8958_v61 }
0x44a9   :  { %v8963_v56 = vpop.xlane.xlu1 %8962 }
0x44aa   :  { %v8965_v36 = vsub.f32 %v8955_v1, %v8963_v56  ;;  %v8960_v27 = vpop.xlane.xlu0 %8959 }
0x44ab   :  { %v8964_v51 = vsub.f32 %v8950_v18, %v8960_v27 }
0x44ac   :  { %v8968_v32 = vmul.f32 1.442695, %v8965_v36 }
0x44ad   :  { %v8966_v55 = vmul.f32 1.442695, %v8964_v51 }
0x44ae   :  { %16165 = vpow2.f32 %v8968_v32 }
0x44af   :  { %16167 = vpow2.f32 %v8966_v55 }
0x44b8   :  { %v16166_v19 = vpop.eup %16165 }
0x44b9   :  { %v16168_v25 = vpop.eup %16167  ;;  %v8973_v49 = vsel %vm145_vm0, %v16166_v19, 0.0 }
0x44ba   :  { %8974 = vadd.xlane.f32.xlu1 %v8973_v49  ;;  %v8970_v44 = vsel %vm145_vm0, %v16168_v25, 0.0 }
0x44bb   :  { %8971 = vadd.xlane.f32.xlu0 %v8970_v44 }
0x44cb   :  { %15682 = vrot.lane.b32.xlu1 %v18649_v3, %s16359_s25 }
0x44cf   :  { %15687 = vrot.lane.b32.xlu1 %v18640_v9, %s16360_s26 }
0x44d1   :  { %15677 = vrot.lane.b32.xlu0 %v18640_v9, %s16359_s25 }
0x44d3   :  { %9073 = vrot.lane.b32.xlu1 %v18651_v41, %s16360_s26 }
0x44d5   :  { %15692 = vrot.lane.b32.xlu0 %v18649_v3, %s16360_s26 }
0x44d9   :  { %9075 = vrot.lane.b32.xlu0 %v18659_v20, %s16360_s26 }
0x4547   :  { %v8975_v0 = vpop.xlane.xlu1 %8974 }
0x4548   :  { %v8972_v57 = vpop.xlane.xlu0 %8971 }
0x4549   :  { %16169 = vrcp.f32 %v8972_v57 }
0x454a   :  { %16171 = vrcp.f32 %v8975_v0 }
0x454b   :  { %v15683_v11 = vpop.permute.xlu1 %15682 }
0x454c   :  { %v15678_v54 = vpop.permute.xlu0 %15677  ;;  %v15685_v21 = vunpack.i.h.bf16 %v15683_v11  ;;  %v15684_v63 = vunpack.i.l.bf16 %v15683_v11 }
0x454d   :  { %v15680_v43 = vunpack.i.h.bf16 %v15678_v54  ;;  %v15679_v46 = vunpack.i.l.bf16 %v15678_v54 }
0x454e   :  { %v15077_v6 = vpack.c.bf16 %v15685_v21, %v15684_v63 }
0x454f   :  { %v15688_v7 = vpop.permute.xlu1 %15687  ;;  %v15073_v17 = vpack.c.bf16 %v15680_v43, %v15679_v46 }
0x4550   :  { %v15690_v10 = vunpack.i.h.bf16 %v15688_v7  ;;  %v15689_v24 = vunpack.i.l.bf16 %v15688_v7  ;;  %v15693_v16 = vpop.permute.xlu0 %15692 }
0x4551   :  { %15074 = vmatprep.subr.bf16.mxu0 %v15073_v17  ;;  %v15695_v35 = vunpack.i.h.bf16 %v15693_v16  ;;  %v15694_v34 = vunpack.i.l.bf16 %v15693_v16 }
0x4552   :  { %15076 = vmatpush3.bf16.msra.mxu0 %v15073_v17  ;;  %v15081_v39 = vpack.c.bf16 %v15690_v10, %v15689_v24 }
0x4553   :  { %v16170_v59 = vpop.eup %16169  ;;  %15078 = vmatprep.subr.bf16.mxu0 %v15077_v6  ;;  %v9074_v53 = vpop.permute.xlu1 %9073  ;;  %v15087_v47 = vpack.c.bf16 %v15695_v35, %v15694_v34 }
0x4554   :  { %v16172_v26 = vpop.eup %16171  ;;  %v8978_v52 = vmul.f32 %v16170_v59, %v16168_v25  ;;  %v9076_v15 = vpop.permute.xlu0 %9075 }
0x4555   :  { %v8979_v8 = vmul.f32 %v16172_v26, %v16166_v19 }
0x4556   :  { %15080 = vmatpush3.bf16.msra.mxu0 %v15077_v6  ;;  %14155 = vmatprep.mubr.msk.f32.mxu0 %vm145_vm0, %v8978_v52 }
0x4557   :  { %15083 = vmatprep.subr.msk.bf16.mxu0 %vm16555_vm2, %v15081_v39 }
0x4559   :  { %14156 = vmatmul.mubr.msk.f32.vlgmr.msra.gmra.mrb[110].mxu0 %vm145_vm0, %v8979_v8 }
0x455a   :  { %14166 = vmatprep.mubr.msk.f32.mxu0 %vm491_vm1, %v9074_v53 }
0x455f   :  { %15086 = vmatpush3.bf16.xpose.msk.msra.mxu0 %vm16555_vm2, %v15081_v39 }
0x4560   :  { %15089 = vmatprep.subr.msk.bf16.mxu0 %vm16555_vm2, %v15087_v47 }
0x4567   :  { %15092 = vmatpush3.bf16.xpose.msk.msra.mxu0 %vm16555_vm2, %v15087_v47 }
0x456e   :  { %14167 = vmatmul.mubr.msk.f32.vlgmr.msra.gmra.mrb[112].mxu0 %vm491_vm1, %v9076_v15 }
0x462c   :  { %v18693_v5 = vpop.f32.mrb[110].mxu0 }
0x462d   :  { %v18695_v58 = vpop.f32.mrb[111].mxu0 }
0x4641   :  { %v14168_v48 = vpop.f32.mrb[112].mxu0 }
0x4642   :  { %v9169_v13 = vadd.f32 %v14168_v48, %v17223_v38  ;;  %v9163_v29 = vpop.f32.mrb[113].mxu0 }
0x4643   :  { %v9164_v45 = vadd.f32 %v9163_v29, %v17226_v22 }
0x4644   :  { %v9175_v23 = vsel %vm145_vm0, %v9169_v13, -inf }
0x4645   :  { %9176 = vmax.xlane.f32.xlu0 %v9175_v23  ;;  %v9172_v62 = vsel %vm145_vm0, %v9164_v45, -inf }
0x4646   :  { %9173 = vmax.xlane.f32.xlu1 %v9172_v62 }
0x46d2   :  { %v9177_v28 = vpop.xlane.xlu0 %9176 }
0x46d3   :  { %v9179_v42 = vsub.f32 %v9169_v13, %v9177_v28  ;;  %v9174_v1 = vpop.xlane.xlu1 %9173 }
0x46d4   :  { %v9178_v14 = vsub.f32 %v9164_v45, %v9174_v1 }
0x46d5   :  { %v9182_v18 = vmul.f32 1.442695, %v9179_v42 }
0x46d6   :  { %v9180_v60 = vmul.f32 1.442695, %v9178_v14 }
0x46d7   :  { %16173 = vpow2.f32 %v9182_v18 }
0x46d8   :  { %16175 = vpow2.f32 %v9180_v60 }
0x46e1   :  { %v16174_v61 = vpop.eup %16173 }
0x46e2   :  { %v16176_v56 = vpop.eup %16175  ;;  %v9187_v36 = vsel %vm145_vm0, %v16174_v61, 0.0 }
0x46e3   :  { %9188 = vadd.xlane.f32.xlu1 %v9187_v36  ;;  %v9184_v27 = vsel %vm145_vm0, %v16176_v56, 0.0 }
0x46e4   :  { %9185 = vadd.xlane.f32.xlu0 %v9184_v27 }
0x46f4   :  { %15702 = vrot.lane.b32.xlu1 %v18649_v3, %s16358_s24 }
0x46f8   :  { %15707 = vrot.lane.b32.xlu1 %v18640_v9, %s16365_s30 }
0x46fa   :  { %15697 = vrot.lane.b32.xlu0 %v18640_v9, %s16358_s24 }
0x46fc   :  { %9287 = vrot.lane.b32.xlu1 %v18651_v41, %s16365_s30 }
0x46fe   :  { %15712 = vrot.lane.b32.xlu0 %v18649_v3, %s16365_s30 }
0x4702   :  { %9289 = vrot.lane.b32.xlu0 %v18659_v20, %s16365_s30 }
0x4770   :  { %v9189_v51 = vpop.xlane.xlu1 %9188 }
0x4771   :  { %v9186_v32 = vpop.xlane.xlu0 %9185 }
0x4772   :  { %16177 = vrcp.f32 %v9186_v32 }
0x4773   :  { %16179 = vrcp.f32 %v9189_v51 }
0x4774   :  { %v15703_v55 = vpop.permute.xlu1 %15702 }
0x4775   :  { %v15698_v19 = vpop.permute.xlu0 %15697  ;;  %v15705_v25 = vunpack.i.h.bf16 %v15703_v55  ;;  %v15704_v49 = vunpack.i.l.bf16 %v15703_v55 }
0x4776   :  { %v15700_v44 = vunpack.i.h.bf16 %v15698_v19  ;;  %v15699_v0 = vunpack.i.l.bf16 %v15698_v19 }
0x4777   :  { %v15097_v63 = vpack.c.bf16 %v15705_v25, %v15704_v49 }
0x4778   :  { %v15708_v57 = vpop.permute.xlu1 %15707  ;;  %v15093_v11 = vpack.c.bf16 %v15700_v44, %v15699_v0 }
0x4779   :  { %v15710_v54 = vunpack.i.h.bf16 %v15708_v57  ;;  %v15709_v21 = vunpack.i.l.bf16 %v15708_v57  ;;  %v15713_v10 = vpop.permute.xlu0 %15712 }
0x477a   :  { %15094 = vmatprep.subr.bf16.mxu1 %v15093_v11  ;;  %v15715_v59 = vunpack.i.h.bf16 %v15713_v10  ;;  %v15714_v26 = vunpack.i.l.bf16 %v15713_v10  ;;  %v9873_v10 = vld [vmem:[%s19484_s4 + $0x2a8] sm:$0xff] }
0x477b   :  { %15096 = vmatpush3.bf16.msra.mxu1 %v15093_v11  ;;  %v15101_v17 = vpack.c.bf16 %v15710_v54, %v15709_v21 }
0x477c   :  { %v16178_v43 = vpop.eup %16177  ;;  %15098 = vmatprep.subr.bf16.mxu1 %v15097_v63  ;;  %v9288_v6 = vpop.permute.xlu1 %9287  ;;  %v15107_v52 = vpack.c.bf16 %v15715_v59, %v15714_v26  ;;  %v9875_v59 = vld [vmem:[%s19484_s4 + $0x2b8] sm:$0xff] }
0x477d   :  { %v16180_v46 = vpop.eup %16179  ;;  %v9192_v7 = vmul.f32 %v16178_v43, %v16176_v56  ;;  %v9290_v39 = vpop.permute.xlu0 %9289 }
0x477e   :  { %v9193_v24 = vmul.f32 %v16180_v46, %v16174_v61 }
0x477f   :  { %15100 = vmatpush3.bf16.msra.mxu1 %v15097_v63  ;;  %14177 = vmatprep.mubr.msk.f32.mxu1 %vm145_vm0, %v9192_v7 }
0x4780   :  { %15103 = vmatprep.subr.msk.bf16.mxu1 %vm16555_vm2, %v15101_v17 }
0x4782   :  { %14178 = vmatmul.mubr.msk.f32.vlgmr.msra.gmra.mrb[102].mxu1 %vm145_vm0, %v9193_v24 }
0x4783   :  { %14188 = vmatprep.mubr.msk.f32.mxu1 %vm491_vm1, %v9288_v6  ;;  %v9874_v6 = vld [vmem:[%s19484_s4 + $0x2b0] sm:$0xff] }
0x4784   :  { %v15153_v26 = vpack.c.bf16 %v9875_v59, %v9874_v6 }
0x4788   :  { %15106 = vmatpush3.bf16.xpose.msk.msra.mxu1 %vm16555_vm2, %v15101_v17  ;;  %v9872_v17 = vld [vmem:[%s19484_s4 + $0x2a0] sm:$0xff] }
0x4789   :  { %15109 = vmatprep.subr.msk.bf16.mxu1 %vm16555_vm2, %v15107_v52  ;;  %v15149_v24 = vpack.c.bf16 %v9873_v10, %v9872_v17 }
0x4790   :  { %15112 = vmatpush3.bf16.xpose.msk.msra.mxu1 %vm16555_vm2, %v15107_v52 }
0x4797   :  { %14189 = vmatmul.mubr.msk.f32.vlgmr.msra.gmra.mrb[104].mxu1 %vm491_vm1, %v9290_v39 }
0x4855   :  { %v18727_v8 = vpop.f32.mrb[102].mxu1 }
0x4856   :  { %v18729_v16 = vpop.f32.mrb[103].mxu1 }
0x486a   :  { %v14190_v53 = vpop.f32.mrb[104].mxu1 }
0x486b   :  { %v9383_v35 = vadd.f32 %v14190_v53, %v17223_v38  ;;  %v9377_v34 = vpop.f32.mrb[105].mxu1 }
0x486c   :  { %v9378_v47 = vadd.f32 %v9377_v34, %v17226_v22 }
0x486d   :  { %v9389_v15 = vsel %vm145_vm0, %v9383_v35, -inf }
0x486e   :  { %9390 = vmax.xlane.f32.xlu0 %v9389_v15  ;;  %v9386_v48 = vsel %vm145_vm0, %v9378_v47, -inf }
0x486f   :  { %9387 = vmax.xlane.f32.xlu1 %v9386_v48 }
0x48fb   :  { %v9391_v13 = vpop.xlane.xlu0 %9390 }
0x48fc   :  { %v9393_v29 = vsub.f32 %v9383_v35, %v9391_v13  ;;  %v9388_v45 = vpop.xlane.xlu1 %9387 }
0x48fd   :  { %v9392_v23 = vsub.f32 %v9378_v47, %v9388_v45 }
0x48fe   :  { %v9396_v62 = vmul.f32 1.442695, %v9393_v29  ;;  %v12576_v29 = vld [vmem:[%s19484_s4 + $0x3fd] ss:$0 sm:$0xff] }
0x48ff   :  { %v9394_v28 = vmul.f32 1.442695, %v9392_v23 }
0x4900   :  { %16181 = vpow2.f32 %v9396_v62 }
0x4901   :  { %16183 = vpow2.f32 %v9394_v28 }
0x490a   :  { %v16182_v42 = vpop.eup %16181 }
0x490b   :  { %v16184_v1 = vpop.eup %16183  ;;  %v9401_v14 = vsel %vm145_vm0, %v16182_v42, 0.0 }
0x490c   :  { %9402 = vadd.xlane.f32.xlu1 %v9401_v14  ;;  %v9398_v18 = vsel %vm145_vm0, %v16184_v1, 0.0 }
0x490d   :  { %9399 = vadd.xlane.f32.xlu0 %v9398_v18 }
0x491d   :  { %15722 = vrot.lane.b32.xlu1 %v18649_v3, %s16363_s28 }
0x4921   :  { %15727 = vrot.lane.b32.xlu1 %v18640_v9, %s16367_s11 }
0x4923   :  { %15717 = vrot.lane.b32.xlu0 %v18640_v9, %s16363_s28 }
0x4925   :  { %9501 = vrot.lane.b32.xlu1 %v18651_v41, %s16367_s11 }
0x4927   :  { %15732 = vrot.lane.b32.xlu0 %v18649_v3, %s16367_s11 }
0x492b   :  { %9503 = vrot.lane.b32.xlu0 %v18659_v20, %s16367_s11 }
0x4999   :  { %v9403_v60 = vpop.xlane.xlu1 %9402 }
0x499a   :  { %v9400_v61 = vpop.xlane.xlu0 %9399 }
0x499b   :  { %16185 = vrcp.f32 %v9400_v61 }
0x499c   :  { %16187 = vrcp.f32 %v9403_v60 }
0x499d   :  { %v15723_v56 = vpop.permute.xlu1 %15722 }
0x499e   :  { %v15718_v36 = vpop.permute.xlu0 %15717  ;;  %v15725_v27 = vunpack.i.h.bf16 %v15723_v56  ;;  %v15724_v51 = vunpack.i.l.bf16 %v15723_v56 }
0x499f   :  { %v15720_v32 = vunpack.i.h.bf16 %v15718_v36  ;;  %v15719_v55 = vunpack.i.l.bf16 %v15718_v36 }
0x49a0   :  { %v15117_v44 = vpack.c.bf16 %v15725_v27, %v15724_v51 }
0x49a1   :  { %v15728_v19 = vpop.permute.xlu1 %15727  ;;  %v15113_v25 = vpack.c.bf16 %v15720_v32, %v15719_v55 }
0x49a2   :  { %v15730_v49 = vunpack.i.h.bf16 %v15728_v19  ;;  %v15729_v41 = vunpack.i.l.bf16 %v15728_v19  ;;  %v15733_v54 = vpop.permute.xlu0 %15732 }
0x49a3   :  { %15114 = vmatprep.subr.bf16.mxu0 %v15113_v25  ;;  %v15735_v43 = vunpack.i.h.bf16 %v15733_v54  ;;  %v15734_v46 = vunpack.i.l.bf16 %v15733_v54 }
0x49a4   :  { %15116 = vmatpush3.bf16.msra.mxu0 %v15113_v25  ;;  %v15121_v11 = vpack.c.bf16 %v15730_v49, %v15729_v41 }
0x49a5   :  { %v16186_v0 = vpop.eup %16185  ;;  %15118 = vmatprep.subr.bf16.mxu0 %v15117_v44  ;;  %v9502_v63 = vpop.permute.xlu1 %9501  ;;  %v15127_v7 = vpack.c.bf16 %v15735_v43, %v15734_v46  ;;  %v8862_v43 = vld [vmem:[%s19484_s4 + $0x290] sm:$0xff] }
0x49a6   :  { %v16188_v20 = vpop.eup %16187  ;;  %v9406_v57 = vmul.f32 %v16186_v0, %v16184_v1  ;;  %v9504_v52 = vpop.permute.xlu0 %9503 }
0x49a7   :  { %v9407_v21 = vmul.f32 %v16188_v20, %v16182_v42 }
0x49a8   :  { %15120 = vmatpush3.bf16.msra.mxu0 %v15117_v44  ;;  %14199 = vmatprep.mubr.msk.f32.mxu0 %vm145_vm0, %v9406_v57 }
0x49a9   :  { %15123 = vmatprep.subr.msk.bf16.mxu0 %vm16555_vm2, %v15121_v11 }
0x49ab   :  { %14200 = vmatmul.mubr.msk.f32.vlgmr.msra.gmra.mrb[114].mxu0 %vm145_vm0, %v9407_v21  ;;  %v8860_v21 = vld [vmem:[%s19484_s4 + $0x280] sm:$0xff] }
0x49ac   :  { %14210 = vmatprep.mubr.msk.f32.mxu0 %vm491_vm1, %v9502_v63  ;;  %v8861_v63 = vld [vmem:[%s19484_s4 + $0x288] sm:$0xff] }
0x49ad   :  { %v15141_v46 = vpack.c.bf16 %v8861_v63, %v8860_v21 }
0x49b1   :  { %15126 = vmatpush3.bf16.xpose.msk.msra.mxu0 %vm16555_vm2, %v15121_v11 }
0x49b2   :  { %15129 = vmatprep.subr.msk.bf16.mxu0 %vm16555_vm2, %v15127_v7 }
0x49b9   :  { %15132 = vmatpush3.bf16.xpose.msk.msra.mxu0 %vm16555_vm2, %v15127_v7  ;;  %v8863_v7 = vld [vmem:[%s19484_s4 + $0x298] sm:$0xff] }
0x49ba   :  { %15150 = vmatprep.subr.bf16.mxu0 %v15149_v24  ;;  %v15145_v17 = vpack.c.bf16 %v8863_v7, %v8862_v43  ;;  %v12575_v7 = vld [vmem:[%s19484_s4 + $0x404] ss:$0 sm:$0xff] }
0x49c0   :  { %14211 = vmatmul.mubr.msk.f32.vlgmr.msra.gmra.mrb[116].mxu0 %vm491_vm1, %v9504_v52 }
0x49c1   :  { %15152 = vmatpush3.bf16.msra.mxu0 %v15149_v24  ;;  %14243 = vmatprep.mubr.msk.f32.mxu0 %vm145_vm0, %v18603_v2 }
0x49c2   :  { %15154 = vmatprep.subr.bf16.mxu0 %v15153_v26 }
0x49c5   :  { %15156 = vmatpush3.bf16.msra.mxu0 %v15153_v26 }
0x49c8   :  { %14244 = vmatmul.mubr.msk.f32.vlgmr.msra.gmra.mrb[118].mxu0 %vm145_vm0, %v18605_v31 }
0x49c9   :  { %14246 = vmatprep.mubr.msk.f32.mxu0 %vm145_vm0, %v18617_v4 }
0x49cc   :  { %14247 = vmatmul.mubr.msk.f32.gmra.mrb[120].mxu0 %vm145_vm0, %v18620_v12 }
0x4a7e   :  { %v14201_v39 = vpop.f32.mrb[114].mxu0 }
0x4a7f   :  { %v9492_v53 = vpop.f32.mrb[115].mxu0 }
0x4a93   :  { %v14212_v35 = vpop.f32.mrb[116].mxu0 }
0x4a94   :  { %v9597_v34 = vadd.f32 %v14212_v35, %v17223_v38  ;;  %v9591_v47 = vpop.f32.mrb[117].mxu0 }
0x4a95   :  { %v9592_v15 = vadd.f32 %v9591_v47, %v17226_v22 }
0x4a96   :  { %v9603_v48 = vsel %vm145_vm0, %v9597_v34, -inf }
0x4a97   :  { %9604 = vmax.xlane.f32.xlu0 %v9603_v48  ;;  %v9600_v13 = vsel %vm145_vm0, %v9592_v15, -inf }
0x4a98   :  { %9601 = vmax.xlane.f32.xlu1 %v9600_v13 }
0x4a9b   :  { %v14245_v45 = vpop.f32.mrb[118].mxu0 }
0x4a9c   :  { %v18788_v23 = vadd.f32 %v14245_v45, %v12576_v29  ;;  %v9947_v62 = vpop.f32.mrb[119].mxu0 }
0x4a9d   :  { %v18790_v28 = vadd.f32 %v12576_v29, %v9947_v62 }
0x4a9f   :  { %v14248_v38 = vpop.f32.mrb[120].mxu0  ;;  %14264 = vmatprep.mubr.msk.f32.mxu0 %vm491_vm1, %v18790_v28 }
0x4aa0   :  { %v18794_v22 = vadd.f32 %v14248_v38, %v12576_v29  ;;  %v9957_v42 = vpop.f32.mrb[121].mxu0 }
0x4aa1   :  { %v18796_v1 = vadd.f32 %v12576_v29, %v9957_v42 }
0x4b24   :  { %v9605_v14 = vpop.xlane.xlu0 %9604 }
0x4b25   :  { %v9607_v18 = vsub.f32 %v9597_v34, %v9605_v14  ;;  %v9602_v60 = vpop.xlane.xlu1 %9601 }
0x4b26   :  { %v9606_v61 = vsub.f32 %v9592_v15, %v9602_v60 }
0x4b27   :  { %v9610_v56 = vmul.f32 1.442695, %v9607_v18 }
0x4b28   :  { %v9608_v36 = vmul.f32 1.442695, %v9606_v61 }
0x4b29   :  { %16189 = vpow2.f32 %v9610_v56 }
0x4b2a   :  { %16191 = vpow2.f32 %v9608_v36 }
0x4b33   :  { %v16190_v27 = vpop.eup %16189 }
0x4b34   :  { %v16192_v51 = vpop.eup %16191  ;;  %v9615_v32 = vsel %vm145_vm0, %v16190_v27, 0.0 }
0x4b35   :  { %9616 = vadd.xlane.f32.xlu1 %v9615_v32  ;;  %v9612_v55 = vsel %vm145_vm0, %v16192_v51, 0.0 }
0x4b36   :  { %9613 = vadd.xlane.f32.xlu0 %v9612_v55 }
0x4b46   :  { %15742 = vrot.lane.b32.xlu1 %v18649_v3, %s16366_s10 }
0x4b4a   :  { %9717 = vrot.lane.b32.xlu1 %v18729_v16, %s16369_s16 }
0x4b4c   :  { %15737 = vrot.lane.b32.xlu0 %v18640_v9, %s16366_s10 }
0x4b4e   :  { %9725 = vrot.lane.b32.xlu1 %v9492_v53, %s16371_s18 }
0x4b50   :  { %9719 = vrot.lane.b32.xlu0 %v18727_v8, %s16369_s16 }
0x4b54   :  { %9727 = vrot.lane.b32.xlu0 %v14201_v39, %s16371_s18 }
0x4bc2   :  { %v9617_v19 = vpop.xlane.xlu1 %9616 }
0x4bc3   :  { %v9614_v25 = vpop.xlane.xlu0 %9613 }
0x4bc4   :  { %16193 = vrcp.f32 %v9614_v25  ;;  %v9967_v25 = vld [vmem:[%s19485_s5 + $0x68] sm:$0xff] }
0x4bc5   :  { %16195 = vrcp.f32 %v9617_v19 }
0x4bc6   :  { %v15743_v49 = vpop.permute.xlu1 %15742 }
0x4bc7   :  { %v15738_v41 = vpop.permute.xlu0 %15737  ;;  %v15745_v3 = vunpack.i.h.bf16 %v15743_v49  ;;  %v15744_v44 = vunpack.i.l.bf16 %v15743_v49 }
0x4bc8   :  { %v15740_v0 = vunpack.i.h.bf16 %v15738_v41  ;;  %v15739_v16 = vunpack.i.l.bf16 %v15738_v41  ;;  %v9968_v41 = vld [vmem:[%s19485_s5 + $0x70] sm:$0xff] }
0x4bc9   :  { %v15137_v57 = vpack.c.bf16 %v15745_v3, %v15744_v44  ;;  %v9969_v3 = vld [vmem:[%s19485_s5 + $0x78] sm:$0xff] }
0x4bca   :  { %v15133_v20 = vpack.c.bf16 %v15740_v0, %v15739_v16  ;;  %v9718_v59 = vpop.permute.xlu1 %9717  ;;  %v15161_v44 = vpack.c.bf16 %v9969_v3, %v9968_v41 }
0x4bcb   :  { %v9720_v6 = vpop.permute.xlu0 %9719  ;;  %v9739_v39 = vsel %vm491_vm1, %v18695_v58, %v9718_v59  ;;  %v12571_v58 = vld [vmem:[%s19484_s4 + $0x3fc] ss:$0 sm:$0xff] }
0x4bcc   :  { %15134 = vmatprep.subr.bf16.mxu1 %v15133_v20  ;;  %v9740_v35 = vsel %vm491_vm1, %v18693_v5, %v9720_v6  ;;  %v12581_v6 = vld [vmem:[%s19485_s5 + $0x83] ss:$0 sm:$0xff] }
0x4bcd   :  { %15136 = vmatpush3.bf16.msra.mxu1 %v15133_v20 }
0x4bce   :  { %v16194_v9 = vpop.eup %16193  ;;  %15138 = vmatprep.subr.bf16.mxu1 %v15137_v57  ;;  %v9726_v52 = vpop.permute.xlu1 %9725 }
0x4bcf   :  { %v16196_v11 = vpop.eup %16195  ;;  %v9620_v8 = vmul.f32 %v16194_v9, %v16192_v51  ;;  %v9728_v26 = vpop.permute.xlu0 %9727  ;;  %v9741_v34 = vsel %vm575_vm5, %v9739_v39, %v9726_v52 }
0x4bd0   :  { %v9621_v54 = vmul.f32 %v16196_v11, %v16190_v27  ;;  %v9742_v15 = vsel %vm575_vm5, %v9740_v35, %v9728_v26 }
0x4bd1   :  { %15140 = vmatpush3.bf16.msra.mxu1 %v15137_v57  ;;  %14221 = vmatprep.mubr.msk.f32.mxu1 %vm145_vm0, %v9620_v8 }
0x4bd2   :  { %15142 = vmatprep.subr.bf16.mxu1 %v15141_v46 }
0x4bd4   :  { %14222 = vmatmul.mubr.msk.f32.vlgmr.msra.gmra.mrb[106].mxu1 %vm145_vm0, %v9621_v54  ;;  %v12574_v54 = vld [vmem:[%s19484_s4 + $0x403] ss:$0 sm:$0xff] }
0x4bd5   :  { %15144 = vmatpush3.bf16.msra.mxu1 %v15141_v46 }
0x4bd6   :  { %15146 = vmatprep.subr.bf16.mxu1 %v15145_v17 }
0x4bd9   :  { %15148 = vmatpush3.bf16.msra.mxu1 %v15145_v17 }
0x4ca7   :  { %v14223_v10 = vpop.f32.mrb[106].mxu1 }
0x4ca8   :  { %9735 = vrot.lane.b32.xlu0 %v14223_v10, %s16372_s13  ;;  %v9706_v24 = vpop.f32.mrb[107].mxu1 }
0x4ca9   :  { %9733 = vrot.lane.b32.xlu1 %v9706_v24, %s16372_s13 }
0x4d1a   :  { %v9736_v53 = vpop.permute.xlu0 %9735 }
0x4d1b   :  { %v9734_v47 = vpop.permute.xlu1 %9733  ;;  %v9744_v13 = vsel %vm1313_vm6, %v9742_v15, %v9736_v53 }
0x4d1c   :  { %v9743_v48 = vsel %vm1313_vm6, %v9741_v34, %v9734_v47 }
0x4d1d   :  { %14232 = vmatprep.mubr.msk.f32.mxu1 %vm145_vm0, %v9743_v48  ;;  %v19515_v48 = vld [vmem:[#allocation8_spill] sm:$0xff] }
0x4d1e   :  { %14233 = vmatmul.mubr.msk.f32.vlgmr.msra.gmra.mrb[108].mxu1 %vm145_vm0, %v9744_v13 }
0x4df1   :  { %v14234_v29 = vpop.f32.mrb[108].mxu1 }
0x4df2   :  { %v9827_v45 = vadd.f32 %v14234_v29, %v12571_v58  ;;  %v9821_v5 = vpop.f32.mrb[109].mxu1 }
0x4df3   :  { %v9822_v62 = vadd.f32 %v12571_v58, %v9821_v5  ;;  %v19516_v5 = vld [vmem:[#allocation9_spill] sm:$0xff] }
0x4df4   :  { %v9831_v38 = vadd.f32 %v9827_v45, %v18631_v33 }
0x4df5   :  { %v9830_v42 = vadd.f32 %v9822_v62, %v18629_v50  ;;  %v9966_v50 = vld [vmem:[%s19485_s5 + $0x60] sm:$0xff] }
0x4df6   :  { %v9835_v14 = vsel %vm145_vm0, %v9831_v38, 0.0  ;;  %v15157_v49 = vpack.c.bf16 %v9967_v25, %v9966_v50 }
0x4df7   :  { %9836 = vadd.xlane.f32.xlu0 %v9835_v14  ;;  %v9832_v18 = vsel %vm145_vm0, %v9830_v42, 0.0 }
0x4df8   :  { %9833 = vadd.xlane.f32.xlu1 %v9832_v18  ;;  %15158 = vmatprep.subr.bf16.mxu1 %v15157_v49 }
0x4df9   :  { %15160 = vmatpush3.bf16.msra.mxu1 %v15157_v49 }
0x4dfa   :  { %15162 = vmatprep.subr.bf16.mxu1 %v15161_v44 }
0x4dfd   :  { %15164 = vmatpush3.bf16.msra.mxu1 %v15161_v44 }
0x4e84   :  { %v9837_v60 = vpop.xlane.xlu0 %9836 }
0x4e85   :  { %v9839_v61 = vmul.f32 0.03125, %v9837_v60  ;;  %v9834_v56 = vpop.xlane.xlu1 %9833 }
0x4e86   :  { %v9838_v36 = vmul.f32 0.03125, %v9834_v56 }
0x4e87   :  { %v9841_v27 = vsub.f32 %v9831_v38, %v9839_v61 }
0x4e88   :  { %v9840_v51 = vsub.f32 %v9830_v42, %v9838_v36  ;;  %v19517_v42 = vld [vmem:[#allocation10_spill] sm:$0xff] }
0x4e89   :  { %v9843_v32 = vmul.f32 %v9841_v27, %v9841_v27 }
0x4e8a   :  { %v9842_v55 = vmul.f32 %v9840_v51, %v9840_v51 }
0x4e8b   :  { %v9847_v19 = vsel %vm145_vm0, %v9843_v32, 0.0 }
0x4e8c   :  { %9848 = vadd.xlane.f32.xlu1 %v9847_v19  ;;  %v9844_v33 = vsel %vm145_vm0, %v9842_v55, 0.0 }
0x4e8d   :  { %9845 = vadd.xlane.f32.xlu0 %v9844_v33 }
0x4f19   :  { %v9849_v0 = vpop.xlane.xlu1 %9848 }
0x4f1a   :  { %v9851_v16 = vmul.f32 0.03125, %v9849_v0  ;;  %v9846_v20 = vpop.xlane.xlu0 %9845 }
0x4f1b   :  { %v9850_v57 = vmul.f32 0.03125, %v9846_v20 }
0x4f1c   :  { %v9853_v9 = vadd.f32 1e-05, %v9851_v16 }
0x4f1d   :  { %v9852_v11 = vadd.f32 1e-05, %v9850_v57 }
0x4f1e   :  { %16197 = vrsqrt.f32 %v9853_v9 }
0x4f1f   :  { %16199 = vrsqrt.f32 %v9852_v11 }
0x4f28   :  { %v16198_v8 = vpop.eup %16197 }
0x4f29   :  { %v16200_v21 = vpop.eup %16199  ;;  %v9857_v63 = vmul.f32 %v16198_v8, %v9841_v27 }
0x4f2a   :  { %v9856_v43 = vmul.f32 %v16200_v21, %v9840_v51 }
0x4f2b   :  { %v9864_v46 = vmul.f32 %v12574_v54, %v9857_v63 }
0x4f2c   :  { %v9863_v17 = vmul.f32 %v12574_v54, %v9856_v43 }
0x4f2d   :  { %v18865_v24 = vadd.f32 %v12575_v7, %v9864_v46 }
0x4f2e   :  { %v18863_v10 = vadd.f32 %v12575_v7, %v9863_v17 }
0x4f30   :  { %14257 = vmatprep.mubr.msk.f32.mxu1 %vm145_vm0, %v18863_v10 }
0x4f31   :  { %14258 = vmatmul.mubr.msk.f32.vlgmr.msra.gmra.mrb[110].mxu1 %vm145_vm0, %v18865_v24 }
0x5004   :  { %v14259_v59 = vpop.f32.mrb[110].mxu1 }
0x5005   :  { %v10053_v26 = vadd.f32 %v14259_v59, %v12581_v6  ;;  %v10047_v52 = vpop.f32.mrb[111].mxu1 }
0x5006   :  { %v10048_v39 = vadd.f32 %v12581_v6, %v10047_v52 }
0x5008   :  { %v15165_v53 = vpack.c.bf16 %v10053_v26, %v10048_v39  ;;  %v18874_v35 = vpack.i.bf16 %v10053_v26, %v10048_v39 }
0x500a   :  { %15167 = vmatprep.subr.msk.bf16.mxu0 %vm16555_vm2, %v15165_v53 }
0x500b   :  { %15170 = vmatpush3.bf16.xpose.msk.msra.mxu0 %vm16555_vm2, %v15165_v53 }
0x5012   :  { %14265 = vmatmul.mubr.msk.f32.vlgmr.msra.gmra.mrb[122].mxu0 %vm491_vm1, %v18788_v23 }
0x5013   :  { %14267 = vmatprep.mubr.msk.f32.mxu0 %vm491_vm1, %v18796_v1 }
0x5016   :  { %14268 = vmatmul.mubr.msk.f32.gmra.mrb[124].mxu0 %vm491_vm1, %v18794_v22 }
0x50e5   :  { %v14266_v34 = vpop.f32.mrb[122].mxu0 }
0x50e6   :  { %v10151_v47 = vadd.f32 %v14266_v34, %v17458_v37  ;;  %v10145_v15 = vpop.f32.mrb[123].mxu0 }
0x50e7   :  { %v10146_v13 = vadd.f32 %v10145_v15, %v19515_v48 }
0x50e8   :  { %v10167_v58 = vsel %vm575_vm5, %v10151_v47, -inf }
0x50e9   :  { %10168 = vmax.xlane.f32.xlu1 %v10167_v58  ;;  %v14269_v29 = vpop.f32.mrb[124].mxu0  ;;  %v10164_v45 = vsel %vm575_vm5, %v10146_v13, -inf }
0x50ea   :  { %v10161_v62 = vadd.f32 %v14269_v29, %v19516_v5  ;;  %v10155_v38 = vpop.f32.mrb[125].mxu0  ;;  %10165 = vmax.xlane.f32.xlu0 %v10164_v45 }
0x50eb   :  { %v10156_v14 = vadd.f32 %v10155_v38, %v19517_v42 }
0x50ec   :  { %v10173_v18 = vsel %vm575_vm5, %v10161_v62, -inf }
0x50ed   :  { %10174 = vmax.xlane.f32.xlu1 %v10173_v18  ;;  %v10170_v60 = vsel %vm575_vm5, %v10156_v14, -inf }
0x50ee   :  { %10171 = vmax.xlane.f32.xlu0 %v10170_v60 }
0x50fe   :  { %15752 = vrot.lane.b32.xlu1 %v18874_v35, %s16360_s26 }
0x5102   :  { %15757 = vrot.lane.b32.xlu1 %v18874_v35, %s16365_s30 }
0x5104   :  { %15747 = vrot.lane.b32.xlu0 %v18874_v35, %s16359_s25 }
0x5176   :  { %v10169_v61 = vpop.xlane.xlu1 %10168 }
0x5177   :  { %v10177_v56 = vsub.f32 %v10151_v47, %v10169_v61  ;;  %v10166_v36 = vpop.xlane.xlu0 %10165 }
0x5178   :  { %v10176_v27 = vsub.f32 %v10146_v13, %v10166_v36 }
0x5179   :  { %v10182_v51 = vmul.f32 1.442695, %v10177_v56 }
0x517a   :  { %v10180_v32 = vmul.f32 1.442695, %v10176_v27  ;;  %v10175_v55 = vpop.xlane.xlu1 %10174 }
0x517b   :  { %16201 = vpow2.f32 %v10182_v51  ;;  %v10179_v19 = vsub.f32 %v10161_v62, %v10175_v55  ;;  %v10172_v33 = vpop.xlane.xlu0 %10171 }
0x517c   :  { %16203 = vpow2.f32 %v10180_v32  ;;  %v10178_v50 = vsub.f32 %v10156_v14, %v10172_v33 }
0x517d   :  { %v10186_v25 = vmul.f32 1.442695, %v10179_v19 }
0x517e   :  { %v10184_v49 = vmul.f32 1.442695, %v10178_v50  ;;  %v15753_v41 = vpop.permute.xlu1 %15752 }
0x517f   :  { %16205 = vpow2.f32 %v10186_v25  ;;  %v15755_v3 = vunpack.i.h.bf16 %v15753_v41  ;;  %v15748_v44 = vpop.permute.xlu0 %15747  ;;  %v15754_v0 = vunpack.i.l.bf16 %v15753_v41 }
0x5180   :  { %16207 = vpow2.f32 %v10184_v49  ;;  %v15750_v16 = vunpack.i.h.bf16 %v15748_v44  ;;  %v15749_v20 = vunpack.i.l.bf16 %v15748_v44 }
0x5181   :  { %v15175_v9 = vpack.c.bf16 %v15755_v3, %v15754_v0 }
0x5182   :  { %v15171_v57 = vpack.c.bf16 %v15750_v16, %v15749_v20  ;;  %v15758_v17 = vpop.permute.xlu1 %15757 }
0x5183   :  { %v15760_v34 = vunpack.i.h.bf16 %v15758_v17  ;;  %v15759_v47 = vunpack.i.l.bf16 %v15758_v17 }
0x5184   :  { %15172 = vmatprep.subr.bf16.mxu1 %v15171_v57 }
0x5185   :  { %v16202_v11 = vpop.eup %16201  ;;  %15174 = vmatpush3.bf16.msra.mxu1 %v15171_v57  ;;  %v15185_v29 = vpack.c.bf16 %v15760_v34, %v15759_v47 }
0x5186   :  { %v16204_v8 = vpop.eup %16203  ;;  %15177 = vmatprep.subr.msk.bf16.mxu1 %vm16555_vm2, %v15175_v9  ;;  %v10191_v54 = vsel %vm575_vm5, %v16202_v11, 0.0 }
0x5187   :  { %10192 = vadd.xlane.f32.xlu1 %v10191_v54  ;;  %v10188_v21 = vsel %vm575_vm5, %v16204_v8, 0.0 }
0x5188   :  { %10189 = vadd.xlane.f32.xlu0 %v10188_v21 }
0x5189   :  { %v16206_v63 = vpop.eup %16205 }
0x518a   :  { %v16208_v43 = vpop.eup %16207  ;;  %v10197_v46 = vsel %vm575_vm5, %v16206_v63, 0.0 }
0x518b   :  { %10198 = vadd.xlane.f32.xlu1 %v10197_v46  ;;  %v10194_v7 = vsel %vm575_vm5, %v16208_v43, 0.0 }
0x518c   :  { %10195 = vadd.xlane.f32.xlu0 %v10194_v7 }
0x519c   :  { %10313 = vrot.lane.b32.xlu1 %v18788_v23, %s16360_s26 }
0x51a0   :  { %10317 = vrot.lane.b32.xlu1 %v18794_v22, %s16360_s26 }
0x51a2   :  { %10311 = vrot.lane.b32.xlu0 %v18790_v28, %s16360_s26 }
0x51a4   :  { %10567 = vrot.lane.b32.xlu1 %v18790_v28, %s16365_s30 }
0x51a6   :  { %10315 = vrot.lane.b32.xlu0 %v18796_v1, %s16360_s26 }
0x51a8   :  { %10571 = vrot.lane.b32.xlu1 %v18796_v1, %s16365_s30 }
0x51aa   :  { %15762 = vrot.lane.b32.xlu0 %v18874_v35, %s16367_s11 }
0x51ac   :  { %10823 = vrot.lane.b32.xlu1 %v18790_v28, %s16367_s11 }
0x51ae   :  { %10569 = vrot.lane.b32.xlu0 %v18788_v23, %s16365_s30 }
0x51b0   :  { %10827 = vrot.lane.b32.xlu1 %v18796_v1, %s16367_s11 }
0x51b2   :  { %10573 = vrot.lane.b32.xlu0 %v18794_v22, %s16365_s30 }
0x51b6   :  { %10825 = vrot.lane.b32.xlu0 %v18788_v23, %s16367_s11 }
0x51ba   :  { %10829 = vrot.lane.b32.xlu0 %v18794_v22, %s16367_s11 }
0x5214   :  { %v10193_v6 = vpop.xlane.xlu1 %10192 }
0x5215   :  { %16209 = vrcp.f32 %v10193_v6  ;;  %v10190_v59 = vpop.xlane.xlu0 %10189 }
0x5216   :  { %16211 = vrcp.f32 %v10190_v59 }
0x5218   :  { %v10199_v28 = vpop.xlane.xlu1 %10198 }
0x5219   :  { %16213 = vrcp.f32 %v10199_v28  ;;  %v10196_v26 = vpop.xlane.xlu0 %10195 }
0x521a   :  { %16215 = vrcp.f32 %v10196_v26 }
0x521c   :  { %v10314_v1 = vpop.permute.xlu1 %10313 }
0x521d   :  { %v10312_v52 = vpop.permute.xlu0 %10311 }
0x521f   :  { %v16210_v39 = vpop.eup %16209 }
0x5220   :  { %v16212_v53 = vpop.eup %16211  ;;  %v10205_v13 = vmul.f32 %v16210_v39, %v16202_v11  ;;  %v10318_v45 = vpop.permute.xlu1 %10317 }
0x5221   :  { %v10316_v15 = vpop.permute.xlu0 %10315  ;;  %v10204_v23 = vmul.f32 %v16212_v53, %v16204_v8 }
0x5223   :  { %v16214_v58 = vpop.eup %16213  ;;  %14274 = vmatprep.mubr.msk.f32.mxu1 %vm575_vm5, %v10204_v23 }
0x5224   :  { %v16216_v22 = vpop.eup %16215  ;;  %14275 = vmatmul.mubr.msk.f32.vlgmr.msra.gmra.mrb[112].mxu1 %vm575_vm5, %v10205_v13  ;;  %v10207_v14 = vmul.f32 %v16214_v58, %v16206_v63  ;;  %v10568_v61 = vpop.permute.xlu1 %10567 }
0x5225   :  { %15180 = vmatpush3.bf16.xpose.msk.msra.mxu1 %vm16555_vm2, %v15175_v9  ;;  %v15763_v62 = vpop.permute.xlu0 %15762  ;;  %v10206_v38 = vmul.f32 %v16216_v22, %v16208_v43 }
0x5226   :  { %15187 = vmatprep.subr.msk.bf16.mxu1 %vm16555_vm2, %v15185_v29  ;;  %v15765_v18 = vunpack.i.h.bf16 %v15763_v62  ;;  %v15764_v60 = vunpack.i.l.bf16 %v15763_v62 }
0x5227   :  { %14277 = vmatprep.mubr.msk.f32.mxu1 %vm575_vm5, %v10206_v38 }
0x5228   :  { %14278 = vmatmul.mubr.msk.f32.gmra.mrb[114].mxu1 %vm575_vm5, %v10207_v14  ;;  %v15195_v56 = vpack.c.bf16 %v15765_v18, %v15764_v60  ;;  %v10572_v27 = vpop.permute.xlu1 %10571 }
0x5229   :  { %14284 = vmatprep.mubr.msk.f32.mxu1 %vm491_vm1, %v10312_v52  ;;  %v10570_v36 = vpop.permute.xlu0 %10569 }
0x522c   :  { %14285 = vmatmul.mubr.msk.f32.vlgmr.msra.gmra.mrb[116].mxu1 %vm491_vm1, %v10314_v1  ;;  %v10824_v32 = vpop.permute.xlu1 %10823 }
0x522d   :  { %15190 = vmatpush3.bf16.xpose.msk.msra.mxu1 %vm16555_vm2, %v15185_v29  ;;  %14287 = vmatprep.mubr.msk.f32.mxu1 %vm491_vm1, %v10316_v15  ;;  %v10574_v51 = vpop.permute.xlu0 %10573 }
0x522e   :  { %15197 = vmatprep.subr.msk.bf16.mxu1 %vm16555_vm2, %v15195_v56 }
0x5230   :  { %14288 = vmatmul.mubr.msk.f32.gmra.mrb[118].mxu1 %vm491_vm1, %v10318_v45  ;;  %v10828_v19 = vpop.permute.xlu1 %10827 }
0x5231   :  { %14304 = vmatprep.mubr.msk.f32.mxu1 %vm491_vm1, %v10568_v61  ;;  %v10826_v55 = vpop.permute.xlu0 %10825 }
0x5234   :  { %14305 = vmatmul.mubr.msk.f32.vlgmr.msra.gmra.mrb[120].mxu1 %vm491_vm1, %v10570_v36 }
0x5235   :  { %15200 = vmatpush3.bf16.xpose.msk.msra.mxu1 %vm16555_vm2, %v15195_v56  ;;  %14307 = vmatprep.mubr.msk.f32.mxu1 %vm491_vm1, %v10572_v27  ;;  %v10830_v33 = vpop.permute.xlu0 %10829 }
0x5238   :  { %14308 = vmatmul.mubr.msk.f32.gmra.mrb[122].mxu1 %vm491_vm1, %v10574_v51 }
0x5239   :  { %14324 = vmatprep.mubr.msk.f32.mxu1 %vm491_vm1, %v10824_v32 }
0x523c   :  { %14325 = vmatmul.mubr.msk.f32.vlgmr.msra.gmra.mrb[124].mxu1 %vm491_vm1, %v10826_v55 }
0x523d   :  { %14327 = vmatprep.mubr.msk.f32.mxu1 %vm491_vm1, %v10828_v19 }
0x5240   :  { %14328 = vmatmul.mubr.msk.f32.gmra.mrb[126].mxu1 %vm491_vm1, %v10830_v33 }
0x52f7   :  { %v18958_v50 = vpop.f32.mrb[112].mxu1 }
0x52f8   :  { %v18960_v30 = vpop.f32.mrb[113].mxu1 }
0x52fb   :  { %v18962_v25 = vpop.f32.mrb[114].mxu1 }
0x52fc   :  { %v18964_v49 = vpop.f32.mrb[115].mxu1 }
0x52ff   :  { %v14286_v41 = vpop.f32.mrb[116].mxu1 }
0x5300   :  { %v10407_v3 = vadd.f32 %v14286_v41, %v17458_v37  ;;  %v10401_v44 = vpop.f32.mrb[117].mxu1 }
0x5301   :  { %v10402_v0 = vadd.f32 %v10401_v44, %v19515_v48 }
0x5302   :  { %v10423_v16 = vsel %vm575_vm5, %v10407_v3, -inf }
0x5303   :  { %10424 = vmax.xlane.f32.xlu0 %v10423_v16  ;;  %v14289_v20 = vpop.f32.mrb[118].mxu1  ;;  %v10420_v57 = vsel %vm575_vm5, %v10402_v0, -inf }
0x5304   :  { %v10417_v9 = vadd.f32 %v14289_v20, %v19516_v5  ;;  %v10411_v11 = vpop.f32.mrb[119].mxu1  ;;  %10421 = vmax.xlane.f32.xlu1 %v10420_v57 }
0x5305   :  { %v10412_v8 = vadd.f32 %v10411_v11, %v19517_v42 }
0x5306   :  { %v10429_v54 = vsel %vm575_vm5, %v10417_v9, -inf }
0x5307   :  { %v14306_v21 = vpop.f32.mrb[120].mxu1  ;;  %v10426_v63 = vsel %vm575_vm5, %v10412_v8, -inf }
0x5308   :  { %v10663_v43 = vadd.f32 %v14306_v21, %v17458_v37  ;;  %v10657_v46 = vpop.f32.mrb[121].mxu1  ;;  %10427 = vmax.xlane.f32.xlu0 %v10426_v63  ;;  %10430 = vmax.xlane.f32.xlu1 %v10429_v54 }
0x5309   :  { %v10658_v7 = vadd.f32 %v10657_v46, %v19515_v48 }
0x530a   :  { %v10679_v17 = vsel %vm575_vm5, %v10663_v43, -inf }
0x530b   :  { %v14309_v6 = vpop.f32.mrb[122].mxu1  ;;  %v10676_v59 = vsel %vm575_vm5, %v10658_v7, -inf }
0x530c   :  { %v10673_v28 = vadd.f32 %v14309_v6, %v19516_v5  ;;  %v10667_v26 = vpop.f32.mrb[123].mxu1  ;;  %10677 = vmax.xlane.f32.xlu0 %v10676_v59  ;;  %10680 = vmax.xlane.f32.xlu1 %v10679_v17 }
0x530d   :  { %v10668_v52 = vadd.f32 %v10667_v26, %v19517_v42 }
0x530e   :  { %v10685_v1 = vsel %vm575_vm5, %v10673_v28, -inf }
0x530f   :  { %v14326_v39 = vpop.f32.mrb[124].mxu1  ;;  %v10682_v53 = vsel %vm575_vm5, %v10668_v52, -inf }
0x5310   :  { %v10919_v34 = vadd.f32 %v14326_v39, %v17458_v37  ;;  %v10913_v47 = vpop.f32.mrb[125].mxu1  ;;  %10683 = vmax.xlane.f32.xlu0 %v10682_v53  ;;  %10686 = vmax.xlane.f32.xlu1 %v10685_v1 }
0x5311   :  { %v10914_v15 = vadd.f32 %v10913_v47, %v19515_v48 }
0x5312   :  { %v10935_v23 = vsel %vm575_vm5, %v10919_v34, -inf }
0x5313   :  { %v14329_v13 = vpop.f32.mrb[126].mxu1  ;;  %v10932_v58 = vsel %vm575_vm5, %v10914_v15, -inf }
0x5314   :  { %v18987_v22 = vadd.f32 %v14329_v13, %v19516_v5  ;;  %v10923_v29 = vpop.f32.mrb[127].mxu1  ;;  %10933 = vmax.xlane.f32.xlu0 %v10932_v58  ;;  %10936 = vmax.xlane.f32.xlu1 %v10935_v23 }
0x5315   :  { %v10924_v45 = vadd.f32 %v10923_v29, %v19517_v42 }
0x5316   :  { %v10941_v37 = vsel %vm575_vm5, %v18987_v22, -inf }
0x5317   :  { %v10938_v62 = vsel %vm575_vm5, %v10924_v45, -inf }
0x5318   :  { %10939 = vmax.xlane.f32.xlu0 %v10938_v62  ;;  %10942 = vmax.xlane.f32.xlu1 %v10941_v37 }
0x5390   :  { %v10425_v48 = vpop.xlane.xlu0 %10424 }
0x5391   :  { %v10433_v38 = vsub.f32 %v10407_v3, %v10425_v48  ;;  %v10422_v14 = vpop.xlane.xlu1 %10421 }
0x5392   :  { %v10432_v18 = vsub.f32 %v10402_v0, %v10422_v14 }
0x5393   :  { %v10438_v60 = vmul.f32 1.442695, %v10433_v38 }
0x5394   :  { %v10436_v61 = vmul.f32 1.442695, %v10432_v18 }
0x5395   :  { %16217 = vpow2.f32 %v10438_v60  ;;  %v10428_v5 = vpop.xlane.xlu0 %10427  ;;  %v10431_v56 = vpop.xlane.xlu1 %10430 }
0x5396   :  { %16219 = vpow2.f32 %v10436_v61  ;;  %v10434_v36 = vsub.f32 %v10412_v8, %v10428_v5  ;;  %v10435_v27 = vsub.f32 %v10417_v9, %v10431_v56 }
0x5398   :  { %v10440_v42 = vmul.f32 1.442695, %v10434_v36  ;;  %v10442_v51 = vmul.f32 1.442695, %v10435_v27 }
0x5399   :  { %v10678_v32 = vpop.xlane.xlu0 %10677  ;;  %v10681_v55 = vpop.xlane.xlu1 %10680 }
0x539a   :  { %16221 = vpow2.f32 %v10440_v42  ;;  %v10688_v19 = vsub.f32 %v10658_v7, %v10678_v32  ;;  %v10689_v33 = vsub.f32 %v10663_v43, %v10681_v55 }
0x539b   :  { %16223 = vpow2.f32 %v10442_v51 }
0x539c   :  { %v10692_v41 = vmul.f32 1.442695, %v10688_v19  ;;  %v10694_v3 = vmul.f32 1.442695, %v10689_v33 }
0x539d   :  { %v10684_v44 = vpop.xlane.xlu0 %10683  ;;  %v10687_v0 = vpop.xlane.xlu1 %10686 }
0x539e   :  { %16225 = vpow2.f32 %v10692_v41  ;;  %v10690_v16 = vsub.f32 %v10668_v52, %v10684_v44  ;;  %v10691_v20 = vsub.f32 %v10673_v28, %v10687_v0 }
0x539f   :  { %v18993_v57 = vpop.eup %16217  ;;  %16227 = vpow2.f32 %v10694_v3 }
0x53a0   :  { %v18995_v11 = vpop.eup %16219  ;;  %v10696_v9 = vmul.f32 1.442695, %v10690_v16  ;;  %v10698_v8 = vmul.f32 1.442695, %v10691_v20  ;;  %v10447_v54 = vsel %vm575_vm5, %v18993_v57, 0.0 }
0x53a1   :  { %v10934_v21 = vpop.xlane.xlu0 %10933  ;;  %10448 = vadd.xlane.f32.xlu1 %v10447_v54  ;;  %v10937_v63 = vpop.xlane.xlu1 %10936  ;;  %v10444_v43 = vsel %vm575_vm5, %v18995_v11, 0.0 }
0x53a2   :  { %16229 = vpow2.f32 %v10696_v9  ;;  %v10944_v46 = vsub.f32 %v10914_v15, %v10934_v21  ;;  %v10945_v7 = vsub.f32 %v10919_v34, %v10937_v63  ;;  %10445 = vadd.xlane.f32.xlu0 %v10444_v43 }
0x53a3   :  { %16231 = vpow2.f32 %v10698_v8 }
0x53a4   :  { %v19001_v17 = vpop.eup %16221  ;;  %v10948_v6 = vmul.f32 1.442695, %v10944_v46  ;;  %v10950_v59 = vmul.f32 1.442695, %v10945_v7 }
0x53a5   :  { %v19003_v28 = vpop.eup %16223  ;;  %v10940_v26 = vpop.xlane.xlu0 %10939  ;;  %v10450_v1 = vsel %vm575_vm5, %v19001_v17, 0.0 }
0x53a6   :  { %v10943_v52 = vpop.xlane.xlu1 %10942  ;;  %16233 = vpow2.f32 %v10948_v6  ;;  %v10946_v39 = vsub.f32 %v10924_v45, %v10940_v26  ;;  %10451 = vadd.xlane.f32.xlu0 %v10450_v1  ;;  %v10453_v34 = vsel %vm575_vm5, %v19003_v28, 0.0 }
0x53a7   :  { %v10947_v53 = vsub.f32 %v18987_v22, %v10943_v52  ;;  %16235 = vpow2.f32 %v10950_v59  ;;  %10454 = vadd.xlane.f32.xlu1 %v10453_v34 }
0x53a8   :  { %v19010_v47 = vpop.eup %16225  ;;  %v10952_v15 = vmul.f32 1.442695, %v10946_v39 }
0x53a9   :  { %v10954_v23 = vmul.f32 1.442695, %v10947_v53  ;;  %v19012_v13 = vpop.eup %16227  ;;  %v10700_v58 = vsel %vm575_vm5, %v19010_v47, 0.0 }
0x53aa   :  { %16237 = vpow2.f32 %v10952_v15  ;;  %10701 = vadd.xlane.f32.xlu0 %v10700_v58  ;;  %v10703_v22 = vsel %vm575_vm5, %v19012_v13, 0.0  ;;  %v11314_v58 = vld [vmem:[%s19487_s7 + $0x40] sm:$0xff] }
0x53ab   :  { %16239 = vpow2.f32 %v10954_v23  ;;  %10704 = vadd.xlane.f32.xlu1 %v10703_v22 }
0x53ac   :  { %v19018_v29 = vpop.eup %16229 }
0x53ad   :  { %v19020_v45 = vpop.eup %16231  ;;  %v10706_v37 = vsel %vm575_vm5, %v19018_v29, 0.0 }
0x53ae   :  { %10707 = vadd.xlane.f32.xlu0 %v10706_v37  ;;  %v10709_v62 = vsel %vm575_vm5, %v19020_v45, 0.0 }
0x53af   :  { %10710 = vadd.xlane.f32.xlu1 %v10709_v62 }
0x53b0   :  { %v19026_v48 = vpop.eup %16233 }
0x53b1   :  { %v19028_v38 = vpop.eup %16235  ;;  %v10956_v14 = vsel %vm575_vm5, %v19026_v48, 0.0 }
0x53b2   :  { %10957 = vadd.xlane.f32.xlu0 %v10956_v14  ;;  %v10959_v18 = vsel %vm575_vm5, %v19028_v38, 0.0 }
0x53b3   :  { %10960 = vadd.xlane.f32.xlu1 %v10959_v18 }
0x53b4   :  { %v19034_v60 = vpop.eup %16237 }
0x53b5   :  { %v19036_v61 = vpop.eup %16239  ;;  %v10962_v5 = vsel %vm575_vm5, %v19034_v60, 0.0 }
0x53b6   :  { %10963 = vadd.xlane.f32.xlu0 %v10962_v5  ;;  %v10965_v56 = vsel %vm575_vm5, %v19036_v61, 0.0 }
0x53b7   :  { %10966 = vadd.xlane.f32.xlu1 %v10965_v56 }
0x53c8   :  { %15772 = vrot.lane.b32.xlu1 %v18874_v35, %s16363_s28 }
0x53cc   :  { %15777 = vrot.lane.b32.xlu1 %v18874_v35, %s16366_s10  ;;  %15767 = vrot.lane.b32.xlu0 %v18874_v35, %s16358_s24 }
0x542e   :  { %v10449_v36 = vpop.xlane.xlu1 %10448 }
0x542f   :  { %v10446_v27 = vpop.xlane.xlu0 %10445 }
0x5430   :  { %16241 = vrcp.f32 %v10446_v27 }
0x5431   :  { %16243 = vrcp.f32 %v10449_v36 }
0x5433   :  { %v10452_v42 = vpop.xlane.xlu0 %10451 }
0x5434   :  { %v10455_v51 = vpop.xlane.xlu1 %10454  ;;  %16245 = vrcp.f32 %v10452_v42 }
0x5435   :  { %16247 = vrcp.f32 %v10455_v51 }
0x5437   :  { %v10702_v32 = vpop.xlane.xlu0 %10701 }
0x5438   :  { %v10705_v55 = vpop.xlane.xlu1 %10704  ;;  %16249 = vrcp.f32 %v10702_v32 }
0x5439   :  { %16251 = vrcp.f32 %v10705_v55 }
0x543a   :  { %v16242_v19 = vpop.eup %16241 }
0x543b   :  { %v10708_v33 = vpop.xlane.xlu0 %10707  ;;  %v10460_v41 = vmul.f32 %v16242_v19, %v18995_v11  ;;  %v16244_v43 = vpop.eup %16243  ;;  %v10058_v19 = vld [vmem:[%s19484_s4 + $0x2d0] sm:$0xff] }
0x543c   :  { %v10711_v3 = vpop.xlane.xlu1 %10710  ;;  %16253 = vrcp.f32 %v10708_v33  ;;  %v10461_v52 = vmul.f32 %v16244_v43, %v18993_v57  ;;  %v10059_v33 = vld [vmem:[%s19484_s4 + $0x2d8] sm:$0xff] }
0x543d   :  { %14294 = vmatprep.mubr.msk.f32.mxu0 %vm575_vm5, %v10460_v41  ;;  %16255 = vrcp.f32 %v10711_v3  ;;  %v15209_v41 = vpack.c.bf16 %v10059_v33, %v10058_v19 }
0x543e   :  { %v16246_v46 = vpop.eup %16245 }
0x543f   :  { %v10958_v44 = vpop.xlane.xlu0 %10957  ;;  %v16248_v1 = vpop.eup %16247  ;;  %v10462_v39 = vmul.f32 %v16246_v46, %v19001_v17  ;;  %v11315_v17 = vld [vmem:[%s19487_s7 + $0x48] sm:$0xff] }
0x5440   :  { %v10961_v0 = vpop.xlane.xlu1 %10960  ;;  %16257 = vrcp.f32 %v10958_v44  ;;  %v10463_v15 = vmul.f32 %v16248_v1, %v19003_v28  ;;  %v15213_v28 = vpack.c.bf16 %v11315_v17, %v11314_v58 }
0x5441   :  { %16259 = vrcp.f32 %v10961_v0  ;;  %v11452_v0 = vld [vmem:[%s19484_s4 + $0x2e0] sm:$0xff] }
0x5442   :  { %v16250_v53 = vpop.eup %16249 }
0x5443   :  { %v10964_v16 = vpop.xlane.xlu0 %10963  ;;  %v16252_v23 = vpop.eup %16251  ;;  %v10716_v57 = vmul.f32 %v16250_v53, %v19010_v47 }
0x5444   :  { %v10967_v35 = vpop.xlane.xlu1 %10966  ;;  %16261 = vrcp.f32 %v10964_v16  ;;  %v10717_v37 = vmul.f32 %v16252_v23, %v19012_v13  ;;  %v11316_v13 = vld [vmem:[%s19487_s7 + $0x50] sm:$0xff]  ;;  %v11453_v16 = vld [vmem:[%s19484_s4 + $0x2e8] sm:$0xff] }
0x5445   :  { %16263 = vrcp.f32 %v10967_v35  ;;  %v19110_v35 = vpack.c.bf16 %v11453_v16, %v11452_v0 }
0x5446   :  { %v16254_v22 = vpop.eup %16253 }
0x5447   :  { %v15768_v20 = vpop.permute.xlu0 %15767  ;;  %v16256_v62 = vpop.eup %16255  ;;  %v10718_v47 = vmul.f32 %v16254_v22, %v19018_v29  ;;  %v11317_v29 = vld [vmem:[%s19487_s7 + $0x58] sm:$0xff] }
0x5448   :  { %v15770_v9 = vunpack.i.h.bf16 %v15768_v20  ;;  %v15769_v8 = vunpack.i.l.bf16 %v15768_v20  ;;  %v15773_v54 = vpop.permute.xlu1 %15772  ;;  %v10719_v18 = vmul.f32 %v16256_v62, %v19020_v45  ;;  %v15217_v45 = vpack.c.bf16 %v11317_v29, %v11316_v13 }
0x5449   :  { %v15775_v21 = vunpack.i.h.bf16 %v15773_v54  ;;  %v15774_v63 = vunpack.i.l.bf16 %v15773_v54 }
0x544a   :  { %v15181_v11 = vpack.c.bf16 %v15770_v9, %v15769_v8  ;;  %v16258_v14 = vpop.eup %16257 }
0x544b   :  { %v15191_v7 = vpack.c.bf16 %v15775_v21, %v15774_v63  ;;  %v16260_v5 = vpop.eup %16259  ;;  %v10972_v56 = vmul.f32 %v16258_v14, %v19026_v48 }
0x544c   :  { %v15778_v6 = vpop.permute.xlu1 %15777  ;;  %15182 = vmatprep.subr.bf16.mxu0 %v15181_v11  ;;  %v10973_v27 = vmul.f32 %v16260_v5, %v19028_v38  ;;  %v10056_v38 = vld [vmem:[%s19484_s4 + $0x2c0] sm:$0xff] }
0x544d   :  { %v15780_v59 = vunpack.i.h.bf16 %v15778_v6  ;;  %v15779_v26 = vunpack.i.l.bf16 %v15778_v6  ;;  %15184 = vmatpush3.bf16.msra.mxu0 %v15181_v11  ;;  %v12631_v6 = vld [vmem:[%s19487_s7 + $0x82] ss:$0 sm:$0xff] }
0x544e   :  { %15192 = vmatprep.subr.bf16.mxu0 %v15191_v7  ;;  %v16262_v36 = vpop.eup %16261 }
0x544f   :  { %v15201_v34 = vpack.c.bf16 %v15780_v59, %v15779_v26  ;;  %v16264_v42 = vpop.eup %16263  ;;  %v10974_v51 = vmul.f32 %v16262_v36, %v19034_v60  ;;  %v10057_v60 = vld [vmem:[%s19484_s4 + $0x2c8] sm:$0xff] }
0x5450   :  { %14295 = vmatmul.mubr.msk.f32.vlgmr.msra.gmra.mrb[126].mxu0 %vm575_vm5, %v10461_v52  ;;  %v10975_v48 = vmul.f32 %v16264_v42, %v19036_v61  ;;  %v15205_v32 = vpack.c.bf16 %v10057_v60, %v10056_v38 }
0x5451   :  { %14297 = vmatprep.mubr.msk.f32.mxu0 %vm575_vm5, %v10462_v39  ;;  %15194 = vmatpush3.bf16.msra.mxu0 %v15191_v7 }
0x5452   :  { %15202 = vmatprep.subr.bf16.mxu0 %v15201_v34  ;;  %15206 = vmatprep.subr.bf16.mxu1 %v15205_v32 }
0x5453   :  { %15208 = vmatpush3.bf16.msra.mxu1 %v15205_v32 }
0x5454   :  { %14298 = vmatmul.mubr.msk.f32.gmra.mrb[128].mxu0 %vm575_vm5, %v10463_v15  ;;  %15210 = vmatprep.subr.bf16.mxu1 %v15209_v41 }
0x5455   :  { %14314 = vmatprep.mubr.msk.f32.mxu0 %vm575_vm5, %v10716_v57 }
0x5457   :  { %15212 = vmatpush3.bf16.msra.mxu1 %v15209_v41 }
0x5458   :  { %14315 = vmatmul.mubr.msk.f32.vlgmr.msra.gmra.mrb[130].mxu0 %vm575_vm5, %v10717_v37  ;;  %15222 = vmatprep.subr.bf16.mxu1 %v19110_v35 }
0x5459   :  { %15204 = vmatpush3.bf16.msra.mxu0 %v15201_v34  ;;  %14317 = vmatprep.mubr.msk.f32.mxu0 %vm575_vm5, %v10718_v47 }
0x545a   :  { %15214 = vmatprep.subr.bf16.mxu0 %v15213_v28 }
0x545c   :  { %14318 = vmatmul.mubr.msk.f32.gmra.mrb[132].mxu0 %vm575_vm5, %v10719_v18 }
0x545d   :  { %14334 = vmatprep.mubr.msk.f32.mxu0 %vm575_vm5, %v10972_v56 }
0x5460   :  { %14335 = vmatmul.mubr.msk.f32.vlgmr.msra.gmra.mrb[134].mxu0 %vm575_vm5, %v10973_v27 }
0x5461   :  { %14337 = vmatprep.mubr.msk.f32.mxu0 %vm575_vm5, %v10974_v51  ;;  %15216 = vmatpush3.bf16.msra.mxu0 %v15213_v28 }
0x5462   :  { %15218 = vmatprep.subr.bf16.mxu0 %v15217_v45 }
0x5464   :  { %14338 = vmatmul.mubr.msk.f32.gmra.mrb[136].mxu0 %vm575_vm5, %v10975_v48 }
0x5465   :  { %15220 = vmatpush3.bf16.msra.mxu0 %v15217_v45  ;;  %14362 = vmatprep.mubr.msk.f32.mxu0 %vm145_vm0, %v18863_v10 }
0x5468   :  { %14363 = vmatmul.mubr.msk.f32.vlgmr.msra.gmra.mrb[138].mxu0 %vm145_vm0, %v18865_v24 }
0x5523   :  { %v14296_v61 = vpop.f32.mrb[126].mxu0 }
0x5524   :  { %11085 = vrot.lane.b32.xlu1 %v14296_v61, %s16369_s16  ;;  %v10548_v55 = vpop.f32.mrb[127].mxu0 }
0x5525   :  { %11083 = vrot.lane.b32.xlu0 %v10548_v55, %s16369_s16 }
0x5527   :  { %v14299_v3 = vpop.f32.mrb[128].mxu0 }
0x5528   :  { %11089 = vrot.lane.b32.xlu1 %v14299_v3, %s16369_s16  ;;  %v10558_v44 = vpop.f32.mrb[129].mxu0 }
0x5529   :  { %11087 = vrot.lane.b32.xlu0 %v10558_v44, %s16369_s16 }
0x552b   :  { %v14316_v20 = vpop.f32.mrb[130].mxu0 }
0x552c   :  { %11101 = vrot.lane.b32.xlu1 %v14316_v20, %s16371_s18  ;;  %v10804_v9 = vpop.f32.mrb[131].mxu0 }
0x552d   :  { %11099 = vrot.lane.b32.xlu0 %v10804_v9, %s16371_s18 }
0x552f   :  { %v14319_v8 = vpop.f32.mrb[132].mxu0 }
0x5530   :  { %11105 = vrot.lane.b32.xlu1 %v14319_v8, %s16371_s18  ;;  %v10814_v54 = vpop.f32.mrb[133].mxu0  ;;  %v11454_v8 = vld [vmem:[%s19484_s4 + $0x2f0] sm:$0xff] }
0x5531   :  { %11103 = vrot.lane.b32.xlu0 %v10814_v54, %s16371_s18  ;;  %v11455_v54 = vld [vmem:[%s19484_s4 + $0x2f8] sm:$0xff]  ;;  %s16374_s18 = smov [#allocation2]  }
0x5533   :  { %v14336_v21 = vpop.f32.mrb[134].mxu0 }
0x5534   :  { %11117 = vrot.lane.b32.xlu1 %v14336_v21, %s16372_s13  ;;  %v11060_v63 = vpop.f32.mrb[135].mxu0 }
0x5535   :  { %11115 = vrot.lane.b32.xlu0 %v11060_v63, %s16372_s13 }
0x5537   :  { %v14339_v11 = vpop.f32.mrb[136].mxu0 }
0x5538   :  { %11121 = vrot.lane.b32.xlu1 %v14339_v11, %s16372_s13  ;;  %v11070_v43 = vpop.f32.mrb[137].mxu0 }
0x5539   :  { %11119 = vrot.lane.b32.xlu0 %v11070_v43, %s16372_s13  ;;  %s12191_s13 = sshll.u32 %s16374_s18, 4  ;;  %s12192_s13 = int_to_ptr.vmem [resolvable:$true] %s12191_s13 }
0x553a   :  { %s16309_s22 = scalar_lea.vmem %s12192_s13, 256  ;;  %p16314_p1 = scmp.lt.s32.totalorder %s12192_s13, %s12192_s13 }
0x553b   :  { %v14364_v46 = vpop.f32.mrb[138].mxu0  ;;  %p16310_p0 = scmp.ne.s32.totalorder %s12192_s13, %s16309_s22  ;;  %p16315_p2 = scmp.lt.s32.totalorder %s16309_s22, %s16309_s22 }
0x553c   :  { %v11389_v7 = vpop.f32.mrb[139].mxu0  ;;  %v19127_v53 = vadd.f32 %v14364_v46, %v12631_v6 }
0x553d   :  { %v19124_v59 = vadd.f32 %v12631_v6, %v11389_v7  ;;  %p16316_p3 = por %p16315_p2, %p16314_p1 }
0x553e   :  { %v19130_v15 = vmul.f32 0.70710677, %v19127_v53 }
0x553f   :  { %v11400_v26 = vmul.f32 0.70710677, %v19124_v59  ;;  %p16317_p4 = pnand %p16316_p3, %p16310_p0 }
0x5540   :  { %v11407_v57 = vand.u32 2147483647, %v19130_v15 }
0x5541   :  { %v11406_v52 = vand.u32 2147483647, %v11400_v26  ;;  %vm11402_vm2 = vcmp.ge.f32.partialorder %v11400_v26, 0.0 }
0x5542   :  { %v11409_v17 = vmul.f32 0.3275911, %v11407_v57  ;;  %v11435_v41 = vsub.f32 0.0, %v11407_v57  ;;  %v11404_v20 = vsel %vm11402_vm2, 1.0, %v19514_v40 }
0x5543   :  { %v11408_v1 = vmul.f32 0.3275911, %v11406_v52  ;;  %v11434_v62 = vsub.f32 0.0, %v11406_v52 }
0x5544   :  { %v11411_v37 = vadd.f32 1.0, %v11409_v17  ;;  %v11437_v9 = vmul.f32 %v11435_v41, %v11407_v57  ;;  %v11398_v17 = vmul.f32 0.5, %v19124_v59 }
0x5545   :  { %v11410_v39 = vadd.f32 1.0, %v11408_v1  ;;  %v11436_v14 = vmul.f32 %v11434_v62, %v11406_v52  ;;  %v15225_v1 = vpack.c.bf16 %v11455_v54, %v11454_v8 }
0x5547   :  { %16265 = vrcp.f32 %v11410_v39  ;;  %v11438_v5 = vmul.f32 1.442695, %v11436_v14  ;;  %v11440_v39 = vmul.f32 1.442695, %v11437_v9 }
0x5548   :  { %16267 = vrcp.f32 %v11411_v37 }
0x5549   :  { %16269 = vpow2.f32 %v11438_v5 }
0x554a   :  { %16271 = vpow2.f32 %v11440_v39 }
0x5551   :  { %v16266_v34 = vpop.eup %16265 }
0x5552   :  { %v11416_v23 = vmul.f32 1.0614054, %v16266_v34  ;;  %v19133_v56 = vpop.eup %16267 }
0x5553   :  { %v11417_v29 = vmul.f32 1.0614054, %v19133_v56  ;;  %v16270_v60 = vpop.eup %16269 }
0x5554   :  { %v11418_v58 = vadd.f32 -1.4531521, %v11416_v23 }
0x5555   :  { %v11419_v42 = vadd.f32 -1.4531521, %v11417_v29  ;;  %v11460_v29 = vld [vmem:[%s19484_s4 + $0x320] sm:$0xff] }
0x5556   :  { %v11420_v22 = vmul.f32 %v16266_v34, %v11418_v58 }
0x5557   :  { %v11421_v32 = vmul.f32 %v19133_v56, %v11419_v42  ;;  %v11462_v42 = vld [vmem:[%s19484_s4 + $0x330] sm:$0xff] }
0x5558   :  { %v11422_v28 = vadd.f32 1.4214138, %v11420_v22 }
0x5559   :  { %v11423_v33 = vadd.f32 1.4214138, %v11421_v32  ;;  %v11464_v32 = vld [vmem:[%s19484_s4 + $0x340] sm:$0xff] }
0x555a   :  { %v11424_v47 = vmul.f32 %v16266_v34, %v11422_v28 }
0x555b   :  { %v11425_v16 = vmul.f32 %v19133_v56, %v11423_v33  ;;  %v11467_v33 = vld [vmem:[%s19484_s4 + $0x358] sm:$0xff] }
0x555c   :  { %v11426_v18 = vadd.f32 -0.28449672, %v11424_v47 }
0x555d   :  { %v11427_v6 = vadd.f32 -0.28449672, %v11425_v16 }
0x555e   :  { %v11428_v13 = vmul.f32 %v16266_v34, %v11426_v18 }
0x555f   :  { %v11429_v62 = vmul.f32 %v19133_v56, %v11427_v6 }
0x5560   :  { %v11430_v36 = vadd.f32 0.2548296, %v11428_v13 }
0x5561   :  { %v11431_v5 = vadd.f32 0.2548296, %v11429_v62 }
0x5562   :  { %v11432_v51 = vmul.f32 %v16266_v34, %v11430_v36  ;;  %v11461_v36 = vld [vmem:[%s19484_s4 + $0x328] sm:$0xff] }
0x5564   :  { %v11442_v61 = vmul.f32 %v16270_v60, %v11432_v51  ;;  %v11463_v51 = vld [vmem:[%s19484_s4 + $0x338] sm:$0xff] }
0x5565   :  { %v15241_v60 = vpack.c.bf16 %v11463_v51, %v11462_v42 }
0x5566   :  { %v11444_v3 = vsub.f32 1.0, %v11442_v61 }
0x5568   :  { %v11446_v21 = vmul.f32 %v11444_v3, %v11404_v20  ;;  %v12624_v20 = vld [vmem:[%s19484_s4 + $0x3fe] ss:$0 sm:$0xff] }
0x556a   :  { %v11448_v23 = vadd.f32 1.0, %v11446_v21 }
0x556c   :  { %v11450_v59 = vmul.f32 %v11448_v23, %v11398_v17 }
0x5596   :  { %v11086_v27 = vpop.permute.xlu1 %11085 }
0x5597   :  { %v11084_v45 = vpop.permute.xlu0 %11083  ;;  %v11128_v43 = vsel %vm491_vm1, %v18958_v50, %v11086_v27  ;;  %v11457_v50 = vld [vmem:[%s19484_s4 + $0x308] sm:$0xff]  ;;  %v11433_v27 = vmul.f32 %v19133_v56, %v11431_v5 }
0x5598   :  { %v11127_v63 = vsel %vm491_vm1, %v18960_v30, %v11084_v45  ;;  %v11456_v30 = vld [vmem:[%s19484_s4 + $0x300] sm:$0xff]  ;;  %v15237_v45 = vpack.c.bf16 %v11461_v36, %v11460_v29  ;;  %v11465_v56 = vld [vmem:[%s19484_s4 + $0x348] sm:$0xff] }
0x559a   :  { %v11090_v48 = vpop.permute.xlu1 %11089 }
0x559b   :  { %v11088_v38 = vpop.permute.xlu0 %11087  ;;  %v11130_v22 = vsel %vm491_vm1, %v18962_v25, %v11090_v48  ;;  %v11458_v25 = vld [vmem:[%s19484_s4 + $0x310] sm:$0xff]  ;;  %v16272_v48 = vpop.eup %16271 }
0x559c   :  { %v11129_v57 = vsel %vm491_vm1, %v18964_v49, %v11088_v38  ;;  %v15229_v49 = vpack.c.bf16 %v11457_v50, %v11456_v30  ;;  %v11443_v38 = vmul.f32 %v16272_v48, %v11433_v27  ;;  %vm11403_vm1 = vcmp.ge.f32.partialorder %v19130_v15, 0.0 }
0x559d   :  { %v11405_v41 = vsel %vm11403_vm1, 1.0, %v19514_v40  ;;  %v11399_v15 = vmul.f32 0.5, %v19127_v53 }
0x559e   :  { %v11102_v55 = vpop.permute.xlu1 %11101  ;;  %v11445_v61 = vsub.f32 1.0, %v11443_v38  ;;  %v11592_v38 = vld [vmem:[%s19487_s7 + $0x70] sm:$0xff] }
0x559f   :  { %v11100_v19 = vpop.permute.xlu0 %11099  ;;  %v11132_v26 = vsel %vm575_vm5, %v11128_v43, %v11102_v55  ;;  %v15245_v55 = vpack.c.bf16 %v11465_v56, %v11464_v32 }
0x55a0   :  { %v11131_v46 = vsel %vm575_vm5, %v11127_v63, %v11100_v19  ;;  %v11466_v19 = vld [vmem:[%s19484_s4 + $0x350] sm:$0xff]  ;;  %v11447_v3 = vmul.f32 %v11445_v61, %v11405_v41 }
0x55a2   :  { %v11106_v44 = vpop.permute.xlu1 %11105 }
0x55a3   :  { %v11104_v0 = vpop.permute.xlu0 %11103  ;;  %v11134_v47 = vsel %vm575_vm5, %v11130_v22, %v11106_v44  ;;  %v15249_v44 = vpack.c.bf16 %v11467_v33, %v11466_v19 }
0x55a4   :  { %v11133_v37 = vsel %vm575_vm5, %v11129_v57, %v11104_v0  ;;  %v11449_v0 = vadd.f32 1.0, %v11447_v3 }
0x55a6   :  { %v11118_v11 = vpop.permute.xlu1 %11117  ;;  %v11451_v16 = vmul.f32 %v11449_v0, %v11399_v15 }
0x55a7   :  { %v11116_v7 = vpop.permute.xlu0 %11115  ;;  %v11136_v34 = vsel %vm1313_vm6, %v11132_v26, %v11118_v11 }
0x55a8   :  { %v11135_v52 = vsel %vm1313_vm6, %v11131_v46, %v11116_v7 }
0x55a9   :  { %14348 = vmatprep.mubr.msk.f32.mxu1 %vm145_vm0, %v11135_v52 }
0x55aa   :  { %14349 = vmatmul.mubr.msk.f32.vlgmr.msra.gmra.mrb[128].mxu1 %vm145_vm0, %v11136_v34  ;;  %v11122_v58 = vpop.permute.xlu1 %11121 }
0x55ab   :  { %15224 = vmatpush3.bf16.msra.mxu1 %v19110_v35  ;;  %v11120_v28 = vpop.permute.xlu0 %11119  ;;  %v11138_v18 = vsel %vm1313_vm6, %v11134_v47, %v11122_v58  ;;  %v11459_v35 = vld [vmem:[%s19484_s4 + $0x318] sm:$0xff] }
0x55ac   :  { %v11137_v14 = vsel %vm1313_vm6, %v11133_v37, %v11120_v28  ;;  %15226 = vmatprep.subr.bf16.mxu1 %v15225_v1  ;;  %v15233_v13 = vpack.c.bf16 %v11459_v35, %v11458_v25 }
0x55ad   :  { %14351 = vmatprep.mubr.msk.f32.mxu1 %vm145_vm0, %v11137_v14 }
0x55ae   :  { %14352 = vmatmul.mubr.msk.f32.gmra.mrb[130].mxu1 %vm145_vm0, %v11138_v18 }
0x55af   :  { %15228 = vmatpush3.bf16.msra.mxu1 %v15225_v1  ;;  %14397 = vmatprep.mubr.f32.mxu1 %v11450_v59 }
0x55b0   :  { %15230 = vmatprep.subr.bf16.mxu1 %v15229_v49 }
0x55b3   :  { %15232 = vmatpush3.bf16.msra.mxu1 %v15229_v49 }
0x55b4   :  { %15234 = vmatprep.subr.bf16.mxu1 %v15233_v13 }
0x55b7   :  { %15236 = vmatpush3.bf16.msra.mxu1 %v15233_v13 }
0x55b8   :  { %15238 = vmatprep.subr.bf16.mxu1 %v15237_v45 }
0x55bb   :  { %15240 = vmatpush3.bf16.msra.mxu1 %v15237_v45 }
0x55bc   :  { %15242 = vmatprep.subr.bf16.mxu1 %v15241_v60 }
0x55bf   :  { %15244 = vmatpush3.bf16.msra.mxu1 %v15241_v60  ;;  %v11593_v60 = vld [vmem:[%s19487_s7 + $0x78] sm:$0xff] }
0x55c0   :  { %15246 = vmatprep.subr.bf16.mxu1 %v15245_v55  ;;  %v15257_v32 = vpack.c.bf16 %v11593_v60, %v11592_v38 }
0x55c3   :  { %15248 = vmatpush3.bf16.msra.mxu1 %v15245_v55 }
0x55c4   :  { %15250 = vmatprep.subr.bf16.mxu1 %v15249_v44 }
0x55c7   :  { %15252 = vmatpush3.bf16.msra.mxu1 %v15249_v44 }
0x55ca   :  { %14398 = vmatmul.mubr.f32.vlgmr.msra.gmra.mrb[132].mxu1 %v11451_v16 }
0x567d   :  { %v14350_v9 = vpop.f32.mrb[128].mxu1 }
0x567e   :  { %v11227_v8 = vadd.f32 %v14350_v9, %v12624_v20  ;;  %v11221_v54 = vpop.f32.mrb[129].mxu1 }
0x567f   :  { %v11222_v21 = vadd.f32 %v12624_v20, %v11221_v54 }
0x5680   :  { %v11241_v63 = vadd.f32 %v11227_v8, %v18605_v31  ;;  %v12629_v8 = vld [vmem:[%s19484_s4 + $0x409] ss:$0 sm:$0xff] }
0x5681   :  { %v11240_v11 = vadd.f32 %v11222_v21, %v18603_v2  ;;  %v14353_v43 = vpop.f32.mrb[130].mxu1 }
0x5682   :  { %v11231_v46 = vpop.f32.mrb[131].mxu1  ;;  %v11247_v7 = vsel %vm145_vm0, %v11241_v63, 0.0  ;;  %v11237_v53 = vadd.f32 %v14353_v43, %v12624_v20 }
0x5683   :  { %v11232_v6 = vadd.f32 %v12624_v20, %v11231_v46  ;;  %11248 = vadd.xlane.f32.xlu1 %v11247_v7  ;;  %v11244_v26 = vsel %vm145_vm0, %v11240_v11, 0.0 }
0x5684   :  { %11245 = vadd.xlane.f32.xlu0 %v11244_v26  ;;  %v11243_v1 = vadd.f32 %v11237_v53, %v18620_v12 }
0x5685   :  { %v11242_v52 = vadd.f32 %v11232_v6, %v18617_v4  ;;  %v12634_v4 = vld [vmem:[%s19484_s4 + $0x3ff] ss:$0 sm:$0xff] }
0x5686   :  { %v11253_v31 = vsel %vm145_vm0, %v11243_v1, 0.0 }
0x5687   :  { %v11250_v39 = vsel %vm145_vm0, %v11242_v52, 0.0 }
0x5688   :  { %11251 = vadd.xlane.f32.xlu0 %v11250_v39 }
0x568c   :  { %11254 = vadd.xlane.f32.xlu0 %v11253_v31 }
0x569d   :  { %v14399_v2 = vpop.f32.mrb[132].mxu1 }
0x569e   :  { %v11539_v34 = vpop.f32.mrb[133].mxu1  ;;  %v11545_v35 = vadd.f32 %v14399_v2, %v12634_v4 }
0x569f   :  { %v11540_v47 = vadd.f32 %v12634_v4, %v11539_v34  ;;  %v11808_v4 = vld [vmem:[%s19484_s4 + $0x380] sm:$0xff] }
0x56a0   :  { %v19229_v27 = vadd.f32 %v11545_v35, %v18865_v24  ;;  %v11591_v24 = vld [vmem:[%s19487_s7 + $0x68] sm:$0xff]  ;;  %v11816_v35 = vld [vmem:[%s19484_s4 + $0x3c0] sm:$0xff] }
0x56a1   :  { %v19225_v5 = vadd.f32 %v11540_v47, %v18863_v10  ;;  %v11590_v10 = vld [vmem:[%s19487_s7 + $0x60] sm:$0xff] }
0x56a2   :  { %v11553_v51 = vsel %vm145_vm0, %v19229_v27, 0.0  ;;  %v15253_v48 = vpack.c.bf16 %v11591_v24, %v11590_v10  ;;  %v11812_v47 = vld [vmem:[%s19484_s4 + $0x3a0] sm:$0xff] }
0x56a3   :  { %v11550_v42 = vsel %vm145_vm0, %v19225_v5, 0.0 }
0x56a4   :  { %15254 = vmatprep.subr.bf16.mxu0 %v15253_v48 }
0x56a5   :  { %15256 = vmatpush3.bf16.msra.mxu0 %v15253_v48 }
0x56a6   :  { %15258 = vmatprep.subr.bf16.mxu0 %v15257_v32 }
0x56a9   :  { %15260 = vmatpush3.bf16.msra.mxu0 %v15257_v32 }
0x5710   :  { %v11249_v23 = vpop.xlane.xlu1 %11248 }
0x5711   :  { %v11257_v30 = vmul.f32 0.03125, %v11249_v23  ;;  %v11246_v50 = vpop.xlane.xlu0 %11245  ;;  %v11804_v23 = vld [vmem:[%s19484_s4 + $0x360] sm:$0xff] }
0x5712   :  { %v11256_v57 = vmul.f32 0.03125, %v11246_v50 }
0x5713   :  { %v11261_v58 = vsub.f32 %v11241_v63, %v11257_v30  ;;  %v11805_v30 = vld [vmem:[%s19484_s4 + $0x368] sm:$0xff] }
0x5714   :  { %v11260_v17 = vsub.f32 %v11240_v11, %v11256_v57  ;;  %v12630_v11 = vld [vmem:[%s19484_s4 + $0x40a] ss:$0 sm:$0xff]  ;;  %v15261_v50 = vpack.c.bf16 %v11805_v30, %v11804_v23  ;;  %v11806_v57 = vld [vmem:[%s19484_s4 + $0x370] sm:$0xff] }
0x5715   :  { %v11252_v22 = vpop.xlane.xlu0 %11251  ;;  %v11265_v12 = vmul.f32 %v11261_v58, %v11261_v58 }
0x5716   :  { %v11258_v37 = vmul.f32 0.03125, %v11252_v22  ;;  %v11264_v28 = vmul.f32 %v11260_v17, %v11260_v17  ;;  %15262 = vmatprep.subr.bf16.mxu0 %v15261_v50  ;;  %v11809_v22 = vld [vmem:[%s19484_s4 + $0x388] sm:$0xff] }
0x5717   :  { %v11271_v62 = vsel %vm145_vm0, %v11265_v12, 0.0  ;;  %v15269_v12 = vpack.c.bf16 %v11809_v22, %v11808_v4 }
0x5718   :  { %v11262_v14 = vsub.f32 %v11242_v52, %v11258_v37  ;;  %11272 = vadd.xlane.f32.xlu0 %v11271_v62  ;;  %v11268_v49 = vsel %vm145_vm0, %v11264_v28, 0.0  ;;  %v11810_v37 = vld [vmem:[%s19484_s4 + $0x390] sm:$0xff]  ;;  %v11811_v28 = vld [vmem:[%s19484_s4 + $0x398] sm:$0xff] }
0x5719   :  { %11269 = vadd.xlane.f32.xlu1 %v11268_v49  ;;  %v11255_v18 = vpop.xlane.xlu0 %11254  ;;  %v15273_v62 = vpack.c.bf16 %v11811_v28, %v11810_v37 }
0x571a   :  { %v11259_v59 = vmul.f32 0.03125, %v11255_v18  ;;  %v11266_v25 = vmul.f32 %v11262_v14, %v11262_v14  ;;  %v11814_v18 = vld [vmem:[%s19484_s4 + $0x3b0] sm:$0xff] }
0x571c   :  { %v11263_v13 = vsub.f32 %v11243_v1, %v11259_v59  ;;  %v11274_v29 = vsel %vm145_vm0, %v11266_v25, 0.0  ;;  %v11815_v59 = vld [vmem:[%s19484_s4 + $0x3b8] sm:$0xff] }
0x571d   :  { %11275 = vadd.xlane.f32.xlu1 %v11274_v29  ;;  %v15281_v25 = vpack.c.bf16 %v11815_v59, %v11814_v18 }
0x571e   :  { %v11267_v36 = vmul.f32 %v11263_v13, %v11263_v13 }
0x5720   :  { %v11277_v45 = vsel %vm145_vm0, %v11267_v36, 0.0  ;;  %v11818_v36 = vld [vmem:[%s19484_s4 + $0x3d0] sm:$0xff] }
0x5721   :  { %11278 = vadd.xlane.f32.xlu0 %v11277_v45  ;;  %11551 = vadd.xlane.f32.xlu1 %v11550_v42  ;;  %v11819_v45 = vld [vmem:[%s19484_s4 + $0x3d8] sm:$0xff] }
0x5722   :  { %v15289_v42 = vpack.c.bf16 %v11819_v45, %v11818_v36 }
0x5725   :  { %11554 = vadd.xlane.f32.xlu0 %v11553_v51  ;;  %v12637_v51 = vld [vmem:[%s19487_s7 + $0x83] ss:$0 sm:$0xff] }
0x57a5   :  { %v11273_v56 = vpop.xlane.xlu0 %11272 }
0x57a6   :  { %v11281_v61 = vmul.f32 0.03125, %v11273_v56  ;;  %v11270_v55 = vpop.xlane.xlu1 %11269 }
0x57a7   :  { %v11280_v19 = vmul.f32 0.03125, %v11270_v55 }
0x57a8   :  { %v11285_v33 = vadd.f32 1e-05, %v11281_v61 }
0x57a9   :  { %v11284_v41 = vadd.f32 1e-05, %v11280_v19 }
0x57aa   :  { %16273 = vrsqrt.f32 %v11285_v33  ;;  %v11276_v3 = vpop.xlane.xlu1 %11275 }
0x57ab   :  { %16275 = vrsqrt.f32 %v11284_v41  ;;  %v11282_v44 = vmul.f32 0.03125, %v11276_v3 }
0x57ad   :  { %v11286_v0 = vadd.f32 1e-05, %v11282_v44 }
0x57ae   :  { %v11279_v15 = vpop.xlane.xlu0 %11278 }
0x57af   :  { %16277 = vrsqrt.f32 %v11286_v0  ;;  %v11283_v16 = vmul.f32 0.03125, %v11279_v15 }
0x57b1   :  { %v11287_v20 = vadd.f32 1e-05, %v11283_v16 }
0x57b3   :  { %16279 = vrsqrt.f32 %v11287_v20 }
0x57b4   :  { %v16274_v9 = vpop.eup %16273 }
0x57b5   :  { %v16276_v54 = vpop.eup %16275  ;;  %v11293_v21 = vmul.f32 %v16274_v9, %v11261_v58  ;;  %v11807_v58 = vld [vmem:[%s19484_s4 + $0x378] sm:$0xff] }
0x57b6   :  { %v11292_v63 = vmul.f32 %v16276_v54, %v11260_v17  ;;  %v15265_v17 = vpack.c.bf16 %v11807_v58, %v11806_v57 }
0x57b7   :  { %v11302_v43 = vmul.f32 %v12629_v8, %v11293_v21 }
0x57b8   :  { %v11301_v46 = vmul.f32 %v12629_v8, %v11292_v63 }
0x57b9   :  { %v16278_v7 = vpop.eup %16277  ;;  %v19256_v26 = vadd.f32 %v12630_v11, %v11302_v43 }
0x57ba   :  { %v19254_v53 = vadd.f32 %v12630_v11, %v11301_v46  ;;  %v11294_v6 = vmul.f32 %v16278_v7, %v11262_v14  ;;  %v11813_v14 = vld [vmem:[%s19484_s4 + $0x3a8] sm:$0xff] }
0x57bb   :  { %v15277_v49 = vpack.c.bf16 %v11813_v14, %v11812_v47 }
0x57bc   :  { %14408 = vmatprep.mubr.msk.f32.mxu0 %vm145_vm0, %v19254_v53  ;;  %v11303_v52 = vmul.f32 %v12629_v8, %v11294_v6 }
0x57bd   :  { %v16280_v1 = vpop.eup %16279  ;;  %14409 = vmatmul.mubr.msk.f32.vlgmr.msra.gmra.mrb[140].mxu0 %vm145_vm0, %v19256_v26 }
0x57be   :  { %v19262_v39 = vadd.f32 %v12630_v11, %v11303_v52  ;;  %v11295_v31 = vmul.f32 %v16280_v1, %v11263_v13  ;;  %15264 = vmatpush3.bf16.msra.mxu0 %v15261_v50  ;;  %v11817_v13 = vld [vmem:[%s19484_s4 + $0x3c8] sm:$0xff] }
0x57bf   :  { %15266 = vmatprep.subr.bf16.mxu0 %v15265_v17  ;;  %v15285_v29 = vpack.c.bf16 %v11817_v13, %v11816_v35 }
0x57c0   :  { %14411 = vmatprep.mubr.msk.f32.mxu0 %vm145_vm0, %v19262_v39  ;;  %v11304_v2 = vmul.f32 %v12629_v8, %v11295_v31 }
0x57c2   :  { %v19266_v34 = vadd.f32 %v12630_v11, %v11304_v2  ;;  %15268 = vmatpush3.bf16.msra.mxu0 %v15265_v17 }
0x57c3   :  { %15270 = vmatprep.subr.bf16.mxu0 %v15269_v12 }
0x57c4   :  { %14412 = vmatmul.mubr.msk.f32.gmra.mrb[142].mxu0 %vm145_vm0, %v19266_v34 }
0x57c6   :  { %15272 = vmatpush3.bf16.msra.mxu0 %v15269_v12 }
0x57c7   :  { %15274 = vmatprep.subr.bf16.mxu0 %v15273_v62 }
0x57ca   :  { %15276 = vmatpush3.bf16.msra.mxu0 %v15273_v62 }
0x57cb   :  { %15278 = vmatprep.subr.bf16.mxu0 %v15277_v49 }
0x57ce   :  { %15280 = vmatpush3.bf16.msra.mxu0 %v15277_v49 }
0x57cf   :  { %15282 = vmatprep.subr.bf16.mxu0 %v15281_v25 }
0x57d2   :  { %15284 = vmatpush3.bf16.msra.mxu0 %v15281_v25 }
0x57d3   :  { %15286 = vmatprep.subr.bf16.mxu0 %v15285_v29 }
0x57d6   :  { %15288 = vmatpush3.bf16.msra.mxu0 %v15285_v29 }
0x57d7   :  { %15290 = vmatprep.subr.bf16.mxu0 %v15289_v42 }
0x57da   :  { %15292 = vmatpush3.bf16.msra.mxu0 %v15289_v42 }
0x5890   :  { %v14410_v10 = vpop.f32.mrb[140].mxu0 }
0x5891   :  { %v19321_v24 = vadd.f32 %v14410_v10, %v12637_v51  ;;  %v11677_v48 = vpop.f32.mrb[141].mxu0 }
0x5892   :  { %v19323_v38 = vadd.f32 %v12637_v51, %v11677_v48 }
0x5893   :  { %v19326_v60 = vmul.f32 0.70710677, %v19321_v24 }
0x5894   :  { %v19329_v32 = vmul.f32 0.70710677, %v19323_v38 }
0x5895   :  { %v11713_v56 = vand.u32 2147483647, %v19326_v60  ;;  %vm11705_vm5 = vcmp.ge.f32.partialorder %v19326_v60, 0.0 }
0x5896   :  { %v11712_v61 = vand.u32 2147483647, %v19329_v32  ;;  %vm11704_vm6 = vcmp.ge.f32.partialorder %v19329_v32, 0.0  ;;  %v11696_v32 = vmul.f32 0.5, %v19323_v38 }
0x5897   :  { %v11717_v55 = vmul.f32 0.3275911, %v11713_v56  ;;  %v14413_v19 = vpop.f32.mrb[142].mxu0  ;;  %v11769_v11 = vsub.f32 0.0, %v11713_v56 }
0x5898   :  { %v11716_v33 = vmul.f32 0.3275911, %v11712_v61  ;;  %v19333_v41 = vadd.f32 %v14413_v19, %v12637_v51  ;;  %v11687_v3 = vpop.f32.mrb[143].mxu0  ;;  %v11768_v46 = vsub.f32 0.0, %v11712_v61 }
0x5899   :  { %v11721_v44 = vadd.f32 1.0, %v11717_v55  ;;  %v19335_v0 = vadd.f32 %v12637_v51, %v11687_v3  ;;  %v11773_v6 = vmul.f32 %v11769_v11, %v11713_v56 }
0x589a   :  { %v11720_v15 = vadd.f32 1.0, %v11716_v33  ;;  %v19338_v16 = vmul.f32 0.70710677, %v19333_v41  ;;  %v11772_v31 = vmul.f32 %v11768_v46, %v11712_v61 }
0x589b   :  { %16281 = vrcp.f32 %v11721_v44  ;;  %v19341_v20 = vmul.f32 0.70710677, %v19335_v0  ;;  %v11778_v50 = vmul.f32 1.442695, %v11773_v6 }
0x589c   :  { %16283 = vrcp.f32 %v11720_v15  ;;  %v11715_v9 = vand.u32 2147483647, %v19338_v16  ;;  %v11776_v4 = vmul.f32 1.442695, %v11772_v31  ;;  %v11709_v31 = vsel %vm11705_vm5, 1.0, %v19514_v40 }
0x589d   :  { %v11714_v8 = vand.u32 2147483647, %v19341_v20  ;;  %vm11707_vm12 = vcmp.ge.f32.partialorder %v19338_v16, 0.0  ;;  %vm11706_vm13 = vcmp.ge.f32.partialorder %v19341_v20, 0.0 }
0x589e   :  { %v11719_v54 = vmul.f32 0.3275911, %v11715_v9  ;;  %v11771_v30 = vsub.f32 0.0, %v11715_v9 }
0x589f   :  { %v11718_v21 = vmul.f32 0.3275911, %v11714_v8  ;;  %v11770_v57 = vsub.f32 0.0, %v11714_v8 }
0x58a0   :  { %v11723_v63 = vadd.f32 1.0, %v11719_v54  ;;  %v11775_v28 = vmul.f32 %v11771_v30, %v11715_v9  ;;  %v11708_v30 = vsel %vm11704_vm6, 1.0, %v19514_v40 }
0x58a1   :  { %v11722_v43 = vadd.f32 1.0, %v11718_v21  ;;  %v11774_v47 = vmul.f32 %v11770_v57, %v11714_v8 }
0x58a2   :  { %16285 = vrcp.f32 %v11723_v63  ;;  %v11782_v29 = vmul.f32 1.442695, %v11775_v28  ;;  %v11697_v28 = vmul.f32 0.5, %v19321_v24  ;;  %v11699_v24 = vmul.f32 0.5, %v19333_v41 }
0x58a3   :  { %16287 = vrcp.f32 %v11722_v43  ;;  %v11780_v45 = vmul.f32 1.442695, %v11774_v47 }
0x58a4   :  { %16289 = vpow2.f32 %v11778_v50 }
0x58a5   :  { %v16282_v7 = vpop.eup %16281  ;;  %16291 = vpow2.f32 %v11776_v4 }
0x58a6   :  { %v16284_v52 = vpop.eup %16283  ;;  %v11733_v1 = vmul.f32 1.0614054, %v16282_v7  ;;  %16293 = vpow2.f32 %v11782_v29 }
0x58a7   :  { %v11732_v2 = vmul.f32 1.0614054, %v16284_v52  ;;  %16295 = vpow2.f32 %v11780_v45 }
0x58a8   :  { %v11737_v23 = vadd.f32 -1.4531521, %v11733_v1 }
0x58a9   :  { %v11736_v58 = vadd.f32 -1.4531521, %v11732_v2 }
0x58aa   :  { %v11741_v17 = vmul.f32 %v16282_v7, %v11737_v23 }
0x58ab   :  { %v11740_v22 = vmul.f32 %v16284_v52, %v11736_v58 }
0x58ac   :  { %v16286_v12 = vpop.eup %16285  ;;  %v11745_v37 = vadd.f32 1.4214138, %v11741_v17 }
0x58ad   :  { %v16288_v62 = vpop.eup %16287  ;;  %v11744_v14 = vadd.f32 1.4214138, %v11740_v22  ;;  %v11735_v49 = vmul.f32 1.0614054, %v16286_v12 }
0x58ae   :  { %v11749_v18 = vmul.f32 %v16282_v7, %v11745_v37  ;;  %v11734_v59 = vmul.f32 1.0614054, %v16288_v62  ;;  %v16290_v9 = vpop.eup %16289 }
0x58af   :  { %v11748_v25 = vmul.f32 %v16284_v52, %v11744_v14  ;;  %v11739_v35 = vadd.f32 -1.4531521, %v11735_v49  ;;  %v16292_v21 = vpop.eup %16291 }
0x58b0   :  { %v11753_v13 = vadd.f32 -0.28449672, %v11749_v18  ;;  %v11738_v36 = vadd.f32 -1.4531521, %v11734_v59  ;;  %v16294_v58 = vpop.eup %16293 }
0x58b1   :  { %v11752_v42 = vadd.f32 -0.28449672, %v11748_v25  ;;  %v11743_v51 = vmul.f32 %v16286_v12, %v11739_v35  ;;  %v16296_v4 = vpop.eup %16295  ;;  %v11698_v35 = vmul.f32 0.5, %v19335_v0 }
0x58b2   :  { %v11757_v10 = vmul.f32 %v16282_v7, %v11753_v13  ;;  %v11742_v48 = vmul.f32 %v16288_v62, %v11738_v36  ;;  %v12642_v36 = vld [vmem:[%s19484_s4 + $0x400] ss:$0 sm:$0xff] }
0x58b3   :  { %v11756_v56 = vmul.f32 %v16284_v52, %v11752_v42  ;;  %v11747_v61 = vadd.f32 1.4214138, %v11743_v51 }
0x58b4   :  { %v11761_v55 = vadd.f32 0.2548296, %v11757_v10  ;;  %v11746_v19 = vadd.f32 1.4214138, %v11742_v48  ;;  %v11552_v10 = vpop.xlane.xlu1 %11551 }
0x58b5   :  { %v11760_v33 = vadd.f32 0.2548296, %v11756_v56  ;;  %v11751_v3 = vmul.f32 %v16286_v12, %v11747_v61  ;;  %v11556_v41 = vmul.f32 0.03125, %v11552_v10  ;;  %v12076_v10 = vld [vmem:[%s19484_s4 + $0x40] sm:$0xff] }
0x58b6   :  { %v11765_v44 = vmul.f32 %v16282_v7, %v11761_v55  ;;  %v11750_v15 = vmul.f32 %v16288_v62, %v11746_v19 }
0x58b7   :  { %v11764_v8 = vmul.f32 %v16284_v52, %v11760_v33  ;;  %v11755_v54 = vadd.f32 -0.28449672, %v11751_v3 }
0x58b8   :  { %v11785_v63 = vmul.f32 %v16290_v9, %v11765_v44  ;;  %v11754_v11 = vadd.f32 -0.28449672, %v11750_v15  ;;  %v11558_v9 = vsub.f32 %v19225_v5, %v11556_v41  ;;  %v11984_v5 = vld [vmem:[%s19484_s4 + $0x20] sm:$0xff] }
0x58b9   :  { %v11784_v43 = vmul.f32 %v16292_v21, %v11764_v8  ;;  %v11759_v46 = vmul.f32 %v16286_v12, %v11755_v54 }
0x58ba   :  { %v11789_v6 = vsub.f32 1.0, %v11785_v63  ;;  %v11758_v1 = vmul.f32 %v16288_v62, %v11754_v11  ;;  %v11560_v11 = vmul.f32 %v11558_v9, %v11558_v9 }
0x58bb   :  { %v11788_v2 = vsub.f32 1.0, %v11784_v43  ;;  %v11763_v23 = vadd.f32 0.2548296, %v11759_v46  ;;  %v11986_v46 = vld [vmem:[%s19484_s4 + $0x30] sm:$0xff] }
0x58bc   :  { %v11793_v7 = vmul.f32 %v11789_v6, %v11709_v31  ;;  %v11762_v52 = vadd.f32 0.2548296, %v11758_v1  ;;  %v11987_v6 = vld [vmem:[%s19484_s4 + $0x38] sm:$0xff] }
0x58bd   :  { %v11792_v50 = vmul.f32 %v11788_v2, %v11708_v30  ;;  %v11767_v57 = vmul.f32 %v16286_v12, %v11763_v23  ;;  %v11711_v12 = vsel %vm11707_vm12, 1.0, %v19514_v40  ;;  %v15297_v1 = vpack.c.bf16 %v11987_v6, %v11986_v46 }
0x58be   :  { %v11797_v60 = vadd.f32 1.0, %v11793_v7  ;;  %v11766_v17 = vmul.f32 %v16288_v62, %v11762_v52  ;;  %v11710_v62 = vsel %vm11706_vm13, 1.0, %v19514_v40  ;;  %v11555_v40 = vpop.xlane.xlu0 %11554 }
0x58bf   :  { %v11796_v22 = vadd.f32 1.0, %v11792_v50  ;;  %v11787_v37 = vmul.f32 %v16294_v58, %v11767_v57  ;;  %v11557_v0 = vmul.f32 0.03125, %v11555_v40 }
0x58c0   :  { %v11786_v47 = vmul.f32 %v16296_v4, %v11766_v17  ;;  %v11801_v18 = vmul.f32 %v11797_v60, %v11697_v28 }
0x58c1   :  { %v11800_v14 = vmul.f32 %v11796_v22, %v11696_v32  ;;  %v11791_v49 = vsub.f32 1.0, %v11787_v37  ;;  %v11559_v3 = vsub.f32 %v19229_v27, %v11557_v0  ;;  %v11562_v27 = vsel %vm145_vm0, %v11560_v11, 0.0  ;;  %v12078_v0 = vld [vmem:[%s19484_s4 + $0x50] sm:$0xff]  ;;  %v12643_v11 = vld [vmem:[%s19484_s4 + $0x40b] ss:$0 sm:$0xff] }
0x58c2   :  { %v11790_v59 = vsub.f32 1.0, %v11786_v47 }
0x58c3   :  { %14446 = vmatprep.mubr.f32.mxu0 %v11800_v14  ;;  %v11795_v25 = vmul.f32 %v11791_v49, %v11711_v12  ;;  %v11561_v21 = vmul.f32 %v11559_v3, %v11559_v3 }
0x58c4   :  { %14447 = vmatmul.mubr.f32.vlgmr.msra.gmra.mrb[144].mxu0 %v11801_v18  ;;  %v11794_v38 = vmul.f32 %v11790_v59, %v11710_v62 }
0x58c5   :  { %v11799_v16 = vadd.f32 1.0, %v11795_v25  ;;  %v11565_v43 = vsel %vm145_vm0, %v11561_v21, 0.0 }
0x58c6   :  { %v11798_v13 = vadd.f32 1.0, %v11794_v38 }
0x58c7   :  { %v11803_v29 = vmul.f32 %v11799_v16, %v11699_v24 }
0x58c8   :  { %v11802_v20 = vmul.f32 %v11798_v13, %v11698_v35  ;;  %v12635_v13 = vld [vmem:[%s19484_s4 + $0x405] ss:$0 sm:$0xff] }
0x58ca   :  { %14449 = vmatprep.mubr.f32.mxu0 %v11802_v20 }
0x58cb   :  { %14450 = vmatmul.mubr.f32.gmra.mrb[146].mxu0 %v11803_v29 }
0x5997   :  { %v14448_v45 = vpop.f32.mrb[144].mxu0 }
0x5998   :  { %v11897_v42 = vadd.f32 %v14448_v45, %v12642_v36  ;;  %v11891_v51 = vpop.f32.mrb[145].mxu0  ;;  %v12636_v45 = vld [vmem:[%s19484_s4 + $0x406] ss:$0 sm:$0xff] }
0x5999   :  { %v11892_v48 = vadd.f32 %v12642_v36, %v11891_v51 }
0x599a   :  { %v11911_v56 = vadd.f32 %v11897_v42, %v19256_v26 }
0x599b   :  { %v11910_v61 = vadd.f32 %v11892_v48, %v19254_v53  ;;  %v12077_v48 = vld [vmem:[%s19484_s4 + $0x48] sm:$0xff] }
0x599c   :  { %v11917_v55 = vsel %vm145_vm0, %v11911_v56, 0.0 }
0x599d   :  { %11918 = vadd.xlane.f32.xlu0 %v11917_v55  ;;  %v11914_v19 = vsel %vm145_vm0, %v11910_v61, 0.0 }
0x599e   :  { %v14451_v33 = vpop.f32.mrb[146].mxu0  ;;  %11915 = vadd.xlane.f32.xlu1 %v11914_v19 }
0x599f   :  { %v11907_v44 = vadd.f32 %v14451_v33, %v12642_v36  ;;  %v11901_v15 = vpop.f32.mrb[147].mxu0 }
0x59a0   :  { %v11902_v8 = vadd.f32 %v12642_v36, %v11901_v15 }
0x59a1   :  { %v11913_v26 = vadd.f32 %v11907_v44, %v19266_v34 }
0x59a2   :  { %v11912_v54 = vadd.f32 %v11902_v8, %v19262_v39  ;;  %v11985_v39 = vld [vmem:[%s19484_s4 + $0x28] sm:$0xff] }
0x59a3   :  { %v11923_v53 = vsel %vm145_vm0, %v11913_v26, 0.0  ;;  %v15293_v34 = vpack.c.bf16 %v11985_v39, %v11984_v5  ;;  %v12644_v39 = vld [vmem:[%s19484_s4 + $0x40c] ss:$0 sm:$0xff] }
0x59a4   :  { %11924 = vadd.xlane.f32.xlu0 %v11923_v53  ;;  %v11920_v63 = vsel %vm145_vm0, %v11912_v54, 0.0 }
0x59a5   :  { %11921 = vadd.xlane.f32.xlu1 %v11920_v63  ;;  %15294 = vmatprep.subr.bf16.mxu1 %v15293_v34 }
0x59a6   :  { %15296 = vmatpush3.bf16.msra.mxu1 %v15293_v34 }
0x59a7   :  { %15298 = vmatprep.subr.bf16.mxu1 %v15297_v1 }
0x59a8   :  { %11566 = vadd.xlane.f32.xlu0 %v11565_v43 }
0x59a9   :  { %11563 = vadd.xlane.f32.xlu1 %v11562_v27 }
0x59aa   :  { %15300 = vmatpush3.bf16.msra.mxu1 %v15297_v1 }
0x5a2a   :  { %v11919_v31 = vpop.xlane.xlu0 %11918 }
0x5a2b   :  { %v11927_v2 = vmul.f32 0.03125, %v11919_v31  ;;  %v11916_v23 = vpop.xlane.xlu1 %11915 }
0x5a2c   :  { %v11926_v7 = vmul.f32 0.03125, %v11916_v23 }
0x5a2d   :  { %v19384_v30 = vsub.f32 %v11911_v56, %v11927_v2  ;;  %v15301_v56 = vpack.c.bf16 %v12077_v48, %v12076_v10 }
0x5a2e   :  { %v19386_v52 = vsub.f32 %v11910_v61, %v11926_v7  ;;  %v12079_v61 = vld [vmem:[%s19484_s4 + $0x58] sm:$0xff] }
0x5a2f   :  { %v11935_v50 = vmul.f32 %v19384_v30, %v19384_v30  ;;  %v15305_v41 = vpack.c.bf16 %v12079_v61, %v12078_v0  ;;  %15302 = vmatprep.subr.bf16.mxu1 %v15301_v56 }
0x5a30   :  { %v11934_v57 = vmul.f32 %v19386_v52, %v19386_v52 }
0x5a31   :  { %v11925_v58 = vpop.xlane.xlu0 %11924  ;;  %v11941_v60 = vsel %vm145_vm0, %v11935_v50, 0.0 }
0x5a32   :  { %v11929_v17 = vmul.f32 0.03125, %v11925_v58  ;;  %11942 = vadd.xlane.f32.xlu0 %v11941_v60  ;;  %v11922_v4 = vpop.xlane.xlu1 %11921  ;;  %v11938_v32 = vsel %vm145_vm0, %v11934_v57, 0.0  ;;  %v12645_v58 = vld [vmem:[%s19484_s4 + $0x3e3] ss:$0 sm:$0xff] }
0x5a33   :  { %v11928_v22 = vmul.f32 0.03125, %v11922_v4  ;;  %11939 = vadd.xlane.f32.xlu1 %v11938_v32 }
0x5a34   :  { %v19394_v37 = vsub.f32 %v11913_v26, %v11929_v17 }
0x5a35   :  { %v19396_v28 = vsub.f32 %v11912_v54, %v11928_v22  ;;  %v11567_v47 = vpop.xlane.xlu0 %11566 }
0x5a36   :  { %v11569_v14 = vmul.f32 0.03125, %v11567_v47  ;;  %v11564_v49 = vpop.xlane.xlu1 %11563  ;;  %v11937_v18 = vmul.f32 %v19394_v37, %v19394_v37 }
0x5a37   :  { %v11568_v12 = vmul.f32 0.03125, %v11564_v49  ;;  %v11936_v59 = vmul.f32 %v19396_v28, %v19396_v28 }
0x5a38   :  { %v11571_v62 = vadd.f32 1e-05, %v11569_v14  ;;  %v11947_v25 = vsel %vm145_vm0, %v11937_v18, 0.0 }
0x5a39   :  { %v11570_v38 = vadd.f32 1e-05, %v11568_v12  ;;  %11948 = vadd.xlane.f32.xlu0 %v11947_v25  ;;  %v11944_v16 = vsel %vm145_vm0, %v11936_v59, 0.0 }
0x5a3a   :  { %16297 = vrsqrt.f32 %v11571_v62  ;;  %11945 = vadd.xlane.f32.xlu1 %v11944_v16 }
0x5a3b   :  { %16299 = vrsqrt.f32 %v11570_v38 }
0x5a44   :  { %v16298_v35 = vpop.eup %16297 }
0x5a45   :  { %v16300_v24 = vpop.eup %16299  ;;  %v11575_v20 = vmul.f32 %v16298_v35, %v11559_v3 }
0x5a46   :  { %v11574_v29 = vmul.f32 %v16300_v24, %v11558_v9 }
0x5a47   :  { %v11582_v36 = vmul.f32 %v12635_v13, %v11575_v20 }
0x5a48   :  { %v11581_v40 = vmul.f32 %v12635_v13, %v11574_v29 }
0x5a49   :  { %v11589_v51 = vadd.f32 %v12636_v45, %v11582_v36 }
0x5a4a   :  { %v11588_v42 = vadd.f32 %v12636_v45, %v11581_v40 }
0x5a4c   :  { %14460 = vmatprep.mubr.msk.f32.mxu1 %vm145_vm0, %v11588_v42 }
0x5a4d   :  { %14461 = vmatmul.mubr.msk.f32.vlgmr.msra.gmra.mrb[134].mxu1 %vm145_vm0, %v11589_v51 }
0x5a4e   :  { %15304 = vmatpush3.bf16.msra.mxu1 %v15301_v56 }
0x5a4f   :  { %15306 = vmatprep.subr.bf16.mxu1 %v15305_v41 }
0x5a52   :  { %15308 = vmatpush3.bf16.msra.mxu1 %v15305_v41 }
0x5abf   :  { %v11943_v55 = vpop.xlane.xlu0 %11942 }
0x5ac0   :  { %v11951_v19 = vmul.f32 0.03125, %v11943_v55  ;;  %v11940_v33 = vpop.xlane.xlu1 %11939 }
0x5ac1   :  { %v11950_v3 = vmul.f32 0.03125, %v11940_v33 }
0x5ac2   :  { %v11955_v44 = vadd.f32 1e-05, %v11951_v19 }
0x5ac3   :  { %v11954_v15 = vadd.f32 1e-05, %v11950_v3 }
0x5ac4   :  { %16301 = vrsqrt.f32 %v11955_v44 }
0x5ac5   :  { %16303 = vrsqrt.f32 %v11954_v15 }
0x5ac6   :  { %v11949_v9 = vpop.xlane.xlu0 %11948 }
0x5ac7   :  { %v11953_v8 = vmul.f32 0.03125, %v11949_v9  ;;  %v11946_v26 = vpop.xlane.xlu1 %11945 }
0x5ac8   :  { %v11952_v54 = vmul.f32 0.03125, %v11946_v26 }
0x5ac9   :  { %v11957_v53 = vadd.f32 1e-05, %v11953_v8 }
0x5aca   :  { %v11956_v21 = vadd.f32 1e-05, %v11952_v54 }
0x5acb   :  { %16305 = vrsqrt.f32 %v11957_v53 }
0x5acc   :  { %16307 = vrsqrt.f32 %v11956_v21 }
0x5ace   :  { %v16302_v63 = vpop.eup %16301 }
0x5acf   :  { %v16304_v43 = vpop.eup %16303  ;;  %v11963_v27 = vmul.f32 %v16302_v63, %v19384_v30 }
0x5ad0   :  { %v11962_v5 = vmul.f32 %v16304_v43, %v19386_v52 }
0x5ad1   :  { %v11972_v34 = vmul.f32 %v12643_v11, %v11963_v27 }
0x5ad2   :  { %v11971_v46 = vmul.f32 %v12643_v11, %v11962_v5 }
0x5ad3   :  { %v11981_v31 = vadd.f32 %v12644_v39, %v11972_v34 }
0x5ad4   :  { %v11980_v6 = vadd.f32 %v12644_v39, %v11971_v46 }
0x5ad5   :  { %v16306_v1 = vpop.eup %16305 }
0x5ad6   :  { %v16308_v2 = vpop.eup %16307  ;;  %14471 = vmatprep.mubr.msk.f32.mxu1 %vm145_vm0, %v11980_v6  ;;  %v11965_v23 = vmul.f32 %v16306_v1, %v19394_v37 }
0x5ad7   :  { %14472 = vmatmul.mubr.msk.f32.vlgmr.msra.gmra.mrb[136].mxu1 %vm145_vm0, %v11981_v31  ;;  %v11964_v7 = vmul.f32 %v16308_v2, %v19396_v28 }
0x5ad8   :  { %v11974_v30 = vmul.f32 %v12643_v11, %v11965_v23 }
0x5ad9   :  { %v11973_v52 = vmul.f32 %v12643_v11, %v11964_v7 }
0x5ada   :  { %v11983_v57 = vadd.f32 %v12644_v39, %v11974_v30 }
0x5adb   :  { %v11982_v50 = vadd.f32 %v12644_v39, %v11973_v52 }
0x5add   :  { %14474 = vmatprep.mubr.msk.f32.mxu1 %vm145_vm0, %v11982_v50 }
0x5ade   :  { %14475 = vmatmul.mubr.msk.f32.gmra.mrb[138].mxu1 %vm145_vm0, %v11983_v57 }
0x5b20   :  { %v14462_v60 = vpop.f32.mrb[134].mxu1 }
0x5b21   :  { %v12071_v17 = vadd.f32 %v14462_v60, %v12645_v58  ;;  %v12065_v4 = vpop.f32.mrb[135].mxu1 }
0x5b22   :  { %v12066_v32 = vadd.f32 %v12645_v58, %v12065_v4 }
0x5b23   :  { %12075 = vst.msk [vmem:[#allocation2 + $0x8] sm:$0xff] %vm145_vm0, %v12071_v17 }
0x5b24   :  { %12074 = vst.msk [vmem:[#allocation2] sm:$0xff] %vm145_vm0, %v12066_v32 }
0x5b25   :  { %16320 = shalt.err (!%p16317_p4)
}
0x5b26   :  { %s16321_s24 = scalar_lea.hbm %s19488_s8, 256 }
0x5b27   :  { %p16322_p5 = scmp.ne.s32.totalorder %s19488_s8, %s16321_s24  ;;  %p16325_p6 = scmp.lt.u32.totalorder %s16321_s24, %s19488_s8 }
0x5b29   :  { %p16327_p7 = pnand %p16325_p6, %p16322_p5 }
0x5b2b   :  { %16330 = shalt.err (!%p16327_p7)
}
0x5b2c   :  { %s16375_s10 = smov 128   ;;  %v12648_v22 = vld [vmem:[%s19484_s4 + $0x3e4] ss:$0 sm:$0xff]  ;;  %s16376_s14 = smov [#allocation4]  }
0x5b2d   :  { %12197 = dma.vmem_to_hbm [thread:$0]  %s12192_s13, 256, %s19488_s8, [#allocation3], %s16375_s10, %s16375_s10, %s16369_s16  }
0x5b2e   :  { %s12203_s1 = sshll.u32 %s16376_s14, 4  ;;  %s12204_s1 = int_to_ptr.vmem [resolvable:$true] %s12203_s1 }
0x5b2f   :  { %s16331_s4 = scalar_lea.vmem %s12204_s1, 512  ;;  %p16336_p9 = scmp.lt.s32.totalorder %s12204_s1, %s12204_s1 }
0x5b30   :  { %p16332_p8 = scmp.ne.s32.totalorder %s12204_s1, %s16331_s4  ;;  %p16337_p10 = scmp.lt.s32.totalorder %s16331_s4, %s16331_s4 }
0x5b32   :  { %p16338_p11 = por %p16337_p10, %p16336_p9 }
0x5b34   :  { %p16339_p12 = pnand %p16338_p11, %p16332_p8 }
0x5baa   :  { %v14473_v37 = vpop.f32.mrb[136].mxu1 }
0x5bab   :  { %v12169_v28 = vadd.f32 %v14473_v37, %v12648_v22  ;;  %v12163_v47 = vpop.f32.mrb[137].mxu1 }
0x5bac   :  { %v12164_v14 = vadd.f32 %v12648_v22, %v12163_v47 }
0x5bad   :  { %12183 = vst.msk [vmem:[#allocation4 + $0x8] sm:$0xff] %vm145_vm0, %v12169_v28 }
0x5bae   :  { %12182 = vst.msk [vmem:[#allocation4] sm:$0xff] %vm145_vm0, %v12164_v14 }
0x5bb1   :  { %v14476_v49 = vpop.f32.mrb[138].mxu1 }
0x5bb2   :  { %v12179_v18 = vadd.f32 %v14476_v49, %v12648_v22  ;;  %v12173_v12 = vpop.f32.mrb[139].mxu1 }
0x5bb3   :  { %v12174_v59 = vadd.f32 %v12648_v22, %v12173_v12 }
0x5bb4   :  { %12185 = vst.msk [vmem:[#allocation4 + $0x18] sm:$0xff] %vm145_vm0, %v12179_v18 }
0x5bb5   :  { %12184 = vst.msk [vmem:[#allocation4 + $0x10] sm:$0xff] %vm145_vm0, %v12174_v59 }
0x5bb6   :  { %16342 = shalt.err (!%p16339_p12)
}
0x5bb7   :  { %s16343_s6 = scalar_lea.hbm %s19489_s9, 512 }
0x5bb8   :  { %p16344_p13 = scmp.ne.s32.totalorder %s19489_s9, %s16343_s6  ;;  %p16347_p0 = scmp.lt.u32.totalorder %s16343_s6, %s19489_s9 }
0x5bba   :  { %p16349_p1 = pnand %p16347_p0, %p16344_p13 }
0x5bbc   :  { %16352 = shalt.err (!%p16349_p1)
}
0x5bbd   :  { %12209 = dma.vmem_to_hbm [thread:$0]  %s12204_s1, 512, %s19489_s9, [#allocation5], %s16375_s10, %s16375_s10, %s16369_s16  }
0x5bbe   :  { %16353 = dma.done.wait [#allocation3], 256  }
0x5bbf   :  { %16354 = vsyncadd [#allocation3], 4294967040 }
0x5bc0   :  { %16355 = dma.done.wait [#allocation5], 512  }
0x5bc1   :  { %16356 = vsyncadd [#allocation5], 4294966784 }
0x5bc2   :  { %12216 = vsyncpa [#allocation3], 1 }
0x5bc3   :  { %12217 = vsyncpa [#allocation5], 1 }

</bundles_post_ra>
